<compile_context>
chip_gen: v5e
topology: v5e:2x2
jax: 0.10.0
libtpu: 0.0.40
codegen_flags: <defaults>
</compile_context>

<pallas_src>
import functools

import jax
import jax.numpy as jnp
from jax import lax
from jax.experimental import pallas as pl
from jax.experimental.pallas import tpu as pltpu


def _round_up(x, m):
    return (x + m - 1) // m * m


def _choose_tiles(K, N):
    """Pick (tn, tk) for a GEMM with reduction K and output width N.

    tn: 256 only when N is a large multiple of 256 (keeps >=2 parallel N tiles
        for the small-M conv layers so both v7x TensorCores get work; 128
        matches the v5e 128x128 MXU arrays).
    tk: single K step when K <= 1024, else 512 (amortizes the ~0.35us per
        grid-step overhead; bf16 tiles stay well under the scoped VMEM limit).
    """
    tn = 256 if (N % 256 == 0 and N >= 512) else 128
    tk = _round_up(K, 128) if K <= 1024 else 512
    return tn, tk


# ----------------------------------------------------------------------------
# Pallas kernel: tiled matmul, bf16 operands, f32 accumulation in the output
# block (k-invariant), fused bias (+ optional ReLU) on the last k step.
# ----------------------------------------------------------------------------
def _matmul_bias_kernel(x_ref, w_ref, b_ref, o_ref, *, apply_relu):
    k = pl.program_id(2)

    @pl.when(k == 0)
    def _():
        o_ref[...] = jnp.zeros_like(o_ref)

    o_ref[...] += jnp.dot(x_ref[...], w_ref[...],
                          preferred_element_type=jnp.float32)

    @pl.when(k == pl.num_programs(2) - 1)
    def _():
        out = o_ref[...] + b_ref[...]
        if apply_relu:
            out = jnp.maximum(out, 0.0)
        o_ref[...] = out


def pallas_matmul_bias(x, wp, bp, *, n_out, tn, tk, relu):
    """relu_opt(x @ W + b) with a Pallas TPU kernel.

    x:  (M, K) activations (any float dtype; cast to bf16 here).
    wp: (Kp, Np) bf16 weights, already padded to tile multiples at init.
    bp: (1, Np)  f32 bias, already padded at init.
    Returns (M, n_out) float32.
    """
    M, K = x.shape
    Kp, Np = wp.shape
    tm = min(_round_up(M, 16), 256)
    Mp = _round_up(M, tm)

    xp = x.astype(jnp.bfloat16)
    if Mp != M or Kp != K:
        xp = jnp.pad(xp, ((0, Mp - M), (0, Kp - K)))

    grid = (Mp // tm, Np // tn, Kp // tk)
    out = pl.pallas_call(
        functools.partial(_matmul_bias_kernel, apply_relu=relu),
        out_shape=jax.ShapeDtypeStruct((Mp, Np), jnp.float32),
        grid_spec=pltpu.PrefetchScalarGridSpec(
            num_scalar_prefetch=0,
            grid=grid,
            in_specs=[
                pl.BlockSpec((tm, tk), lambda i, j, k: (i, k)),
                pl.BlockSpec((tk, tn), lambda i, j, k: (k, j)),
                pl.BlockSpec((1, tn), lambda i, j, k: (0, j)),
            ],
            out_specs=pl.BlockSpec((tm, tn), lambda i, j, k: (i, j)),
        ),
        compiler_params=pltpu.CompilerParams(
            dimension_semantics=("parallel", "parallel", "arbitrary"),
        ),
        cost_estimate=pl.CostEstimate(
            flops=2 * Mp * Np * Kp,
            transcendentals=0,
            bytes_accessed=Mp * Kp * 2 + Kp * Np * 2 + Mp * Np * 4,
        ),
    )(xp, wp, bp)
    return out[:M, :n_out]


# ----------------------------------------------------------------------------
# Fused FC head: relu(x @ W2 + b2) @ W3 + b3 in a single Pallas kernel.
# Everything fits in VMEM (M<=16, K=1024, hidden=128, out padded to 128).
# ----------------------------------------------------------------------------
def _fc_head_kernel(x_ref, w2_ref, b2_ref, w3_ref, b3_ref, o_ref):
    h = jnp.dot(x_ref[...], w2_ref[...], preferred_element_type=jnp.float32)
    h = jnp.maximum(h + b2_ref[...], 0.0)
    o_ref[...] = (
        jnp.dot(h.astype(w3_ref.dtype), w3_ref[...],
                preferred_element_type=jnp.float32)
        + b3_ref[...]
    )


def pallas_fc_head(x, w2, b2, w3p, b3p, *, n_out):
    M, K = x.shape
    Mp = _round_up(M, 16)
    xp = jnp.pad(x.astype(jnp.bfloat16), ((0, Mp - M), (0, 0)))
    Hd = w2.shape[1]
    Np = w3p.shape[1]
    out = pl.pallas_call(
        _fc_head_kernel,
        out_shape=jax.ShapeDtypeStruct((Mp, Np), jnp.float32),
        grid=(1,),
        in_specs=[
            pl.BlockSpec((Mp, K), lambda i: (0, 0)),
            pl.BlockSpec((K, Hd), lambda i: (0, 0)),
            pl.BlockSpec((1, Hd), lambda i: (0, 0)),
            pl.BlockSpec((Hd, Np), lambda i: (0, 0)),
            pl.BlockSpec((1, Np), lambda i: (0, 0)),
        ],
        out_specs=pl.BlockSpec((Mp, Np), lambda i: (0, 0)),
        cost_estimate=pl.CostEstimate(
            flops=2 * Mp * Hd * (K + Np),
            transcendentals=0,
            bytes_accessed=Mp * K * 2 + K * Hd * 2 + Hd * Np * 2 + Mp * Np * 4,
        ),
    )(xp, w2, b2, w3p, b3p)
    return out[:M, :n_out]


# ----------------------------------------------------------------------------
# Conv / pool built on the Pallas GEMM
# ----------------------------------------------------------------------------
def conv2d(x_nhwc, wgt, cfg, *, relu):
    """Conv2d via im2col (bf16) + Pallas GEMM (bias and ReLU fused)."""
    kh, kw, stride, pad = cfg["kh"], cfg["kw"], cfg["stride"], cfg["pad"]
    xpad = x_nhwc.astype(jnp.bfloat16)
    if pad:
        xpad = jnp.pad(xpad, ((0, 0), (pad, pad), (pad, pad), (0, 0)))
    n, h, w_, c = xpad.shape
    oh = (h - kh) // stride + 1
    ow = (w_ - kw) // stride + 1

    # TODO(synk): the im2col intermediate is still materialized in HBM; a
    # K-blocked index_map consuming the shifted views directly would remove it.
    patches = []
    for i in range(kh):
        for j in range(kw):
            patches.append(
                xpad[:, i: i + (oh - 1) * stride + 1: stride,
                        j: j + (ow - 1) * stride + 1: stride, :]
            )
    # (n, oh, ow, kh*kw, c) -> (n*oh*ow, kh*kw*c); index order (i, j, c)
    # matches the (kh, kw, ic, oc) weight layout prepared at init.
    cols = jnp.stack(patches, axis=3).reshape(n * oh * ow, kh * kw * c)

    y = pallas_matmul_bias(cols, wgt["w"], wgt["b"],
                           n_out=cfg["oc"], tn=cfg["tn"], tk=cfg["tk"],
                           relu=relu)
    return y.reshape(n, oh, ow, cfg["oc"])


def maxpool2d(x_nhwc, ksize=3, stride=2):
    # PyTorch MaxPool2d(3, stride=2): no padding, floor mode -> VALID window.
    return lax.reduce_window(
        x_nhwc, -jnp.inf, lax.max,
        (1, ksize, ksize, 1), (1, stride, stride, 1), "VALID"
    )


# ----------------------------------------------------------------------------
# Spatial bookkeeping (resolves the LazyLinear input feature count)
# ----------------------------------------------------------------------------
def _conv_out(h, k, s, p):
    return (h + 2 * p - k) // s + 1


def _pool_out(h, k, s):
    return (h - k) // s + 1


def flatten_size(h, w):
    h = _conv_out(h, 12, 1, 0); w = _conv_out(w, 12, 1, 0)
    h = _pool_out(h, 3, 2);     w = _pool_out(w, 3, 2)
    h = _conv_out(h, 6, 1, 2);  w = _conv_out(w, 6, 1, 2)
    h = _pool_out(h, 3, 2);     w = _pool_out(w, 3, 2)
    h = _conv_out(h, 3, 1, 1);  w = _conv_out(w, 3, 1, 1)
    h = _conv_out(h, 3, 1, 1);  w = _conv_out(w, 3, 1, 1)
    h = _pool_out(h, 3, 2);     w = _pool_out(w, 3, 2)
    return 256 * h * w


# ----------------------------------------------------------------------------
# Parameter init: weights are stored in GEMM-ready layout (transposed to
# (kh*kw*ic, oc), padded to tile multiples, cast to bf16) ONCE here, so the
# hot path never transposes/pads/casts a weight again.
# ----------------------------------------------------------------------------
def prepare_params(key, img_h, img_w):
    ks = jax.random.split(key, 14)
    arrs, meta = {}, {}

    def conv_layer(name, kw_key, kb_key, ic, oc, ksize, stride, pad):
        fan_in = ic * ksize * ksize
        w4 = jax.random.normal(kw_key, (oc, ic, ksize, ksize),
                               jnp.float32) / jnp.sqrt(fan_in)
        b = 0.01 * jax.random.normal(kb_key, (oc,), jnp.float32)
        K, N = ksize * ksize * ic, oc
        tn, tk = _choose_tiles(K, N)
        Kp, Np = _round_up(K, tk), _round_up(N, tn)
        wmat = jnp.transpose(w4, (2, 3, 1, 0)).reshape(K, N)  # (kh,kw,ic,oc)
        arrs[name] = {
            "w": jnp.pad(wmat, ((0, Kp - K), (0, Np - N))).astype(jnp.bfloat16),
            "b": jnp.pad(b, ((0, Np - N),)).reshape(1, Np),
        }
        meta[name] = {"kh": ksize, "kw": ksize, "oc": oc, "stride": stride,
                      "pad": pad, "tn": tn, "tk": tk}

    conv_layer("conv1", ks[0], ks[1], 1, 96, 12, 1, 0)
    conv_layer("conv2", ks[2], ks[3], 96, 256, 6, 1, 2)
    conv_layer("conv3", ks[4], ks[5], 256, 384, 3, 1, 1)
    conv_layer("conv4", ks[6], ks[7], 384, 256, 3, 1, 1)

    # fc1 (LazyLinear(1024))
    fc_in = flatten_size(img_h, img_w)
    w1 = jax.random.normal(ks[8], (fc_in, 1024), jnp.float32) / jnp.sqrt(fc_in)
    b1 = 0.01 * jax.random.normal(ks[9], (1024,), jnp.float32)
    tn, tk = _choose_tiles(fc_in, 1024)
    Kp, Np = _round_up(fc_in, tk), _round_up(1024, tn)
    arrs["fc1"] = {
        "w": jnp.pad(w1, ((0, Kp - fc_in), (0, Np - 1024))).astype(jnp.bfloat16),
        "b": jnp.pad(b1, ((0, Np - 1024),)).reshape(1, Np),
    }
    meta["fc1"] = {"n_out": 1024, "tn": tn, "tk": tk}

    # fc2 + fc3, fused into a single head kernel; fc3's N=16 padded to 128.
    w2 = jax.random.normal(ks[10], (1024, 128), jnp.float32) / jnp.sqrt(1024.0)
    b2 = 0.01 * jax.random.normal(ks[11], (128,), jnp.float32)
    w3 = jax.random.normal(ks[12], (128, 16), jnp.float32) / jnp.sqrt(128.0)
    b3 = 0.01 * jax.random.normal(ks[13], (16,), jnp.float32)
    arrs["fc2_w"] = w2.astype(jnp.bfloat16)
    arrs["fc2_b"] = b2.reshape(1, 128)
    arrs["fc3_w"] = jnp.pad(w3, ((0, 0), (0, 128 - 16))).astype(jnp.bfloat16)
    arrs["fc3_b"] = jnp.pad(b3, ((0, 128 - 16),)).reshape(1, 128)
    meta["head"] = {"n_out": 16}

    return arrs, meta


# ----------------------------------------------------------------------------
# Network forward
# ----------------------------------------------------------------------------
def forward_once(x_nchw, arrs, meta):
    x = jnp.transpose(x_nchw, (0, 2, 3, 1))  # NCHW -> NHWC internal layout
    x = conv2d(x, arrs["conv1"], meta["conv1"], relu=True)
    x = maxpool2d(x)
    x = conv2d(x, arrs["conv2"], meta["conv2"], relu=True)
    x = maxpool2d(x)
    x = conv2d(x, arrs["conv3"], meta["conv3"], relu=True)
    x = conv2d(x, arrs["conv4"], meta["conv4"], relu=True)
    x = maxpool2d(x)
    # torch: output.view(output.size(0), -1) on an NCHW tensor
    n, h, w, c = x.shape
    flat = jnp.transpose(x, (0, 3, 1, 2)).reshape(n, c * h * w)
    y = pallas_matmul_bias(flat, arrs["fc1"]["w"], arrs["fc1"]["b"],
                           n_out=meta["fc1"]["n_out"],
                           tn=meta["fc1"]["tn"], tk=meta["fc1"]["tk"],
                           relu=True)
    y = pallas_fc_head(y, arrs["fc2_w"], arrs["fc2_b"],
                       arrs["fc3_w"], arrs["fc3_b"],
                       n_out=meta["head"]["n_out"])
    return y


def _siamese_forward(input1, input2, arrs, *, meta):
    # torch.cuda stream / synchronize calls are host-side scheduling no-ops.
    # Batch both branches through one forward pass: every weight is read from
    # HBM once per layer instead of twice, and kernel-launch overhead halves.
    b = input1.shape[0]
    x = jnp.concatenate([input1, input2], axis=0)
    out = forward_once(x, arrs, meta)
    return out[:b], out[b:]


if __name__ == "__main__":
    B, C, H, W = 2, 1, 48, 48  # smallest convenient size surviving the CNN stack
    key = jax.random.PRNGKey(0)
    k_in1, k_in2, k_par = jax.random.split(key, 3)

    input1 = jax.random.normal(k_in1, (B, C, H, W), jnp.float32)
    input2 = jax.random.normal(k_in2, (B, C, H, W), jnp.float32)

    arrs, meta = prepare_params(k_par, H, W)  # GEMM-ready weights, built once

    siamese_forward = jax.jit(functools.partial(_siamese_forward, meta=meta))
    out1, out2 = siamese_forward(input1, input2, arrs)
    jax.block_until_ready((out1, out2))

    assert out1.shape == (B, 16) and out2.shape == (B, 16)
    assert jnp.all(jnp.isfinite(out1)) and jnp.all(jnp.isfinite(out2))
    print("KERNEL_OK")
</pallas_src>

<mosaic_0001>
module attributes {stable_mosaic.version = 11 : i64} {
  func.func @_matmul_bias_kernel(%arg0: i32, %arg1: i32, %arg2: i32, %arg3: memref<256x256xbf16, #tpu.memory_space<vmem>>, %arg4: memref<256x128xbf16, #tpu.memory_space<vmem>>, %arg5: memref<1x128xf32, #tpu.memory_space<vmem>>, %arg6: memref<256x128xf32, #tpu.memory_space<vmem>>) attributes {dimension_semantics = [#tpu.dimension_semantics<parallel>, #tpu.dimension_semantics<parallel>, #tpu.dimension_semantics<arbitrary>], iteration_bounds = array<i64: 22, 1, 1>, scalar_prefetch = 0 : i64, scratch_operands = 0 : i64, tpu.core_type = #tpu.core_type<tc>, window_params = [{transform_indices = @transform_0, window_bounds = array<i64: 256, 256>}, {transform_indices = @transform_1, window_bounds = array<i64: 256, 128>}, {transform_indices = @transform_2, window_bounds = array<i64: 1, 128>}, {transform_indices = @transform_3, window_bounds = array<i64: 256, 128>}]} {
    %c0_i32 = arith.constant 0 : i32
    %0 = arith.cmpi eq, %arg2, %c0_i32 : i32
    %1 = arith.extui %0 : i1 to i32
    %c0_i32_0 = arith.constant 0 : i32
    %2 = arith.cmpi ne, %1, %c0_i32_0 : i32
    scf.if %2 {
      %cst_10 = arith.constant 0.000000e+00 : f32
      %12 = vector.broadcast %cst_10 : f32 to vector<256x128xf32>
      %c0_11 = arith.constant 0 : index
      %c0_12 = arith.constant 0 : index
      %13 = vector.load %arg6[%c0_11, %c0_12] : memref<256x128xf32, #tpu.memory_space<vmem>>, vector<256x128xf32>
      tpu.vector_store %arg6[%c0_11, %c0_12], %12 {strides = array<i32>} : memref<256x128xf32, #tpu.memory_space<vmem>>, vector<256x128xf32>,
    } else {
    }
    %c0 = arith.constant 0 : index
    %c0_1 = arith.constant 0 : index
    %3 = vector.load %arg6[%c0, %c0_1] : memref<256x128xf32, #tpu.memory_space<vmem>>, vector<256x128xf32>
    %c0_2 = arith.constant 0 : index
    %c0_3 = arith.constant 0 : index
    %4 = vector.load %arg3[%c0_2, %c0_3] : memref<256x256xbf16, #tpu.memory_space<vmem>>, vector<256x256xbf16>
    %c0_4 = arith.constant 0 : index
    %c0_5 = arith.constant 0 : index
    %5 = vector.load %arg4[%c0_4, %c0_5] : memref<256x128xbf16, #tpu.memory_space<vmem>>, vector<256x128xbf16>
    %cst = arith.constant dense<0.000000e+00> : vector<256x128xf32>
    %6 = tpu.matmul %4, %5, %cst {dimension_numbers = #tpu.dot_dimension_numbers<[1], [0], [0], [1], [0, 0, 1, 1], [], []>} : vector<256x256xbf16>, vector<256x128xbf16>, vector<256x128xf32> -> vector<256x128xf32>
    %7 = arith.addf %3, %6 : vector<256x128xf32>
    %c0_6 = arith.constant 0 : index
    %c0_7 = arith.constant 0 : index
    %8 = vector.load %arg6[%c0_6, %c0_7] : memref<256x128xf32, #tpu.memory_space<vmem>>, vector<256x128xf32>
    tpu.vector_store %arg6[%c0_6, %c0_7], %7 {strides = array<i32>} : memref<256x128xf32, #tpu.memory_space<vmem>>, vector<256x128xf32>,
    %c0_i32_8 = arith.constant 0 : i32
    %9 = arith.cmpi eq, %arg2, %c0_i32_8 : i32
    %10 = arith.extui %9 : i1 to i32
    %c0_i32_9 = arith.constant 0 : i32
    %11 = arith.cmpi ne, %10, %c0_i32_9 : i32
    scf.if %11 {
      %c0_10 = arith.constant 0 : index
      %c0_11 = arith.constant 0 : index
      %12 = vector.load %arg6[%c0_10, %c0_11] : memref<256x128xf32, #tpu.memory_space<vmem>>, vector<256x128xf32>
      %c0_12 = arith.constant 0 : index
      %c0_13 = arith.constant 0 : index
      %13 = vector.load %arg5[%c0_12, %c0_13] : memref<1x128xf32, #tpu.memory_space<vmem>>, vector<1x128xf32>
      %14 = vector.broadcast %13 : vector<1x128xf32> to vector<256x128xf32>
      %15 = arith.addf %12, %14 : vector<256x128xf32>
      %cst_14 = arith.constant 0.000000e+00 : f32
      %16 = vector.broadcast %cst_14 : f32 to vector<256x128xf32>
      %17 = arith.maximumf %15, %16 : vector<256x128xf32>
      %c0_15 = arith.constant 0 : index
      %c0_16 = arith.constant 0 : index
      %18 = vector.load %arg6[%c0_15, %c0_16] : memref<256x128xf32, #tpu.memory_space<vmem>>, vector<256x128xf32>
      tpu.vector_store %arg6[%c0_15, %c0_16], %17 {strides = array<i32>} : memref<256x128xf32, #tpu.memory_space<vmem>>, vector<256x128xf32>,
    } else {
    }
    return
  }
  func.func @transform_0(%arg0: i32, %arg1: i32, %arg2: i32) -> (i32, i32) {
    %c0_i32 = arith.constant 0 : i32
    return %arg0, %arg2 : i32, i32
  }
  func.func @transform_1(%arg0: i32, %arg1: i32, %arg2: i32) -> (i32, i32) {
    %c0_i32 = arith.constant 0 : i32
    return %arg2, %arg1 : i32, i32
  }
  func.func @transform_2(%arg0: i32, %arg1: i32, %arg2: i32) -> (i32, i32) {
    %c0_i32 = arith.constant 0 : i32
    %c0_i32_0 = arith.constant 0 : i32
    return %c0_i32, %arg1 : i32, i32
  }
  func.func @transform_3(%arg0: i32, %arg1: i32, %arg2: i32) -> (i32, i32) {
    %c0_i32 = arith.constant 0 : i32
    return %arg0, %arg1 : i32, i32
  }
}

module attributes {stable_mosaic.version = 11 : i64} {
  func.func @_matmul_bias_kernel(%arg0: i32, %arg1: i32, %arg2: i32, %arg3: memref<256x512xbf16, #tpu.memory_space<vmem>>, %arg4: memref<512x128xbf16, #tpu.memory_space<vmem>>, %arg5: memref<1x128xf32, #tpu.memory_space<vmem>>, %arg6: memref<256x128xf32, #tpu.memory_space<vmem>>) attributes {dimension_semantics = [#tpu.dimension_semantics<parallel>, #tpu.dimension_semantics<parallel>, #tpu.dimension_semantics<arbitrary>], iteration_bounds = array<i64: 5, 2, 7>, scalar_prefetch = 0 : i64, scratch_operands = 0 : i64, tpu.core_type = #tpu.core_type<tc>, window_params = [{transform_indices = @transform_0, window_bounds = array<i64: 256, 512>}, {transform_indices = @transform_1, window_bounds = array<i64: 512, 128>}, {transform_indices = @transform_2, window_bounds = array<i64: 1, 128>}, {transform_indices = @transform_3, window_bounds = array<i64: 256, 128>}]} {
    %c0_i32 = arith.constant 0 : i32
    %0 = arith.cmpi eq, %arg2, %c0_i32 : i32
    %1 = arith.extui %0 : i1 to i32
    %c0_i32_0 = arith.constant 0 : i32
    %2 = arith.cmpi ne, %1, %c0_i32_0 : i32
    scf.if %2 {
      %cst_9 = arith.constant 0.000000e+00 : f32
      %12 = vector.broadcast %cst_9 : f32 to vector<256x128xf32>
      %c0_10 = arith.constant 0 : index
      %c0_11 = arith.constant 0 : index
      %13 = vector.load %arg6[%c0_10, %c0_11] : memref<256x128xf32, #tpu.memory_space<vmem>>, vector<256x128xf32>
      tpu.vector_store %arg6[%c0_10, %c0_11], %12 {strides = array<i32>} : memref<256x128xf32, #tpu.memory_space<vmem>>, vector<256x128xf32>,
    } else {
    }
    %c0 = arith.constant 0 : index
    %c0_1 = arith.constant 0 : index
    %3 = vector.load %arg6[%c0, %c0_1] : memref<256x128xf32, #tpu.memory_space<vmem>>, vector<256x128xf32>
    %c0_2 = arith.constant 0 : index
    %c0_3 = arith.constant 0 : index
    %4 = vector.load %arg3[%c0_2, %c0_3] : memref<256x512xbf16, #tpu.memory_space<vmem>>, vector<256x512xbf16>
    %c0_4 = arith.constant 0 : index
    %c0_5 = arith.constant 0 : index
    %5 = vector.load %arg4[%c0_4, %c0_5] : memref<512x128xbf16, #tpu.memory_space<vmem>>, vector<512x128xbf16>
    %cst = arith.constant dense<0.000000e+00> : vector<256x128xf32>
    %6 = tpu.matmul %4, %5, %cst {dimension_numbers = #tpu.dot_dimension_numbers<[1], [0], [0], [1], [0, 0, 1, 1], [], []>} : vector<256x512xbf16>, vector<512x128xbf16>, vector<256x128xf32> -> vector<256x128xf32>
    %7 = arith.addf %3, %6 : vector<256x128xf32>
    %c0_6 = arith.constant 0 : index
    %c0_7 = arith.constant 0 : index
    %8 = vector.load %arg6[%c0_6, %c0_7] : memref<256x128xf32, #tpu.memory_space<vmem>>, vector<256x128xf32>
    tpu.vector_store %arg6[%c0_6, %c0_7], %7 {strides = array<i32>} : memref<256x128xf32, #tpu.memory_space<vmem>>, vector<256x128xf32>,
    %c6_i32 = arith.constant 6 : i32
    %9 = arith.cmpi eq, %arg2, %c6_i32 : i32
    %10 = arith.extui %9 : i1 to i32
    %c0_i32_8 = arith.constant 0 : i32
    %11 = arith.cmpi ne, %10, %c0_i32_8 : i32
    scf.if %11 {
      %c0_9 = arith.constant 0 : index
      %c0_10 = arith.constant 0 : index
      %12 = vector.load %arg6[%c0_9, %c0_10] : memref<256x128xf32, #tpu.memory_space<vmem>>, vector<256x128xf32>
      %c0_11 = arith.constant 0 : index
      %c0_12 = arith.constant 0 : index
      %13 = vector.load %arg5[%c0_11, %c0_12] : memref<1x128xf32, #tpu.memory_space<vmem>>, vector<1x128xf32>
      %14 = vector.broadcast %13 : vector<1x128xf32> to vector<256x128xf32>
      %15 = arith.addf %12, %14 : vector<256x128xf32>
      %cst_13 = arith.constant 0.000000e+00 : f32
      %16 = vector.broadcast %cst_13 : f32 to vector<256x128xf32>
      %17 = arith.maximumf %15, %16 : vector<256x128xf32>
      %c0_14 = arith.constant 0 : index
      %c0_15 = arith.constant 0 : index
      %18 = vector.load %arg6[%c0_14, %c0_15] : memref<256x128xf32, #tpu.memory_space<vmem>>, vector<256x128xf32>
      tpu.vector_store %arg6[%c0_14, %c0_15], %17 {strides = array<i32>} : memref<256x128xf32, #tpu.memory_space<vmem>>, vector<256x128xf32>,
    } else {
    }
    return
  }
  func.func @transform_0(%arg0: i32, %arg1: i32, %arg2: i32) -> (i32, i32) {
    %c0_i32 = arith.constant 0 : i32
    return %arg0, %arg2 : i32, i32
  }
  func.func @transform_1(%arg0: i32, %arg1: i32, %arg2: i32) -> (i32, i32) {
    %c0_i32 = arith.constant 0 : i32
    return %arg2, %arg1 : i32, i32
  }
  func.func @transform_2(%arg0: i32, %arg1: i32, %arg2: i32) -> (i32, i32) {
    %c0_i32 = arith.constant 0 : i32
    %c0_i32_0 = arith.constant 0 : i32
    return %c0_i32, %arg1 : i32, i32
  }
  func.func @transform_3(%arg0: i32, %arg1: i32, %arg2: i32) -> (i32, i32) {
    %c0_i32 = arith.constant 0 : i32
    return %arg0, %arg1 : i32, i32
  }
}

module attributes {stable_mosaic.version = 11 : i64} {
  func.func @_matmul_bias_kernel(%arg0: i32, %arg1: i32, %arg2: i32, %arg3: memref<256x512xbf16, #tpu.memory_space<vmem>>, %arg4: memref<512x128xbf16, #tpu.memory_space<vmem>>, %arg5: memref<1x128xf32, #tpu.memory_space<vmem>>, %arg6: memref<256x128xf32, #tpu.memory_space<vmem>>) attributes {dimension_semantics = [#tpu.dimension_semantics<parallel>, #tpu.dimension_semantics<parallel>, #tpu.dimension_semantics<arbitrary>], iteration_bounds = array<i64: 1, 3, 5>, scalar_prefetch = 0 : i64, scratch_operands = 0 : i64, tpu.core_type = #tpu.core_type<tc>, window_params = [{transform_indices = @transform_0, window_bounds = array<i64: 256, 512>}, {transform_indices = @transform_1, window_bounds = array<i64: 512, 128>}, {transform_indices = @transform_2, window_bounds = array<i64: 1, 128>}, {transform_indices = @transform_3, window_bounds = array<i64: 256, 128>}]} {
    %c0_i32 = arith.constant 0 : i32
    %0 = arith.cmpi eq, %arg2, %c0_i32 : i32
    %1 = arith.extui %0 : i1 to i32
    %c0_i32_0 = arith.constant 0 : i32
    %2 = arith.cmpi ne, %1, %c0_i32_0 : i32
    scf.if %2 {
      %cst_9 = arith.constant 0.000000e+00 : f32
      %12 = vector.broadcast %cst_9 : f32 to vector<256x128xf32>
      %c0_10 = arith.constant 0 : index
      %c0_11 = arith.constant 0 : index
      %13 = vector.load %arg6[%c0_10, %c0_11] : memref<256x128xf32, #tpu.memory_space<vmem>>, vector<256x128xf32>
      tpu.vector_store %arg6[%c0_10, %c0_11], %12 {strides = array<i32>} : memref<256x128xf32, #tpu.memory_space<vmem>>, vector<256x128xf32>,
    } else {
    }
    %c0 = arith.constant 0 : index
    %c0_1 = arith.constant 0 : index
    %3 = vector.load %arg6[%c0, %c0_1] : memref<256x128xf32, #tpu.memory_space<vmem>>, vector<256x128xf32>
    %c0_2 = arith.constant 0 : index
    %c0_3 = arith.constant 0 : index
    %4 = vector.load %arg3[%c0_2, %c0_3] : memref<256x512xbf16, #tpu.memory_space<vmem>>, vector<256x512xbf16>
    %c0_4 = arith.constant 0 : index
    %c0_5 = arith.constant 0 : index
    %5 = vector.load %arg4[%c0_4, %c0_5] : memref<512x128xbf16, #tpu.memory_space<vmem>>, vector<512x128xbf16>
    %cst = arith.constant dense<0.000000e+00> : vector<256x128xf32>
    %6 = tpu.matmul %4, %5, %cst {dimension_numbers = #tpu.dot_dimension_numbers<[1], [0], [0], [1], [0, 0, 1, 1], [], []>} : vector<256x512xbf16>, vector<512x128xbf16>, vector<256x128xf32> -> vector<256x128xf32>
    %7 = arith.addf %3, %6 : vector<256x128xf32>
    %c0_6 = arith.constant 0 : index
    %c0_7 = arith.constant 0 : index
    %8 = vector.load %arg6[%c0_6, %c0_7] : memref<256x128xf32, #tpu.memory_space<vmem>>, vector<256x128xf32>
    tpu.vector_store %arg6[%c0_6, %c0_7], %7 {strides = array<i32>} : memref<256x128xf32, #tpu.memory_space<vmem>>, vector<256x128xf32>,
    %c4_i32 = arith.constant 4 : i32
    %9 = arith.cmpi eq, %arg2, %c4_i32 : i32
    %10 = arith.extui %9 : i1 to i32
    %c0_i32_8 = arith.constant 0 : i32
    %11 = arith.cmpi ne, %10, %c0_i32_8 : i32
    scf.if %11 {
      %c0_9 = arith.constant 0 : index
      %c0_10 = arith.constant 0 : index
      %12 = vector.load %arg6[%c0_9, %c0_10] : memref<256x128xf32, #tpu.memory_space<vmem>>, vector<256x128xf32>
      %c0_11 = arith.constant 0 : index
      %c0_12 = arith.constant 0 : index
      %13 = vector.load %arg5[%c0_11, %c0_12] : memref<1x128xf32, #tpu.memory_space<vmem>>, vector<1x128xf32>
      %14 = vector.broadcast %13 : vector<1x128xf32> to vector<256x128xf32>
      %15 = arith.addf %12, %14 : vector<256x128xf32>
      %cst_13 = arith.constant 0.000000e+00 : f32
      %16 = vector.broadcast %cst_13 : f32 to vector<256x128xf32>
      %17 = arith.maximumf %15, %16 : vector<256x128xf32>
      %c0_14 = arith.constant 0 : index
      %c0_15 = arith.constant 0 : index
      %18 = vector.load %arg6[%c0_14, %c0_15] : memref<256x128xf32, #tpu.memory_space<vmem>>, vector<256x128xf32>
      tpu.vector_store %arg6[%c0_14, %c0_15], %17 {strides = array<i32>} : memref<256x128xf32, #tpu.memory_space<vmem>>, vector<256x128xf32>,
    } else {
    }
    return
  }
  func.func @transform_0(%arg0: i32, %arg1: i32, %arg2: i32) -> (i32, i32) {
    %c0_i32 = arith.constant 0 : i32
    return %arg0, %arg2 : i32, i32
  }
  func.func @transform_1(%arg0: i32, %arg1: i32, %arg2: i32) -> (i32, i32) {
    %c0_i32 = arith.constant 0 : i32
    return %arg2, %arg1 : i32, i32
  }
  func.func @transform_2(%arg0: i32, %arg1: i32, %arg2: i32) -> (i32, i32) {
    %c0_i32 = arith.constant 0 : i32
    %c0_i32_0 = arith.constant 0 : i32
    return %c0_i32, %arg1 : i32, i32
  }
  func.func @transform_3(%arg0: i32, %arg1: i32, %arg2: i32) -> (i32, i32) {
    %c0_i32 = arith.constant 0 : i32
    return %arg0, %arg1 : i32, i32
  }
}

module attributes {stable_mosaic.version = 11 : i64} {
  func.func @_matmul_bias_kernel(%arg0: i32, %arg1: i32, %arg2: i32, %arg3: memref<256x512xbf16, #tpu.memory_space<vmem>>, %arg4: memref<512x128xbf16, #tpu.memory_space<vmem>>, %arg5: memref<1x128xf32, #tpu.memory_space<vmem>>, %arg6: memref<256x128xf32, #tpu.memory_space<vmem>>) attributes {dimension_semantics = [#tpu.dimension_semantics<parallel>, #tpu.dimension_semantics<parallel>, #tpu.dimension_semantics<arbitrary>], iteration_bounds = array<i64: 1, 2, 7>, scalar_prefetch = 0 : i64, scratch_operands = 0 : i64, tpu.core_type = #tpu.core_type<tc>, window_params = [{transform_indices = @transform_0, window_bounds = array<i64: 256, 512>}, {transform_indices = @transform_1, window_bounds = array<i64: 512, 128>}, {transform_indices = @transform_2, window_bounds = array<i64: 1, 128>}, {transform_indices = @transform_3, window_bounds = array<i64: 256, 128>}]} {
    %c0_i32 = arith.constant 0 : i32
    %0 = arith.cmpi eq, %arg2, %c0_i32 : i32
    %1 = arith.extui %0 : i1 to i32
    %c0_i32_0 = arith.constant 0 : i32
    %2 = arith.cmpi ne, %1, %c0_i32_0 : i32
    scf.if %2 {
      %cst_9 = arith.constant 0.000000e+00 : f32
      %12 = vector.broadcast %cst_9 : f32 to vector<256x128xf32>
      %c0_10 = arith.constant 0 : index
      %c0_11 = arith.constant 0 : index
      %13 = vector.load %arg6[%c0_10, %c0_11] : memref<256x128xf32, #tpu.memory_space<vmem>>, vector<256x128xf32>
      tpu.vector_store %arg6[%c0_10, %c0_11], %12 {strides = array<i32>} : memref<256x128xf32, #tpu.memory_space<vmem>>, vector<256x128xf32>,
    } else {
    }
    %c0 = arith.constant 0 : index
    %c0_1 = arith.constant 0 : index
    %3 = vector.load %arg6[%c0, %c0_1] : memref<256x128xf32, #tpu.memory_space<vmem>>, vector<256x128xf32>
    %c0_2 = arith.constant 0 : index
    %c0_3 = arith.constant 0 : index
    %4 = vector.load %arg3[%c0_2, %c0_3] : memref<256x512xbf16, #tpu.memory_space<vmem>>, vector<256x512xbf16>
    %c0_4 = arith.constant 0 : index
    %c0_5 = arith.constant 0 : index
    %5 = vector.load %arg4[%c0_4, %c0_5] : memref<512x128xbf16, #tpu.memory_space<vmem>>, vector<512x128xbf16>
    %cst = arith.constant dense<0.000000e+00> : vector<256x128xf32>
    %6 = tpu.matmul %4, %5, %cst {dimension_numbers = #tpu.dot_dimension_numbers<[1], [0], [0], [1], [0, 0, 1, 1], [], []>} : vector<256x512xbf16>, vector<512x128xbf16>, vector<256x128xf32> -> vector<256x128xf32>
    %7 = arith.addf %3, %6 : vector<256x128xf32>
    %c0_6 = arith.constant 0 : index
    %c0_7 = arith.constant 0 : index
    %8 = vector.load %arg6[%c0_6, %c0_7] : memref<256x128xf32, #tpu.memory_space<vmem>>, vector<256x128xf32>
    tpu.vector_store %arg6[%c0_6, %c0_7], %7 {strides = array<i32>} : memref<256x128xf32, #tpu.memory_space<vmem>>, vector<256x128xf32>,
    %c6_i32 = arith.constant 6 : i32
    %9 = arith.cmpi eq, %arg2, %c6_i32 : i32
    %10 = arith.extui %9 : i1 to i32
    %c0_i32_8 = arith.constant 0 : i32
    %11 = arith.cmpi ne, %10, %c0_i32_8 : i32
    scf.if %11 {
      %c0_9 = arith.constant 0 : index
      %c0_10 = arith.constant 0 : index
      %12 = vector.load %arg6[%c0_9, %c0_10] : memref<256x128xf32, #tpu.memory_space<vmem>>, vector<256x128xf32>
      %c0_11 = arith.constant 0 : index
      %c0_12 = arith.constant 0 : index
      %13 = vector.load %arg5[%c0_11, %c0_12] : memref<1x128xf32, #tpu.memory_space<vmem>>, vector<1x128xf32>
      %14 = vector.broadcast %13 : vector<1x128xf32> to vector<256x128xf32>
      %15 = arith.addf %12, %14 : vector<256x128xf32>
      %cst_13 = arith.constant 0.000000e+00 : f32
      %16 = vector.broadcast %cst_13 : f32 to vector<256x128xf32>
      %17 = arith.maximumf %15, %16 : vector<256x128xf32>
      %c0_14 = arith.constant 0 : index
      %c0_15 = arith.constant 0 : index
      %18 = vector.load %arg6[%c0_14, %c0_15] : memref<256x128xf32, #tpu.memory_space<vmem>>, vector<256x128xf32>
      tpu.vector_store %arg6[%c0_14, %c0_15], %17 {strides = array<i32>} : memref<256x128xf32, #tpu.memory_space<vmem>>, vector<256x128xf32>,
    } else {
    }
    return
  }
  func.func @transform_0(%arg0: i32, %arg1: i32, %arg2: i32) -> (i32, i32) {
    %c0_i32 = arith.constant 0 : i32
    return %arg0, %arg2 : i32, i32
  }
  func.func @transform_1(%arg0: i32, %arg1: i32, %arg2: i32) -> (i32, i32) {
    %c0_i32 = arith.constant 0 : i32
    return %arg2, %arg1 : i32, i32
  }
  func.func @transform_2(%arg0: i32, %arg1: i32, %arg2: i32) -> (i32, i32) {
    %c0_i32 = arith.constant 0 : i32
    %c0_i32_0 = arith.constant 0 : i32
    return %c0_i32, %arg1 : i32, i32
  }
  func.func @transform_3(%arg0: i32, %arg1: i32, %arg2: i32) -> (i32, i32) {
    %c0_i32 = arith.constant 0 : i32
    return %arg0, %arg1 : i32, i32
  }
}

module attributes {stable_mosaic.version = 11 : i64} {
  func.func @_matmul_bias_kernel(%arg0: i32, %arg1: i32, %arg2: i32, %arg3: memref<16x512xbf16, #tpu.memory_space<vmem>>, %arg4: memref<512x256xbf16, #tpu.memory_space<vmem>>, %arg5: memref<1x256xf32, #tpu.memory_space<vmem>>, %arg6: memref<16x256xf32, #tpu.memory_space<vmem>>) attributes {dimension_semantics = [#tpu.dimension_semantics<parallel>, #tpu.dimension_semantics<parallel>, #tpu.dimension_semantics<arbitrary>], iteration_bounds = array<i64: 1, 4, 5>, scalar_prefetch = 0 : i64, scratch_operands = 0 : i64, tpu.core_type = #tpu.core_type<tc>, window_params = [{transform_indices = @transform_0, window_bounds = array<i64: 16, 512>}, {transform_indices = @transform_1, window_bounds = array<i64: 512, 256>}, {transform_indices = @transform_2, window_bounds = array<i64: 1, 256>}, {transform_indices = @transform_3, window_bounds = array<i64: 16, 256>}]} {
    %c0_i32 = arith.constant 0 : i32
    %0 = arith.cmpi eq, %arg2, %c0_i32 : i32
    %1 = arith.extui %0 : i1 to i32
    %c0_i32_0 = arith.constant 0 : i32
    %2 = arith.cmpi ne, %1, %c0_i32_0 : i32
    scf.if %2 {
      %cst_9 = arith.constant 0.000000e+00 : f32
      %12 = vector.broadcast %cst_9 : f32 to vector<16x256xf32>
      %c0_10 = arith.constant 0 : index
      %c0_11 = arith.constant 0 : index
      %13 = vector.load %arg6[%c0_10, %c0_11] : memref<16x256xf32, #tpu.memory_space<vmem>>, vector<16x256xf32>
      tpu.vector_store %arg6[%c0_10, %c0_11], %12 {strides = array<i32>} : memref<16x256xf32, #tpu.memory_space<vmem>>, vector<16x256xf32>,
    } else {
    }
    %c0 = arith.constant 0 : index
    %c0_1 = arith.constant 0 : index
    %3 = vector.load %arg6[%c0, %c0_1] : memref<16x256xf32, #tpu.memory_space<vmem>>, vector<16x256xf32>
    %c0_2 = arith.constant 0 : index
    %c0_3 = arith.constant 0 : index
    %4 = vector.load %arg3[%c0_2, %c0_3] : memref<16x512xbf16, #tpu.memory_space<vmem>>, vector<16x512xbf16>
    %c0_4 = arith.constant 0 : index
    %c0_5 = arith.constant 0 : index
    %5 = vector.load %arg4[%c0_4, %c0_5] : memref<512x256xbf16, #tpu.memory_space<vmem>>, vector<512x256xbf16>
    %cst = arith.constant dense<0.000000e+00> : vector<16x256xf32>
    %6 = tpu.matmul %4, %5, %cst {dimension_numbers = #tpu.dot_dimension_numbers<[1], [0], [0], [1], [0, 0, 1, 1], [], []>} : vector<16x512xbf16>, vector<512x256xbf16>, vector<16x256xf32> -> vector<16x256xf32>
    %7 = arith.addf %3, %6 : vector<16x256xf32>
    %c0_6 = arith.constant 0 : index
    %c0_7 = arith.constant 0 : index
    %8 = vector.load %arg6[%c0_6, %c0_7] : memref<16x256xf32, #tpu.memory_space<vmem>>, vector<16x256xf32>
    tpu.vector_store %arg6[%c0_6, %c0_7], %7 {strides = array<i32>} : memref<16x256xf32, #tpu.memory_space<vmem>>, vector<16x256xf32>,
    %c4_i32 = arith.constant 4 : i32
    %9 = arith.cmpi eq, %arg2, %c4_i32 : i32
    %10 = arith.extui %9 : i1 to i32
    %c0_i32_8 = arith.constant 0 : i32
    %11 = arith.cmpi ne, %10, %c0_i32_8 : i32
    scf.if %11 {
      %c0_9 = arith.constant 0 : index
      %c0_10 = arith.constant 0 : index
      %12 = vector.load %arg6[%c0_9, %c0_10] : memref<16x256xf32, #tpu.memory_space<vmem>>, vector<16x256xf32>
      %c0_11 = arith.constant 0 : index
      %c0_12 = arith.constant 0 : index
      %13 = vector.load %arg5[%c0_11, %c0_12] : memref<1x256xf32, #tpu.memory_space<vmem>>, vector<1x256xf32>
      %14 = vector.broadcast %13 : vector<1x256xf32> to vector<16x256xf32>
      %15 = arith.addf %12, %14 : vector<16x256xf32>
      %cst_13 = arith.constant 0.000000e+00 : f32
      %16 = vector.broadcast %cst_13 : f32 to vector<16x256xf32>
      %17 = arith.maximumf %15, %16 : vector<16x256xf32>
      %c0_14 = arith.constant 0 : index
      %c0_15 = arith.constant 0 : index
      %18 = vector.load %arg6[%c0_14, %c0_15] : memref<16x256xf32, #tpu.memory_space<vmem>>, vector<16x256xf32>
      tpu.vector_store %arg6[%c0_14, %c0_15], %17 {strides = array<i32>} : memref<16x256xf32, #tpu.memory_space<vmem>>, vector<16x256xf32>,
    } else {
    }
    return
  }
  func.func @transform_0(%arg0: i32, %arg1: i32, %arg2: i32) -> (i32, i32) {
    %c0_i32 = arith.constant 0 : i32
    return %arg0, %arg2 : i32, i32
  }
  func.func @transform_1(%arg0: i32, %arg1: i32, %arg2: i32) -> (i32, i32) {
    %c0_i32 = arith.constant 0 : i32
    return %arg2, %arg1 : i32, i32
  }
  func.func @transform_2(%arg0: i32, %arg1: i32, %arg2: i32) -> (i32, i32) {
    %c0_i32 = arith.constant 0 : i32
    %c0_i32_0 = arith.constant 0 : i32
    return %c0_i32, %arg1 : i32, i32
  }
  func.func @transform_3(%arg0: i32, %arg1: i32, %arg2: i32) -> (i32, i32) {
    %c0_i32 = arith.constant 0 : i32
    return %arg0, %arg1 : i32, i32
  }
}

module attributes {stable_mosaic.version = 11 : i64} {
  func.func @_fc_head_kernel(%arg0: i32, %arg1: memref<16x1024xbf16, #tpu.memory_space<vmem>>, %arg2: memref<1024x128xbf16, #tpu.memory_space<vmem>>, %arg3: memref<1x128xf32, #tpu.memory_space<vmem>>, %arg4: memref<128x128xbf16, #tpu.memory_space<vmem>>, %arg5: memref<1x128xf32, #tpu.memory_space<vmem>>, %arg6: memref<16x128xf32, #tpu.memory_space<vmem>>) attributes {dimension_semantics = [#tpu.dimension_semantics<arbitrary>], iteration_bounds = array<i64: 1>, scalar_prefetch = 0 : i64, scratch_operands = 0 : i64, tpu.core_type = #tpu.core_type<tc>, window_params = [{pipeline_mode = #tpu.pipeline_mode<synchronous>, transform_indices = @transform_0, window_bounds = array<i64: 16, 1024>}, {pipeline_mode = #tpu.pipeline_mode<synchronous>, transform_indices = @transform_1, window_bounds = array<i64: 1024, 128>}, {pipeline_mode = #tpu.pipeline_mode<synchronous>, transform_indices = @transform_2, window_bounds = array<i64: 1, 128>}, {pipeline_mode = #tpu.pipeline_mode<synchronous>, transform_indices = @transform_3, window_bounds = array<i64: 128, 128>}, {pipeline_mode = #tpu.pipeline_mode<synchronous>, transform_indices = @transform_4, window_bounds = array<i64: 1, 128>}, {pipeline_mode = #tpu.pipeline_mode<synchronous>, transform_indices = @transform_5, window_bounds = array<i64: 16, 128>}]} {
    %c0 = arith.constant 0 : index
    %c0_0 = arith.constant 0 : index
    %0 = vector.load %arg1[%c0, %c0_0] : memref<16x1024xbf16, #tpu.memory_space<vmem>>, vector<16x1024xbf16>
    %c0_1 = arith.constant 0 : index
    %c0_2 = arith.constant 0 : index
    %1 = vector.load %arg2[%c0_1, %c0_2] : memref<1024x128xbf16, #tpu.memory_space<vmem>>, vector<1024x128xbf16>
    %cst = arith.constant dense<0.000000e+00> : vector<16x128xf32>
    %2 = tpu.matmul %0, %1, %cst {dimension_numbers = #tpu.dot_dimension_numbers<[1], [0], [0], [1], [0, 0, 1, 1], [], []>} : vector<16x1024xbf16>, vector<1024x128xbf16>, vector<16x128xf32> -> vector<16x128xf32>
    %c0_3 = arith.constant 0 : index
    %c0_4 = arith.constant 0 : index
    %3 = vector.load %arg3[%c0_3, %c0_4] : memref<1x128xf32, #tpu.memory_space<vmem>>, vector<1x128xf32>
    %4 = vector.broadcast %3 : vector<1x128xf32> to vector<16x128xf32>
    %5 = arith.addf %2, %4 : vector<16x128xf32>
    %cst_5 = arith.constant 0.000000e+00 : f32
    %6 = vector.broadcast %cst_5 : f32 to vector<16x128xf32>
    %7 = arith.maximumf %5, %6 : vector<16x128xf32>
    %8 = arith.truncf %7 : vector<16x128xf32> to vector<16x128xbf16>
    %c0_6 = arith.constant 0 : index
    %c0_7 = arith.constant 0 : index
    %9 = vector.load %arg4[%c0_6, %c0_7] : memref<128x128xbf16, #tpu.memory_space<vmem>>, vector<128x128xbf16>
    %cst_8 = arith.constant dense<0.000000e+00> : vector<16x128xf32>
    %10 = tpu.matmul %8, %9, %cst_8 {dimension_numbers = #tpu.dot_dimension_numbers<[1], [0], [0], [1], [0, 0, 1, 1], [], []>} : vector<16x128xbf16>, vector<128x128xbf16>, vector<16x128xf32> -> vector<16x128xf32>
    %c0_9 = arith.constant 0 : index
    %c0_10 = arith.constant 0 : index
    %11 = vector.load %arg5[%c0_9, %c0_10] : memref<1x128xf32, #tpu.memory_space<vmem>>, vector<1x128xf32>
    %12 = vector.broadcast %11 : vector<1x128xf32> to vector<16x128xf32>
    %13 = arith.addf %10, %12 : vector<16x128xf32>
    %c0_11 = arith.constant 0 : index
    %c0_12 = arith.constant 0 : index
    %14 = vector.load %arg6[%c0_11, %c0_12] : memref<16x128xf32, #tpu.memory_space<vmem>>, vector<16x128xf32>
    tpu.vector_store %arg6[%c0_11, %c0_12], %13 {strides = array<i32>} : memref<16x128xf32, #tpu.memory_space<vmem>>, vector<16x128xf32>,
    return
  }
  func.func @transform_0(%arg0: i32) -> (i32, i32) {
    %c0_i32 = arith.constant 0 : i32
    %c0_i32_0 = arith.constant 0 : i32
    %c0_i32_1 = arith.constant 0 : i32
    return %c0_i32, %c0_i32_0 : i32, i32
  }
  func.func @transform_1(%arg0: i32) -> (i32, i32) {
    %c0_i32 = arith.constant 0 : i32
    %c0_i32_0 = arith.constant 0 : i32
    %c0_i32_1 = arith.constant 0 : i32
    return %c0_i32, %c0_i32_0 : i32, i32
  }
  func.func @transform_2(%arg0: i32) -> (i32, i32) {
    %c0_i32 = arith.constant 0 : i32
    %c0_i32_0 = arith.constant 0 : i32
    %c0_i32_1 = arith.constant 0 : i32
    return %c0_i32, %c0_i32_0 : i32, i32
  }
  func.func @transform_3(%arg0: i32) -> (i32, i32) {
    %c0_i32 = arith.constant 0 : i32
    %c0_i32_0 = arith.constant 0 : i32
    %c0_i32_1 = arith.constant 0 : i32
    return %c0_i32, %c0_i32_0 : i32, i32
  }
  func.func @transform_4(%arg0: i32) -> (i32, i32) {
    %c0_i32 = arith.constant 0 : i32
    %c0_i32_0 = arith.constant 0 : i32
    %c0_i32_1 = arith.constant 0 : i32
    return %c0_i32, %c0_i32_0 : i32, i32
  }
  func.func @transform_5(%arg0: i32) -> (i32, i32) {
    %c0_i32 = arith.constant 0 : i32
    %c0_i32_0 = arith.constant 0 : i32
    %c0_i32_1 = arith.constant 0 : i32
    return %c0_i32, %c0_i32_0 : i32, i32
  }
}

</mosaic_0001>

<bundles_post_ra>
// kernel: _siamese_forward.6
= control target key start
LH: loop header
LB: loop body
LE: loop exit
PB: predicated region body
PF: predicated region fallthrough
CT: control target
= control target key end

     0   :  { %s1487_s12 = smov 0   ;;  %s1489_s13 = smov 0   ;;  %s1715_s0 = inlined_call_operand.vmem [shape: bf16[5632,256], index: 0, kind: input, shape index: {}]   ;;  %s1716_s1 = inlined_call_operand.vmem [shape: bf16[256,128], index: 1, kind: input, shape index: {}]   ;;  %s1717_s2 = inlined_call_operand.vmem [shape: f32[1,128], index: 2, kind: input, shape index: {}]   ;;  %s1718_s3 = inlined_call_operand.vmem [shape: f32[5632,128], index: 3, kind: output, shape index: {}]  }
   0x1   :  { %s1491_s14 = smov 0  }
   0x2 LB: > { %s32_s15 = sadd.s32 1, %s1461_s13  ;;  %p1152_p0 = scmp.ge.s32.totalorder %s1465_s14, 1  ;;  %s1465_s14 = sphi %s1491_s14, %s13_s14   ;;  %s1461_s13 = sphi %s1489_s13, %s1720_s13   ;;  %s1457_s12 = sphi %s1487_s12, %s1719_s12  }
   0x3   : > { %p34_p1 = scmp.ge.s32.totalorder %s32_s15, 22  ;;  %p191_p2 = scmp.lt.s32.totalorder %s1465_s14, 23 }
   0x5   : > { %s1722_s15 = smov (%p34_p1, %s32_s15), 0  ;;  %p192_p3 = pnand %p1152_p0, %p191_p2 }
   0x6   : > { %s1153_s28 = sshll.u32 (!%p192_p3), %s1457_s12, 5 }
   0x7   : > { %195 = sbr.rel (%p192_p3) target bundleno = 304 (0x130), region = 32  ;;  %p236_p4 = scmp.lt.s32.totalorder (!%p192_p3), %s1153_s28, 703 }
   0xc   : > { %v1392_v0 = vld [vmem:[%s1716_s1 + $0x38] sm:$0xff]  ;;  %v1391_v2 = vld [vmem:[%s1716_s1 + $0x30] sm:$0xff]  ;;  %v1390_v4 = vld [vmem:[%s1716_s1 + $0x28] sm:$0xff]  ;;  %s1724_s28 = smov (!%p236_p4, %s1153_s28), 703 }
   0xd   : > { %v1400_v1 = vld [vmem:[%s1716_s1 + $0x78] sm:$0xff]  ;;  %655 = vmatpush.bf16.msra.mxu0 %v1392_v0  ;;  %1401 = vmatpush.bf16.msra.mxu2 %v1392_v0  ;;  %v1399_v3 = vld [vmem:[%s1716_s1 + $0x70] sm:$0xff]  ;;  %v1398_v5 = vld [vmem:[%s1716_s1 + $0x68] sm:$0xff]  ;;  %s1352_s17 = sshll.u32 %s1724_s28, 3 }
   0xe   : > { %744 = vmatpush.bf16.msra.mxu1 %v1400_v1  ;;  %1409 = vmatpush.bf16.msra.mxu3 %v1400_v1  ;;  %v1389_v6 = vld [vmem:[%s1716_s1 + $0x20] sm:$0xff]  ;;  %v1388_v8 = vld [vmem:[%s1716_s1 + $0x18] sm:$0xff]  ;;  %v1387_v10 = vld [vmem:[%s1716_s1 + $0x10] sm:$0xff]  ;;  %s1555_s22 = scalar_lea.vmem %s1715_s0, %s1352_s17  ;;  %s1641_s7 = scalar_lea.vmem %s1718_s3, %s1352_s17 }
   0xf   : > { %v1397_v7 = vld [vmem:[%s1716_s1 + $0x60] sm:$0xff]  ;;  %v1396_v9 = vld [vmem:[%s1716_s1 + $0x58] sm:$0xff]  ;;  %v1395_v11 = vld [vmem:[%s1716_s1 + $0x50] sm:$0xff] }
  0x10   : > { %v1386_v12 = vld [vmem:[%s1716_s1 + $0x8] sm:$0xff]  ;;  %v1385_v14 = vld [vmem:[%s1716_s1] sm:$0xff]  ;;  %v1168_v28 = vld [vmem:[%s1555_s22 + $0x10] sm:$0xf] }
  0x11   : > { %656 = vmatpush.bf16.msra.mxu0 %v1391_v2  ;;  %1402 = vmatpush.bf16.msra.mxu2 %v1391_v2  ;;  %v1394_v13 = vld [vmem:[%s1716_s1 + $0x48] sm:$0xff]  ;;  %v1393_v15 = vld [vmem:[%s1716_s1 + $0x40] sm:$0xff]  ;;  %v1356_v29 = vld [vmem:[%s1555_s22 + $0x14] sm:$0xf0] }
  0x12   : > { %745 = vmatpush.bf16.msra.mxu1 %v1399_v3  ;;  %1410 = vmatpush.bf16.msra.mxu3 %v1399_v3  ;;  %v1160_v16 = vld [vmem:[%s1555_s22] sm:$0xf]  ;;  %v1354_v17 = vld [vmem:[%s1555_s22 + $0x4] sm:$0xf0]  ;;  %v1353_v20 = vld [vmem:[%s1555_s22 + $0x4] sm:$0xf]  ;;  %v1169_v36 = vor.u32 %v1356_v29, %v1168_v28 }
  0x13   : > { %v1224_v18 = vld [vmem:[%s1555_s22 + $0x80] sm:$0xf]  ;;  %v1370_v19 = vld [vmem:[%s1555_s22 + $0x84] sm:$0xf0]  ;;  %v1162_v21 = vld [vmem:[%s1555_s22 + $0x8] sm:$0xf0]  ;;  %v1161_v24 = vor.u32 %v1354_v17, %v1160_v16 }
  0x14   : > { %v1369_v22 = vld [vmem:[%s1555_s22 + $0x84] sm:$0xf]  ;;  %v1226_v23 = vld [vmem:[%s1555_s22 + $0x88] sm:$0xf0]  ;;  %v1225_v25 = vor.u32 %v1370_v19, %v1224_v18  ;;  %v1165_v26 = vor.u32 %v1353_v20, %v1162_v21  ;;  %v1232_v30 = vld [vmem:[%s1555_s22 + $0x90] sm:$0xf] }
  0x15   : > { %657 = vmatpush.bf16.msra.mxu0 %v1390_v4  ;;  %1403 = vmatpush.bf16.msra.mxu2 %v1390_v4  ;;  %v1229_v27 = vor.u32 %v1369_v22, %v1226_v23  ;;  %v1372_v31 = vld [vmem:[%s1555_s22 + $0x94] sm:$0xf0]  ;;  %v1355_v32 = vld [vmem:[%s1555_s22 + $0x14] sm:$0xf]  ;;  %v1170_v33 = vld [vmem:[%s1555_s22 + $0x18] sm:$0xf0] }
  0x16   : > { %746 = vmatpush.bf16.msra.mxu1 %v1398_v5  ;;  %1411 = vmatpush.bf16.msra.mxu3 %v1398_v5  ;;  %v1371_v34 = vld [vmem:[%s1555_s22 + $0x94] sm:$0xf]  ;;  %v1234_v35 = vld [vmem:[%s1555_s22 + $0x98] sm:$0xf0]  ;;  %v1233_v37 = vor.u32 %v1372_v31, %v1232_v30  ;;  %v1173_v38 = vor.u32 %v1355_v32, %v1170_v33  ;;  %v1176_v40 = vld [vmem:[%s1555_s22 + $0x20] sm:$0xf] }
  0x17   : > { %v1237_v39 = vor.u32 %v1371_v34, %v1234_v35  ;;  %v1358_v41 = vld [vmem:[%s1555_s22 + $0x24] sm:$0xf0]  ;;  %v1240_v42 = vld [vmem:[%s1555_s22 + $0xa0] sm:$0xf]  ;;  %v1357_v44 = vld [vmem:[%s1555_s22 + $0x24] sm:$0xf] }
  0x18   : > { %v1374_v43 = vld [vmem:[%s1555_s22 + $0xa4] sm:$0xf0]  ;;  %v1178_v45 = vld [vmem:[%s1555_s22 + $0x28] sm:$0xf0]  ;;  %v1373_v46 = vld [vmem:[%s1555_s22 + $0xa4] sm:$0xf]  ;;  %v1177_v48 = vor.u32 %v1358_v41, %v1176_v40 }
  0x19   : > { %658 = vmatpush.bf16.msra.mxu0 %v1389_v6  ;;  %1404 = vmatpush.bf16.msra.mxu2 %v1389_v6  ;;  %v1242_v47 = vld [vmem:[%s1555_s22 + $0xa8] sm:$0xf0]  ;;  %v1241_v49 = vor.u32 %v1374_v43, %v1240_v42  ;;  %v1181_v50 = vor.u32 %v1357_v44, %v1178_v45  ;;  %v1184_v52 = vld [vmem:[%s1555_s22 + $0x30] sm:$0xf]  ;;  %v1360_v53 = vld [vmem:[%s1555_s22 + $0x34] sm:$0xf0] }
  0x1a   : > { %747 = vmatpush.bf16.msra.mxu1 %v1397_v7  ;;  %1412 = vmatpush.bf16.msra.mxu3 %v1397_v7  ;;  %v1245_v51 = vor.u32 %v1373_v46, %v1242_v47  ;;  %v1248_v54 = vld [vmem:[%s1555_s22 + $0xb0] sm:$0xf]  ;;  %v1376_v55 = vld [vmem:[%s1555_s22 + $0xb4] sm:$0xf0]  ;;  %v1359_v56 = vld [vmem:[%s1555_s22 + $0x34] sm:$0xf]  ;;  %v1185_v60 = vor.u32 %v1360_v53, %v1184_v52 }
  0x1b   : > { %v1186_v57 = vld [vmem:[%s1555_s22 + $0x38] sm:$0xf0]  ;;  %v1375_v58 = vld [vmem:[%s1555_s22 + $0xb4] sm:$0xf]  ;;  %v1249_v61 = vor.u32 %v1376_v55, %v1248_v54  ;;  %v1192_v0 = vld [vmem:[%s1555_s22 + $0x40] sm:$0xf] }
  0x1c   : > { %v1250_v59 = vld [vmem:[%s1555_s22 + $0xb8] sm:$0xf0]  ;;  %v1189_v62 = vor.u32 %v1359_v56, %v1186_v57  ;;  %v1362_v1 = vld [vmem:[%s1555_s22 + $0x44] sm:$0xf0]  ;;  %v1256_v2 = vld [vmem:[%s1555_s22 + $0xc0] sm:$0xf] }
  0x1d   : > { %659 = vmatpush.bf16.msra.mxu0 %v1388_v8  ;;  %1405 = vmatpush.bf16.msra.mxu2 %v1388_v8  ;;  %v1253_v63 = vor.u32 %v1375_v58, %v1250_v59  ;;  %v1378_v3 = vld [vmem:[%s1555_s22 + $0xc4] sm:$0xf0]  ;;  %v1361_v4 = vld [vmem:[%s1555_s22 + $0x44] sm:$0xf]  ;;  %v1194_v5 = vld [vmem:[%s1555_s22 + $0x48] sm:$0xf0]  ;;  %v1193_v8 = vor.u32 %v1362_v1, %v1192_v0 }
  0x1e   : > { %748 = vmatpush.bf16.msra.mxu1 %v1396_v9  ;;  %1413 = vmatpush.bf16.msra.mxu3 %v1396_v9  ;;  %v1377_v6 = vld [vmem:[%s1555_s22 + $0xc4] sm:$0xf]  ;;  %v1258_v7 = vld [vmem:[%s1555_s22 + $0xc8] sm:$0xf0]  ;;  %v1257_v9 = vor.u32 %v1378_v3, %v1256_v2  ;;  %v1363_v16 = vld [vmem:[%s1555_s22 + $0x54] sm:$0xf] }
  0x1f   : > { %v1202_v17 = vld [vmem:[%s1555_s22 + $0x58] sm:$0xf0]  ;;  %v1379_v18 = vld [vmem:[%s1555_s22 + $0xd4] sm:$0xf]  ;;  %v1365_v28 = vld [vmem:[%s1555_s22 + $0x64] sm:$0xf] }
  0x20   : > { %v1266_v19 = vld [vmem:[%s1555_s22 + $0xd8] sm:$0xf0]  ;;  %v1205_v22 = vor.u32 %v1363_v16, %v1202_v17  ;;  %v1210_v29 = vld [vmem:[%s1555_s22 + $0x68] sm:$0xf0]  ;;  %v1381_v30 = vld [vmem:[%s1555_s22 + $0xe4] sm:$0xf] }
  0x21   : > { %660 = vmatpush.bf16.msra.mxu0 %v1387_v10  ;;  %1406 = vmatpush.bf16.msra.mxu2 %v1387_v10  ;;  %v1197_v10 = vor.u32 %v1361_v4, %v1194_v5  ;;  %v1269_v23 = vor.u32 %v1379_v18, %v1266_v19  ;;  %v1274_v31 = vld [vmem:[%s1555_s22 + $0xe8] sm:$0xf0]  ;;  %v1213_v34 = vor.u32 %v1365_v28, %v1210_v29  ;;  %v1367_v40 = vld [vmem:[%s1555_s22 + $0x74] sm:$0xf]  ;;  %v1218_v41 = vld [vmem:[%s1555_s22 + $0x78] sm:$0xf0] }
  0x22   : > { %749 = vmatpush.bf16.msra.mxu1 %v1395_v11  ;;  %1414 = vmatpush.bf16.msra.mxu3 %v1395_v11  ;;  %v1261_v11 = vor.u32 %v1377_v6, %v1258_v7  ;;  %v1277_v35 = vor.u32 %v1381_v30, %v1274_v31  ;;  %v1383_v42 = vld [vmem:[%s1555_s22 + $0xf4] sm:$0xf]  ;;  %v1282_v43 = vld [vmem:[%s1555_s22 + $0xf8] sm:$0xf0]  ;;  %v1221_v46 = vor.u32 %v1367_v40, %v1218_v41 }
  0x23   : > { %v1285_v47 = vor.u32 %v1383_v42, %v1282_v43 }
  0x25   : > { %661 = vmatpush.bf16.msra.mxu0 %v1386_v12  ;;  %1407 = vmatpush.bf16.msra.mxu2 %v1386_v12  ;;  %v1200_v12 = vld [vmem:[%s1555_s22 + $0x50] sm:$0xf] }
  0x26   : > { %750 = vmatpush.bf16.msra.mxu1 %v1394_v13  ;;  %1415 = vmatpush.bf16.msra.mxu3 %v1394_v13  ;;  %v1364_v13 = vld [vmem:[%s1555_s22 + $0x54] sm:$0xf0] }
  0x27   : > { %v1201_v20 = vor.u32 %v1364_v13, %v1200_v12 }
  0x29   : > { %662 = vmatpush.bf16.msra.mxu0 %v1385_v14  ;;  %1408 = vmatpush.bf16.msra.mxu2 %v1385_v14  ;;  %v1264_v14 = vld [vmem:[%s1555_s22 + $0xd0] sm:$0xf] }
  0x2a   : > { %751 = vmatpush.bf16.msra.mxu1 %v1393_v15  ;;  %1416 = vmatpush.bf16.msra.mxu3 %v1393_v15  ;;  %v1380_v15 = vld [vmem:[%s1555_s22 + $0xd4] sm:$0xf0] }
  0x2b   : > { %v1265_v21 = vor.u32 %v1380_v15, %v1264_v14 }
  0x2c   : > { %663 = vmatmul.bf16.vlgmr.msra.gmra.mxu0 %v1161_v24  ;;  %703 = vmatmul.bf16.vlgmr.msra.gmra.mxu2 %v1225_v25  ;;  %v1208_v24 = vld [vmem:[%s1555_s22 + $0x60] sm:$0xf]  ;;  %v1366_v25 = vld [vmem:[%s1555_s22 + $0x64] sm:$0xf0] }
  0x2d   : > { %752 = vmatmul.bf16.vlgmr.msra.gmra.mxu1 %v1165_v26  ;;  %792 = vmatmul.bf16.vlgmr.msra.gmra.mxu3 %v1229_v27  ;;  %v1272_v26 = vld [vmem:[%s1555_s22 + $0xe0] sm:$0xf]  ;;  %v1382_v27 = vld [vmem:[%s1555_s22 + $0xe4] sm:$0xf0]  ;;  %v1209_v32 = vor.u32 %v1366_v25, %v1208_v24 }
  0x2e   : > { %v1273_v33 = vor.u32 %v1382_v27, %v1272_v26 }
  0x3c   : > { %668 = vmatmul.bf16.gmra.mxu0 %v1169_v36  ;;  %708 = vmatmul.bf16.gmra.mxu2 %v1233_v37  ;;  %v1216_v36 = vld [vmem:[%s1555_s22 + $0x70] sm:$0xf]  ;;  %v1368_v37 = vld [vmem:[%s1555_s22 + $0x74] sm:$0xf0] }
  0x3d   : > { %757 = vmatmul.bf16.gmra.mxu1 %v1173_v38  ;;  %797 = vmatmul.bf16.gmra.mxu3 %v1237_v39  ;;  %v1280_v38 = vld [vmem:[%s1555_s22 + $0xf0] sm:$0xf]  ;;  %v1384_v39 = vld [vmem:[%s1555_s22 + $0xf4] sm:$0xf0]  ;;  %v1217_v44 = vor.u32 %v1368_v37, %v1216_v36 }
  0x3e   : > { %v1281_v45 = vor.u32 %v1384_v39, %v1280_v38 }
  0x4c   : > { %673 = vmatmul.bf16.gmra.mxu0 %v1177_v48  ;;  %713 = vmatmul.bf16.gmra.mxu2 %v1241_v49 }
  0x4d   : > { %762 = vmatmul.bf16.gmra.mxu1 %v1181_v50  ;;  %802 = vmatmul.bf16.gmra.mxu3 %v1245_v51  ;;  %v1633_v51 = vld [vmem:[%s1717_s2] ss:$0 sm:$0xff] }
  0x5c   : > { %678 = vmatmul.bf16.gmra.mxu0 %v1185_v60  ;;  %718 = vmatmul.bf16.gmra.mxu2 %v1249_v61 }
  0x5d   : > { %767 = vmatmul.bf16.gmra.mxu1 %v1189_v62  ;;  %807 = vmatmul.bf16.gmra.mxu3 %v1253_v63 }
  0x6c   : > { %683 = vmatmul.bf16.gmra.mxu0 %v1193_v8  ;;  %723 = vmatmul.bf16.gmra.mxu2 %v1257_v9 }
  0x6d   : > { %772 = vmatmul.bf16.gmra.mxu1 %v1197_v10  ;;  %812 = vmatmul.bf16.gmra.mxu3 %v1261_v11 }
  0x7c   : > { %688 = vmatmul.bf16.gmra.mxu0 %v1201_v20  ;;  %728 = vmatmul.bf16.gmra.mxu2 %v1265_v21 }
  0x7d   : > { %777 = vmatmul.bf16.gmra.mxu1 %v1205_v22  ;;  %817 = vmatmul.bf16.gmra.mxu3 %v1269_v23 }
  0x8c   : > { %693 = vmatmul.bf16.gmra.mxu0 %v1209_v32  ;;  %733 = vmatmul.bf16.gmra.mxu2 %v1273_v33 }
  0x8d   : > { %782 = vmatmul.bf16.gmra.mxu1 %v1213_v34  ;;  %822 = vmatmul.bf16.gmra.mxu3 %v1277_v35 }
  0x9c   : > { %698 = vmatmul.bf16.gmra.mxu0 %v1217_v44  ;;  %738 = vmatmul.bf16.gmra.mxu2 %v1281_v45 }
  0x9d   : > { %787 = vmatmul.bf16.gmra.mxu1 %v1221_v46  ;;  %827 = vmatmul.bf16.gmra.mxu3 %v1285_v47 }
  0xa9   : > { %v664_v48 = vpop.f32.mrf.mxu0 }
  0xaa   : > { %v753_v49 = vpop.f32.mrf.mxu1 }
  0xab   : > { %v754_v50 = vadd.f32 %v753_v49, %v664_v48 }
  0xad   : > { %v936_v52 = vadd.f32 %v1633_v51, %v754_v50 }
  0xaf   : > { %v704_v53 = vpop.f32.mrf.mxu2  ;;  %v968_v55 = vmax.f32 %v936_v52, 0.0 }
  0xb0   : > { %v793_v54 = vpop.f32.mrf.mxu3 }
  0xb1   : > { %v794_v56 = vadd.f32 %v793_v54, %v704_v53  ;;  %v666_v57 = vpop.f32.mrf.mxu0  ;;  %1000 = vst [vmem:[%s1641_s7] sm:$0xff] %v968_v55 }
  0xb2   : > { %v755_v58 = vpop.f32.mrf.mxu1 }
  0xb3   : > { %v756_v59 = vadd.f32 %v755_v58, %v666_v57  ;;  %v952_v60 = vadd.f32 %v1633_v51, %v794_v56 }
  0xb5   : > { %v984_v61 = vmax.f32 %v952_v60, 0.0  ;;  %v937_v62 = vadd.f32 %v1633_v51, %v756_v59 }
  0xb7   : > { %v706_v63 = vpop.f32.mrf.mxu2  ;;  %1016 = vst [vmem:[%s1641_s7 + $0x80] sm:$0xff] %v984_v61  ;;  %v969_v1 = vmax.f32 %v937_v62, 0.0 }
  0xb8   : > { %v795_v0 = vpop.f32.mrf.mxu3 }
  0xb9   : > { %v796_v2 = vadd.f32 %v795_v0, %v706_v63  ;;  %v669_v3 = vpop.f32.mrf.mxu0  ;;  %1001 = vst [vmem:[%s1641_s7 + $0x8] sm:$0xff] %v969_v1 }
  0xba   : > { %v758_v4 = vpop.f32.mrf.mxu1 }
  0xbb   : > { %v759_v5 = vadd.f32 %v758_v4, %v669_v3  ;;  %v953_v6 = vadd.f32 %v1633_v51, %v796_v2 }
  0xbd   : > { %v985_v7 = vmax.f32 %v953_v6, 0.0  ;;  %v938_v8 = vadd.f32 %v1633_v51, %v759_v5 }
  0xbf   : > { %v709_v9 = vpop.f32.mrf.mxu2  ;;  %1017 = vst [vmem:[%s1641_s7 + $0x88] sm:$0xff] %v985_v7  ;;  %v970_v11 = vmax.f32 %v938_v8, 0.0 }
  0xc0   : > { %v798_v10 = vpop.f32.mrf.mxu3 }
  0xc1   : > { %v799_v12 = vadd.f32 %v798_v10, %v709_v9  ;;  %v671_v13 = vpop.f32.mrf.mxu0  ;;  %1002 = vst [vmem:[%s1641_s7 + $0x10] sm:$0xff] %v970_v11 }
  0xc2   : > { %v760_v14 = vpop.f32.mrf.mxu1 }
  0xc3   : > { %v761_v15 = vadd.f32 %v760_v14, %v671_v13  ;;  %v954_v16 = vadd.f32 %v1633_v51, %v799_v12 }
  0xc5   : > { %v986_v17 = vmax.f32 %v954_v16, 0.0  ;;  %v939_v18 = vadd.f32 %v1633_v51, %v761_v15 }
  0xc7   : > { %v711_v19 = vpop.f32.mrf.mxu2  ;;  %1018 = vst [vmem:[%s1641_s7 + $0x90] sm:$0xff] %v986_v17  ;;  %v971_v21 = vmax.f32 %v939_v18, 0.0 }
  0xc8   : > { %v800_v20 = vpop.f32.mrf.mxu3 }
  0xc9   : > { %v801_v22 = vadd.f32 %v800_v20, %v711_v19  ;;  %v674_v23 = vpop.f32.mrf.mxu0  ;;  %1003 = vst [vmem:[%s1641_s7 + $0x18] sm:$0xff] %v971_v21 }
  0xca   : > { %v763_v24 = vpop.f32.mrf.mxu1 }
  0xcb   : > { %v764_v25 = vadd.f32 %v763_v24, %v674_v23  ;;  %v955_v26 = vadd.f32 %v1633_v51, %v801_v22 }
  0xcd   : > { %v987_v27 = vmax.f32 %v955_v26, 0.0  ;;  %v940_v28 = vadd.f32 %v1633_v51, %v764_v25 }
  0xcf   : > { %v714_v29 = vpop.f32.mrf.mxu2  ;;  %1019 = vst [vmem:[%s1641_s7 + $0x98] sm:$0xff] %v987_v27  ;;  %v972_v31 = vmax.f32 %v940_v28, 0.0 }
  0xd0   : > { %v803_v30 = vpop.f32.mrf.mxu3 }
  0xd1   : > { %v804_v32 = vadd.f32 %v803_v30, %v714_v29  ;;  %v676_v33 = vpop.f32.mrf.mxu0  ;;  %1004 = vst [vmem:[%s1641_s7 + $0x20] sm:$0xff] %v972_v31 }
  0xd2   : > { %v765_v34 = vpop.f32.mrf.mxu1 }
  0xd3   : > { %v766_v35 = vadd.f32 %v765_v34, %v676_v33  ;;  %v956_v36 = vadd.f32 %v1633_v51, %v804_v32 }
  0xd5   : > { %v988_v37 = vmax.f32 %v956_v36, 0.0  ;;  %v941_v38 = vadd.f32 %v1633_v51, %v766_v35 }
  0xd7   : > { %v716_v39 = vpop.f32.mrf.mxu2  ;;  %1020 = vst [vmem:[%s1641_s7 + $0xa0] sm:$0xff] %v988_v37  ;;  %v973_v41 = vmax.f32 %v941_v38, 0.0 }
  0xd8   : > { %v805_v40 = vpop.f32.mrf.mxu3 }
  0xd9   : > { %v806_v42 = vadd.f32 %v805_v40, %v716_v39  ;;  %v679_v43 = vpop.f32.mrf.mxu0  ;;  %1005 = vst [vmem:[%s1641_s7 + $0x28] sm:$0xff] %v973_v41 }
  0xda   : > { %v768_v44 = vpop.f32.mrf.mxu1 }
  0xdb   : > { %v769_v45 = vadd.f32 %v768_v44, %v679_v43  ;;  %v957_v46 = vadd.f32 %v1633_v51, %v806_v42 }
  0xdd   : > { %v989_v47 = vmax.f32 %v957_v46, 0.0  ;;  %v942_v48 = vadd.f32 %v1633_v51, %v769_v45 }
  0xdf   : > { %v719_v49 = vpop.f32.mrf.mxu2  ;;  %1021 = vst [vmem:[%s1641_s7 + $0xa8] sm:$0xff] %v989_v47  ;;  %v974_v52 = vmax.f32 %v942_v48, 0.0 }
  0xe0   : > { %v808_v50 = vpop.f32.mrf.mxu3 }
  0xe1   : > { %v809_v53 = vadd.f32 %v808_v50, %v719_v49  ;;  %v681_v54 = vpop.f32.mrf.mxu0  ;;  %1006 = vst [vmem:[%s1641_s7 + $0x30] sm:$0xff] %v974_v52 }
  0xe2   : > { %v770_v55 = vpop.f32.mrf.mxu1 }
  0xe3   : > { %v771_v56 = vadd.f32 %v770_v55, %v681_v54  ;;  %v958_v57 = vadd.f32 %v1633_v51, %v809_v53 }
  0xe5   : > { %v990_v58 = vmax.f32 %v958_v57, 0.0  ;;  %v943_v59 = vadd.f32 %v1633_v51, %v771_v56 }
  0xe7   : > { %v721_v60 = vpop.f32.mrf.mxu2  ;;  %1022 = vst [vmem:[%s1641_s7 + $0xb0] sm:$0xff] %v990_v58  ;;  %v975_v62 = vmax.f32 %v943_v59, 0.0 }
  0xe8   : > { %v810_v61 = vpop.f32.mrf.mxu3 }
  0xe9   : > { %v811_v63 = vadd.f32 %v810_v61, %v721_v60  ;;  %v684_v0 = vpop.f32.mrf.mxu0  ;;  %1007 = vst [vmem:[%s1641_s7 + $0x38] sm:$0xff] %v975_v62 }
  0xea   : > { %v773_v1 = vpop.f32.mrf.mxu1 }
  0xeb   : > { %v774_v2 = vadd.f32 %v773_v1, %v684_v0  ;;  %v959_v3 = vadd.f32 %v1633_v51, %v811_v63 }
  0xed   : > { %v991_v4 = vmax.f32 %v959_v3, 0.0  ;;  %v944_v5 = vadd.f32 %v1633_v51, %v774_v2 }
  0xef   : > { %v724_v6 = vpop.f32.mrf.mxu2  ;;  %1023 = vst [vmem:[%s1641_s7 + $0xb8] sm:$0xff] %v991_v4  ;;  %v976_v8 = vmax.f32 %v944_v5, 0.0 }
  0xf0   : > { %v813_v7 = vpop.f32.mrf.mxu3 }
  0xf1   : > { %v814_v9 = vadd.f32 %v813_v7, %v724_v6  ;;  %v686_v10 = vpop.f32.mrf.mxu0  ;;  %1008 = vst [vmem:[%s1641_s7 + $0x40] sm:$0xff] %v976_v8 }
  0xf2   : > { %v775_v11 = vpop.f32.mrf.mxu1 }
  0xf3   : > { %v776_v12 = vadd.f32 %v775_v11, %v686_v10  ;;  %v960_v13 = vadd.f32 %v1633_v51, %v814_v9 }
  0xf5   : > { %v992_v14 = vmax.f32 %v960_v13, 0.0  ;;  %v945_v15 = vadd.f32 %v1633_v51, %v776_v12 }
  0xf7   : > { %v726_v16 = vpop.f32.mrf.mxu2  ;;  %1024 = vst [vmem:[%s1641_s7 + $0xc0] sm:$0xff] %v992_v14  ;;  %v977_v18 = vmax.f32 %v945_v15, 0.0 }
  0xf8   : > { %v815_v17 = vpop.f32.mrf.mxu3 }
  0xf9   : > { %v816_v19 = vadd.f32 %v815_v17, %v726_v16  ;;  %v689_v20 = vpop.f32.mrf.mxu0  ;;  %1009 = vst [vmem:[%s1641_s7 + $0x48] sm:$0xff] %v977_v18 }
  0xfa   : > { %v778_v21 = vpop.f32.mrf.mxu1 }
  0xfb   : > { %v779_v22 = vadd.f32 %v778_v21, %v689_v20  ;;  %v961_v23 = vadd.f32 %v1633_v51, %v816_v19 }
  0xfd   : > { %v993_v24 = vmax.f32 %v961_v23, 0.0  ;;  %v946_v25 = vadd.f32 %v1633_v51, %v779_v22 }
  0xff   : > { %v729_v26 = vpop.f32.mrf.mxu2  ;;  %1025 = vst [vmem:[%s1641_s7 + $0xc8] sm:$0xff] %v993_v24  ;;  %v978_v28 = vmax.f32 %v946_v25, 0.0 }
 0x100   : > { %v818_v27 = vpop.f32.mrf.mxu3 }
 0x101   : > { %v819_v29 = vadd.f32 %v818_v27, %v729_v26  ;;  %v691_v30 = vpop.f32.mrf.mxu0  ;;  %1010 = vst [vmem:[%s1641_s7 + $0x50] sm:$0xff] %v978_v28 }
 0x102   : > { %v780_v31 = vpop.f32.mrf.mxu1 }
 0x103   : > { %v781_v32 = vadd.f32 %v780_v31, %v691_v30  ;;  %v962_v33 = vadd.f32 %v1633_v51, %v819_v29 }
 0x105   : > { %v994_v34 = vmax.f32 %v962_v33, 0.0  ;;  %v947_v35 = vadd.f32 %v1633_v51, %v781_v32 }
 0x107   : > { %v731_v36 = vpop.f32.mrf.mxu2  ;;  %1026 = vst [vmem:[%s1641_s7 + $0xd0] sm:$0xff] %v994_v34  ;;  %v979_v38 = vmax.f32 %v947_v35, 0.0 }
 0x108   : > { %v820_v37 = vpop.f32.mrf.mxu3 }
 0x109   : > { %v821_v39 = vadd.f32 %v820_v37, %v731_v36  ;;  %v694_v40 = vpop.f32.mrf.mxu0  ;;  %1011 = vst [vmem:[%s1641_s7 + $0x58] sm:$0xff] %v979_v38 }
 0x10a   : > { %v783_v41 = vpop.f32.mrf.mxu1 }
 0x10b   : > { %v784_v42 = vadd.f32 %v783_v41, %v694_v40  ;;  %v963_v43 = vadd.f32 %v1633_v51, %v821_v39 }
 0x10d   : > { %v995_v44 = vmax.f32 %v963_v43, 0.0  ;;  %v948_v45 = vadd.f32 %v1633_v51, %v784_v42 }
 0x10f   : > { %v734_v46 = vpop.f32.mrf.mxu2  ;;  %1027 = vst [vmem:[%s1641_s7 + $0xd8] sm:$0xff] %v995_v44  ;;  %v980_v48 = vmax.f32 %v948_v45, 0.0 }
 0x110   : > { %v823_v47 = vpop.f32.mrf.mxu3 }
 0x111   : > { %v824_v49 = vadd.f32 %v823_v47, %v734_v46  ;;  %v696_v50 = vpop.f32.mrf.mxu0  ;;  %1012 = vst [vmem:[%s1641_s7 + $0x60] sm:$0xff] %v980_v48 }
 0x112   : > { %v785_v52 = vpop.f32.mrf.mxu1 }
 0x113   : > { %v786_v53 = vadd.f32 %v785_v52, %v696_v50  ;;  %v964_v54 = vadd.f32 %v1633_v51, %v824_v49 }
 0x115   : > { %v996_v55 = vmax.f32 %v964_v54, 0.0  ;;  %v949_v56 = vadd.f32 %v1633_v51, %v786_v53 }
 0x117   : > { %v736_v57 = vpop.f32.mrf.mxu2  ;;  %1028 = vst [vmem:[%s1641_s7 + $0xe0] sm:$0xff] %v996_v55  ;;  %v981_v59 = vmax.f32 %v949_v56, 0.0 }
 0x118   : > { %v825_v58 = vpop.f32.mrf.mxu3 }
 0x119   : > { %v826_v60 = vadd.f32 %v825_v58, %v736_v57  ;;  %v699_v61 = vpop.f32.mrf.mxu0  ;;  %1013 = vst [vmem:[%s1641_s7 + $0x68] sm:$0xff] %v981_v59 }
 0x11a   : > { %v788_v62 = vpop.f32.mrf.mxu1 }
 0x11b   : > { %v789_v63 = vadd.f32 %v788_v62, %v699_v61  ;;  %v965_v0 = vadd.f32 %v1633_v51, %v826_v60 }
 0x11d   : > { %v997_v1 = vmax.f32 %v965_v0, 0.0  ;;  %v950_v2 = vadd.f32 %v1633_v51, %v789_v63 }
 0x11f   : > { %v739_v3 = vpop.f32.mrf.mxu2  ;;  %1029 = vst [vmem:[%s1641_s7 + $0xe8] sm:$0xff] %v997_v1  ;;  %v982_v5 = vmax.f32 %v950_v2, 0.0 }
 0x120   : > { %v828_v4 = vpop.f32.mrf.mxu3 }
 0x121   : > { %v829_v6 = vadd.f32 %v828_v4, %v739_v3  ;;  %v701_v7 = vpop.f32.mrf.mxu0  ;;  %1014 = vst [vmem:[%s1641_s7 + $0x70] sm:$0xff] %v982_v5 }
 0x122   : > { %v790_v8 = vpop.f32.mrf.mxu1 }
 0x123   : > { %v791_v9 = vadd.f32 %v790_v8, %v701_v7  ;;  %v966_v10 = vadd.f32 %v1633_v51, %v829_v6 }
 0x125   : > { %v998_v11 = vmax.f32 %v966_v10, 0.0  ;;  %v951_v12 = vadd.f32 %v1633_v51, %v791_v9 }
 0x127   : > { %v741_v13 = vpop.f32.mrf.mxu2  ;;  %1030 = vst [vmem:[%s1641_s7 + $0xf0] sm:$0xff] %v998_v11  ;;  %v983_v15 = vmax.f32 %v951_v12, 0.0 }
 0x128   : > { %v830_v14 = vpop.f32.mrf.mxu3 }
 0x129   : > { %v831_v16 = vadd.f32 %v830_v14, %v741_v13  ;;  %1015 = vst [vmem:[%s1641_s7 + $0x78] sm:$0xff] %v983_v15 }
 0x12b   : > { %v967_v17 = vadd.f32 %v1633_v51, %v831_v16 }
 0x12d   : > { %v999_v18 = vmax.f32 %v967_v17, 0.0 }
 0x12f   : > { %1031 = vst [vmem:[%s1641_s7 + $0xf8] sm:$0xff] %v999_v18 }
 0x130 PF: > { %s13_s14 = sadd.s32 1, %s1465_s14   ;;  %s1719_s12 = smov %s1461_s13 }
 0x131   : > { %p10_p5 = scmp.ge.s32.totalorder %s13_s14, 24   ;;  %s1720_s13 = smov %s1722_s15 }
 0x133   :  { %12 = sbr.rel (!%p10_p5) target bundleno = 2 (0x2), region = 76 }

// kernel: _siamese_forward.7
= control target key start
LH: loop header
LB: loop body
LE: loop exit
PB: predicated region body
PF: predicated region fallthrough
CT: control target
= control target key end

     0   :  { %s3850_s0 = inlined_call_operand.vmem [shape: bf16[1280,3584], index: 0, kind: input, shape index: {}]   ;;  %s3851_s1 = inlined_call_operand.vmem [shape: bf16[3584,256], index: 1, kind: input, shape index: {}]   ;;  %s3852_s2 = inlined_call_operand.vmem [shape: f32[1,256], index: 2, kind: input, shape index: {}]   ;;  %s3853_s3 = inlined_call_operand.vmem [shape: f32[1280,256], index: 3, kind: output, shape index: {}]  }
   0x1   :  { %3856 = sst [smem:[#allocation8_spill]] %s3850_s0 }
   0x2   :  { %3857 = sst [smem:[#allocation9_spill]] %s3851_s1 }
   0x3   :  { %3858 = sst [smem:[#allocation10_spill]] %s3853_s3 }
   0x4   :  { %s2955_s12 = smov 0   ;;  %s2957_s13 = smov 0  }
   0x5   :  { %s2959_s14 = smov 0   ;;  %s2961_s15 = smov 0  }
   0x6   :  { %s2963_s16 = smov 0   ;;  %s2965_s17 = smov 0  }
   0x7   :  { %s2967_s18 = smov 0   ;;  %s2969_s19 = smov 0  }
   0x8   :  { %s2971_s20 = smov 0   ;;  %s2973_s21 = smov 0  }
   0x9   :  { %s2975_s22 = smov 0   ;;  %s2977_s23 = smov 0  }
   0xa   :  { %s2979_s24 = smov 0  }
   0xb LB: > { %3859 = sst [smem:[#allocation5_spill]] %s2916_s20  ;;  %s25_s26 = sadd.s32 1, %s2920_s21  ;;  %s2932_s24 = sphi %s2979_s24, %s13_s24   ;;  %s2928_s23 = sphi %s2977_s23, %s3885_s23   ;;  %s2924_s22 = sphi %s2975_s22, %s3884_s22   ;;  %s2920_s21 = sphi %s2973_s21, %s3883_s21   ;;  %s2916_s20 = sphi %s2971_s20, %s3882_s20   ;;  %s2912_s19 = sphi %s2969_s19, %s3881_s19   ;;  %s2908_s18 = sphi %s2967_s18, %s3880_s18   ;;  %s2904_s17 = sphi %s2965_s17, %s3879_s17   ;;  %s2900_s16 = sphi %s2963_s16, %s3878_s16   ;;  %s2896_s15 = sphi %s2961_s15, %s3877_s15   ;;  %s2892_s14 = sphi %s2959_s14, %s3876_s14   ;;  %s2888_s13 = sphi %s2957_s13, %s3875_s13   ;;  %s2884_s12 = sphi %s2955_s12, %s3874_s12  }
   0xc   : > { %p26_p0 = scmp.ge.s32.totalorder %s25_s26, 7  ;;  %s28_s27 = sadd.s32 1, %s2924_s22 }
   0xd   : > { %s32_s28 = sadd.s32 1, %s2928_s23  ;;  %s41_s29 = sadd.s32 1, %s2904_s17 }
   0xe   : > { %s3887_s26 = smov (%p26_p0, %s25_s26), 0  ;;  %s3889_s27 = smov (!%p26_p0, %s28_s27), %s2924_s22 }
   0xf   : > { %3860 = sst [smem:[#allocation6_spill]] %s3887_s26  ;;  %s37_s30 = ssub.s32 %s2920_s21, %s3887_s26 }
  0x10   : > { %p48_p1 = scmp.ne.s32.totalorder %s2904_s17, %s2900_s16  ;;  %p30_p2 = scmp.ge.s32.totalorder %s3889_s27, 2 }
  0x11   : > { %p49_p3 = scmp.eq.s32.totalorder %s2932_s24, 0  ;;  %s69_s4 = sadd.s32 1, %s2896_s15 }
  0x12   : > { %p76_p4 = scmp.ne.s32.totalorder %s2896_s15, %s2892_s14  ;;  %s3891_s27 = smov (%p30_p2, %s3889_s27), 0 }
  0x13   : > { %3861 = sst [smem:[#allocation7_spill]] %s3891_s27  ;;  %s3893_s28 = smov (!%p30_p2, %s32_s28), %s2928_s23 }
  0x14   : > { %p3039_p5 = por %p49_p3, %p48_p1  ;;  %s65_s6 = ssub.s32 %s2924_s22, %s3891_s27 }
  0x15   : > { %p34_p6 = scmp.ge.s32.totalorder %s3893_s28, 5  ;;  %s66_s7 = sor.u32 %s65_s6, %s37_s30 }
  0x16   : > { %p67_p7 = scmp.eq.s32.totalorder %s66_s7, 0  ;;  %p3045_p8 = por %p76_p4, %p49_p3 }
  0x17   : > { %s3895_s28 = smov (%p34_p6, %s3893_s28), 0  ;;  %s123_s11 = sadd.s32 1, %s2888_s13 }
  0x18   : > { %s3052_s9 = scalar_select %p67_p7, %s2896_s15, %s69_s4  }
  0x19   : > { %s36_s10 = ssub.s32 %s2928_s23, %s3895_s28  ;;  %p133_p11 = scmp.ne.s32.totalorder %s2888_s13, %s2884_s12 }
  0x1a   : > { %s38_s25 = sor.u32 %s37_s30, %s36_s10  ;;  %s120_s26 = sor.u32 %s65_s6, %s36_s10 }
  0x1b   : > { %p39_p9 = scmp.eq.s32.totalorder %s38_s25, 0  ;;  %p121_p10 = scmp.eq.s32.totalorder %s120_s26, 0 }
  0x1c   : > { %s3864_s27 = sadd.s32 4294967295, %s2932_s24   ;;  %p2219_p0 = scmp.ge.s32.totalorder %s2932_s24, 70 }
  0x1d   : > { %p134_p12 = scmp.eq.s32.totalorder %s3864_s27, 69 }
  0x1e   : > { %s3062_s3 = scalar_select %p39_p9, %s2904_s17, %s41_s29  }
  0x1f   : > { %s3065_s7 = scalar_select %p121_p10, %s2888_s13, %s123_s11  }
  0x20   : > { %p3067_p13 = por %p134_p12, %p133_p11  ;;  %156 = sbr.rel (%p2219_p0) target bundleno = 185 (0xb9), region = 16 }
  0x25   : > { %159 = sbr.rel (!%p3039_p5) target bundleno = 111 (0x6f), region = 20  ;;  %s161_s25 = sand.u32 (%p3039_p5), 1, %s2904_s17  }
  0x26   : > { %s2222_s26 = sshll.u32 (%p3039_p5), %s2920_s21, 2  ;;  %s2220_s27 = sshll.u32 (%p3039_p5), %s161_s25, 9 }
  0x27   : > { %s2723_s29 = smul.u32 (%p3039_p5), 896, %s2928_s23  ;;  %s3866_s0 = sld [smem:[#allocation8_spill]] (%p3039_p5) }
  0x28   : > { %s3085_s5 = scalar_lea.vmem (%p3039_p5), [#allocation2], %s2220_s27 }
  0x29   : > { %s167_s30 = sadd.s32 (%p3039_p5), %s2723_s29, %s2222_s26 }
  0x2a   : > { %s2224_s4 = sshll.u32 %s167_s30, 2 }
  0x2d   : > { %s3080_s11 = scalar_lea.vmem %s3866_s0, %s2224_s4 }
  0x2e   : > { %v182_v0 = vld [vmem:[%s3080_s11] sm:$0xff]  ;;  %v184_v1 = vld [vmem:[%s3080_s11 + $0x8] sm:$0xff]  ;;  %v186_v2 = vld [vmem:[%s3080_s11 + $0x70] sm:$0xff] }
  0x2f   : > { %183 = vst [vmem:[%s3085_s5] sm:$0xff] %v182_v0  ;;  %v188_v3 = vld [vmem:[%s3080_s11 + $0x78] sm:$0xff]  ;;  %v190_v4 = vld [vmem:[%s3080_s11 + $0xe0] sm:$0xff]  ;;  %v192_v5 = vld [vmem:[%s3080_s11 + $0xe8] sm:$0xff] }
  0x30   : > { %185 = vst [vmem:[%s3085_s5 + $0x8] sm:$0xff] %v184_v1  ;;  %v194_v6 = vld [vmem:[%s3080_s11 + $0x150] sm:$0xff]  ;;  %v196_v7 = vld [vmem:[%s3080_s11 + $0x158] sm:$0xff]  ;;  %v198_v8 = vld [vmem:[%s3080_s11 + $0x1c0] sm:$0xff] }
  0x31   : > { %187 = vst [vmem:[%s3085_s5 + $0x10] sm:$0xff] %v186_v2  ;;  %v200_v9 = vld [vmem:[%s3080_s11 + $0x1c8] sm:$0xff]  ;;  %v202_v10 = vld [vmem:[%s3080_s11 + $0x230] sm:$0xff]  ;;  %v204_v11 = vld [vmem:[%s3080_s11 + $0x238] sm:$0xff] }
  0x32   : > { %189 = vst [vmem:[%s3085_s5 + $0x18] sm:$0xff] %v188_v3  ;;  %v206_v12 = vld [vmem:[%s3080_s11 + $0x2a0] sm:$0xff]  ;;  %v208_v13 = vld [vmem:[%s3080_s11 + $0x2a8] sm:$0xff]  ;;  %v210_v14 = vld [vmem:[%s3080_s11 + $0x310] sm:$0xff] }
  0x33   : > { %191 = vst [vmem:[%s3085_s5 + $0x20] sm:$0xff] %v190_v4  ;;  %v212_v15 = vld [vmem:[%s3080_s11 + $0x318] sm:$0xff]  ;;  %v214_v16 = vld [vmem:[%s3080_s11 + $0x380] sm:$0xff]  ;;  %v216_v17 = vld [vmem:[%s3080_s11 + $0x388] sm:$0xff] }
  0x34   : > { %193 = vst [vmem:[%s3085_s5 + $0x28] sm:$0xff] %v192_v5  ;;  %v218_v18 = vld [vmem:[%s3080_s11 + $0x3f0] sm:$0xff]  ;;  %v220_v19 = vld [vmem:[%s3080_s11 + $0x3f8] sm:$0xff]  ;;  %v222_v20 = vld [vmem:[%s3080_s11 + $0x460] sm:$0xff] }
  0x35   : > { %195 = vst [vmem:[%s3085_s5 + $0x30] sm:$0xff] %v194_v6  ;;  %v224_v21 = vld [vmem:[%s3080_s11 + $0x468] sm:$0xff]  ;;  %v226_v22 = vld [vmem:[%s3080_s11 + $0x4d0] sm:$0xff]  ;;  %v228_v23 = vld [vmem:[%s3080_s11 + $0x4d8] sm:$0xff] }
  0x36   : > { %197 = vst [vmem:[%s3085_s5 + $0x38] sm:$0xff] %v196_v7  ;;  %v230_v24 = vld [vmem:[%s3080_s11 + $0x540] sm:$0xff]  ;;  %v232_v25 = vld [vmem:[%s3080_s11 + $0x548] sm:$0xff]  ;;  %v234_v26 = vld [vmem:[%s3080_s11 + $0x5b0] sm:$0xff] }
  0x37   : > { %199 = vst [vmem:[%s3085_s5 + $0x40] sm:$0xff] %v198_v8  ;;  %v236_v27 = vld [vmem:[%s3080_s11 + $0x5b8] sm:$0xff]  ;;  %v238_v28 = vld [vmem:[%s3080_s11 + $0x620] sm:$0xff]  ;;  %v240_v29 = vld [vmem:[%s3080_s11 + $0x628] sm:$0xff] }
  0x38   : > { %201 = vst [vmem:[%s3085_s5 + $0x48] sm:$0xff] %v200_v9  ;;  %v242_v30 = vld [vmem:[%s3080_s11 + $0x690] sm:$0xff]  ;;  %v244_v31 = vld [vmem:[%s3080_s11 + $0x698] sm:$0xff]  ;;  %v246_v32 = vld [vmem:[%s3080_s11 + $0x700] sm:$0xff] }
  0x39   : > { %203 = vst [vmem:[%s3085_s5 + $0x50] sm:$0xff] %v202_v10  ;;  %v248_v33 = vld [vmem:[%s3080_s11 + $0x708] sm:$0xff]  ;;  %v250_v34 = vld [vmem:[%s3080_s11 + $0x770] sm:$0xff]  ;;  %v252_v35 = vld [vmem:[%s3080_s11 + $0x778] sm:$0xff] }
  0x3a   : > { %205 = vst [vmem:[%s3085_s5 + $0x58] sm:$0xff] %v204_v11  ;;  %v254_v36 = vld [vmem:[%s3080_s11 + $0x7e0] sm:$0xff]  ;;  %v256_v37 = vld [vmem:[%s3080_s11 + $0x7e8] sm:$0xff]  ;;  %v258_v38 = vld [vmem:[%s3080_s11 + $0x850] sm:$0xff] }
  0x3b   : > { %207 = vst [vmem:[%s3085_s5 + $0x60] sm:$0xff] %v206_v12  ;;  %v260_v39 = vld [vmem:[%s3080_s11 + $0x858] sm:$0xff]  ;;  %v262_v40 = vld [vmem:[%s3080_s11 + $0x8c0] sm:$0xff]  ;;  %v264_v41 = vld [vmem:[%s3080_s11 + $0x8c8] sm:$0xff] }
  0x3c   : > { %209 = vst [vmem:[%s3085_s5 + $0x68] sm:$0xff] %v208_v13  ;;  %v266_v42 = vld [vmem:[%s3080_s11 + $0x930] sm:$0xff]  ;;  %v268_v43 = vld [vmem:[%s3080_s11 + $0x938] sm:$0xff]  ;;  %v270_v44 = vld [vmem:[%s3080_s11 + $0x9a0] sm:$0xff] }
  0x3d   : > { %211 = vst [vmem:[%s3085_s5 + $0x70] sm:$0xff] %v210_v14  ;;  %v272_v45 = vld [vmem:[%s3080_s11 + $0x9a8] sm:$0xff]  ;;  %v274_v46 = vld [vmem:[%s3080_s11 + $0xa10] sm:$0xff]  ;;  %v276_v47 = vld [vmem:[%s3080_s11 + $0xa18] sm:$0xff] }
  0x3e   : > { %213 = vst [vmem:[%s3085_s5 + $0x78] sm:$0xff] %v212_v15  ;;  %v278_v48 = vld [vmem:[%s3080_s11 + $0xa80] sm:$0xff]  ;;  %v280_v49 = vld [vmem:[%s3080_s11 + $0xa88] sm:$0xff]  ;;  %v282_v50 = vld [vmem:[%s3080_s11 + $0xaf0] sm:$0xff] }
  0x3f   : > { %215 = vst [vmem:[%s3085_s5 + $0x80] sm:$0xff] %v214_v16  ;;  %v284_v51 = vld [vmem:[%s3080_s11 + $0xaf8] sm:$0xff]  ;;  %v286_v52 = vld [vmem:[%s3080_s11 + $0xb60] sm:$0xff]  ;;  %v288_v53 = vld [vmem:[%s3080_s11 + $0xb68] sm:$0xff] }
  0x40   : > { %217 = vst [vmem:[%s3085_s5 + $0x88] sm:$0xff] %v216_v17  ;;  %v290_v54 = vld [vmem:[%s3080_s11 + $0xbd0] sm:$0xff]  ;;  %v292_v55 = vld [vmem:[%s3080_s11 + $0xbd8] sm:$0xff]  ;;  %v294_v56 = vld [vmem:[%s3080_s11 + $0xc40] sm:$0xff] }
  0x41   : > { %219 = vst [vmem:[%s3085_s5 + $0x90] sm:$0xff] %v218_v18  ;;  %v296_v57 = vld [vmem:[%s3080_s11 + $0xc48] sm:$0xff]  ;;  %v298_v58 = vld [vmem:[%s3080_s11 + $0xcb0] sm:$0xff]  ;;  %v300_v59 = vld [vmem:[%s3080_s11 + $0xcb8] sm:$0xff] }
  0x42   : > { %221 = vst [vmem:[%s3085_s5 + $0x98] sm:$0xff] %v220_v19  ;;  %v302_v60 = vld [vmem:[%s3080_s11 + $0xd20] sm:$0xff]  ;;  %v304_v61 = vld [vmem:[%s3080_s11 + $0xd28] sm:$0xff]  ;;  %v306_v62 = vld [vmem:[%s3080_s11 + $0xd90] sm:$0xff] }
  0x43   : > { %223 = vst [vmem:[%s3085_s5 + $0xa0] sm:$0xff] %v222_v20  ;;  %v308_v63 = vld [vmem:[%s3080_s11 + $0xd98] sm:$0xff] }
  0x44   : > { %225 = vst [vmem:[%s3085_s5 + $0xa8] sm:$0xff] %v224_v21 }
  0x45   : > { %227 = vst [vmem:[%s3085_s5 + $0xb0] sm:$0xff] %v226_v22 }
  0x46   : > { %229 = vst [vmem:[%s3085_s5 + $0xb8] sm:$0xff] %v228_v23 }
  0x47   : > { %231 = vst [vmem:[%s3085_s5 + $0xc0] sm:$0xff] %v230_v24 }
  0x48   : > { %233 = vst [vmem:[%s3085_s5 + $0xc8] sm:$0xff] %v232_v25 }
  0x49   : > { %235 = vst [vmem:[%s3085_s5 + $0xd0] sm:$0xff] %v234_v26 }
  0x4a   : > { %237 = vst [vmem:[%s3085_s5 + $0xd8] sm:$0xff] %v236_v27 }
  0x4b   : > { %239 = vst [vmem:[%s3085_s5 + $0xe0] sm:$0xff] %v238_v28 }
  0x4c   : > { %241 = vst [vmem:[%s3085_s5 + $0xe8] sm:$0xff] %v240_v29 }
  0x4d   : > { %243 = vst [vmem:[%s3085_s5 + $0xf0] sm:$0xff] %v242_v30 }
  0x4e   : > { %245 = vst [vmem:[%s3085_s5 + $0xf8] sm:$0xff] %v244_v31 }
  0x4f   : > { %247 = vst [vmem:[%s3085_s5 + $0x100] sm:$0xff] %v246_v32 }
  0x50   : > { %249 = vst [vmem:[%s3085_s5 + $0x108] sm:$0xff] %v248_v33 }
  0x51   : > { %251 = vst [vmem:[%s3085_s5 + $0x110] sm:$0xff] %v250_v34 }
  0x52   : > { %253 = vst [vmem:[%s3085_s5 + $0x118] sm:$0xff] %v252_v35 }
  0x53   : > { %255 = vst [vmem:[%s3085_s5 + $0x120] sm:$0xff] %v254_v36 }
  0x54   : > { %257 = vst [vmem:[%s3085_s5 + $0x128] sm:$0xff] %v256_v37 }
  0x55   : > { %259 = vst [vmem:[%s3085_s5 + $0x130] sm:$0xff] %v258_v38 }
  0x56   : > { %261 = vst [vmem:[%s3085_s5 + $0x138] sm:$0xff] %v260_v39 }
  0x57   : > { %263 = vst [vmem:[%s3085_s5 + $0x140] sm:$0xff] %v262_v40 }
  0x58   : > { %265 = vst [vmem:[%s3085_s5 + $0x148] sm:$0xff] %v264_v41 }
  0x59   : > { %267 = vst [vmem:[%s3085_s5 + $0x150] sm:$0xff] %v266_v42 }
  0x5a   : > { %269 = vst [vmem:[%s3085_s5 + $0x158] sm:$0xff] %v268_v43 }
  0x5b   : > { %271 = vst [vmem:[%s3085_s5 + $0x160] sm:$0xff] %v270_v44 }
  0x5c   : > { %273 = vst [vmem:[%s3085_s5 + $0x168] sm:$0xff] %v272_v45 }
  0x5d   : > { %275 = vst [vmem:[%s3085_s5 + $0x170] sm:$0xff] %v274_v46 }
  0x5e   : > { %277 = vst [vmem:[%s3085_s5 + $0x178] sm:$0xff] %v276_v47 }
  0x5f   : > { %279 = vst [vmem:[%s3085_s5 + $0x180] sm:$0xff] %v278_v48 }
  0x60   : > { %281 = vst [vmem:[%s3085_s5 + $0x188] sm:$0xff] %v280_v49 }
  0x61   : > { %283 = vst [vmem:[%s3085_s5 + $0x190] sm:$0xff] %v282_v50 }
  0x62   : > { %285 = vst [vmem:[%s3085_s5 + $0x198] sm:$0xff] %v284_v51 }
  0x63   : > { %287 = vst [vmem:[%s3085_s5 + $0x1a0] sm:$0xff] %v286_v52 }
  0x64   : > { %289 = vst [vmem:[%s3085_s5 + $0x1a8] sm:$0xff] %v288_v53 }
  0x65   : > { %291 = vst [vmem:[%s3085_s5 + $0x1b0] sm:$0xff] %v290_v54 }
  0x66   : > { %293 = vst [vmem:[%s3085_s5 + $0x1b8] sm:$0xff] %v292_v55 }
  0x67   : > { %295 = vst [vmem:[%s3085_s5 + $0x1c0] sm:$0xff] %v294_v56 }
  0x68   : > { %297 = vst [vmem:[%s3085_s5 + $0x1c8] sm:$0xff] %v296_v57 }
  0x69   : > { %299 = vst [vmem:[%s3085_s5 + $0x1d0] sm:$0xff] %v298_v58 }
  0x6a   : > { %301 = vst [vmem:[%s3085_s5 + $0x1d8] sm:$0xff] %v300_v59 }
  0x6b   : > { %303 = vst [vmem:[%s3085_s5 + $0x1e0] sm:$0xff] %v302_v60 }
  0x6c   : > { %305 = vst [vmem:[%s3085_s5 + $0x1e8] sm:$0xff] %v304_v61 }
  0x6d   : > { %307 = vst [vmem:[%s3085_s5 + $0x1f0] sm:$0xff] %v306_v62 }
  0x6e   : > { %309 = vst [vmem:[%s3085_s5 + $0x1f8] sm:$0xff] %v308_v63 }
  0x6f PF: > { %315 = sbr.rel (!%p3045_p8) target bundleno = 185 (0xb9), region = 43  ;;  %s317_s25 = sand.u32 (%p3045_p8), 1, %s2896_s15  }
  0x70   : > { %s2625_s26 = sshll.u32 (%p3045_p8), %s2920_s21, 7  ;;  %s2225_s27 = sshll.u32 (%p3045_p8), %s317_s25, 8 }
  0x71   : > { %s322_s29 = sadd.s32 (%p3045_p8), %s2924_s22, %s2625_s26  ;;  %s3867_s1 = sld [smem:[#allocation9_spill]] (%p3045_p8) }
  0x72   : > { %s2228_s30 = sshll.u32 (%p3045_p8), %s322_s29, 2  ;;  %s3225_s8 = scalar_lea.vmem (%p3045_p8), [#allocation3], %s2225_s27 }
  0x77   : > { %s3220_s10 = scalar_lea.vmem %s3867_s1, %s2228_s30 }
  0x78   : > { %v341_v0 = vld [vmem:[%s3220_s10] sm:$0xf]  ;;  %v343_v1 = vld [vmem:[%s3220_s10 + $0x8] sm:$0xf]  ;;  %v345_v2 = vld [vmem:[%s3220_s10 + $0x10] sm:$0xf] }
  0x79   : > { %342 = vst [vmem:[%s3225_s8] sm:$0xf] %v341_v0  ;;  %v347_v3 = vld [vmem:[%s3220_s10 + $0x18] sm:$0xf]  ;;  %v349_v4 = vld [vmem:[%s3220_s10 + $0x20] sm:$0xf] }
  0x7a   : > { %344 = vst [vmem:[%s3225_s8 + $0x4] sm:$0xf] %v343_v1  ;;  %v351_v5 = vld [vmem:[%s3220_s10 + $0x28] sm:$0xf]  ;;  %v353_v6 = vld [vmem:[%s3220_s10 + $0x30] sm:$0xf] }
  0x7b   : > { %346 = vst [vmem:[%s3225_s8 + $0x8] sm:$0xf] %v345_v2  ;;  %v355_v7 = vld [vmem:[%s3220_s10 + $0x38] sm:$0xf]  ;;  %v357_v8 = vld [vmem:[%s3220_s10 + $0x40] sm:$0xf] }
  0x7c   : > { %348 = vst [vmem:[%s3225_s8 + $0xc] sm:$0xf] %v347_v3  ;;  %v359_v9 = vld [vmem:[%s3220_s10 + $0x48] sm:$0xf]  ;;  %v361_v10 = vld [vmem:[%s3220_s10 + $0x50] sm:$0xf] }
  0x7d   : > { %350 = vst [vmem:[%s3225_s8 + $0x10] sm:$0xf] %v349_v4  ;;  %v363_v11 = vld [vmem:[%s3220_s10 + $0x58] sm:$0xf]  ;;  %v365_v12 = vld [vmem:[%s3220_s10 + $0x60] sm:$0xf] }
  0x7e   : > { %352 = vst [vmem:[%s3225_s8 + $0x14] sm:$0xf] %v351_v5  ;;  %v367_v13 = vld [vmem:[%s3220_s10 + $0x68] sm:$0xf]  ;;  %v369_v14 = vld [vmem:[%s3220_s10 + $0x70] sm:$0xf] }
  0x7f   : > { %354 = vst [vmem:[%s3225_s8 + $0x18] sm:$0xf] %v353_v6  ;;  %v371_v15 = vld [vmem:[%s3220_s10 + $0x78] sm:$0xf]  ;;  %v373_v16 = vld [vmem:[%s3220_s10 + $0x80] sm:$0xf] }
  0x80   : > { %356 = vst [vmem:[%s3225_s8 + $0x1c] sm:$0xf] %v355_v7  ;;  %v375_v17 = vld [vmem:[%s3220_s10 + $0x88] sm:$0xf]  ;;  %v377_v18 = vld [vmem:[%s3220_s10 + $0x90] sm:$0xf] }
  0x81   : > { %358 = vst [vmem:[%s3225_s8 + $0x20] sm:$0xf] %v357_v8  ;;  %v379_v19 = vld [vmem:[%s3220_s10 + $0x98] sm:$0xf]  ;;  %v381_v20 = vld [vmem:[%s3220_s10 + $0xa0] sm:$0xf] }
  0x82   : > { %360 = vst [vmem:[%s3225_s8 + $0x24] sm:$0xf] %v359_v9  ;;  %v383_v21 = vld [vmem:[%s3220_s10 + $0xa8] sm:$0xf]  ;;  %v385_v22 = vld [vmem:[%s3220_s10 + $0xb0] sm:$0xf] }
  0x83   : > { %362 = vst [vmem:[%s3225_s8 + $0x28] sm:$0xf] %v361_v10  ;;  %v387_v23 = vld [vmem:[%s3220_s10 + $0xb8] sm:$0xf]  ;;  %v389_v24 = vld [vmem:[%s3220_s10 + $0xc0] sm:$0xf] }
  0x84   : > { %364 = vst [vmem:[%s3225_s8 + $0x2c] sm:$0xf] %v363_v11  ;;  %v391_v25 = vld [vmem:[%s3220_s10 + $0xc8] sm:$0xf]  ;;  %v393_v26 = vld [vmem:[%s3220_s10 + $0xd0] sm:$0xf] }
  0x85   : > { %366 = vst [vmem:[%s3225_s8 + $0x30] sm:$0xf] %v365_v12  ;;  %v395_v27 = vld [vmem:[%s3220_s10 + $0xd8] sm:$0xf]  ;;  %v397_v28 = vld [vmem:[%s3220_s10 + $0xe0] sm:$0xf] }
  0x86   : > { %368 = vst [vmem:[%s3225_s8 + $0x34] sm:$0xf] %v367_v13  ;;  %v399_v29 = vld [vmem:[%s3220_s10 + $0xe8] sm:$0xf]  ;;  %v401_v30 = vld [vmem:[%s3220_s10 + $0xf0] sm:$0xf] }
  0x87   : > { %370 = vst [vmem:[%s3225_s8 + $0x38] sm:$0xf] %v369_v14  ;;  %v403_v31 = vld [vmem:[%s3220_s10 + $0xf8] sm:$0xf]  ;;  %v405_v32 = vld [vmem:[%s3220_s10 + $0x100] sm:$0xf] }
  0x88   : > { %372 = vst [vmem:[%s3225_s8 + $0x3c] sm:$0xf] %v371_v15  ;;  %v407_v33 = vld [vmem:[%s3220_s10 + $0x108] sm:$0xf]  ;;  %v409_v34 = vld [vmem:[%s3220_s10 + $0x110] sm:$0xf] }
  0x89   : > { %374 = vst [vmem:[%s3225_s8 + $0x40] sm:$0xf] %v373_v16  ;;  %v411_v35 = vld [vmem:[%s3220_s10 + $0x118] sm:$0xf]  ;;  %v413_v36 = vld [vmem:[%s3220_s10 + $0x120] sm:$0xf] }
  0x8a   : > { %376 = vst [vmem:[%s3225_s8 + $0x44] sm:$0xf] %v375_v17  ;;  %v415_v37 = vld [vmem:[%s3220_s10 + $0x128] sm:$0xf]  ;;  %v417_v38 = vld [vmem:[%s3220_s10 + $0x130] sm:$0xf] }
  0x8b   : > { %378 = vst [vmem:[%s3225_s8 + $0x48] sm:$0xf] %v377_v18  ;;  %v419_v39 = vld [vmem:[%s3220_s10 + $0x138] sm:$0xf]  ;;  %v421_v40 = vld [vmem:[%s3220_s10 + $0x140] sm:$0xf] }
  0x8c   : > { %380 = vst [vmem:[%s3225_s8 + $0x4c] sm:$0xf] %v379_v19  ;;  %v423_v41 = vld [vmem:[%s3220_s10 + $0x148] sm:$0xf]  ;;  %v425_v42 = vld [vmem:[%s3220_s10 + $0x150] sm:$0xf] }
  0x8d   : > { %382 = vst [vmem:[%s3225_s8 + $0x50] sm:$0xf] %v381_v20  ;;  %v427_v43 = vld [vmem:[%s3220_s10 + $0x158] sm:$0xf]  ;;  %v429_v44 = vld [vmem:[%s3220_s10 + $0x160] sm:$0xf] }
  0x8e   : > { %384 = vst [vmem:[%s3225_s8 + $0x54] sm:$0xf] %v383_v21  ;;  %v431_v45 = vld [vmem:[%s3220_s10 + $0x168] sm:$0xf]  ;;  %v433_v46 = vld [vmem:[%s3220_s10 + $0x170] sm:$0xf] }
  0x8f   : > { %386 = vst [vmem:[%s3225_s8 + $0x58] sm:$0xf] %v385_v22  ;;  %v435_v47 = vld [vmem:[%s3220_s10 + $0x178] sm:$0xf]  ;;  %v437_v48 = vld [vmem:[%s3220_s10 + $0x180] sm:$0xf] }
  0x90   : > { %388 = vst [vmem:[%s3225_s8 + $0x5c] sm:$0xf] %v387_v23  ;;  %v439_v49 = vld [vmem:[%s3220_s10 + $0x188] sm:$0xf]  ;;  %v441_v50 = vld [vmem:[%s3220_s10 + $0x190] sm:$0xf] }
  0x91   : > { %390 = vst [vmem:[%s3225_s8 + $0x60] sm:$0xf] %v389_v24  ;;  %v443_v51 = vld [vmem:[%s3220_s10 + $0x198] sm:$0xf]  ;;  %v445_v52 = vld [vmem:[%s3220_s10 + $0x1a0] sm:$0xf] }
  0x92   : > { %392 = vst [vmem:[%s3225_s8 + $0x64] sm:$0xf] %v391_v25  ;;  %v447_v53 = vld [vmem:[%s3220_s10 + $0x1a8] sm:$0xf]  ;;  %v449_v54 = vld [vmem:[%s3220_s10 + $0x1b0] sm:$0xf] }
  0x93   : > { %394 = vst [vmem:[%s3225_s8 + $0x68] sm:$0xf] %v393_v26  ;;  %v451_v55 = vld [vmem:[%s3220_s10 + $0x1b8] sm:$0xf]  ;;  %v453_v56 = vld [vmem:[%s3220_s10 + $0x1c0] sm:$0xf] }
  0x94   : > { %396 = vst [vmem:[%s3225_s8 + $0x6c] sm:$0xf] %v395_v27  ;;  %v455_v57 = vld [vmem:[%s3220_s10 + $0x1c8] sm:$0xf]  ;;  %v457_v58 = vld [vmem:[%s3220_s10 + $0x1d0] sm:$0xf] }
  0x95   : > { %398 = vst [vmem:[%s3225_s8 + $0x70] sm:$0xf] %v397_v28  ;;  %v459_v59 = vld [vmem:[%s3220_s10 + $0x1d8] sm:$0xf]  ;;  %v461_v60 = vld [vmem:[%s3220_s10 + $0x1e0] sm:$0xf] }
  0x96   : > { %400 = vst [vmem:[%s3225_s8 + $0x74] sm:$0xf] %v399_v29  ;;  %v463_v61 = vld [vmem:[%s3220_s10 + $0x1e8] sm:$0xf]  ;;  %v465_v62 = vld [vmem:[%s3220_s10 + $0x1f0] sm:$0xf] }
  0x97   : > { %402 = vst [vmem:[%s3225_s8 + $0x78] sm:$0xf] %v401_v30  ;;  %v467_v63 = vld [vmem:[%s3220_s10 + $0x1f8] sm:$0xf] }
  0x98   : > { %404 = vst [vmem:[%s3225_s8 + $0x7c] sm:$0xf] %v403_v31 }
  0x99   : > { %406 = vst [vmem:[%s3225_s8 + $0x80] sm:$0xf] %v405_v32 }
  0x9a   : > { %408 = vst [vmem:[%s3225_s8 + $0x84] sm:$0xf] %v407_v33 }
  0x9b   : > { %410 = vst [vmem:[%s3225_s8 + $0x88] sm:$0xf] %v409_v34 }
  0x9c   : > { %412 = vst [vmem:[%s3225_s8 + $0x8c] sm:$0xf] %v411_v35 }
  0x9d   : > { %414 = vst [vmem:[%s3225_s8 + $0x90] sm:$0xf] %v413_v36 }
  0x9e   : > { %416 = vst [vmem:[%s3225_s8 + $0x94] sm:$0xf] %v415_v37 }
  0x9f   : > { %418 = vst [vmem:[%s3225_s8 + $0x98] sm:$0xf] %v417_v38 }
  0xa0   : > { %420 = vst [vmem:[%s3225_s8 + $0x9c] sm:$0xf] %v419_v39 }
  0xa1   : > { %422 = vst [vmem:[%s3225_s8 + $0xa0] sm:$0xf] %v421_v40 }
  0xa2   : > { %424 = vst [vmem:[%s3225_s8 + $0xa4] sm:$0xf] %v423_v41 }
  0xa3   : > { %426 = vst [vmem:[%s3225_s8 + $0xa8] sm:$0xf] %v425_v42 }
  0xa4   : > { %428 = vst [vmem:[%s3225_s8 + $0xac] sm:$0xf] %v427_v43 }
  0xa5   : > { %430 = vst [vmem:[%s3225_s8 + $0xb0] sm:$0xf] %v429_v44 }
  0xa6   : > { %432 = vst [vmem:[%s3225_s8 + $0xb4] sm:$0xf] %v431_v45 }
  0xa7   : > { %434 = vst [vmem:[%s3225_s8 + $0xb8] sm:$0xf] %v433_v46 }
  0xa8   : > { %436 = vst [vmem:[%s3225_s8 + $0xbc] sm:$0xf] %v435_v47 }
  0xa9   : > { %438 = vst [vmem:[%s3225_s8 + $0xc0] sm:$0xf] %v437_v48 }
  0xaa   : > { %440 = vst [vmem:[%s3225_s8 + $0xc4] sm:$0xf] %v439_v49 }
  0xab   : > { %442 = vst [vmem:[%s3225_s8 + $0xc8] sm:$0xf] %v441_v50 }
  0xac   : > { %444 = vst [vmem:[%s3225_s8 + $0xcc] sm:$0xf] %v443_v51 }
  0xad   : > { %446 = vst [vmem:[%s3225_s8 + $0xd0] sm:$0xf] %v445_v52 }
  0xae   : > { %448 = vst [vmem:[%s3225_s8 + $0xd4] sm:$0xf] %v447_v53 }
  0xaf   : > { %450 = vst [vmem:[%s3225_s8 + $0xd8] sm:$0xf] %v449_v54 }
  0xb0   : > { %452 = vst [vmem:[%s3225_s8 + $0xdc] sm:$0xf] %v451_v55 }
  0xb1   : > { %454 = vst [vmem:[%s3225_s8 + $0xe0] sm:$0xf] %v453_v56 }
  0xb2   : > { %456 = vst [vmem:[%s3225_s8 + $0xe4] sm:$0xf] %v455_v57 }
  0xb3   : > { %458 = vst [vmem:[%s3225_s8 + $0xe8] sm:$0xf] %v457_v58 }
  0xb4   : > { %460 = vst [vmem:[%s3225_s8 + $0xec] sm:$0xf] %v459_v59 }
  0xb5   : > { %462 = vst [vmem:[%s3225_s8 + $0xf0] sm:$0xf] %v461_v60 }
  0xb6   : > { %464 = vst [vmem:[%s3225_s8 + $0xf4] sm:$0xf] %v463_v61 }
  0xb7   : > { %466 = vst [vmem:[%s3225_s8 + $0xf8] sm:$0xf] %v465_v62 }
  0xb8   : > { %468 = vst [vmem:[%s3225_s8 + $0xfc] sm:$0xf] %v467_v63 }
  0xb9 PF: > { %p2229_p1 = scmp.ge.s32.totalorder %s2932_s24, 1  ;;  %p625_p2 = scmp.lt.s32.totalorder %s2932_s24, 71 }
  0xbb   : > { %p626_p3 = pnand %p2229_p1, %p625_p2 }
  0xbc   : > { %s632_s11 = sand.u32 (!%p626_p3), 1, %s2900_s16   ;;  %s639_s5 = sand.u32 (!%p626_p3), 1, %s2892_s14  }
  0xbd   : > { %629 = sbr.rel (%p626_p3) target bundleno = 734 (0x2de), region = 88  ;;  %s2230_s25 = sshll.u32 (!%p626_p3), %s632_s11, 9 }
  0xbe   : > { %s2231_s26 = sshll.u32 (!%p626_p3), %s639_s5, 8  ;;  %s665_s27 = sand.u32 (!%p626_p3), 1, %s2884_s12  }
  0xbf   : > { %p671_p4 = scmp.lt.s32.totalorder (!%p626_p3), %s2912_s19, 1  ;;  %s2232_s29 = sshll.u32 (!%p626_p3), %s665_s27, 8 }
  0xc0   : > { %s3365_s8 = scalar_lea.vmem (!%p626_p3), [#allocation2], %s2230_s25  ;;  %s3367_s0 = scalar_lea.vmem (!%p626_p3), [#allocation3], %s2231_s26 }
  0xc1   : > { %s3369_s1 = scalar_lea.vmem (!%p626_p3), [#allocation4], %s2232_s29  ;;  %p2233_p5 = scmp.ne.s32.totalorder (!%p626_p3), %s2908_s18, 0 }
  0xc2   : > { %s3359_s30 = scalar_select %p671_p4, %s2912_s19, 1 }
  0xc3   : > { %678 = sbr.rel (%p2233_p5) target bundleno = 233 (0xe9), region = 100 }
  0xc4   : > { %s673_s10 = scalar_lea.vmem %s3852_s2, %s3359_s30 }
  0xc8   : > { %v2934_v0 = vmov 0.0  }
  0xc9   : > { %679 = vst [vmem:[%s3369_s1] sm:$0xff] %v2934_v0 }
  0xca   : > { %680 = vst [vmem:[%s3369_s1 + $0x8] sm:$0xff] %v2934_v0 }
  0xcb   : > { %681 = vst [vmem:[%s3369_s1 + $0x10] sm:$0xff] %v2934_v0 }
  0xcc   : > { %682 = vst [vmem:[%s3369_s1 + $0x18] sm:$0xff] %v2934_v0 }
  0xcd   : > { %683 = vst [vmem:[%s3369_s1 + $0x20] sm:$0xff] %v2934_v0 }
  0xce   : > { %684 = vst [vmem:[%s3369_s1 + $0x28] sm:$0xff] %v2934_v0 }
  0xcf   : > { %685 = vst [vmem:[%s3369_s1 + $0x30] sm:$0xff] %v2934_v0 }
  0xd0   : > { %686 = vst [vmem:[%s3369_s1 + $0x38] sm:$0xff] %v2934_v0 }
  0xd1   : > { %687 = vst [vmem:[%s3369_s1 + $0x40] sm:$0xff] %v2934_v0 }
  0xd2   : > { %688 = vst [vmem:[%s3369_s1 + $0x48] sm:$0xff] %v2934_v0 }
  0xd3   : > { %689 = vst [vmem:[%s3369_s1 + $0x50] sm:$0xff] %v2934_v0 }
  0xd4   : > { %690 = vst [vmem:[%s3369_s1 + $0x58] sm:$0xff] %v2934_v0 }
  0xd5   : > { %691 = vst [vmem:[%s3369_s1 + $0x60] sm:$0xff] %v2934_v0 }
  0xd6   : > { %692 = vst [vmem:[%s3369_s1 + $0x68] sm:$0xff] %v2934_v0 }
  0xd7   : > { %693 = vst [vmem:[%s3369_s1 + $0x70] sm:$0xff] %v2934_v0 }
  0xd8   : > { %694 = vst [vmem:[%s3369_s1 + $0x78] sm:$0xff] %v2934_v0 }
  0xd9   : > { %695 = vst [vmem:[%s3369_s1 + $0x80] sm:$0xff] %v2934_v0 }
  0xda   : > { %696 = vst [vmem:[%s3369_s1 + $0x88] sm:$0xff] %v2934_v0 }
  0xdb   : > { %697 = vst [vmem:[%s3369_s1 + $0x90] sm:$0xff] %v2934_v0 }
  0xdc   : > { %698 = vst [vmem:[%s3369_s1 + $0x98] sm:$0xff] %v2934_v0 }
  0xdd   : > { %699 = vst [vmem:[%s3369_s1 + $0xa0] sm:$0xff] %v2934_v0 }
  0xde   : > { %700 = vst [vmem:[%s3369_s1 + $0xa8] sm:$0xff] %v2934_v0 }
  0xdf   : > { %701 = vst [vmem:[%s3369_s1 + $0xb0] sm:$0xff] %v2934_v0 }
  0xe0   : > { %702 = vst [vmem:[%s3369_s1 + $0xb8] sm:$0xff] %v2934_v0 }
  0xe1   : > { %703 = vst [vmem:[%s3369_s1 + $0xc0] sm:$0xff] %v2934_v0 }
  0xe2   : > { %704 = vst [vmem:[%s3369_s1 + $0xc8] sm:$0xff] %v2934_v0 }
  0xe3   : > { %705 = vst [vmem:[%s3369_s1 + $0xd0] sm:$0xff] %v2934_v0 }
  0xe4   : > { %706 = vst [vmem:[%s3369_s1 + $0xd8] sm:$0xff] %v2934_v0 }
  0xe5   : > { %707 = vst [vmem:[%s3369_s1 + $0xe0] sm:$0xff] %v2934_v0 }
  0xe6   : > { %708 = vst [vmem:[%s3369_s1 + $0xe8] sm:$0xff] %v2934_v0 }
  0xe7   : > { %709 = vst [vmem:[%s3369_s1 + $0xf0] sm:$0xff] %v2934_v0 }
  0xe8   : > { %710 = vst [vmem:[%s3369_s1 + $0xf8] sm:$0xff] %v2934_v0 }
  0xe9 PF: > { %v2697_v1 = vld [vmem:[%s3367_s0 + $0x38] sm:$0xff]  ;;  %v2696_v5 = vld [vmem:[%s3367_s0 + $0x30] sm:$0xff]  ;;  %v2695_v9 = vld [vmem:[%s3367_s0 + $0x28] sm:$0xff]  ;;  %p2618_p6 = scmp.ne.s32.totalorder %s2908_s18, 6 }
  0xea   : > { %v2705_v2 = vld [vmem:[%s3367_s0 + $0x78] sm:$0xff]  ;;  %1383 = vmatpush.bf16.msra.mxu0 %v2697_v1  ;;  %v2704_v6 = vld [vmem:[%s3367_s0 + $0x70] sm:$0xff]  ;;  %v2703_v10 = vld [vmem:[%s3367_s0 + $0x68] sm:$0xff] }
  0xeb   : > { %v2713_v3 = vld [vmem:[%s3367_s0 + $0xb8] sm:$0xff]  ;;  %1472 = vmatpush.bf16.msra.mxu1 %v2705_v2  ;;  %v2712_v7 = vld [vmem:[%s3367_s0 + $0xb0] sm:$0xff]  ;;  %v2711_v11 = vld [vmem:[%s3367_s0 + $0xa8] sm:$0xff] }
  0xec   : > { %v2721_v4 = vld [vmem:[%s3367_s0 + $0xf8] sm:$0xff]  ;;  %1561 = vmatpush.bf16.msra.mxu2 %v2713_v3  ;;  %v2720_v8 = vld [vmem:[%s3367_s0 + $0xf0] sm:$0xff]  ;;  %v2719_v12 = vld [vmem:[%s3367_s0 + $0xe8] sm:$0xff] }
  0xed   : > { %1650 = vmatpush.bf16.msra.mxu3 %v2721_v4  ;;  %v2694_v13 = vld [vmem:[%s3367_s0 + $0x20] sm:$0xff]  ;;  %v2693_v17 = vld [vmem:[%s3367_s0 + $0x18] sm:$0xff]  ;;  %v2692_v21 = vld [vmem:[%s3367_s0 + $0x10] sm:$0xff] }
  0xee   : > { %1384 = vmatpush.bf16.msra.mxu0 %v2696_v5  ;;  %v2702_v14 = vld [vmem:[%s3367_s0 + $0x60] sm:$0xff]  ;;  %v2701_v18 = vld [vmem:[%s3367_s0 + $0x58] sm:$0xff]  ;;  %v2700_v22 = vld [vmem:[%s3367_s0 + $0x50] sm:$0xff] }
  0xef   : > { %1473 = vmatpush.bf16.msra.mxu1 %v2704_v6  ;;  %v2710_v15 = vld [vmem:[%s3367_s0 + $0xa0] sm:$0xff]  ;;  %v2709_v19 = vld [vmem:[%s3367_s0 + $0x98] sm:$0xff]  ;;  %v2708_v23 = vld [vmem:[%s3367_s0 + $0x90] sm:$0xff] }
  0xf0   : > { %1562 = vmatpush.bf16.msra.mxu2 %v2712_v7  ;;  %v2718_v16 = vld [vmem:[%s3367_s0 + $0xe0] sm:$0xff]  ;;  %v2717_v20 = vld [vmem:[%s3367_s0 + $0xd8] sm:$0xff]  ;;  %v2716_v24 = vld [vmem:[%s3367_s0 + $0xd0] sm:$0xff] }
  0xf1   : > { %1651 = vmatpush.bf16.msra.mxu3 %v2720_v8  ;;  %v2691_v25 = vld [vmem:[%s3367_s0 + $0x8] sm:$0xff]  ;;  %v2690_v29 = vld [vmem:[%s3367_s0] sm:$0xff]  ;;  %v2628_v34 = vld [vmem:[%s3365_s8 + $0xc] sm:$0xf0] }
  0xf2   : > { %1385 = vmatpush.bf16.msra.mxu0 %v2695_v9  ;;  %v2699_v26 = vld [vmem:[%s3367_s0 + $0x48] sm:$0xff]  ;;  %v2698_v30 = vld [vmem:[%s3367_s0 + $0x40] sm:$0xff]  ;;  %v2238_v36 = vld [vmem:[%s3365_s8 + $0x10] sm:$0xf0] }
  0xf3   : > { %1474 = vmatpush.bf16.msra.mxu1 %v2703_v10  ;;  %v2707_v27 = vld [vmem:[%s3367_s0 + $0x88] sm:$0xff]  ;;  %v2706_v31 = vld [vmem:[%s3367_s0 + $0x80] sm:$0xff]  ;;  %v2629_v38 = vld [vmem:[%s3365_s8 + $0x14] sm:$0xf0] }
  0xf4   : > { %1563 = vmatpush.bf16.msra.mxu2 %v2711_v11  ;;  %v2715_v28 = vld [vmem:[%s3367_s0 + $0xc8] sm:$0xff]  ;;  %v2714_v32 = vld [vmem:[%s3367_s0 + $0xc0] sm:$0xff]  ;;  %v2246_v40 = vld [vmem:[%s3365_s8 + $0x18] sm:$0xf0] }
  0xf5   : > { %1652 = vmatpush.bf16.msra.mxu3 %v2719_v12  ;;  %v2236_v33 = vld [vmem:[%s3365_s8] sm:$0xf]  ;;  %v2626_v35 = vld [vmem:[%s3365_s8 + $0x4] sm:$0xf]  ;;  %v2244_v37 = vld [vmem:[%s3365_s8 + $0x8] sm:$0xf] }
  0xf6   : > { %1386 = vmatpush.bf16.msra.mxu0 %v2694_v13  ;;  %v2627_v39 = vld [vmem:[%s3365_s8 + $0xc] sm:$0xf]  ;;  %v2237_v41 = vor.u32 %v2628_v34, %v2236_v33  ;;  %v2241_v42 = vor.u32 %v2626_v35, %v2238_v36  ;;  %v2245_v43 = vor.u32 %v2629_v38, %v2244_v37  ;;  %v2252_v45 = vld [vmem:[%s3365_s8 + $0x20] sm:$0xf]  ;;  %v2632_v46 = vld [vmem:[%s3365_s8 + $0x2c] sm:$0xf0] }
  0xf7   : > { %1475 = vmatpush.bf16.msra.mxu1 %v2702_v14  ;;  %v2249_v44 = vor.u32 %v2627_v39, %v2246_v40  ;;  %v2630_v47 = vld [vmem:[%s3365_s8 + $0x24] sm:$0xf]  ;;  %v2254_v48 = vld [vmem:[%s3365_s8 + $0x30] sm:$0xf0]  ;;  %v2260_v49 = vld [vmem:[%s3365_s8 + $0x28] sm:$0xf]  ;;  %v2253_v53 = vor.u32 %v2632_v46, %v2252_v45 }
  0xf8   : > { %1564 = vmatpush.bf16.msra.mxu2 %v2710_v15  ;;  %v2633_v50 = vld [vmem:[%s3365_s8 + $0x34] sm:$0xf0]  ;;  %v2631_v51 = vld [vmem:[%s3365_s8 + $0x2c] sm:$0xf]  ;;  %v2262_v52 = vld [vmem:[%s3365_s8 + $0x38] sm:$0xf0]  ;;  %v2257_v54 = vor.u32 %v2630_v47, %v2254_v48 }
  0xf9   : > { %1653 = vmatpush.bf16.msra.mxu3 %v2718_v16  ;;  %v2261_v55 = vor.u32 %v2633_v50, %v2260_v49  ;;  %v2265_v56 = vor.u32 %v2631_v51, %v2262_v52  ;;  %v2268_v57 = vld [vmem:[%s3365_s8 + $0x40] sm:$0xf]  ;;  %v2636_v58 = vld [vmem:[%s3365_s8 + $0x4c] sm:$0xf0]  ;;  %v2634_v59 = vld [vmem:[%s3365_s8 + $0x44] sm:$0xf] }
  0xfa   : > { %1387 = vmatpush.bf16.msra.mxu0 %v2693_v17  ;;  %v2270_v60 = vld [vmem:[%s3365_s8 + $0x50] sm:$0xf0]  ;;  %v2276_v61 = vld [vmem:[%s3365_s8 + $0x48] sm:$0xf]  ;;  %v2637_v62 = vld [vmem:[%s3365_s8 + $0x54] sm:$0xf0]  ;;  %v2269_v1 = vor.u32 %v2636_v58, %v2268_v57 }
  0xfb   : > { %1476 = vmatpush.bf16.msra.mxu1 %v2701_v18  ;;  %v2635_v63 = vld [vmem:[%s3365_s8 + $0x4c] sm:$0xf]  ;;  %v2278_v0 = vld [vmem:[%s3365_s8 + $0x58] sm:$0xf0]  ;;  %v2273_v2 = vor.u32 %v2634_v59, %v2270_v60  ;;  %v2277_v3 = vor.u32 %v2637_v62, %v2276_v61  ;;  %v2284_v5 = vld [vmem:[%s3365_s8 + $0x60] sm:$0xf] }
  0xfc   : > { %1565 = vmatpush.bf16.msra.mxu2 %v2709_v19  ;;  %v2281_v4 = vor.u32 %v2635_v63, %v2278_v0  ;;  %v2640_v6 = vld [vmem:[%s3365_s8 + $0x6c] sm:$0xf0]  ;;  %v2638_v7 = vld [vmem:[%s3365_s8 + $0x64] sm:$0xf]  ;;  %v2286_v8 = vld [vmem:[%s3365_s8 + $0x70] sm:$0xf0] }
  0xfd   : > { %1654 = vmatpush.bf16.msra.mxu3 %v2717_v20  ;;  %v2292_v9 = vld [vmem:[%s3365_s8 + $0x68] sm:$0xf]  ;;  %v2641_v10 = vld [vmem:[%s3365_s8 + $0x74] sm:$0xf0]  ;;  %v2639_v11 = vld [vmem:[%s3365_s8 + $0x6c] sm:$0xf]  ;;  %v2285_v13 = vor.u32 %v2640_v6, %v2284_v5  ;;  %v2289_v14 = vor.u32 %v2638_v7, %v2286_v8 }
  0xfe   : > { %1388 = vmatpush.bf16.msra.mxu0 %v2692_v21  ;;  %v2294_v12 = vld [vmem:[%s3365_s8 + $0x78] sm:$0xf0]  ;;  %v2293_v15 = vor.u32 %v2641_v10, %v2292_v9  ;;  %v2300_v17 = vld [vmem:[%s3365_s8 + $0x80] sm:$0xf]  ;;  %v2644_v18 = vld [vmem:[%s3365_s8 + $0x8c] sm:$0xf0] }
  0xff   : > { %1477 = vmatpush.bf16.msra.mxu1 %v2700_v22  ;;  %v2297_v16 = vor.u32 %v2639_v11, %v2294_v12  ;;  %v2642_v19 = vld [vmem:[%s3365_s8 + $0x84] sm:$0xf]  ;;  %v2302_v20 = vld [vmem:[%s3365_s8 + $0x90] sm:$0xf0]  ;;  %v2308_v21 = vld [vmem:[%s3365_s8 + $0x88] sm:$0xf] }
 0x100   : > { %1566 = vmatpush.bf16.msra.mxu2 %v2708_v23  ;;  %v2645_v22 = vld [vmem:[%s3365_s8 + $0x94] sm:$0xf0]  ;;  %v2643_v23 = vld [vmem:[%s3365_s8 + $0x8c] sm:$0xf]  ;;  %v2324_v33 = vld [vmem:[%s3365_s8 + $0xa8] sm:$0xf] }
 0x101   : > { %1655 = vmatpush.bf16.msra.mxu3 %v2716_v24  ;;  %v2310_v24 = vld [vmem:[%s3365_s8 + $0x98] sm:$0xf0]  ;;  %v2649_v34 = vld [vmem:[%s3365_s8 + $0xb4] sm:$0xf0]  ;;  %v2647_v35 = vld [vmem:[%s3365_s8 + $0xac] sm:$0xf] }
 0x102   : > { %1389 = vmatpush.bf16.msra.mxu0 %v2691_v25  ;;  %v2301_v25 = vor.u32 %v2644_v18, %v2300_v17  ;;  %v2326_v36 = vld [vmem:[%s3365_s8 + $0xb8] sm:$0xf0]  ;;  %v2325_v39 = vor.u32 %v2649_v34, %v2324_v33  ;;  %v2340_v45 = vld [vmem:[%s3365_s8 + $0xc8] sm:$0xf]  ;;  %v2653_v46 = vld [vmem:[%s3365_s8 + $0xd4] sm:$0xf0] }
 0x103   : > { %1478 = vmatpush.bf16.msra.mxu1 %v2699_v26  ;;  %v2305_v26 = vor.u32 %v2642_v19, %v2302_v20  ;;  %v2329_v40 = vor.u32 %v2647_v35, %v2326_v36  ;;  %v2651_v47 = vld [vmem:[%s3365_s8 + $0xcc] sm:$0xf]  ;;  %v2342_v48 = vld [vmem:[%s3365_s8 + $0xd8] sm:$0xf0]  ;;  %v2341_v51 = vor.u32 %v2653_v46, %v2340_v45  ;;  %v2356_v57 = vld [vmem:[%s3365_s8 + $0xe8] sm:$0xf] }
 0x104   : > { %1567 = vmatpush.bf16.msra.mxu2 %v2707_v27  ;;  %v2309_v27 = vor.u32 %v2645_v22, %v2308_v21  ;;  %v2345_v52 = vor.u32 %v2651_v47, %v2342_v48  ;;  %v2657_v58 = vld [vmem:[%s3365_s8 + $0xf4] sm:$0xf0]  ;;  %v2655_v59 = vld [vmem:[%s3365_s8 + $0xec] sm:$0xf]  ;;  %v2358_v60 = vld [vmem:[%s3365_s8 + $0xf8] sm:$0xf0] }
 0x105   : > { %1656 = vmatpush.bf16.msra.mxu3 %v2715_v28  ;;  %v2313_v28 = vor.u32 %v2643_v23, %v2310_v24  ;;  %v2357_v63 = vor.u32 %v2657_v58, %v2356_v57  ;;  %v2361_v0 = vor.u32 %v2655_v59, %v2358_v60  ;;  %v2372_v5 = vld [vmem:[%s3365_s8 + $0x108] sm:$0xf]  ;;  %v2661_v6 = vld [vmem:[%s3365_s8 + $0x114] sm:$0xf0]  ;;  %v2659_v7 = vld [vmem:[%s3365_s8 + $0x10c] sm:$0xf] }
 0x106   : > { %1390 = vmatpush.bf16.msra.mxu0 %v2690_v29  ;;  %v2316_v29 = vld [vmem:[%s3365_s8 + $0xa0] sm:$0xf]  ;;  %v2374_v8 = vld [vmem:[%s3365_s8 + $0x118] sm:$0xf0]  ;;  %v2664_v24 = vld [vmem:[%s3365_s8 + $0x12c] sm:$0xf0] }
 0x107   : > { %1479 = vmatpush.bf16.msra.mxu1 %v2698_v30  ;;  %v2648_v30 = vld [vmem:[%s3365_s8 + $0xac] sm:$0xf0]  ;;  %v711_v21 = vld [vmem:[%s3369_s1] sm:$0xff]  ;;  %v2398_v57 = vld [vmem:[%s3365_s8 + $0x150] sm:$0xf0] }
 0x108   : > { %1568 = vmatpush.bf16.msra.mxu2 %v2706_v31  ;;  %v2646_v31 = vld [vmem:[%s3365_s8 + $0xa4] sm:$0xf]  ;;  %v2317_v37 = vor.u32 %v2648_v30, %v2316_v29  ;;  %v2380_v23 = vld [vmem:[%s3365_s8 + $0x120] sm:$0xf]  ;;  %v2665_v29 = vld [vmem:[%s3365_s8 + $0x134] sm:$0xf0] }
 0x109   : > { %1657 = vmatpush.bf16.msra.mxu3 %v2714_v32  ;;  %1391 = vmatmul.bf16.vlgmr.msra.gmra.mxu0 %v2237_v41  ;;  %v2318_v32 = vld [vmem:[%s3365_s8 + $0xb0] sm:$0xf0]  ;;  %v2332_v41 = vld [vmem:[%s3365_s8 + $0xc0] sm:$0xf]  ;;  %v2663_v30 = vld [vmem:[%s3365_s8 + $0x12c] sm:$0xf]  ;;  %v2381_v35 = vor.u32 %v2664_v24, %v2380_v23 }
 0x10a   : > { %1480 = vmatmul.bf16.vlgmr.msra.gmra.mxu1 %v2241_v42  ;;  %v2321_v38 = vor.u32 %v2646_v31, %v2318_v32  ;;  %v2652_v42 = vld [vmem:[%s3365_s8 + $0xcc] sm:$0xf0]  ;;  %v2390_v31 = vld [vmem:[%s3365_s8 + $0x138] sm:$0xf0]  ;;  %v2404_v58 = vld [vmem:[%s3365_s8 + $0x148] sm:$0xf] }
 0x10b   : > { %1569 = vmatmul.bf16.vlgmr.msra.gmra.mxu2 %v2245_v43  ;;  %v2650_v43 = vld [vmem:[%s3365_s8 + $0xc4] sm:$0xf]  ;;  %v2333_v49 = vor.u32 %v2652_v42, %v2332_v41  ;;  %v2393_v41 = vor.u32 %v2663_v30, %v2390_v31  ;;  %v712_v42 = vld [vmem:[%s3369_s1 + $0x8] sm:$0xff]  ;;  %v2669_v59 = vld [vmem:[%s3365_s8 + $0x154] sm:$0xf0] }
 0x10c   : > { %1658 = vmatmul.bf16.vlgmr.msra.gmra.mxu3 %v2249_v44  ;;  %v2334_v44 = vld [vmem:[%s3365_s8 + $0xd0] sm:$0xf0]  ;;  %v2667_v60 = vld [vmem:[%s3365_s8 + $0x14c] sm:$0xf]  ;;  %v2420_v24 = vld [vmem:[%s3365_s8 + $0x168] sm:$0xf] }
 0x10d   : > { %v2337_v50 = vor.u32 %v2650_v43, %v2334_v44  ;;  %v2414_v23 = vld [vmem:[%s3365_s8 + $0x170] sm:$0xf0] }
 0x119   : > { %1396 = vmatmul.bf16.gmra.mxu0 %v2253_v53  ;;  %v2348_v53 = vld [vmem:[%s3365_s8 + $0xe0] sm:$0xf] }
 0x11a   : > { %1485 = vmatmul.bf16.gmra.mxu1 %v2257_v54  ;;  %v2656_v54 = vld [vmem:[%s3365_s8 + $0xec] sm:$0xf0] }
 0x11b   : > { %1574 = vmatmul.bf16.gmra.mxu2 %v2261_v55  ;;  %v2654_v55 = vld [vmem:[%s3365_s8 + $0xe4] sm:$0xf]  ;;  %v2349_v61 = vor.u32 %v2656_v54, %v2348_v53  ;;  %v2396_v53 = vld [vmem:[%s3365_s8 + $0x140] sm:$0xf]  ;;  %v2668_v54 = vld [vmem:[%s3365_s8 + $0x14c] sm:$0xf0] }
 0x11c   : > { %1663 = vmatmul.bf16.gmra.mxu3 %v2265_v56  ;;  %v2350_v56 = vld [vmem:[%s3365_s8 + $0xf0] sm:$0xf0] }
 0x11d   : > { %v2353_v62 = vor.u32 %v2654_v55, %v2350_v56  ;;  %v2666_v56 = vld [vmem:[%s3365_s8 + $0x144] sm:$0xf] }
 0x129   : > { %1401 = vmatmul.bf16.gmra.mxu0 %v2269_v1  ;;  %v2364_v1 = vld [vmem:[%s3365_s8 + $0x100] sm:$0xf] }
 0x12a   : > { %1490 = vmatmul.bf16.gmra.mxu1 %v2273_v2  ;;  %v2660_v2 = vld [vmem:[%s3365_s8 + $0x10c] sm:$0xf0] }
 0x12b   : > { %1579 = vmatmul.bf16.gmra.mxu2 %v2277_v3  ;;  %v2658_v3 = vld [vmem:[%s3365_s8 + $0x104] sm:$0xf]  ;;  %v2365_v9 = vor.u32 %v2660_v2, %v2364_v1  ;;  %v2397_v1 = vor.u32 %v2668_v54, %v2396_v53  ;;  %v2401_v2 = vor.u32 %v2666_v56, %v2398_v57  ;;  %v2430_v53 = vld [vmem:[%s3365_s8 + $0x190] sm:$0xf0]  ;;  %v2436_v54 = vld [vmem:[%s3365_s8 + $0x188] sm:$0xf] }
 0x12c   : > { %1668 = vmatmul.bf16.gmra.mxu3 %v2281_v4  ;;  %v2366_v4 = vld [vmem:[%s3365_s8 + $0x110] sm:$0xf0]  ;;  %v2675_v56 = vld [vmem:[%s3365_s8 + $0x18c] sm:$0xf]  ;;  %v2438_v57 = vld [vmem:[%s3365_s8 + $0x198] sm:$0xf0] }
 0x12d   : > { %v2369_v10 = vor.u32 %v2658_v3, %v2366_v4 }
 0x139   : > { %1406 = vmatmul.bf16.gmra.mxu0 %v2285_v13  ;;  %v2373_v13 = vor.u32 %v2661_v6, %v2372_v5  ;;  %v2405_v6 = vor.u32 %v2669_v59, %v2404_v58 }
 0x13a   : > { %1495 = vmatmul.bf16.gmra.mxu1 %v2289_v14  ;;  %v2377_v14 = vor.u32 %v2659_v7, %v2374_v8  ;;  %v714_v8 = vld [vmem:[%s3369_s1 + $0x18] sm:$0xff] }
 0x13b   : > { %1584 = vmatmul.bf16.gmra.mxu2 %v2293_v15 }
 0x13c   : > { %1673 = vmatmul.bf16.gmra.mxu3 %v2297_v16 }
 0x149   : > { %1411 = vmatmul.bf16.gmra.mxu0 %v2301_v25 }
 0x14a   : > { %1500 = vmatmul.bf16.gmra.mxu1 %v2305_v26  ;;  %v2662_v26 = vld [vmem:[%s3365_s8 + $0x124] sm:$0xf] }
 0x14b   : > { %1589 = vmatmul.bf16.gmra.mxu2 %v2309_v27  ;;  %v2382_v27 = vld [vmem:[%s3365_s8 + $0x130] sm:$0xf0] }
 0x14c   : > { %1678 = vmatmul.bf16.gmra.mxu3 %v2313_v28  ;;  %v2388_v28 = vld [vmem:[%s3365_s8 + $0x128] sm:$0xf]  ;;  %v2385_v36 = vor.u32 %v2662_v26, %v2382_v27  ;;  %v2671_v26 = vld [vmem:[%s3365_s8 + $0x16c] sm:$0xf]  ;;  %v2422_v27 = vld [vmem:[%s3365_s8 + $0x178] sm:$0xf0] }
 0x159   : > { %1416 = vmatmul.bf16.gmra.mxu0 %v2317_v37 }
 0x15a   : > { %1505 = vmatmul.bf16.gmra.mxu1 %v2321_v38 }
 0x15b   : > { %1594 = vmatmul.bf16.gmra.mxu2 %v2325_v39 }
 0x15c   : > { %1683 = vmatmul.bf16.gmra.mxu3 %v2329_v40  ;;  %v2389_v40 = vor.u32 %v2665_v29, %v2388_v28 }
 0x169   : > { %1421 = vmatmul.bf16.gmra.mxu0 %v2333_v49 }
 0x16a   : > { %1510 = vmatmul.bf16.gmra.mxu1 %v2337_v50 }
 0x16b   : > { %1599 = vmatmul.bf16.gmra.mxu2 %v2341_v51  ;;  %v713_v51 = vld [vmem:[%s3369_s1 + $0x10] sm:$0xff] }
 0x16c   : > { %1688 = vmatmul.bf16.gmra.mxu3 %v2345_v52 }
 0x179   : > { %1426 = vmatmul.bf16.gmra.mxu0 %v2349_v61  ;;  %v2406_v61 = vld [vmem:[%s3365_s8 + $0x158] sm:$0xf0] }
 0x17a   : > { %1515 = vmatmul.bf16.gmra.mxu1 %v2353_v62  ;;  %v2409_v7 = vor.u32 %v2667_v60, %v2406_v61 }
 0x17b   : > { %1604 = vmatmul.bf16.gmra.mxu2 %v2357_v63 }
 0x17c   : > { %1693 = vmatmul.bf16.gmra.mxu3 %v2361_v0 }
 0x186   : > { %v1392_v11 = vpop.f32.mrf.mxu0 }
 0x187   : > { %v1481_v12 = vpop.f32.mrf.mxu1 }
 0x188   : > { %v1482_v15 = vadd.f32 %v1481_v12, %v1392_v11 }
 0x189   : > { %1431 = vmatmul.bf16.gmra.mxu0 %v2365_v9 }
 0x18a   : > { %1520 = vmatmul.bf16.gmra.mxu1 %v2369_v10 }
 0x18b   : > { %1609 = vmatmul.bf16.gmra.mxu2 %v2373_v13 }
 0x18c   : > { %1698 = vmatmul.bf16.gmra.mxu3 %v2377_v14 }
 0x18e   : > { %v1570_v16 = vpop.f32.mrf.mxu2  ;;  %v1394_v19 = vpop.f32.mrf.mxu0 }
 0x18f   : > { %v1659_v17 = vpop.f32.mrf.mxu3  ;;  %v1571_v18 = vadd.f32 %v1570_v16, %v1482_v15  ;;  %v1483_v20 = vpop.f32.mrf.mxu1 }
 0x190   : > { %v1484_v32 = vadd.f32 %v1483_v20, %v1394_v19  ;;  %v2412_v19 = vld [vmem:[%s3365_s8 + $0x160] sm:$0xf]  ;;  %v2672_v20 = vld [vmem:[%s3365_s8 + $0x16c] sm:$0xf0] }
 0x191   : > { %v1660_v22 = vadd.f32 %v1659_v17, %v1571_v18  ;;  %v715_v17 = vld [vmem:[%s3369_s1 + $0x20] sm:$0xff]  ;;  %v2413_v31 = vor.u32 %v2672_v20, %v2412_v19  ;;  %v2446_v19 = vld [vmem:[%s3365_s8 + $0x1b0] sm:$0xf0]  ;;  %v2452_v20 = vld [vmem:[%s3365_s8 + $0x1a8] sm:$0xf] }
 0x193   : > { %v1739_v25 = vadd.f32 %v1660_v22, %v711_v21  ;;  %v2670_v22 = vld [vmem:[%s3365_s8 + $0x164] sm:$0xf] }
 0x195   : > { %1771 = vst [vmem:[%s3369_s1] sm:$0xff] %v1739_v25  ;;  %v2673_v25 = vld [vmem:[%s3365_s8 + $0x174] sm:$0xf0] }
 0x196   : > { %v1572_v33 = vpop.f32.mrf.mxu2  ;;  %v1397_v38 = vpop.f32.mrf.mxu0 }
 0x197   : > { %v1661_v34 = vpop.f32.mrf.mxu3  ;;  %v1573_v37 = vadd.f32 %v1572_v33, %v1484_v32  ;;  %v1486_v39 = vpop.f32.mrf.mxu1  ;;  %v2417_v32 = vor.u32 %v2670_v22, %v2414_v23  ;;  %v2679_v22 = vld [vmem:[%s3365_s8 + $0x1ac] sm:$0xf]  ;;  %v2454_v23 = vld [vmem:[%s3365_s8 + $0x1b8] sm:$0xf0] }
 0x198   : > { %v1487_v45 = vadd.f32 %v1486_v39, %v1397_v38  ;;  %v716_v38 = vld [vmem:[%s3369_s1 + $0x28] sm:$0xff] }
 0x199   : > { %v1662_v43 = vadd.f32 %v1661_v34, %v1573_v37  ;;  %1436 = vmatmul.bf16.gmra.mxu0 %v2381_v35  ;;  %v2425_v37 = vor.u32 %v2671_v26, %v2422_v27 }
 0x19a   : > { %1525 = vmatmul.bf16.gmra.mxu1 %v2385_v36  ;;  %v2421_v36 = vor.u32 %v2673_v25, %v2420_v24 }
 0x19b   : > { %v1740_v44 = vadd.f32 %v1662_v43, %v712_v42  ;;  %1614 = vmatmul.bf16.gmra.mxu2 %v2389_v40 }
 0x19c   : > { %1703 = vmatmul.bf16.gmra.mxu3 %v2393_v41 }
 0x19d   : > { %1772 = vst [vmem:[%s3369_s1 + $0x8] sm:$0xff] %v1740_v44 }
 0x19e   : > { %v1575_v46 = vpop.f32.mrf.mxu2  ;;  %v1399_v49 = vpop.f32.mrf.mxu0 }
 0x19f   : > { %v1664_v47 = vpop.f32.mrf.mxu3  ;;  %v1576_v48 = vadd.f32 %v1575_v46, %v1487_v45  ;;  %v1488_v50 = vpop.f32.mrf.mxu1 }
 0x1a0   : > { %v1489_v62 = vadd.f32 %v1488_v50, %v1399_v49  ;;  %v2428_v49 = vld [vmem:[%s3365_s8 + $0x180] sm:$0xf]  ;;  %v2676_v50 = vld [vmem:[%s3365_s8 + $0x18c] sm:$0xf0] }
 0x1a1   : > { %v1665_v52 = vadd.f32 %v1664_v47, %v1576_v48  ;;  %v717_v47 = vld [vmem:[%s3369_s1 + $0x30] sm:$0xff]  ;;  %v2429_v61 = vor.u32 %v2676_v50, %v2428_v49  ;;  %v2468_v50 = vld [vmem:[%s3365_s8 + $0x1c8] sm:$0xf] }
 0x1a2   : > { %v2462_v49 = vld [vmem:[%s3365_s8 + $0x1d0] sm:$0xf0] }
 0x1a3   : > { %v1741_v55 = vadd.f32 %v1665_v52, %v713_v51  ;;  %v2674_v52 = vld [vmem:[%s3365_s8 + $0x184] sm:$0xf] }
 0x1a5   : > { %1773 = vst [vmem:[%s3369_s1 + $0x10] sm:$0xff] %v1741_v55  ;;  %v2677_v55 = vld [vmem:[%s3365_s8 + $0x194] sm:$0xf0] }
 0x1a6   : > { %v1577_v63 = vpop.f32.mrf.mxu2  ;;  %v1402_v4 = vpop.f32.mrf.mxu0 }
 0x1a7   : > { %v1666_v0 = vpop.f32.mrf.mxu3  ;;  %v1578_v3 = vadd.f32 %v1577_v63, %v1489_v62  ;;  %v1491_v5 = vpop.f32.mrf.mxu1  ;;  %v2433_v62 = vor.u32 %v2674_v52, %v2430_v53  ;;  %v2683_v52 = vld [vmem:[%s3365_s8 + $0x1cc] sm:$0xf]  ;;  %v2470_v53 = vld [vmem:[%s3365_s8 + $0x1d8] sm:$0xf0] }
 0x1a8   : > { %v1492_v11 = vadd.f32 %v1491_v5, %v1402_v4  ;;  %v718_v4 = vld [vmem:[%s3369_s1 + $0x38] sm:$0xff] }
 0x1a9   : > { %v1667_v9 = vadd.f32 %v1666_v0, %v1578_v3  ;;  %1441 = vmatmul.bf16.gmra.mxu0 %v2397_v1  ;;  %v2441_v3 = vor.u32 %v2675_v56, %v2438_v57 }
 0x1aa   : > { %1530 = vmatmul.bf16.gmra.mxu1 %v2401_v2  ;;  %v2437_v2 = vor.u32 %v2677_v55, %v2436_v54 }
 0x1ab   : > { %v1742_v10 = vadd.f32 %v1667_v9, %v714_v8  ;;  %1619 = vmatmul.bf16.gmra.mxu2 %v2405_v6 }
 0x1ac   : > { %1708 = vmatmul.bf16.gmra.mxu3 %v2409_v7 }
 0x1ad   : > { %1774 = vst [vmem:[%s3369_s1 + $0x18] sm:$0xff] %v1742_v10 }
 0x1ae   : > { %v1580_v12 = vpop.f32.mrf.mxu2  ;;  %v1404_v15 = vpop.f32.mrf.mxu0 }
 0x1af   : > { %v1669_v13 = vpop.f32.mrf.mxu3  ;;  %v1581_v14 = vadd.f32 %v1580_v12, %v1492_v11  ;;  %v1493_v16 = vpop.f32.mrf.mxu1 }
 0x1b0   : > { %v1494_v28 = vadd.f32 %v1493_v16, %v1404_v15  ;;  %v2444_v15 = vld [vmem:[%s3365_s8 + $0x1a0] sm:$0xf]  ;;  %v2680_v16 = vld [vmem:[%s3365_s8 + $0x1ac] sm:$0xf0] }
 0x1b1   : > { %v1670_v18 = vadd.f32 %v1669_v13, %v1581_v14  ;;  %v719_v13 = vld [vmem:[%s3369_s1 + $0x40] sm:$0xff]  ;;  %v2445_v27 = vor.u32 %v2680_v16, %v2444_v15  ;;  %v2478_v15 = vld [vmem:[%s3365_s8 + $0x1f0] sm:$0xf0]  ;;  %v2484_v16 = vld [vmem:[%s3365_s8 + $0x1e8] sm:$0xf] }
 0x1b3   : > { %v1743_v21 = vadd.f32 %v1670_v18, %v715_v17  ;;  %v2678_v18 = vld [vmem:[%s3365_s8 + $0x1a4] sm:$0xf] }
 0x1b5   : > { %1775 = vst [vmem:[%s3369_s1 + $0x20] sm:$0xff] %v1743_v21  ;;  %v2681_v21 = vld [vmem:[%s3365_s8 + $0x1b4] sm:$0xf0] }
 0x1b6   : > { %v1582_v29 = vpop.f32.mrf.mxu2  ;;  %v1407_v34 = vpop.f32.mrf.mxu0 }
 0x1b7   : > { %v1671_v30 = vpop.f32.mrf.mxu3  ;;  %v1583_v33 = vadd.f32 %v1582_v29, %v1494_v28  ;;  %v1496_v35 = vpop.f32.mrf.mxu1  ;;  %v2449_v28 = vor.u32 %v2678_v18, %v2446_v19  ;;  %v2687_v18 = vld [vmem:[%s3365_s8 + $0x1ec] sm:$0xf]  ;;  %v2486_v19 = vld [vmem:[%s3365_s8 + $0x1f8] sm:$0xf0] }
 0x1b8   : > { %v1497_v41 = vadd.f32 %v1496_v35, %v1407_v34  ;;  %v720_v34 = vld [vmem:[%s3369_s1 + $0x48] sm:$0xff] }
 0x1b9   : > { %v1672_v39 = vadd.f32 %v1671_v30, %v1583_v33  ;;  %1446 = vmatmul.bf16.gmra.mxu0 %v2413_v31  ;;  %v2457_v33 = vor.u32 %v2679_v22, %v2454_v23 }
 0x1ba   : > { %1535 = vmatmul.bf16.gmra.mxu1 %v2417_v32  ;;  %v2453_v32 = vor.u32 %v2681_v21, %v2452_v20 }
 0x1bb   : > { %v1744_v40 = vadd.f32 %v1672_v39, %v716_v38  ;;  %1624 = vmatmul.bf16.gmra.mxu2 %v2421_v36 }
 0x1bc   : > { %1713 = vmatmul.bf16.gmra.mxu3 %v2425_v37 }
 0x1bd   : > { %1776 = vst [vmem:[%s3369_s1 + $0x28] sm:$0xff] %v1744_v40 }
 0x1be   : > { %v1585_v42 = vpop.f32.mrf.mxu2  ;;  %v1409_v45 = vpop.f32.mrf.mxu0 }
 0x1bf   : > { %v1674_v43 = vpop.f32.mrf.mxu3  ;;  %v1586_v44 = vadd.f32 %v1585_v42, %v1497_v41  ;;  %v1498_v46 = vpop.f32.mrf.mxu1 }
 0x1c0   : > { %v1499_v58 = vadd.f32 %v1498_v46, %v1409_v45  ;;  %v2460_v45 = vld [vmem:[%s3365_s8 + $0x1c0] sm:$0xf]  ;;  %v2684_v46 = vld [vmem:[%s3365_s8 + $0x1cc] sm:$0xf0] }
 0x1c1   : > { %v1675_v48 = vadd.f32 %v1674_v43, %v1586_v44  ;;  %v721_v43 = vld [vmem:[%s3369_s1 + $0x50] sm:$0xff]  ;;  %v2461_v57 = vor.u32 %v2684_v46, %v2460_v45 }
 0x1c3   : > { %v1745_v51 = vadd.f32 %v1675_v48, %v717_v47  ;;  %v2682_v48 = vld [vmem:[%s3365_s8 + $0x1c4] sm:$0xf] }
 0x1c5   : > { %1777 = vst [vmem:[%s3369_s1 + $0x30] sm:$0xff] %v1745_v51  ;;  %v2685_v51 = vld [vmem:[%s3365_s8 + $0x1d4] sm:$0xf0] }
 0x1c6   : > { %v1587_v59 = vpop.f32.mrf.mxu2  ;;  %v1412_v0 = vpop.f32.mrf.mxu0 }
 0x1c7   : > { %v1676_v60 = vpop.f32.mrf.mxu3  ;;  %v1588_v63 = vadd.f32 %v1587_v59, %v1499_v58  ;;  %v1501_v1 = vpop.f32.mrf.mxu1  ;;  %v2465_v58 = vor.u32 %v2682_v48, %v2462_v49  ;;  %v726_v48 = vld [vmem:[%s3369_s1 + $0x78] sm:$0xff] }
 0x1c8   : > { %v1502_v7 = vadd.f32 %v1501_v1, %v1412_v0  ;;  %v722_v0 = vld [vmem:[%s3369_s1 + $0x58] sm:$0xff] }
 0x1c9   : > { %v1677_v5 = vadd.f32 %v1676_v60, %v1588_v63  ;;  %1451 = vmatmul.bf16.gmra.mxu0 %v2429_v61  ;;  %v2473_v63 = vor.u32 %v2683_v52, %v2470_v53 }
 0x1ca   : > { %1540 = vmatmul.bf16.gmra.mxu1 %v2433_v62  ;;  %v2469_v62 = vor.u32 %v2685_v51, %v2468_v50 }
 0x1cb   : > { %v1746_v6 = vadd.f32 %v1677_v5, %v718_v4  ;;  %1629 = vmatmul.bf16.gmra.mxu2 %v2437_v2 }
 0x1cc   : > { %1718 = vmatmul.bf16.gmra.mxu3 %v2441_v3 }
 0x1cd   : > { %1778 = vst [vmem:[%s3369_s1 + $0x38] sm:$0xff] %v1746_v6 }
 0x1ce   : > { %v1590_v8 = vpop.f32.mrf.mxu2  ;;  %v1414_v11 = vpop.f32.mrf.mxu0 }
 0x1cf   : > { %v1679_v9 = vpop.f32.mrf.mxu3  ;;  %v1591_v10 = vadd.f32 %v1590_v8, %v1502_v7  ;;  %v1503_v12 = vpop.f32.mrf.mxu1 }
 0x1d0   : > { %v1504_v24 = vadd.f32 %v1503_v12, %v1414_v11  ;;  %v2476_v11 = vld [vmem:[%s3365_s8 + $0x1e0] sm:$0xf]  ;;  %v2688_v12 = vld [vmem:[%s3365_s8 + $0x1ec] sm:$0xf0] }
 0x1d1   : > { %v1680_v14 = vadd.f32 %v1679_v9, %v1591_v10  ;;  %v723_v9 = vld [vmem:[%s3369_s1 + $0x60] sm:$0xff]  ;;  %v2477_v23 = vor.u32 %v2688_v12, %v2476_v11  ;;  %v729_v11 = vld [vmem:[%s3369_s1 + $0x90] sm:$0xff] }
 0x1d3   : > { %v1747_v17 = vadd.f32 %v1680_v14, %v719_v13  ;;  %v2686_v14 = vld [vmem:[%s3365_s8 + $0x1e4] sm:$0xf] }
 0x1d5   : > { %1779 = vst [vmem:[%s3369_s1 + $0x40] sm:$0xff] %v1747_v17  ;;  %v2689_v17 = vld [vmem:[%s3365_s8 + $0x1f4] sm:$0xf0] }
 0x1d6   : > { %v1592_v25 = vpop.f32.mrf.mxu2  ;;  %v1417_v30 = vpop.f32.mrf.mxu0 }
 0x1d7   : > { %v1681_v26 = vpop.f32.mrf.mxu3  ;;  %v1593_v29 = vadd.f32 %v1592_v25, %v1504_v24  ;;  %v1506_v31 = vpop.f32.mrf.mxu1  ;;  %v2481_v24 = vor.u32 %v2686_v14, %v2478_v15 }
 0x1d8   : > { %v1507_v37 = vadd.f32 %v1506_v31, %v1417_v30  ;;  %v724_v30 = vld [vmem:[%s3369_s1 + $0x68] sm:$0xff] }
 0x1d9   : > { %v1682_v35 = vadd.f32 %v1681_v26, %v1593_v29  ;;  %1456 = vmatmul.bf16.gmra.mxu0 %v2445_v27  ;;  %v2489_v29 = vor.u32 %v2687_v18, %v2486_v19 }
 0x1da   : > { %1545 = vmatmul.bf16.gmra.mxu1 %v2449_v28  ;;  %v2485_v28 = vor.u32 %v2689_v17, %v2484_v16 }
 0x1db   : > { %v1748_v36 = vadd.f32 %v1682_v35, %v720_v34  ;;  %1634 = vmatmul.bf16.gmra.mxu2 %v2453_v32 }
 0x1dc   : > { %1723 = vmatmul.bf16.gmra.mxu3 %v2457_v33 }
 0x1dd   : > { %1780 = vst [vmem:[%s3369_s1 + $0x48] sm:$0xff] %v1748_v36 }
 0x1de   : > { %v1595_v38 = vpop.f32.mrf.mxu2  ;;  %v1419_v41 = vpop.f32.mrf.mxu0 }
 0x1df   : > { %v1684_v39 = vpop.f32.mrf.mxu3  ;;  %v1596_v40 = vadd.f32 %v1595_v38, %v1507_v37  ;;  %v1508_v42 = vpop.f32.mrf.mxu1 }
 0x1e0   : > { %v1509_v54 = vadd.f32 %v1508_v42, %v1419_v41 }
 0x1e1   : > { %v1685_v44 = vadd.f32 %v1684_v39, %v1596_v40  ;;  %v725_v39 = vld [vmem:[%s3369_s1 + $0x70] sm:$0xff] }
 0x1e3   : > { %v1749_v47 = vadd.f32 %v1685_v44, %v721_v43 }
 0x1e5   : > { %1781 = vst [vmem:[%s3369_s1 + $0x50] sm:$0xff] %v1749_v47 }
 0x1e6   : > { %v1597_v55 = vpop.f32.mrf.mxu2  ;;  %v1422_v60 = vpop.f32.mrf.mxu0 }
 0x1e7   : > { %v1686_v56 = vpop.f32.mrf.mxu3  ;;  %v1598_v59 = vadd.f32 %v1597_v55, %v1509_v54  ;;  %v1511_v61 = vpop.f32.mrf.mxu1 }
 0x1e8   : > { %v1512_v3 = vadd.f32 %v1511_v61, %v1422_v60 }
 0x1e9   : > { %v1687_v1 = vadd.f32 %v1686_v56, %v1598_v59  ;;  %1461 = vmatmul.bf16.gmra.mxu0 %v2461_v57  ;;  %v727_v57 = vld [vmem:[%s3369_s1 + $0x80] sm:$0xff] }
 0x1ea   : > { %1550 = vmatmul.bf16.gmra.mxu1 %v2465_v58 }
 0x1eb   : > { %v1750_v2 = vadd.f32 %v1687_v1, %v722_v0  ;;  %1639 = vmatmul.bf16.gmra.mxu2 %v2469_v62 }
 0x1ec   : > { %1728 = vmatmul.bf16.gmra.mxu3 %v2473_v63 }
 0x1ed   : > { %1782 = vst [vmem:[%s3369_s1 + $0x58] sm:$0xff] %v1750_v2  ;;  %v728_v2 = vld [vmem:[%s3369_s1 + $0x88] sm:$0xff] }
 0x1ee   : > { %v1600_v4 = vpop.f32.mrf.mxu2  ;;  %v1424_v7 = vpop.f32.mrf.mxu0 }
 0x1ef   : > { %v1689_v5 = vpop.f32.mrf.mxu3  ;;  %v1601_v6 = vadd.f32 %v1600_v4, %v1512_v3  ;;  %v1513_v8 = vpop.f32.mrf.mxu1 }
 0x1f0   : > { %v1514_v20 = vadd.f32 %v1513_v8, %v1424_v7 }
 0x1f1   : > { %v1690_v10 = vadd.f32 %v1689_v5, %v1601_v6 }
 0x1f3   : > { %v1751_v13 = vadd.f32 %v1690_v10, %v723_v9 }
 0x1f5   : > { %1783 = vst [vmem:[%s3369_s1 + $0x60] sm:$0xff] %v1751_v13 }
 0x1f6   : > { %v1602_v21 = vpop.f32.mrf.mxu2  ;;  %v1427_v26 = vpop.f32.mrf.mxu0 }
 0x1f7   : > { %v1691_v22 = vpop.f32.mrf.mxu3  ;;  %v1603_v25 = vadd.f32 %v1602_v21, %v1514_v20  ;;  %v1516_v27 = vpop.f32.mrf.mxu1  ;;  %v730_v20 = vld [vmem:[%s3369_s1 + $0x98] sm:$0xff] }
 0x1f8   : > { %v1517_v33 = vadd.f32 %v1516_v27, %v1427_v26 }
 0x1f9   : > { %v1692_v31 = vadd.f32 %v1691_v22, %v1603_v25  ;;  %1466 = vmatmul.bf16.gmra.mxu0 %v2477_v23 }
 0x1fa   : > { %1555 = vmatmul.bf16.gmra.mxu1 %v2481_v24 }
 0x1fb   : > { %v1752_v32 = vadd.f32 %v1692_v31, %v724_v30  ;;  %1644 = vmatmul.bf16.gmra.mxu2 %v2485_v28 }
 0x1fc   : > { %1733 = vmatmul.bf16.gmra.mxu3 %v2489_v29  ;;  %v731_v29 = vld [vmem:[%s3369_s1 + $0xa0] sm:$0xff] }
 0x1fd   : > { %1784 = vst [vmem:[%s3369_s1 + $0x68] sm:$0xff] %v1752_v32 }
 0x1fe   : > { %v1605_v34 = vpop.f32.mrf.mxu2  ;;  %v1429_v37 = vpop.f32.mrf.mxu0 }
 0x1ff   : > { %v1694_v35 = vpop.f32.mrf.mxu3  ;;  %v1606_v36 = vadd.f32 %v1605_v34, %v1517_v33  ;;  %v1518_v38 = vpop.f32.mrf.mxu1 }
 0x200   : > { %v1519_v42 = vadd.f32 %v1518_v38, %v1429_v37  ;;  %v732_v38 = vld [vmem:[%s3369_s1 + $0xa8] sm:$0xff] }
 0x201   : > { %v1695_v40 = vadd.f32 %v1694_v35, %v1606_v36 }
 0x203   : > { %v1753_v41 = vadd.f32 %v1695_v40, %v725_v39 }
 0x205   : > { %1785 = vst [vmem:[%s3369_s1 + $0x70] sm:$0xff] %v1753_v41 }
 0x206   : > { %v1607_v43 = vpop.f32.mrf.mxu2  ;;  %v1432_v46 = vpop.f32.mrf.mxu0 }
 0x207   : > { %v1696_v44 = vpop.f32.mrf.mxu3  ;;  %v1608_v45 = vadd.f32 %v1607_v43, %v1519_v42  ;;  %v1521_v47 = vpop.f32.mrf.mxu1 }
 0x208   : > { %v1522_v51 = vadd.f32 %v1521_v47, %v1432_v46  ;;  %v733_v47 = vld [vmem:[%s3369_s1 + $0xb0] sm:$0xff] }
 0x209   : > { %v1697_v49 = vadd.f32 %v1696_v44, %v1608_v45 }
 0x20b   : > { %v1754_v50 = vadd.f32 %v1697_v49, %v726_v48 }
 0x20d   : > { %1786 = vst [vmem:[%s3369_s1 + $0x78] sm:$0xff] %v1754_v50 }
 0x20e   : > { %v1610_v52 = vpop.f32.mrf.mxu2  ;;  %v1434_v55 = vpop.f32.mrf.mxu0 }
 0x20f   : > { %v1699_v53 = vpop.f32.mrf.mxu3  ;;  %v1611_v54 = vadd.f32 %v1610_v52, %v1522_v51  ;;  %v1523_v56 = vpop.f32.mrf.mxu1 }
 0x210   : > { %v1524_v60 = vadd.f32 %v1523_v56, %v1434_v55  ;;  %v734_v56 = vld [vmem:[%s3369_s1 + $0xb8] sm:$0xff] }
 0x211   : > { %v1700_v58 = vadd.f32 %v1699_v53, %v1611_v54 }
 0x213   : > { %v1755_v59 = vadd.f32 %v1700_v58, %v727_v57 }
 0x215   : > { %1787 = vst [vmem:[%s3369_s1 + $0x80] sm:$0xff] %v1755_v59 }
 0x216   : > { %v1612_v61 = vpop.f32.mrf.mxu2  ;;  %v1437_v0 = vpop.f32.mrf.mxu0 }
 0x217   : > { %v1701_v62 = vpop.f32.mrf.mxu3  ;;  %v1613_v63 = vadd.f32 %v1612_v61, %v1524_v60  ;;  %v1526_v1 = vpop.f32.mrf.mxu1 }
 0x218   : > { %v1527_v5 = vadd.f32 %v1526_v1, %v1437_v0  ;;  %v735_v1 = vld [vmem:[%s3369_s1 + $0xc0] sm:$0xff] }
 0x219   : > { %v1702_v3 = vadd.f32 %v1701_v62, %v1613_v63 }
 0x21b   : > { %v1756_v4 = vadd.f32 %v1702_v3, %v728_v2 }
 0x21d   : > { %1788 = vst [vmem:[%s3369_s1 + $0x88] sm:$0xff] %v1756_v4 }
 0x21e   : > { %v1615_v6 = vpop.f32.mrf.mxu2  ;;  %v1439_v9 = vpop.f32.mrf.mxu0 }
 0x21f   : > { %v1704_v7 = vpop.f32.mrf.mxu3  ;;  %v1616_v8 = vadd.f32 %v1615_v6, %v1527_v5  ;;  %v1528_v10 = vpop.f32.mrf.mxu1 }
 0x220   : > { %v1529_v14 = vadd.f32 %v1528_v10, %v1439_v9  ;;  %v736_v10 = vld [vmem:[%s3369_s1 + $0xc8] sm:$0xff] }
 0x221   : > { %v1705_v12 = vadd.f32 %v1704_v7, %v1616_v8 }
 0x223   : > { %v1757_v13 = vadd.f32 %v1705_v12, %v729_v11 }
 0x225   : > { %1789 = vst [vmem:[%s3369_s1 + $0x90] sm:$0xff] %v1757_v13 }
 0x226   : > { %v1617_v15 = vpop.f32.mrf.mxu2  ;;  %v1442_v18 = vpop.f32.mrf.mxu0 }
 0x227   : > { %v1706_v16 = vpop.f32.mrf.mxu3  ;;  %v1618_v17 = vadd.f32 %v1617_v15, %v1529_v14  ;;  %v1531_v19 = vpop.f32.mrf.mxu1 }
 0x228   : > { %v1532_v23 = vadd.f32 %v1531_v19, %v1442_v18  ;;  %v737_v19 = vld [vmem:[%s3369_s1 + $0xd0] sm:$0xff] }
 0x229   : > { %v1707_v21 = vadd.f32 %v1706_v16, %v1618_v17 }
 0x22b   : > { %v1758_v22 = vadd.f32 %v1707_v21, %v730_v20 }
 0x22d   : > { %1790 = vst [vmem:[%s3369_s1 + $0x98] sm:$0xff] %v1758_v22 }
 0x22e   : > { %v1620_v24 = vpop.f32.mrf.mxu2  ;;  %v1444_v27 = vpop.f32.mrf.mxu0 }
 0x22f   : > { %v1709_v25 = vpop.f32.mrf.mxu3  ;;  %v1621_v26 = vadd.f32 %v1620_v24, %v1532_v23  ;;  %v1533_v28 = vpop.f32.mrf.mxu1 }
 0x230   : > { %v1534_v32 = vadd.f32 %v1533_v28, %v1444_v27  ;;  %v738_v28 = vld [vmem:[%s3369_s1 + $0xd8] sm:$0xff] }
 0x231   : > { %v1710_v30 = vadd.f32 %v1709_v25, %v1621_v26 }
 0x233   : > { %v1759_v31 = vadd.f32 %v1710_v30, %v731_v29 }
 0x235   : > { %1791 = vst [vmem:[%s3369_s1 + $0xa0] sm:$0xff] %v1759_v31 }
 0x236   : > { %v1622_v33 = vpop.f32.mrf.mxu2  ;;  %v1447_v36 = vpop.f32.mrf.mxu0 }
 0x237   : > { %v1711_v34 = vpop.f32.mrf.mxu3  ;;  %v1623_v35 = vadd.f32 %v1622_v33, %v1534_v32  ;;  %v1536_v37 = vpop.f32.mrf.mxu1 }
 0x238   : > { %v1537_v41 = vadd.f32 %v1536_v37, %v1447_v36  ;;  %v739_v37 = vld [vmem:[%s3369_s1 + $0xe0] sm:$0xff] }
 0x239   : > { %v1712_v39 = vadd.f32 %v1711_v34, %v1623_v35 }
 0x23b   : > { %v1760_v40 = vadd.f32 %v1712_v39, %v732_v38 }
 0x23d   : > { %1792 = vst [vmem:[%s3369_s1 + $0xa8] sm:$0xff] %v1760_v40 }
 0x23e   : > { %v1625_v42 = vpop.f32.mrf.mxu2  ;;  %v1449_v45 = vpop.f32.mrf.mxu0 }
 0x23f   : > { %v1714_v43 = vpop.f32.mrf.mxu3  ;;  %v1626_v44 = vadd.f32 %v1625_v42, %v1537_v41  ;;  %v1538_v46 = vpop.f32.mrf.mxu1 }
 0x240   : > { %v1539_v50 = vadd.f32 %v1538_v46, %v1449_v45 }
 0x241   : > { %v1715_v48 = vadd.f32 %v1714_v43, %v1626_v44  ;;  %v740_v44 = vld [vmem:[%s3369_s1 + $0xe8] sm:$0xff] }
 0x243   : > { %v1761_v49 = vadd.f32 %v1715_v48, %v733_v47 }
 0x245   : > { %1793 = vst [vmem:[%s3369_s1 + $0xb0] sm:$0xff] %v1761_v49 }
 0x246   : > { %v1627_v51 = vpop.f32.mrf.mxu2  ;;  %v1452_v54 = vpop.f32.mrf.mxu0 }
 0x247   : > { %v1716_v52 = vpop.f32.mrf.mxu3  ;;  %v1628_v53 = vadd.f32 %v1627_v51, %v1539_v50  ;;  %v1541_v55 = vpop.f32.mrf.mxu1 }
 0x248   : > { %v1542_v59 = vadd.f32 %v1541_v55, %v1452_v54 }
 0x249   : > { %v1717_v57 = vadd.f32 %v1716_v52, %v1628_v53  ;;  %v741_v53 = vld [vmem:[%s3369_s1 + $0xf0] sm:$0xff] }
 0x24b   : > { %v1762_v58 = vadd.f32 %v1717_v57, %v734_v56 }
 0x24d   : > { %1794 = vst [vmem:[%s3369_s1 + $0xb8] sm:$0xff] %v1762_v58 }
 0x24e   : > { %v1630_v60 = vpop.f32.mrf.mxu2  ;;  %v1454_v63 = vpop.f32.mrf.mxu0 }
 0x24f   : > { %v1719_v61 = vpop.f32.mrf.mxu3  ;;  %v1631_v62 = vadd.f32 %v1630_v60, %v1542_v59  ;;  %v1543_v0 = vpop.f32.mrf.mxu1 }
 0x250   : > { %v1544_v4 = vadd.f32 %v1543_v0, %v1454_v63 }
 0x251   : > { %v1720_v2 = vadd.f32 %v1719_v61, %v1631_v62  ;;  %v742_v61 = vld [vmem:[%s3369_s1 + $0xf8] sm:$0xff] }
 0x253   : > { %v1763_v3 = vadd.f32 %v1720_v2, %v735_v1 }
 0x255   : > { %1795 = vst [vmem:[%s3369_s1 + $0xc0] sm:$0xff] %v1763_v3 }
 0x256   : > { %v1632_v5 = vpop.f32.mrf.mxu2  ;;  %v1457_v8 = vpop.f32.mrf.mxu0 }
 0x257   : > { %v1721_v6 = vpop.f32.mrf.mxu3  ;;  %v1633_v7 = vadd.f32 %v1632_v5, %v1544_v4  ;;  %v1546_v9 = vpop.f32.mrf.mxu1 }
 0x258   : > { %v1547_v13 = vadd.f32 %v1546_v9, %v1457_v8 }
 0x259   : > { %v1722_v11 = vadd.f32 %v1721_v6, %v1633_v7 }
 0x25b   : > { %v1764_v12 = vadd.f32 %v1722_v11, %v736_v10 }
 0x25d   : > { %1796 = vst [vmem:[%s3369_s1 + $0xc8] sm:$0xff] %v1764_v12 }
 0x25e   : > { %v1635_v14 = vpop.f32.mrf.mxu2  ;;  %v1459_v17 = vpop.f32.mrf.mxu0 }
 0x25f   : > { %v1724_v15 = vpop.f32.mrf.mxu3  ;;  %v1636_v16 = vadd.f32 %v1635_v14, %v1547_v13  ;;  %v1548_v18 = vpop.f32.mrf.mxu1 }
 0x260   : > { %v1549_v22 = vadd.f32 %v1548_v18, %v1459_v17 }
 0x261   : > { %v1725_v20 = vadd.f32 %v1724_v15, %v1636_v16 }
 0x263   : > { %v1765_v21 = vadd.f32 %v1725_v20, %v737_v19 }
 0x265   : > { %1797 = vst [vmem:[%s3369_s1 + $0xd0] sm:$0xff] %v1765_v21 }
 0x266   : > { %v1637_v23 = vpop.f32.mrf.mxu2  ;;  %v1462_v26 = vpop.f32.mrf.mxu0 }
 0x267   : > { %v1726_v24 = vpop.f32.mrf.mxu3  ;;  %v1638_v25 = vadd.f32 %v1637_v23, %v1549_v22  ;;  %v1551_v27 = vpop.f32.mrf.mxu1 }
 0x268   : > { %v1552_v31 = vadd.f32 %v1551_v27, %v1462_v26 }
 0x269   : > { %v1727_v29 = vadd.f32 %v1726_v24, %v1638_v25 }
 0x26b   : > { %v1766_v30 = vadd.f32 %v1727_v29, %v738_v28 }
 0x26d   : > { %1798 = vst [vmem:[%s3369_s1 + $0xd8] sm:$0xff] %v1766_v30 }
 0x26e   : > { %v1640_v32 = vpop.f32.mrf.mxu2  ;;  %v1464_v35 = vpop.f32.mrf.mxu0 }
 0x26f   : > { %v1729_v33 = vpop.f32.mrf.mxu3  ;;  %v1641_v34 = vadd.f32 %v1640_v32, %v1552_v31  ;;  %v1553_v36 = vpop.f32.mrf.mxu1 }
 0x270   : > { %v1554_v40 = vadd.f32 %v1553_v36, %v1464_v35 }
 0x271   : > { %v1730_v38 = vadd.f32 %v1729_v33, %v1641_v34 }
 0x273   : > { %v1767_v39 = vadd.f32 %v1730_v38, %v739_v37 }
 0x275   : > { %1799 = vst [vmem:[%s3369_s1 + $0xe0] sm:$0xff] %v1767_v39 }
 0x276   : > { %v1642_v41 = vpop.f32.mrf.mxu2  ;;  %v1467_v45 = vpop.f32.mrf.mxu0 }
 0x277   : > { %v1731_v42 = vpop.f32.mrf.mxu3  ;;  %v1643_v43 = vadd.f32 %v1642_v41, %v1554_v40  ;;  %v1556_v46 = vpop.f32.mrf.mxu1 }
 0x278   : > { %v1557_v49 = vadd.f32 %v1556_v46, %v1467_v45 }
 0x279   : > { %v1732_v47 = vadd.f32 %v1731_v42, %v1643_v43 }
 0x27b   : > { %v1768_v48 = vadd.f32 %v1732_v47, %v740_v44 }
 0x27d   : > { %1800 = vst [vmem:[%s3369_s1 + $0xe8] sm:$0xff] %v1768_v48 }
 0x27e   : > { %v1645_v50 = vpop.f32.mrf.mxu2  ;;  %v1469_v55 = vpop.f32.mrf.mxu0 }
 0x27f   : > { %v1734_v51 = vpop.f32.mrf.mxu3  ;;  %v1646_v52 = vadd.f32 %v1645_v50, %v1557_v49  ;;  %v1558_v56 = vpop.f32.mrf.mxu1 }
 0x280   : > { %v1559_v58 = vadd.f32 %v1558_v56, %v1469_v55 }
 0x281   : > { %v1735_v54 = vadd.f32 %v1734_v51, %v1646_v52 }
 0x283   : > { %v1769_v57 = vadd.f32 %v1735_v54, %v741_v53 }
 0x285   : > { %1801 = vst [vmem:[%s3369_s1 + $0xf0] sm:$0xff] %v1769_v57 }
 0x286   : > { %v1647_v59 = vpop.f32.mrf.mxu2 }
 0x287   : > { %v1648_v60 = vadd.f32 %v1647_v59, %v1559_v58  ;;  %v1736_v62 = vpop.f32.mrf.mxu3 }
 0x289   : > { %v1737_v63 = vadd.f32 %v1736_v62, %v1648_v60  ;;  %1806 = sbr.rel (%p2618_p6) target bundleno = 692 (0x2b4), region = 104 }
 0x28b   : > { %v1770_v0 = vadd.f32 %v1737_v63, %v742_v61 }
 0x28d   : > { %1802 = vst [vmem:[%s3369_s1 + $0xf8] sm:$0xff] %v1770_v0 }
 0x28e   : > { %v1807_v1 = vld [vmem:[%s3369_s1] sm:$0xff]  ;;  %v1808_v3 = vld [vmem:[%s3369_s1 + $0x8] sm:$0xff]  ;;  %v1809_v4 = vld [vmem:[%s3369_s1 + $0x10] sm:$0xff] }
 0x28f   : > { %v3635_v2 = vld [vmem:[%s673_s10] ss:$0 sm:$0xff]  ;;  %v1810_v5 = vld [vmem:[%s3369_s1 + $0x18] sm:$0xff]  ;;  %v1812_v11 = vld [vmem:[%s3369_s1 + $0x28] sm:$0xff] }
 0x290   : > { %v1843_v6 = vadd.f32 %v3635_v2, %v1807_v1  ;;  %v1844_v7 = vadd.f32 %v3635_v2, %v1808_v3  ;;  %v1845_v8 = vadd.f32 %v3635_v2, %v1809_v4  ;;  %v1846_v9 = vadd.f32 %v3635_v2, %v1810_v5  ;;  %v1811_v10 = vld [vmem:[%s3369_s1 + $0x20] sm:$0xff]  ;;  %v1813_v12 = vld [vmem:[%s3369_s1 + $0x30] sm:$0xff]  ;;  %v1814_v15 = vld [vmem:[%s3369_s1 + $0x38] sm:$0xff] }
 0x291   : > { %v1847_v13 = vadd.f32 %v3635_v2, %v1811_v10  ;;  %v1848_v14 = vadd.f32 %v3635_v2, %v1812_v11  ;;  %v1815_v16 = vld [vmem:[%s3369_s1 + $0x40] sm:$0xff]  ;;  %v1849_v20 = vadd.f32 %v3635_v2, %v1813_v12  ;;  %v1816_v21 = vld [vmem:[%s3369_s1 + $0x48] sm:$0xff]  ;;  %v1850_v23 = vadd.f32 %v3635_v2, %v1814_v15  ;;  %v1817_v24 = vld [vmem:[%s3369_s1 + $0x50] sm:$0xff] }
 0x292   : > { %v1875_v17 = vmax.f32 %v1843_v6, 0.0  ;;  %v1876_v18 = vmax.f32 %v1844_v7, 0.0  ;;  %v1877_v19 = vmax.f32 %v1845_v8, 0.0  ;;  %v1878_v22 = vmax.f32 %v1846_v9, 0.0  ;;  %v1818_v27 = vld [vmem:[%s3369_s1 + $0x58] sm:$0xff]  ;;  %v1819_v30 = vld [vmem:[%s3369_s1 + $0x60] sm:$0xff] }
 0x293   : > { %v1879_v25 = vmax.f32 %v1847_v13, 0.0  ;;  %v1851_v26 = vadd.f32 %v3635_v2, %v1815_v16  ;;  %v1880_v28 = vmax.f32 %v1848_v14, 0.0  ;;  %v1852_v29 = vadd.f32 %v3635_v2, %v1816_v21  ;;  %v1820_v33 = vld [vmem:[%s3369_s1 + $0x68] sm:$0xff]  ;;  %v1821_v36 = vld [vmem:[%s3369_s1 + $0x70] sm:$0xff]  ;;  %v1822_v39 = vld [vmem:[%s3369_s1 + $0x78] sm:$0xff] }
 0x294   : > { %1907 = vst [vmem:[%s3369_s1] sm:$0xff] %v1875_v17  ;;  %v1881_v31 = vmax.f32 %v1849_v20, 0.0  ;;  %v1853_v32 = vadd.f32 %v3635_v2, %v1817_v24  ;;  %v1882_v34 = vmax.f32 %v1850_v23, 0.0  ;;  %v1854_v35 = vadd.f32 %v3635_v2, %v1818_v27  ;;  %v1823_v42 = vld [vmem:[%s3369_s1 + $0x80] sm:$0xff]  ;;  %v1824_v45 = vld [vmem:[%s3369_s1 + $0x88] sm:$0xff]  ;;  %v1825_v48 = vld [vmem:[%s3369_s1 + $0x90] sm:$0xff] }
 0x295   : > { %1908 = vst [vmem:[%s3369_s1 + $0x8] sm:$0xff] %v1876_v18  ;;  %v1883_v37 = vmax.f32 %v1851_v26, 0.0  ;;  %v1855_v38 = vadd.f32 %v3635_v2, %v1819_v30  ;;  %v1884_v40 = vmax.f32 %v1852_v29, 0.0  ;;  %v1856_v41 = vadd.f32 %v3635_v2, %v1820_v33  ;;  %v1826_v51 = vld [vmem:[%s3369_s1 + $0x98] sm:$0xff]  ;;  %v1827_v54 = vld [vmem:[%s3369_s1 + $0xa0] sm:$0xff]  ;;  %v1828_v57 = vld [vmem:[%s3369_s1 + $0xa8] sm:$0xff] }
 0x296   : > { %1909 = vst [vmem:[%s3369_s1 + $0x10] sm:$0xff] %v1877_v19  ;;  %v1885_v43 = vmax.f32 %v1853_v32, 0.0  ;;  %v1857_v44 = vadd.f32 %v3635_v2, %v1821_v36  ;;  %v1886_v46 = vmax.f32 %v1854_v35, 0.0  ;;  %v1858_v47 = vadd.f32 %v3635_v2, %v1822_v39  ;;  %v1829_v60 = vld [vmem:[%s3369_s1 + $0xb0] sm:$0xff]  ;;  %v1830_v63 = vld [vmem:[%s3369_s1 + $0xb8] sm:$0xff]  ;;  %v1831_v3 = vld [vmem:[%s3369_s1 + $0xc0] sm:$0xff] }
 0x297   : > { %1910 = vst [vmem:[%s3369_s1 + $0x18] sm:$0xff] %v1878_v22  ;;  %v1887_v49 = vmax.f32 %v1855_v38, 0.0  ;;  %v1859_v50 = vadd.f32 %v3635_v2, %v1823_v42  ;;  %v1888_v52 = vmax.f32 %v1856_v41, 0.0  ;;  %v1860_v53 = vadd.f32 %v3635_v2, %v1824_v45  ;;  %v1832_v6 = vld [vmem:[%s3369_s1 + $0xc8] sm:$0xff]  ;;  %v1833_v9 = vld [vmem:[%s3369_s1 + $0xd0] sm:$0xff]  ;;  %v1834_v12 = vld [vmem:[%s3369_s1 + $0xd8] sm:$0xff] }
 0x298   : > { %1911 = vst [vmem:[%s3369_s1 + $0x20] sm:$0xff] %v1879_v25  ;;  %v1889_v55 = vmax.f32 %v1857_v44, 0.0  ;;  %v1861_v56 = vadd.f32 %v3635_v2, %v1825_v48  ;;  %v1890_v58 = vmax.f32 %v1858_v47, 0.0  ;;  %v1862_v59 = vadd.f32 %v3635_v2, %v1826_v51  ;;  %v1835_v15 = vld [vmem:[%s3369_s1 + $0xe0] sm:$0xff]  ;;  %v1836_v18 = vld [vmem:[%s3369_s1 + $0xe8] sm:$0xff]  ;;  %v1837_v21 = vld [vmem:[%s3369_s1 + $0xf0] sm:$0xff] }
 0x299   : > { %1912 = vst [vmem:[%s3369_s1 + $0x28] sm:$0xff] %v1880_v28  ;;  %v1891_v61 = vmax.f32 %v1859_v50, 0.0  ;;  %v1863_v62 = vadd.f32 %v3635_v2, %v1827_v54  ;;  %v1892_v0 = vmax.f32 %v1860_v53, 0.0  ;;  %v1864_v1 = vadd.f32 %v3635_v2, %v1828_v57  ;;  %v1838_v24 = vld [vmem:[%s3369_s1 + $0xf8] sm:$0xff] }
 0x29a   : > { %1913 = vst [vmem:[%s3369_s1 + $0x30] sm:$0xff] %v1881_v31  ;;  %v1893_v4 = vmax.f32 %v1861_v56, 0.0  ;;  %v1865_v5 = vadd.f32 %v3635_v2, %v1829_v60  ;;  %v1894_v7 = vmax.f32 %v1862_v59, 0.0  ;;  %v1866_v8 = vadd.f32 %v3635_v2, %v1830_v63 }
 0x29b   : > { %1914 = vst [vmem:[%s3369_s1 + $0x38] sm:$0xff] %v1882_v34  ;;  %v1895_v10 = vmax.f32 %v1863_v62, 0.0  ;;  %v1867_v11 = vadd.f32 %v3635_v2, %v1831_v3  ;;  %v1896_v13 = vmax.f32 %v1864_v1, 0.0  ;;  %v1868_v14 = vadd.f32 %v3635_v2, %v1832_v6 }
 0x29c   : > { %1915 = vst [vmem:[%s3369_s1 + $0x40] sm:$0xff] %v1883_v37  ;;  %v1897_v16 = vmax.f32 %v1865_v5, 0.0  ;;  %v1869_v17 = vadd.f32 %v3635_v2, %v1833_v9  ;;  %v1898_v19 = vmax.f32 %v1866_v8, 0.0  ;;  %v1870_v20 = vadd.f32 %v3635_v2, %v1834_v12 }
 0x29d   : > { %1916 = vst [vmem:[%s3369_s1 + $0x48] sm:$0xff] %v1884_v40  ;;  %v1899_v22 = vmax.f32 %v1867_v11, 0.0  ;;  %v1871_v23 = vadd.f32 %v3635_v2, %v1835_v15  ;;  %v1900_v25 = vmax.f32 %v1868_v14, 0.0  ;;  %v1872_v26 = vadd.f32 %v3635_v2, %v1836_v18 }
 0x29e   : > { %1917 = vst [vmem:[%s3369_s1 + $0x50] sm:$0xff] %v1885_v43  ;;  %v1901_v27 = vmax.f32 %v1869_v17, 0.0  ;;  %v1873_v28 = vadd.f32 %v3635_v2, %v1837_v21  ;;  %v1902_v29 = vmax.f32 %v1870_v20, 0.0  ;;  %v1874_v30 = vadd.f32 %v3635_v2, %v1838_v24 }
 0x29f   : > { %1918 = vst [vmem:[%s3369_s1 + $0x58] sm:$0xff] %v1886_v46  ;;  %v1903_v31 = vmax.f32 %v1871_v23, 0.0  ;;  %v1904_v32 = vmax.f32 %v1872_v26, 0.0 }
 0x2a0   : > { %1919 = vst [vmem:[%s3369_s1 + $0x60] sm:$0xff] %v1887_v49  ;;  %v1905_v33 = vmax.f32 %v1873_v28, 0.0  ;;  %v1906_v34 = vmax.f32 %v1874_v30, 0.0 }
 0x2a1   : > { %1920 = vst [vmem:[%s3369_s1 + $0x68] sm:$0xff] %v1888_v52 }
 0x2a2   : > { %1921 = vst [vmem:[%s3369_s1 + $0x70] sm:$0xff] %v1889_v55 }
 0x2a3   : > { %1922 = vst [vmem:[%s3369_s1 + $0x78] sm:$0xff] %v1890_v58 }
 0x2a4   : > { %1923 = vst [vmem:[%s3369_s1 + $0x80] sm:$0xff] %v1891_v61 }
 0x2a5   : > { %1924 = vst [vmem:[%s3369_s1 + $0x88] sm:$0xff] %v1892_v0 }
 0x2a6   : > { %1925 = vst [vmem:[%s3369_s1 + $0x90] sm:$0xff] %v1893_v4 }
 0x2a7   : > { %1926 = vst [vmem:[%s3369_s1 + $0x98] sm:$0xff] %v1894_v7 }
 0x2a8   : > { %1927 = vst [vmem:[%s3369_s1 + $0xa0] sm:$0xff] %v1895_v10 }
 0x2a9   : > { %1928 = vst [vmem:[%s3369_s1 + $0xa8] sm:$0xff] %v1896_v13 }
 0x2aa   : > { %1929 = vst [vmem:[%s3369_s1 + $0xb0] sm:$0xff] %v1897_v16 }
 0x2ab   : > { %1930 = vst [vmem:[%s3369_s1 + $0xb8] sm:$0xff] %v1898_v19 }
 0x2ac   : > { %1931 = vst [vmem:[%s3369_s1 + $0xc0] sm:$0xff] %v1899_v22 }
 0x2ad   : > { %1932 = vst [vmem:[%s3369_s1 + $0xc8] sm:$0xff] %v1900_v25 }
 0x2ae   : > { %1933 = vst [vmem:[%s3369_s1 + $0xd0] sm:$0xff] %v1901_v27 }
 0x2af   : > { %1934 = vst [vmem:[%s3369_s1 + $0xd8] sm:$0xff] %v1902_v29 }
 0x2b0   : > { %1935 = vst [vmem:[%s3369_s1 + $0xe0] sm:$0xff] %v1903_v31 }
 0x2b1   : > { %1936 = vst [vmem:[%s3369_s1 + $0xe8] sm:$0xff] %v1904_v32 }
 0x2b2   : > { %1937 = vst [vmem:[%s3369_s1 + $0xf0] sm:$0xff] %v1905_v33 }
 0x2b3   : > { %1938 = vst [vmem:[%s3369_s1 + $0xf8] sm:$0xff] %v1906_v34 }
 0x2b4 PF: > { %1945 = sbr.rel (!%p3067_p13) target bundleno = 734 (0x2de), region = 108  ;;  %s3868_s14 = sld [smem:[#allocation5_spill]] (%p3067_p13)  ;;  %v2041_v2 = vld [vmem:[%s3369_s1] sm:$0xff] (%p3067_p13)  ;;  %v2043_v35 = vld [vmem:[%s3369_s1 + $0x8] sm:$0xff] (%p3067_p13)  ;;  %v2045_v36 = vld [vmem:[%s3369_s1 + $0x10] sm:$0xff] (%p3067_p13) }
 0x2b5   : > { %s3869_s20 = sld [smem:[#allocation10_spill]] (%p3067_p13)  ;;  %v2047_v37 = vld [vmem:[%s3369_s1 + $0x18] sm:$0xff] (%p3067_p13)  ;;  %v2049_v38 = vld [vmem:[%s3369_s1 + $0x20] sm:$0xff] (%p3067_p13)  ;;  %v2051_v39 = vld [vmem:[%s3369_s1 + $0x28] sm:$0xff] (%p3067_p13) }
 0x2b6   : > { %v2053_v40 = vld [vmem:[%s3369_s1 + $0x30] sm:$0xff] (%p3067_p13)  ;;  %v2055_v41 = vld [vmem:[%s3369_s1 + $0x38] sm:$0xff] (%p3067_p13)  ;;  %v2057_v42 = vld [vmem:[%s3369_s1 + $0x40] sm:$0xff] (%p3067_p13) }
 0x2b7   : > { %v2059_v43 = vld [vmem:[%s3369_s1 + $0x48] sm:$0xff] (%p3067_p13)  ;;  %v2061_v44 = vld [vmem:[%s3369_s1 + $0x50] sm:$0xff] (%p3067_p13)  ;;  %v2063_v45 = vld [vmem:[%s3369_s1 + $0x58] sm:$0xff] (%p3067_p13) }
 0x2b8   : > { %v2065_v46 = vld [vmem:[%s3369_s1 + $0x60] sm:$0xff] (%p3067_p13)  ;;  %v2067_v47 = vld [vmem:[%s3369_s1 + $0x68] sm:$0xff] (%p3067_p13)  ;;  %v2069_v48 = vld [vmem:[%s3369_s1 + $0x70] sm:$0xff] (%p3067_p13) }
 0x2b9   : > { %v2071_v49 = vld [vmem:[%s3369_s1 + $0x78] sm:$0xff]  ;;  %v2073_v50 = vld [vmem:[%s3369_s1 + $0x80] sm:$0xff]  ;;  %v2075_v51 = vld [vmem:[%s3369_s1 + $0x88] sm:$0xff] }
 0x2ba   : > { %s2722_s16 = sshll.u32 %s3868_s14, 6  ;;  %v2077_v52 = vld [vmem:[%s3369_s1 + $0x90] sm:$0xff]  ;;  %v2079_v53 = vld [vmem:[%s3369_s1 + $0x98] sm:$0xff]  ;;  %v2081_v54 = vld [vmem:[%s3369_s1 + $0xa0] sm:$0xff] }
 0x2bb   : > { %s1948_s18 = sadd.s32 %s2912_s19, %s2722_s16  ;;  %v2083_v55 = vld [vmem:[%s3369_s1 + $0xa8] sm:$0xff]  ;;  %v2085_v56 = vld [vmem:[%s3369_s1 + $0xb0] sm:$0xff]  ;;  %v2087_v57 = vld [vmem:[%s3369_s1 + $0xb8] sm:$0xff] }
 0x2bc   : > { %s2622_s11 = sshll.u32 %s1948_s18, 3  ;;  %v2089_v58 = vld [vmem:[%s3369_s1 + $0xc0] sm:$0xff]  ;;  %v2091_v59 = vld [vmem:[%s3369_s1 + $0xc8] sm:$0xff]  ;;  %v2093_v60 = vld [vmem:[%s3369_s1 + $0xd0] sm:$0xff] }
 0x2bd   : > { %s3741_s26 = scalar_lea.vmem %s3869_s20, %s2622_s11  ;;  %v2095_v61 = vld [vmem:[%s3369_s1 + $0xd8] sm:$0xff]  ;;  %v2097_v62 = vld [vmem:[%s3369_s1 + $0xe0] sm:$0xff]  ;;  %v2099_v63 = vld [vmem:[%s3369_s1 + $0xe8] sm:$0xff] }
 0x2be   : > { %2042 = vst [vmem:[%s3741_s26] sm:$0xff] %v2041_v2  ;;  %v2101_v0 = vld [vmem:[%s3369_s1 + $0xf0] sm:$0xff]  ;;  %v2103_v1 = vld [vmem:[%s3369_s1 + $0xf8] sm:$0xff] }
 0x2bf   : > { %2044 = vst [vmem:[%s3741_s26 + $0x10] sm:$0xff] %v2043_v35 }
 0x2c0   : > { %2046 = vst [vmem:[%s3741_s26 + $0x20] sm:$0xff] %v2045_v36 }
 0x2c1   : > { %2048 = vst [vmem:[%s3741_s26 + $0x30] sm:$0xff] %v2047_v37 }
 0x2c2   : > { %2050 = vst [vmem:[%s3741_s26 + $0x40] sm:$0xff] %v2049_v38 }
 0x2c3   : > { %2052 = vst [vmem:[%s3741_s26 + $0x50] sm:$0xff] %v2051_v39 }
 0x2c4   : > { %2054 = vst [vmem:[%s3741_s26 + $0x60] sm:$0xff] %v2053_v40 }
 0x2c5   : > { %2056 = vst [vmem:[%s3741_s26 + $0x70] sm:$0xff] %v2055_v41 }
 0x2c6   : > { %2058 = vst [vmem:[%s3741_s26 + $0x80] sm:$0xff] %v2057_v42 }
 0x2c7   : > { %2060 = vst [vmem:[%s3741_s26 + $0x90] sm:$0xff] %v2059_v43 }
 0x2c8   : > { %2062 = vst [vmem:[%s3741_s26 + $0xa0] sm:$0xff] %v2061_v44 }
 0x2c9   : > { %2064 = vst [vmem:[%s3741_s26 + $0xb0] sm:$0xff] %v2063_v45 }
 0x2ca   : > { %2066 = vst [vmem:[%s3741_s26 + $0xc0] sm:$0xff] %v2065_v46 }
 0x2cb   : > { %2068 = vst [vmem:[%s3741_s26 + $0xd0] sm:$0xff] %v2067_v47 }
 0x2cc   : > { %2070 = vst [vmem:[%s3741_s26 + $0xe0] sm:$0xff] %v2069_v48 }
 0x2cd   : > { %2072 = vst [vmem:[%s3741_s26 + $0xf0] sm:$0xff] %v2071_v49 }
 0x2ce   : > { %2074 = vst [vmem:[%s3741_s26 + $0x100] sm:$0xff] %v2073_v50 }
 0x2cf   : > { %2076 = vst [vmem:[%s3741_s26 + $0x110] sm:$0xff] %v2075_v51 }
 0x2d0   : > { %2078 = vst [vmem:[%s3741_s26 + $0x120] sm:$0xff] %v2077_v52 }
 0x2d1   : > { %2080 = vst [vmem:[%s3741_s26 + $0x130] sm:$0xff] %v2079_v53 }
 0x2d2   : > { %2082 = vst [vmem:[%s3741_s26 + $0x140] sm:$0xff] %v2081_v54 }
 0x2d3   : > { %2084 = vst [vmem:[%s3741_s26 + $0x150] sm:$0xff] %v2083_v55 }
 0x2d4   : > { %2086 = vst [vmem:[%s3741_s26 + $0x160] sm:$0xff] %v2085_v56 }
 0x2d5   : > { %2088 = vst [vmem:[%s3741_s26 + $0x170] sm:$0xff] %v2087_v57 }
 0x2d6   : > { %2090 = vst [vmem:[%s3741_s26 + $0x180] sm:$0xff] %v2089_v58 }
 0x2d7   : > { %2092 = vst [vmem:[%s3741_s26 + $0x190] sm:$0xff] %v2091_v59 }
 0x2d8   : > { %2094 = vst [vmem:[%s3741_s26 + $0x1a0] sm:$0xff] %v2093_v60 }
 0x2d9   : > { %2096 = vst [vmem:[%s3741_s26 + $0x1b0] sm:$0xff] %v2095_v61 }
 0x2da   : > { %2098 = vst [vmem:[%s3741_s26 + $0x1c0] sm:$0xff] %v2097_v62 }
 0x2db   : > { %2100 = vst [vmem:[%s3741_s26 + $0x1d0] sm:$0xff] %v2099_v63 }
 0x2dc   : > { %2102 = vst [vmem:[%s3741_s26 + $0x1e0] sm:$0xff] %v2101_v0 }
 0x2dd   : > { %2104 = vst [vmem:[%s3741_s26 + $0x1f0] sm:$0xff] %v2103_v1 }
 0x2de PF: > { %s13_s24 = sadd.s32 1, %s2932_s24   ;;  %s3871_s1 = sld [smem:[#allocation6_spill]] }
 0x2df   : > { %p3806_p7 = scmp.ge.s32.totalorder %s13_s24, 72   ;;  %s3872_s27 = sld [smem:[#allocation7_spill]] }
 0x2e0   : > { %s3874_s12 = smov %s2888_s13  ;;  %s3875_s13 = smov %s3065_s7 }
 0x2e1   : > { %s3876_s14 = smov %s2896_s15  ;;  %s3877_s15 = smov %s3052_s9 }
 0x2e2   : > { %s3878_s16 = smov %s2904_s17  ;;  %s3879_s17 = smov %s3062_s3 }
 0x2e3   : > { %s3880_s18 = smov %s2920_s21  ;;  %s3881_s19 = smov %s2924_s22 }
 0x2e4   : > { %s3882_s20 = smov %s2928_s23  ;;  %s3883_s21 = smov %s3871_s1 }
 0x2e5   : > { %s3884_s22 = smov %s3872_s27  ;;  %s3885_s23 = smov %s3895_s28 }
 0x2e6   :  { %12 = sbr.rel (!%p3806_p7) target bundleno = 11 (0xb), region = 188 }

// kernel: _siamese_forward.8
= control target key start
LH: loop header
LB: loop body
LE: loop exit
PB: predicated region body
PF: predicated region fallthrough
CT: control target
= control target key end

     0   :  { %s3778_s0 = inlined_call_operand.vmem [shape: bf16[256,2560], index: 0, kind: input, shape index: {}]   ;;  %s3779_s1 = inlined_call_operand.vmem [shape: bf16[2560,384], index: 1, kind: input, shape index: {}]   ;;  %s3780_s2 = inlined_call_operand.vmem [shape: f32[1,384], index: 2, kind: input, shape index: {}]   ;;  %s3781_s3 = inlined_call_operand.vmem [shape: f32[256,384], index: 3, kind: output, shape index: {}]  }
   0x1   :  { %3783 = sst [smem:[#allocation6_spill]] %s3778_s0 }
   0x2   :  { %3784 = sst [smem:[#allocation7_spill]] %s3779_s1 }
   0x3   :  { %s2915_s12 = smov 0   ;;  %s2917_s13 = smov 0  }
   0x4   :  { %s2919_s14 = smov 0   ;;  %s2921_s15 = smov 0  }
   0x5   :  { %s2923_s16 = smov 0   ;;  %s2925_s17 = smov 0  }
   0x6   :  { %s2927_s18 = smov 0   ;;  %s2929_s19 = smov 0  }
   0x7   :  { %s2931_s20 = smov 0   ;;  %s2933_s21 = smov 0  }
   0x8   :  { %s2935_s22 = smov 0  }
   0x9 LB: > { %s2213_s23 = sadd.s32 4294967295, %s2892_s22   ;;  %s25_s24 = sadd.s32 1, %s2884_s20  ;;  %s2892_s22 = sphi %s2935_s22, %s13_s22   ;;  %s2888_s21 = sphi %s2933_s21, %s3801_s21   ;;  %s2884_s20 = sphi %s2931_s20, %s3800_s20   ;;  %s2880_s19 = sphi %s2929_s19, %s3799_s19   ;;  %s2876_s18 = sphi %s2927_s18, %s3798_s18   ;;  %s2872_s17 = sphi %s2925_s17, %s3797_s17   ;;  %s2868_s16 = sphi %s2923_s16, %s3796_s16   ;;  %s2864_s15 = sphi %s2921_s15, %s3795_s15   ;;  %s2860_s14 = sphi %s2919_s14, %s3794_s14   ;;  %s2856_s13 = sphi %s2917_s13, %s3793_s13   ;;  %s2852_s12 = sphi %s2915_s12, %s3792_s12  }
   0xa   : > { %p26_p0 = scmp.ge.s32.totalorder %s25_s24, 5  ;;  %s28_s25 = sadd.s32 1, %s2888_s21 }
   0xb   : > { %s41_s26 = sadd.s32 1, %s2872_s17  ;;  %p48_p1 = scmp.ne.s32.totalorder %s2872_s17, %s2868_s16 }
   0xc   : > { %s3803_s24 = smov (%p26_p0, %s25_s24), 0  ;;  %s3805_s25 = smov (!%p26_p0, %s28_s25), %s2888_s21 }
   0xd   : > { %s37_s27 = ssub.s32 %s2884_s20, %s3803_s24  ;;  %p49_p2 = scmp.eq.s32.totalorder %s2892_s22, 0 }
   0xe   : > { %p30_p3 = scmp.ge.s32.totalorder %s3805_s25, 3  ;;  %p39_p4 = scmp.eq.s32.totalorder %s37_s27, 0 }
   0xf   : > { %p2982_p5 = por %p49_p2, %p48_p1  ;;  %s69_s29 = sadd.s32 1, %s2864_s15 }
  0x10   : > { %s3807_s25 = smov (%p30_p3, %s3805_s25), 0  ;;  %p76_p6 = scmp.ne.s32.totalorder %s2864_s15, %s2860_s14 }
  0x11   : > { %3786 = sst [smem:[#allocation5_spill]] %s3807_s25  ;;  %s65_s4 = ssub.s32 %s2888_s21, %s3807_s25 }
  0x12   : > { %s2990_s30 = scalar_select %p39_p4, %s2872_s17, %s41_s26  }
  0x13   : > { %s66_s5 = sor.u32 %s65_s4, %s37_s27  ;;  %p121_p7 = scmp.eq.s32.totalorder %s65_s4, 0 }
  0x14   : > { %p67_p8 = scmp.eq.s32.totalorder %s66_s5, 0  ;;  %p2996_p9 = por %p76_p6, %p49_p2 }
  0x15   : > { %s123_s7 = sadd.s32 1, %s2856_s13  ;;  %p133_p10 = scmp.ne.s32.totalorder %s2856_s13, %s2852_s12 }
  0x16   : > { %s3004_s8 = scalar_select %p67_p8, %s2864_s15, %s69_s29  }
  0x17   : > { %s3007_s9 = scalar_select %p121_p7, %s2856_s13, %s123_s7  }
  0x18   : > { %p134_p11 = scmp.eq.s32.totalorder %s2213_s23, 14  ;;  %p2216_p13 = scmp.ge.s32.totalorder %s2892_s22, 15 }
  0x1a   : > { %p3009_p12 = por %p134_p11, %p133_p10  ;;  %156 = sbr.rel (%p2216_p13) target bundleno = 179 (0xb3), region = 16 }
  0x1f   : > { %159 = sbr.rel (!%p2982_p5) target bundleno = 105 (0x69), region = 20  ;;  %s161_s11 = sand.u32 (%p2982_p5), 1, %s2872_s17  }
  0x20   : > { %s2618_s26 = sshll.u32 (%p2982_p5), %s2884_s20, 4  ;;  %s2217_s27 = sshll.u32 (%p2982_p5), %s161_s11, 9 }
  0x21   : > { %s3789_s0 = sld [smem:[#allocation6_spill]] (%p2982_p5)  ;;  %s3026_s23 = scalar_lea.vmem (%p2982_p5), [#allocation2], %s2217_s27 }
  0x27   : > { %s3021_s5 = scalar_lea.vmem %s3789_s0, %s2618_s26 }
  0x28   : > { %v182_v0 = vld [vmem:[%s3021_s5] sm:$0xff]  ;;  %v184_v1 = vld [vmem:[%s3021_s5 + $0x8] sm:$0xff]  ;;  %v186_v2 = vld [vmem:[%s3021_s5 + $0x50] sm:$0xff] }
  0x29   : > { %183 = vst [vmem:[%s3026_s23] sm:$0xff] %v182_v0  ;;  %v188_v3 = vld [vmem:[%s3021_s5 + $0x58] sm:$0xff]  ;;  %v190_v4 = vld [vmem:[%s3021_s5 + $0xa0] sm:$0xff]  ;;  %v192_v5 = vld [vmem:[%s3021_s5 + $0xa8] sm:$0xff] }
  0x2a   : > { %185 = vst [vmem:[%s3026_s23 + $0x8] sm:$0xff] %v184_v1  ;;  %v194_v6 = vld [vmem:[%s3021_s5 + $0xf0] sm:$0xff]  ;;  %v196_v7 = vld [vmem:[%s3021_s5 + $0xf8] sm:$0xff]  ;;  %v198_v8 = vld [vmem:[%s3021_s5 + $0x140] sm:$0xff] }
  0x2b   : > { %187 = vst [vmem:[%s3026_s23 + $0x10] sm:$0xff] %v186_v2  ;;  %v200_v9 = vld [vmem:[%s3021_s5 + $0x148] sm:$0xff]  ;;  %v202_v10 = vld [vmem:[%s3021_s5 + $0x190] sm:$0xff]  ;;  %v204_v11 = vld [vmem:[%s3021_s5 + $0x198] sm:$0xff] }
  0x2c   : > { %189 = vst [vmem:[%s3026_s23 + $0x18] sm:$0xff] %v188_v3  ;;  %v206_v12 = vld [vmem:[%s3021_s5 + $0x1e0] sm:$0xff]  ;;  %v208_v13 = vld [vmem:[%s3021_s5 + $0x1e8] sm:$0xff]  ;;  %v210_v14 = vld [vmem:[%s3021_s5 + $0x230] sm:$0xff] }
  0x2d   : > { %191 = vst [vmem:[%s3026_s23 + $0x20] sm:$0xff] %v190_v4  ;;  %v212_v15 = vld [vmem:[%s3021_s5 + $0x238] sm:$0xff]  ;;  %v214_v16 = vld [vmem:[%s3021_s5 + $0x280] sm:$0xff]  ;;  %v216_v17 = vld [vmem:[%s3021_s5 + $0x288] sm:$0xff] }
  0x2e   : > { %193 = vst [vmem:[%s3026_s23 + $0x28] sm:$0xff] %v192_v5  ;;  %v218_v18 = vld [vmem:[%s3021_s5 + $0x2d0] sm:$0xff]  ;;  %v220_v19 = vld [vmem:[%s3021_s5 + $0x2d8] sm:$0xff]  ;;  %v222_v20 = vld [vmem:[%s3021_s5 + $0x320] sm:$0xff] }
  0x2f   : > { %195 = vst [vmem:[%s3026_s23 + $0x30] sm:$0xff] %v194_v6  ;;  %v224_v21 = vld [vmem:[%s3021_s5 + $0x328] sm:$0xff]  ;;  %v226_v22 = vld [vmem:[%s3021_s5 + $0x370] sm:$0xff]  ;;  %v228_v23 = vld [vmem:[%s3021_s5 + $0x378] sm:$0xff] }
  0x30   : > { %197 = vst [vmem:[%s3026_s23 + $0x38] sm:$0xff] %v196_v7  ;;  %v230_v24 = vld [vmem:[%s3021_s5 + $0x3c0] sm:$0xff]  ;;  %v232_v25 = vld [vmem:[%s3021_s5 + $0x3c8] sm:$0xff]  ;;  %v234_v26 = vld [vmem:[%s3021_s5 + $0x410] sm:$0xff] }
  0x31   : > { %199 = vst [vmem:[%s3026_s23 + $0x40] sm:$0xff] %v198_v8  ;;  %v236_v27 = vld [vmem:[%s3021_s5 + $0x418] sm:$0xff]  ;;  %v238_v28 = vld [vmem:[%s3021_s5 + $0x460] sm:$0xff]  ;;  %v240_v29 = vld [vmem:[%s3021_s5 + $0x468] sm:$0xff] }
  0x32   : > { %201 = vst [vmem:[%s3026_s23 + $0x48] sm:$0xff] %v200_v9  ;;  %v242_v30 = vld [vmem:[%s3021_s5 + $0x4b0] sm:$0xff]  ;;  %v244_v31 = vld [vmem:[%s3021_s5 + $0x4b8] sm:$0xff]  ;;  %v246_v32 = vld [vmem:[%s3021_s5 + $0x500] sm:$0xff] }
  0x33   : > { %203 = vst [vmem:[%s3026_s23 + $0x50] sm:$0xff] %v202_v10  ;;  %v248_v33 = vld [vmem:[%s3021_s5 + $0x508] sm:$0xff]  ;;  %v250_v34 = vld [vmem:[%s3021_s5 + $0x550] sm:$0xff]  ;;  %v252_v35 = vld [vmem:[%s3021_s5 + $0x558] sm:$0xff] }
  0x34   : > { %205 = vst [vmem:[%s3026_s23 + $0x58] sm:$0xff] %v204_v11  ;;  %v254_v36 = vld [vmem:[%s3021_s5 + $0x5a0] sm:$0xff]  ;;  %v256_v37 = vld [vmem:[%s3021_s5 + $0x5a8] sm:$0xff]  ;;  %v258_v38 = vld [vmem:[%s3021_s5 + $0x5f0] sm:$0xff] }
  0x35   : > { %207 = vst [vmem:[%s3026_s23 + $0x60] sm:$0xff] %v206_v12  ;;  %v260_v39 = vld [vmem:[%s3021_s5 + $0x5f8] sm:$0xff]  ;;  %v262_v40 = vld [vmem:[%s3021_s5 + $0x640] sm:$0xff]  ;;  %v264_v41 = vld [vmem:[%s3021_s5 + $0x648] sm:$0xff] }
  0x36   : > { %209 = vst [vmem:[%s3026_s23 + $0x68] sm:$0xff] %v208_v13  ;;  %v266_v42 = vld [vmem:[%s3021_s5 + $0x690] sm:$0xff]  ;;  %v268_v43 = vld [vmem:[%s3021_s5 + $0x698] sm:$0xff]  ;;  %v270_v44 = vld [vmem:[%s3021_s5 + $0x6e0] sm:$0xff] }
  0x37   : > { %211 = vst [vmem:[%s3026_s23 + $0x70] sm:$0xff] %v210_v14  ;;  %v272_v45 = vld [vmem:[%s3021_s5 + $0x6e8] sm:$0xff]  ;;  %v274_v46 = vld [vmem:[%s3021_s5 + $0x730] sm:$0xff]  ;;  %v276_v47 = vld [vmem:[%s3021_s5 + $0x738] sm:$0xff] }
  0x38   : > { %213 = vst [vmem:[%s3026_s23 + $0x78] sm:$0xff] %v212_v15  ;;  %v278_v48 = vld [vmem:[%s3021_s5 + $0x780] sm:$0xff]  ;;  %v280_v49 = vld [vmem:[%s3021_s5 + $0x788] sm:$0xff]  ;;  %v282_v50 = vld [vmem:[%s3021_s5 + $0x7d0] sm:$0xff] }
  0x39   : > { %215 = vst [vmem:[%s3026_s23 + $0x80] sm:$0xff] %v214_v16  ;;  %v284_v51 = vld [vmem:[%s3021_s5 + $0x7d8] sm:$0xff]  ;;  %v286_v52 = vld [vmem:[%s3021_s5 + $0x820] sm:$0xff]  ;;  %v288_v53 = vld [vmem:[%s3021_s5 + $0x828] sm:$0xff] }
  0x3a   : > { %217 = vst [vmem:[%s3026_s23 + $0x88] sm:$0xff] %v216_v17  ;;  %v290_v54 = vld [vmem:[%s3021_s5 + $0x870] sm:$0xff]  ;;  %v292_v55 = vld [vmem:[%s3021_s5 + $0x878] sm:$0xff]  ;;  %v294_v56 = vld [vmem:[%s3021_s5 + $0x8c0] sm:$0xff] }
  0x3b   : > { %219 = vst [vmem:[%s3026_s23 + $0x90] sm:$0xff] %v218_v18  ;;  %v296_v57 = vld [vmem:[%s3021_s5 + $0x8c8] sm:$0xff]  ;;  %v298_v58 = vld [vmem:[%s3021_s5 + $0x910] sm:$0xff]  ;;  %v300_v59 = vld [vmem:[%s3021_s5 + $0x918] sm:$0xff] }
  0x3c   : > { %221 = vst [vmem:[%s3026_s23 + $0x98] sm:$0xff] %v220_v19  ;;  %v302_v60 = vld [vmem:[%s3021_s5 + $0x960] sm:$0xff]  ;;  %v304_v61 = vld [vmem:[%s3021_s5 + $0x968] sm:$0xff]  ;;  %v306_v62 = vld [vmem:[%s3021_s5 + $0x9b0] sm:$0xff] }
  0x3d   : > { %223 = vst [vmem:[%s3026_s23 + $0xa0] sm:$0xff] %v222_v20  ;;  %v308_v63 = vld [vmem:[%s3021_s5 + $0x9b8] sm:$0xff] }
  0x3e   : > { %225 = vst [vmem:[%s3026_s23 + $0xa8] sm:$0xff] %v224_v21 }
  0x3f   : > { %227 = vst [vmem:[%s3026_s23 + $0xb0] sm:$0xff] %v226_v22 }
  0x40   : > { %229 = vst [vmem:[%s3026_s23 + $0xb8] sm:$0xff] %v228_v23 }
  0x41   : > { %231 = vst [vmem:[%s3026_s23 + $0xc0] sm:$0xff] %v230_v24 }
  0x42   : > { %233 = vst [vmem:[%s3026_s23 + $0xc8] sm:$0xff] %v232_v25 }
  0x43   : > { %235 = vst [vmem:[%s3026_s23 + $0xd0] sm:$0xff] %v234_v26 }
  0x44   : > { %237 = vst [vmem:[%s3026_s23 + $0xd8] sm:$0xff] %v236_v27 }
  0x45   : > { %239 = vst [vmem:[%s3026_s23 + $0xe0] sm:$0xff] %v238_v28 }
  0x46   : > { %241 = vst [vmem:[%s3026_s23 + $0xe8] sm:$0xff] %v240_v29 }
  0x47   : > { %243 = vst [vmem:[%s3026_s23 + $0xf0] sm:$0xff] %v242_v30 }
  0x48   : > { %245 = vst [vmem:[%s3026_s23 + $0xf8] sm:$0xff] %v244_v31 }
  0x49   : > { %247 = vst [vmem:[%s3026_s23 + $0x100] sm:$0xff] %v246_v32 }
  0x4a   : > { %249 = vst [vmem:[%s3026_s23 + $0x108] sm:$0xff] %v248_v33 }
  0x4b   : > { %251 = vst [vmem:[%s3026_s23 + $0x110] sm:$0xff] %v250_v34 }
  0x4c   : > { %253 = vst [vmem:[%s3026_s23 + $0x118] sm:$0xff] %v252_v35 }
  0x4d   : > { %255 = vst [vmem:[%s3026_s23 + $0x120] sm:$0xff] %v254_v36 }
  0x4e   : > { %257 = vst [vmem:[%s3026_s23 + $0x128] sm:$0xff] %v256_v37 }
  0x4f   : > { %259 = vst [vmem:[%s3026_s23 + $0x130] sm:$0xff] %v258_v38 }
  0x50   : > { %261 = vst [vmem:[%s3026_s23 + $0x138] sm:$0xff] %v260_v39 }
  0x51   : > { %263 = vst [vmem:[%s3026_s23 + $0x140] sm:$0xff] %v262_v40 }
  0x52   : > { %265 = vst [vmem:[%s3026_s23 + $0x148] sm:$0xff] %v264_v41 }
  0x53   : > { %267 = vst [vmem:[%s3026_s23 + $0x150] sm:$0xff] %v266_v42 }
  0x54   : > { %269 = vst [vmem:[%s3026_s23 + $0x158] sm:$0xff] %v268_v43 }
  0x55   : > { %271 = vst [vmem:[%s3026_s23 + $0x160] sm:$0xff] %v270_v44 }
  0x56   : > { %273 = vst [vmem:[%s3026_s23 + $0x168] sm:$0xff] %v272_v45 }
  0x57   : > { %275 = vst [vmem:[%s3026_s23 + $0x170] sm:$0xff] %v274_v46 }
  0x58   : > { %277 = vst [vmem:[%s3026_s23 + $0x178] sm:$0xff] %v276_v47 }
  0x59   : > { %279 = vst [vmem:[%s3026_s23 + $0x180] sm:$0xff] %v278_v48 }
  0x5a   : > { %281 = vst [vmem:[%s3026_s23 + $0x188] sm:$0xff] %v280_v49 }
  0x5b   : > { %283 = vst [vmem:[%s3026_s23 + $0x190] sm:$0xff] %v282_v50 }
  0x5c   : > { %285 = vst [vmem:[%s3026_s23 + $0x198] sm:$0xff] %v284_v51 }
  0x5d   : > { %287 = vst [vmem:[%s3026_s23 + $0x1a0] sm:$0xff] %v286_v52 }
  0x5e   : > { %289 = vst [vmem:[%s3026_s23 + $0x1a8] sm:$0xff] %v288_v53 }
  0x5f   : > { %291 = vst [vmem:[%s3026_s23 + $0x1b0] sm:$0xff] %v290_v54 }
  0x60   : > { %293 = vst [vmem:[%s3026_s23 + $0x1b8] sm:$0xff] %v292_v55 }
  0x61   : > { %295 = vst [vmem:[%s3026_s23 + $0x1c0] sm:$0xff] %v294_v56 }
  0x62   : > { %297 = vst [vmem:[%s3026_s23 + $0x1c8] sm:$0xff] %v296_v57 }
  0x63   : > { %299 = vst [vmem:[%s3026_s23 + $0x1d0] sm:$0xff] %v298_v58 }
  0x64   : > { %301 = vst [vmem:[%s3026_s23 + $0x1d8] sm:$0xff] %v300_v59 }
  0x65   : > { %303 = vst [vmem:[%s3026_s23 + $0x1e0] sm:$0xff] %v302_v60 }
  0x66   : > { %305 = vst [vmem:[%s3026_s23 + $0x1e8] sm:$0xff] %v304_v61 }
  0x67   : > { %307 = vst [vmem:[%s3026_s23 + $0x1f0] sm:$0xff] %v306_v62 }
  0x68   : > { %309 = vst [vmem:[%s3026_s23 + $0x1f8] sm:$0xff] %v308_v63 }
  0x69 PF: > { %315 = sbr.rel (!%p2996_p9) target bundleno = 179 (0xb3), region = 43  ;;  %s317_s28 = sand.u32 (%p2996_p9), 1, %s2864_s15  }
  0x6a   : > { %s2715_s7 = smul.u32 (%p2996_p9), 192, %s2884_s20  ;;  %s2220_s11 = sshll.u32 (%p2996_p9), %s317_s28, 8 }
  0x6b   : > { %s3790_s1 = sld [smem:[#allocation7_spill]] (%p2996_p9)  ;;  %s3166_s6 = scalar_lea.vmem (%p2996_p9), [#allocation3], %s2220_s11 }
  0x6c   : > { %s322_s26 = sadd.s32 (%p2996_p9), %s2888_s21, %s2715_s7 }
  0x6d   : > { %s2223_s27 = sshll.u32 (%p2996_p9), %s322_s26, 2 }
  0x71   : > { %s3161_s0 = scalar_lea.vmem %s3790_s1, %s2223_s27 }
  0x72   : > { %v341_v0 = vld [vmem:[%s3161_s0] sm:$0xf]  ;;  %v343_v1 = vld [vmem:[%s3161_s0 + $0xc] sm:$0xf]  ;;  %v345_v2 = vld [vmem:[%s3161_s0 + $0x18] sm:$0xf] }
  0x73   : > { %342 = vst [vmem:[%s3166_s6] sm:$0xf] %v341_v0  ;;  %v347_v3 = vld [vmem:[%s3161_s0 + $0x24] sm:$0xf]  ;;  %v349_v4 = vld [vmem:[%s3161_s0 + $0x30] sm:$0xf] }
  0x74   : > { %344 = vst [vmem:[%s3166_s6 + $0x4] sm:$0xf] %v343_v1  ;;  %v351_v5 = vld [vmem:[%s3161_s0 + $0x3c] sm:$0xf]  ;;  %v353_v6 = vld [vmem:[%s3161_s0 + $0x48] sm:$0xf] }
  0x75   : > { %346 = vst [vmem:[%s3166_s6 + $0x8] sm:$0xf] %v345_v2  ;;  %v355_v7 = vld [vmem:[%s3161_s0 + $0x54] sm:$0xf]  ;;  %v357_v8 = vld [vmem:[%s3161_s0 + $0x60] sm:$0xf] }
  0x76   : > { %348 = vst [vmem:[%s3166_s6 + $0xc] sm:$0xf] %v347_v3  ;;  %v359_v9 = vld [vmem:[%s3161_s0 + $0x6c] sm:$0xf]  ;;  %v361_v10 = vld [vmem:[%s3161_s0 + $0x78] sm:$0xf] }
  0x77   : > { %350 = vst [vmem:[%s3166_s6 + $0x10] sm:$0xf] %v349_v4  ;;  %v363_v11 = vld [vmem:[%s3161_s0 + $0x84] sm:$0xf]  ;;  %v365_v12 = vld [vmem:[%s3161_s0 + $0x90] sm:$0xf] }
  0x78   : > { %352 = vst [vmem:[%s3166_s6 + $0x14] sm:$0xf] %v351_v5  ;;  %v367_v13 = vld [vmem:[%s3161_s0 + $0x9c] sm:$0xf]  ;;  %v369_v14 = vld [vmem:[%s3161_s0 + $0xa8] sm:$0xf] }
  0x79   : > { %354 = vst [vmem:[%s3166_s6 + $0x18] sm:$0xf] %v353_v6  ;;  %v371_v15 = vld [vmem:[%s3161_s0 + $0xb4] sm:$0xf]  ;;  %v373_v16 = vld [vmem:[%s3161_s0 + $0xc0] sm:$0xf] }
  0x7a   : > { %356 = vst [vmem:[%s3166_s6 + $0x1c] sm:$0xf] %v355_v7  ;;  %v375_v17 = vld [vmem:[%s3161_s0 + $0xcc] sm:$0xf]  ;;  %v377_v18 = vld [vmem:[%s3161_s0 + $0xd8] sm:$0xf] }
  0x7b   : > { %358 = vst [vmem:[%s3166_s6 + $0x20] sm:$0xf] %v357_v8  ;;  %v379_v19 = vld [vmem:[%s3161_s0 + $0xe4] sm:$0xf]  ;;  %v381_v20 = vld [vmem:[%s3161_s0 + $0xf0] sm:$0xf] }
  0x7c   : > { %360 = vst [vmem:[%s3166_s6 + $0x24] sm:$0xf] %v359_v9  ;;  %v383_v21 = vld [vmem:[%s3161_s0 + $0xfc] sm:$0xf]  ;;  %v385_v22 = vld [vmem:[%s3161_s0 + $0x108] sm:$0xf] }
  0x7d   : > { %362 = vst [vmem:[%s3166_s6 + $0x28] sm:$0xf] %v361_v10  ;;  %v387_v23 = vld [vmem:[%s3161_s0 + $0x114] sm:$0xf]  ;;  %v389_v24 = vld [vmem:[%s3161_s0 + $0x120] sm:$0xf] }
  0x7e   : > { %364 = vst [vmem:[%s3166_s6 + $0x2c] sm:$0xf] %v363_v11  ;;  %v391_v25 = vld [vmem:[%s3161_s0 + $0x12c] sm:$0xf]  ;;  %v393_v26 = vld [vmem:[%s3161_s0 + $0x138] sm:$0xf] }
  0x7f   : > { %366 = vst [vmem:[%s3166_s6 + $0x30] sm:$0xf] %v365_v12  ;;  %v395_v27 = vld [vmem:[%s3161_s0 + $0x144] sm:$0xf]  ;;  %v397_v28 = vld [vmem:[%s3161_s0 + $0x150] sm:$0xf] }
  0x80   : > { %368 = vst [vmem:[%s3166_s6 + $0x34] sm:$0xf] %v367_v13  ;;  %v399_v29 = vld [vmem:[%s3161_s0 + $0x15c] sm:$0xf]  ;;  %v401_v30 = vld [vmem:[%s3161_s0 + $0x168] sm:$0xf] }
  0x81   : > { %370 = vst [vmem:[%s3166_s6 + $0x38] sm:$0xf] %v369_v14  ;;  %v403_v31 = vld [vmem:[%s3161_s0 + $0x174] sm:$0xf]  ;;  %v405_v32 = vld [vmem:[%s3161_s0 + $0x180] sm:$0xf] }
  0x82   : > { %372 = vst [vmem:[%s3166_s6 + $0x3c] sm:$0xf] %v371_v15  ;;  %v407_v33 = vld [vmem:[%s3161_s0 + $0x18c] sm:$0xf]  ;;  %v409_v34 = vld [vmem:[%s3161_s0 + $0x198] sm:$0xf] }
  0x83   : > { %374 = vst [vmem:[%s3166_s6 + $0x40] sm:$0xf] %v373_v16  ;;  %v411_v35 = vld [vmem:[%s3161_s0 + $0x1a4] sm:$0xf]  ;;  %v413_v36 = vld [vmem:[%s3161_s0 + $0x1b0] sm:$0xf] }
  0x84   : > { %376 = vst [vmem:[%s3166_s6 + $0x44] sm:$0xf] %v375_v17  ;;  %v415_v37 = vld [vmem:[%s3161_s0 + $0x1bc] sm:$0xf]  ;;  %v417_v38 = vld [vmem:[%s3161_s0 + $0x1c8] sm:$0xf] }
  0x85   : > { %378 = vst [vmem:[%s3166_s6 + $0x48] sm:$0xf] %v377_v18  ;;  %v419_v39 = vld [vmem:[%s3161_s0 + $0x1d4] sm:$0xf]  ;;  %v421_v40 = vld [vmem:[%s3161_s0 + $0x1e0] sm:$0xf] }
  0x86   : > { %380 = vst [vmem:[%s3166_s6 + $0x4c] sm:$0xf] %v379_v19  ;;  %v423_v41 = vld [vmem:[%s3161_s0 + $0x1ec] sm:$0xf]  ;;  %v425_v42 = vld [vmem:[%s3161_s0 + $0x1f8] sm:$0xf] }
  0x87   : > { %382 = vst [vmem:[%s3166_s6 + $0x50] sm:$0xf] %v381_v20  ;;  %v427_v43 = vld [vmem:[%s3161_s0 + $0x204] sm:$0xf]  ;;  %v429_v44 = vld [vmem:[%s3161_s0 + $0x210] sm:$0xf] }
  0x88   : > { %384 = vst [vmem:[%s3166_s6 + $0x54] sm:$0xf] %v383_v21  ;;  %v431_v45 = vld [vmem:[%s3161_s0 + $0x21c] sm:$0xf]  ;;  %v433_v46 = vld [vmem:[%s3161_s0 + $0x228] sm:$0xf] }
  0x89   : > { %386 = vst [vmem:[%s3166_s6 + $0x58] sm:$0xf] %v385_v22  ;;  %v435_v47 = vld [vmem:[%s3161_s0 + $0x234] sm:$0xf]  ;;  %v437_v48 = vld [vmem:[%s3161_s0 + $0x240] sm:$0xf] }
  0x8a   : > { %388 = vst [vmem:[%s3166_s6 + $0x5c] sm:$0xf] %v387_v23  ;;  %v439_v49 = vld [vmem:[%s3161_s0 + $0x24c] sm:$0xf]  ;;  %v441_v50 = vld [vmem:[%s3161_s0 + $0x258] sm:$0xf] }
  0x8b   : > { %390 = vst [vmem:[%s3166_s6 + $0x60] sm:$0xf] %v389_v24  ;;  %v443_v51 = vld [vmem:[%s3161_s0 + $0x264] sm:$0xf]  ;;  %v445_v52 = vld [vmem:[%s3161_s0 + $0x270] sm:$0xf] }
  0x8c   : > { %392 = vst [vmem:[%s3166_s6 + $0x64] sm:$0xf] %v391_v25  ;;  %v447_v53 = vld [vmem:[%s3161_s0 + $0x27c] sm:$0xf]  ;;  %v449_v54 = vld [vmem:[%s3161_s0 + $0x288] sm:$0xf] }
  0x8d   : > { %394 = vst [vmem:[%s3166_s6 + $0x68] sm:$0xf] %v393_v26  ;;  %v451_v55 = vld [vmem:[%s3161_s0 + $0x294] sm:$0xf]  ;;  %v453_v56 = vld [vmem:[%s3161_s0 + $0x2a0] sm:$0xf] }
  0x8e   : > { %396 = vst [vmem:[%s3166_s6 + $0x6c] sm:$0xf] %v395_v27  ;;  %v455_v57 = vld [vmem:[%s3161_s0 + $0x2ac] sm:$0xf]  ;;  %v457_v58 = vld [vmem:[%s3161_s0 + $0x2b8] sm:$0xf] }
  0x8f   : > { %398 = vst [vmem:[%s3166_s6 + $0x70] sm:$0xf] %v397_v28  ;;  %v459_v59 = vld [vmem:[%s3161_s0 + $0x2c4] sm:$0xf]  ;;  %v461_v60 = vld [vmem:[%s3161_s0 + $0x2d0] sm:$0xf] }
  0x90   : > { %400 = vst [vmem:[%s3166_s6 + $0x74] sm:$0xf] %v399_v29  ;;  %v463_v61 = vld [vmem:[%s3161_s0 + $0x2dc] sm:$0xf]  ;;  %v465_v62 = vld [vmem:[%s3161_s0 + $0x2e8] sm:$0xf] }
  0x91   : > { %402 = vst [vmem:[%s3166_s6 + $0x78] sm:$0xf] %v401_v30  ;;  %v467_v63 = vld [vmem:[%s3161_s0 + $0x2f4] sm:$0xf] }
  0x92   : > { %404 = vst [vmem:[%s3166_s6 + $0x7c] sm:$0xf] %v403_v31 }
  0x93   : > { %406 = vst [vmem:[%s3166_s6 + $0x80] sm:$0xf] %v405_v32 }
  0x94   : > { %408 = vst [vmem:[%s3166_s6 + $0x84] sm:$0xf] %v407_v33 }
  0x95   : > { %410 = vst [vmem:[%s3166_s6 + $0x88] sm:$0xf] %v409_v34 }
  0x96   : > { %412 = vst [vmem:[%s3166_s6 + $0x8c] sm:$0xf] %v411_v35 }
  0x97   : > { %414 = vst [vmem:[%s3166_s6 + $0x90] sm:$0xf] %v413_v36 }
  0x98   : > { %416 = vst [vmem:[%s3166_s6 + $0x94] sm:$0xf] %v415_v37 }
  0x99   : > { %418 = vst [vmem:[%s3166_s6 + $0x98] sm:$0xf] %v417_v38 }
  0x9a   : > { %420 = vst [vmem:[%s3166_s6 + $0x9c] sm:$0xf] %v419_v39 }
  0x9b   : > { %422 = vst [vmem:[%s3166_s6 + $0xa0] sm:$0xf] %v421_v40 }
  0x9c   : > { %424 = vst [vmem:[%s3166_s6 + $0xa4] sm:$0xf] %v423_v41 }
  0x9d   : > { %426 = vst [vmem:[%s3166_s6 + $0xa8] sm:$0xf] %v425_v42 }
  0x9e   : > { %428 = vst [vmem:[%s3166_s6 + $0xac] sm:$0xf] %v427_v43 }
  0x9f   : > { %430 = vst [vmem:[%s3166_s6 + $0xb0] sm:$0xf] %v429_v44 }
  0xa0   : > { %432 = vst [vmem:[%s3166_s6 + $0xb4] sm:$0xf] %v431_v45 }
  0xa1   : > { %434 = vst [vmem:[%s3166_s6 + $0xb8] sm:$0xf] %v433_v46 }
  0xa2   : > { %436 = vst [vmem:[%s3166_s6 + $0xbc] sm:$0xf] %v435_v47 }
  0xa3   : > { %438 = vst [vmem:[%s3166_s6 + $0xc0] sm:$0xf] %v437_v48 }
  0xa4   : > { %440 = vst [vmem:[%s3166_s6 + $0xc4] sm:$0xf] %v439_v49 }
  0xa5   : > { %442 = vst [vmem:[%s3166_s6 + $0xc8] sm:$0xf] %v441_v50 }
  0xa6   : > { %444 = vst [vmem:[%s3166_s6 + $0xcc] sm:$0xf] %v443_v51 }
  0xa7   : > { %446 = vst [vmem:[%s3166_s6 + $0xd0] sm:$0xf] %v445_v52 }
  0xa8   : > { %448 = vst [vmem:[%s3166_s6 + $0xd4] sm:$0xf] %v447_v53 }
  0xa9   : > { %450 = vst [vmem:[%s3166_s6 + $0xd8] sm:$0xf] %v449_v54 }
  0xaa   : > { %452 = vst [vmem:[%s3166_s6 + $0xdc] sm:$0xf] %v451_v55 }
  0xab   : > { %454 = vst [vmem:[%s3166_s6 + $0xe0] sm:$0xf] %v453_v56 }
  0xac   : > { %456 = vst [vmem:[%s3166_s6 + $0xe4] sm:$0xf] %v455_v57 }
  0xad   : > { %458 = vst [vmem:[%s3166_s6 + $0xe8] sm:$0xf] %v457_v58 }
  0xae   : > { %460 = vst [vmem:[%s3166_s6 + $0xec] sm:$0xf] %v459_v59 }
  0xaf   : > { %462 = vst [vmem:[%s3166_s6 + $0xf0] sm:$0xf] %v461_v60 }
  0xb0   : > { %464 = vst [vmem:[%s3166_s6 + $0xf4] sm:$0xf] %v463_v61 }
  0xb1   : > { %466 = vst [vmem:[%s3166_s6 + $0xf8] sm:$0xf] %v465_v62 }
  0xb2   : > { %468 = vst [vmem:[%s3166_s6 + $0xfc] sm:$0xf] %v467_v63 }
  0xb3 PF: > { %p2224_p0 = scmp.ge.s32.totalorder %s2892_s22, 1  ;;  %p625_p1 = scmp.lt.s32.totalorder %s2892_s22, 16 }
  0xb5   : > { %p626_p2 = pnand %p2224_p0, %p625_p1 }
  0xb6   : > { %s632_s5 = sand.u32 (!%p626_p2), 1, %s2868_s16   ;;  %s639_s23 = sand.u32 (!%p626_p2), 1, %s2860_s14  }
  0xb7   : > { %629 = sbr.rel (%p626_p2) target bundleno = 720 (0x2d0), region = 88  ;;  %s2225_s28 = sshll.u32 (!%p626_p2), %s632_s5, 9 }
  0xb8   : > { %s2226_s0 = sshll.u32 (!%p626_p2), %s639_s23, 8  ;;  %s665_s7 = sand.u32 (!%p626_p2), 1, %s2852_s12  }
  0xb9   : > { %p671_p3 = scmp.lt.s32.totalorder (!%p626_p2), %s2880_s19, 2  ;;  %s2227_s11 = sshll.u32 (!%p626_p2), %s665_s7, 8 }
  0xba   : > { %s3306_s6 = scalar_lea.vmem (!%p626_p2), [#allocation2], %s2225_s28  ;;  %s3308_s1 = scalar_lea.vmem (!%p626_p2), [#allocation3], %s2226_s0 }
  0xbb   : > { %s3310_s25 = scalar_lea.vmem (!%p626_p2), [#allocation4], %s2227_s11  ;;  %p2228_p4 = scmp.ne.s32.totalorder (!%p626_p2), %s2876_s18, 0 }
  0xbc   : > { %s3300_s26 = scalar_select %p671_p3, %s2880_s19, 2 }
  0xbd   : > { %678 = sbr.rel (%p2228_p4) target bundleno = 227 (0xe3), region = 100 }
  0xbe   : > { %s673_s4 = scalar_lea.vmem %s3780_s2, %s3300_s26 }
  0xc2   : > { %v2894_v0 = vmov 0.0  }
  0xc3   : > { %679 = vst [vmem:[%s3310_s25] sm:$0xff] %v2894_v0 }
  0xc4   : > { %680 = vst [vmem:[%s3310_s25 + $0x8] sm:$0xff] %v2894_v0 }
  0xc5   : > { %681 = vst [vmem:[%s3310_s25 + $0x10] sm:$0xff] %v2894_v0 }
  0xc6   : > { %682 = vst [vmem:[%s3310_s25 + $0x18] sm:$0xff] %v2894_v0 }
  0xc7   : > { %683 = vst [vmem:[%s3310_s25 + $0x20] sm:$0xff] %v2894_v0 }
  0xc8   : > { %684 = vst [vmem:[%s3310_s25 + $0x28] sm:$0xff] %v2894_v0 }
  0xc9   : > { %685 = vst [vmem:[%s3310_s25 + $0x30] sm:$0xff] %v2894_v0 }
  0xca   : > { %686 = vst [vmem:[%s3310_s25 + $0x38] sm:$0xff] %v2894_v0 }
  0xcb   : > { %687 = vst [vmem:[%s3310_s25 + $0x40] sm:$0xff] %v2894_v0 }
  0xcc   : > { %688 = vst [vmem:[%s3310_s25 + $0x48] sm:$0xff] %v2894_v0 }
  0xcd   : > { %689 = vst [vmem:[%s3310_s25 + $0x50] sm:$0xff] %v2894_v0 }
  0xce   : > { %690 = vst [vmem:[%s3310_s25 + $0x58] sm:$0xff] %v2894_v0 }
  0xcf   : > { %691 = vst [vmem:[%s3310_s25 + $0x60] sm:$0xff] %v2894_v0 }
  0xd0   : > { %692 = vst [vmem:[%s3310_s25 + $0x68] sm:$0xff] %v2894_v0 }
  0xd1   : > { %693 = vst [vmem:[%s3310_s25 + $0x70] sm:$0xff] %v2894_v0 }
  0xd2   : > { %694 = vst [vmem:[%s3310_s25 + $0x78] sm:$0xff] %v2894_v0 }
  0xd3   : > { %695 = vst [vmem:[%s3310_s25 + $0x80] sm:$0xff] %v2894_v0 }
  0xd4   : > { %696 = vst [vmem:[%s3310_s25 + $0x88] sm:$0xff] %v2894_v0 }
  0xd5   : > { %697 = vst [vmem:[%s3310_s25 + $0x90] sm:$0xff] %v2894_v0 }
  0xd6   : > { %698 = vst [vmem:[%s3310_s25 + $0x98] sm:$0xff] %v2894_v0 }
  0xd7   : > { %699 = vst [vmem:[%s3310_s25 + $0xa0] sm:$0xff] %v2894_v0 }
  0xd8   : > { %700 = vst [vmem:[%s3310_s25 + $0xa8] sm:$0xff] %v2894_v0 }
  0xd9   : > { %701 = vst [vmem:[%s3310_s25 + $0xb0] sm:$0xff] %v2894_v0 }
  0xda   : > { %702 = vst [vmem:[%s3310_s25 + $0xb8] sm:$0xff] %v2894_v0 }
  0xdb   : > { %703 = vst [vmem:[%s3310_s25 + $0xc0] sm:$0xff] %v2894_v0 }
  0xdc   : > { %704 = vst [vmem:[%s3310_s25 + $0xc8] sm:$0xff] %v2894_v0 }
  0xdd   : > { %705 = vst [vmem:[%s3310_s25 + $0xd0] sm:$0xff] %v2894_v0 }
  0xde   : > { %706 = vst [vmem:[%s3310_s25 + $0xd8] sm:$0xff] %v2894_v0 }
  0xdf   : > { %707 = vst [vmem:[%s3310_s25 + $0xe0] sm:$0xff] %v2894_v0 }
  0xe0   : > { %708 = vst [vmem:[%s3310_s25 + $0xe8] sm:$0xff] %v2894_v0 }
  0xe1   : > { %709 = vst [vmem:[%s3310_s25 + $0xf0] sm:$0xff] %v2894_v0 }
  0xe2   : > { %710 = vst [vmem:[%s3310_s25 + $0xf8] sm:$0xff] %v2894_v0 }
  0xe3 PF: > { %v2690_v1 = vld [vmem:[%s3308_s1 + $0x38] sm:$0xff]  ;;  %v2689_v5 = vld [vmem:[%s3308_s1 + $0x30] sm:$0xff]  ;;  %v2688_v9 = vld [vmem:[%s3308_s1 + $0x28] sm:$0xff]  ;;  %p2613_p5 = scmp.ne.s32.totalorder %s2876_s18, 4 }
  0xe4   : > { %v2698_v2 = vld [vmem:[%s3308_s1 + $0x78] sm:$0xff]  ;;  %1383 = vmatpush.bf16.msra.mxu0 %v2690_v1  ;;  %v2697_v6 = vld [vmem:[%s3308_s1 + $0x70] sm:$0xff]  ;;  %v2696_v10 = vld [vmem:[%s3308_s1 + $0x68] sm:$0xff] }
  0xe5   : > { %v2706_v3 = vld [vmem:[%s3308_s1 + $0xb8] sm:$0xff]  ;;  %1472 = vmatpush.bf16.msra.mxu1 %v2698_v2  ;;  %v2705_v7 = vld [vmem:[%s3308_s1 + $0xb0] sm:$0xff]  ;;  %v2704_v11 = vld [vmem:[%s3308_s1 + $0xa8] sm:$0xff] }
  0xe6   : > { %v2714_v4 = vld [vmem:[%s3308_s1 + $0xf8] sm:$0xff]  ;;  %1561 = vmatpush.bf16.msra.mxu2 %v2706_v3  ;;  %v2713_v8 = vld [vmem:[%s3308_s1 + $0xf0] sm:$0xff]  ;;  %v2712_v12 = vld [vmem:[%s3308_s1 + $0xe8] sm:$0xff] }
  0xe7   : > { %1650 = vmatpush.bf16.msra.mxu3 %v2714_v4  ;;  %v2687_v13 = vld [vmem:[%s3308_s1 + $0x20] sm:$0xff]  ;;  %v2686_v17 = vld [vmem:[%s3308_s1 + $0x18] sm:$0xff]  ;;  %v2685_v21 = vld [vmem:[%s3308_s1 + $0x10] sm:$0xff] }
  0xe8   : > { %1384 = vmatpush.bf16.msra.mxu0 %v2689_v5  ;;  %v2695_v14 = vld [vmem:[%s3308_s1 + $0x60] sm:$0xff]  ;;  %v2694_v18 = vld [vmem:[%s3308_s1 + $0x58] sm:$0xff]  ;;  %v2693_v22 = vld [vmem:[%s3308_s1 + $0x50] sm:$0xff] }
  0xe9   : > { %1473 = vmatpush.bf16.msra.mxu1 %v2697_v6  ;;  %v2703_v15 = vld [vmem:[%s3308_s1 + $0xa0] sm:$0xff]  ;;  %v2702_v19 = vld [vmem:[%s3308_s1 + $0x98] sm:$0xff]  ;;  %v2701_v23 = vld [vmem:[%s3308_s1 + $0x90] sm:$0xff] }
  0xea   : > { %1562 = vmatpush.bf16.msra.mxu2 %v2705_v7  ;;  %v2711_v16 = vld [vmem:[%s3308_s1 + $0xe0] sm:$0xff]  ;;  %v2710_v20 = vld [vmem:[%s3308_s1 + $0xd8] sm:$0xff]  ;;  %v2709_v24 = vld [vmem:[%s3308_s1 + $0xd0] sm:$0xff] }
  0xeb   : > { %1651 = vmatpush.bf16.msra.mxu3 %v2713_v8  ;;  %v2684_v25 = vld [vmem:[%s3308_s1 + $0x8] sm:$0xff]  ;;  %v2683_v29 = vld [vmem:[%s3308_s1] sm:$0xff]  ;;  %v2621_v34 = vld [vmem:[%s3306_s6 + $0xc] sm:$0xf0] }
  0xec   : > { %1385 = vmatpush.bf16.msra.mxu0 %v2688_v9  ;;  %v2692_v26 = vld [vmem:[%s3308_s1 + $0x48] sm:$0xff]  ;;  %v2691_v30 = vld [vmem:[%s3308_s1 + $0x40] sm:$0xff]  ;;  %v2233_v36 = vld [vmem:[%s3306_s6 + $0x10] sm:$0xf0] }
  0xed   : > { %1474 = vmatpush.bf16.msra.mxu1 %v2696_v10  ;;  %v2700_v27 = vld [vmem:[%s3308_s1 + $0x88] sm:$0xff]  ;;  %v2699_v31 = vld [vmem:[%s3308_s1 + $0x80] sm:$0xff]  ;;  %v2622_v38 = vld [vmem:[%s3306_s6 + $0x14] sm:$0xf0] }
  0xee   : > { %1563 = vmatpush.bf16.msra.mxu2 %v2704_v11  ;;  %v2708_v28 = vld [vmem:[%s3308_s1 + $0xc8] sm:$0xff]  ;;  %v2707_v32 = vld [vmem:[%s3308_s1 + $0xc0] sm:$0xff]  ;;  %v2241_v40 = vld [vmem:[%s3306_s6 + $0x18] sm:$0xf0] }
  0xef   : > { %1652 = vmatpush.bf16.msra.mxu3 %v2712_v12  ;;  %v2231_v33 = vld [vmem:[%s3306_s6] sm:$0xf]  ;;  %v2619_v35 = vld [vmem:[%s3306_s6 + $0x4] sm:$0xf]  ;;  %v2239_v37 = vld [vmem:[%s3306_s6 + $0x8] sm:$0xf] }
  0xf0   : > { %1386 = vmatpush.bf16.msra.mxu0 %v2687_v13  ;;  %v2620_v39 = vld [vmem:[%s3306_s6 + $0xc] sm:$0xf]  ;;  %v2232_v41 = vor.u32 %v2621_v34, %v2231_v33  ;;  %v2236_v42 = vor.u32 %v2619_v35, %v2233_v36  ;;  %v2240_v43 = vor.u32 %v2622_v38, %v2239_v37  ;;  %v2247_v45 = vld [vmem:[%s3306_s6 + $0x20] sm:$0xf]  ;;  %v2625_v46 = vld [vmem:[%s3306_s6 + $0x2c] sm:$0xf0] }
  0xf1   : > { %1475 = vmatpush.bf16.msra.mxu1 %v2695_v14  ;;  %v2244_v44 = vor.u32 %v2620_v39, %v2241_v40  ;;  %v2623_v47 = vld [vmem:[%s3306_s6 + $0x24] sm:$0xf]  ;;  %v2249_v48 = vld [vmem:[%s3306_s6 + $0x30] sm:$0xf0]  ;;  %v2255_v49 = vld [vmem:[%s3306_s6 + $0x28] sm:$0xf]  ;;  %v2248_v53 = vor.u32 %v2625_v46, %v2247_v45 }
  0xf2   : > { %1564 = vmatpush.bf16.msra.mxu2 %v2703_v15  ;;  %v2626_v50 = vld [vmem:[%s3306_s6 + $0x34] sm:$0xf0]  ;;  %v2624_v51 = vld [vmem:[%s3306_s6 + $0x2c] sm:$0xf]  ;;  %v2257_v52 = vld [vmem:[%s3306_s6 + $0x38] sm:$0xf0]  ;;  %v2252_v54 = vor.u32 %v2623_v47, %v2249_v48 }
  0xf3   : > { %1653 = vmatpush.bf16.msra.mxu3 %v2711_v16  ;;  %v2256_v55 = vor.u32 %v2626_v50, %v2255_v49  ;;  %v2260_v56 = vor.u32 %v2624_v51, %v2257_v52  ;;  %v2263_v57 = vld [vmem:[%s3306_s6 + $0x40] sm:$0xf]  ;;  %v2629_v58 = vld [vmem:[%s3306_s6 + $0x4c] sm:$0xf0]  ;;  %v2627_v59 = vld [vmem:[%s3306_s6 + $0x44] sm:$0xf] }
  0xf4   : > { %1387 = vmatpush.bf16.msra.mxu0 %v2686_v17  ;;  %v2265_v60 = vld [vmem:[%s3306_s6 + $0x50] sm:$0xf0]  ;;  %v2271_v61 = vld [vmem:[%s3306_s6 + $0x48] sm:$0xf]  ;;  %v2630_v62 = vld [vmem:[%s3306_s6 + $0x54] sm:$0xf0]  ;;  %v2264_v1 = vor.u32 %v2629_v58, %v2263_v57 }
  0xf5   : > { %1476 = vmatpush.bf16.msra.mxu1 %v2694_v18  ;;  %v2628_v63 = vld [vmem:[%s3306_s6 + $0x4c] sm:$0xf]  ;;  %v2273_v0 = vld [vmem:[%s3306_s6 + $0x58] sm:$0xf0]  ;;  %v2268_v2 = vor.u32 %v2627_v59, %v2265_v60  ;;  %v2272_v3 = vor.u32 %v2630_v62, %v2271_v61  ;;  %v2279_v5 = vld [vmem:[%s3306_s6 + $0x60] sm:$0xf] }
  0xf6   : > { %1565 = vmatpush.bf16.msra.mxu2 %v2702_v19  ;;  %v2276_v4 = vor.u32 %v2628_v63, %v2273_v0  ;;  %v2633_v6 = vld [vmem:[%s3306_s6 + $0x6c] sm:$0xf0]  ;;  %v2631_v7 = vld [vmem:[%s3306_s6 + $0x64] sm:$0xf]  ;;  %v2281_v8 = vld [vmem:[%s3306_s6 + $0x70] sm:$0xf0] }
  0xf7   : > { %1654 = vmatpush.bf16.msra.mxu3 %v2710_v20  ;;  %v2287_v9 = vld [vmem:[%s3306_s6 + $0x68] sm:$0xf]  ;;  %v2634_v10 = vld [vmem:[%s3306_s6 + $0x74] sm:$0xf0]  ;;  %v2632_v11 = vld [vmem:[%s3306_s6 + $0x6c] sm:$0xf]  ;;  %v2280_v13 = vor.u32 %v2633_v6, %v2279_v5  ;;  %v2284_v14 = vor.u32 %v2631_v7, %v2281_v8 }
  0xf8   : > { %1388 = vmatpush.bf16.msra.mxu0 %v2685_v21  ;;  %v2289_v12 = vld [vmem:[%s3306_s6 + $0x78] sm:$0xf0]  ;;  %v2288_v15 = vor.u32 %v2634_v10, %v2287_v9  ;;  %v2295_v17 = vld [vmem:[%s3306_s6 + $0x80] sm:$0xf]  ;;  %v2637_v18 = vld [vmem:[%s3306_s6 + $0x8c] sm:$0xf0] }
  0xf9   : > { %1477 = vmatpush.bf16.msra.mxu1 %v2693_v22  ;;  %v2292_v16 = vor.u32 %v2632_v11, %v2289_v12  ;;  %v2635_v19 = vld [vmem:[%s3306_s6 + $0x84] sm:$0xf]  ;;  %v2297_v20 = vld [vmem:[%s3306_s6 + $0x90] sm:$0xf0]  ;;  %v2303_v21 = vld [vmem:[%s3306_s6 + $0x88] sm:$0xf] }
  0xfa   : > { %1566 = vmatpush.bf16.msra.mxu2 %v2701_v23  ;;  %v2638_v22 = vld [vmem:[%s3306_s6 + $0x94] sm:$0xf0]  ;;  %v2636_v23 = vld [vmem:[%s3306_s6 + $0x8c] sm:$0xf]  ;;  %v2319_v33 = vld [vmem:[%s3306_s6 + $0xa8] sm:$0xf] }
  0xfb   : > { %1655 = vmatpush.bf16.msra.mxu3 %v2709_v24  ;;  %v2305_v24 = vld [vmem:[%s3306_s6 + $0x98] sm:$0xf0]  ;;  %v2642_v34 = vld [vmem:[%s3306_s6 + $0xb4] sm:$0xf0]  ;;  %v2640_v35 = vld [vmem:[%s3306_s6 + $0xac] sm:$0xf] }
  0xfc   : > { %1389 = vmatpush.bf16.msra.mxu0 %v2684_v25  ;;  %v2296_v25 = vor.u32 %v2637_v18, %v2295_v17  ;;  %v2321_v36 = vld [vmem:[%s3306_s6 + $0xb8] sm:$0xf0]  ;;  %v2320_v39 = vor.u32 %v2642_v34, %v2319_v33  ;;  %v2335_v45 = vld [vmem:[%s3306_s6 + $0xc8] sm:$0xf]  ;;  %v2646_v46 = vld [vmem:[%s3306_s6 + $0xd4] sm:$0xf0] }
  0xfd   : > { %1478 = vmatpush.bf16.msra.mxu1 %v2692_v26  ;;  %v2300_v26 = vor.u32 %v2635_v19, %v2297_v20  ;;  %v2324_v40 = vor.u32 %v2640_v35, %v2321_v36  ;;  %v2644_v47 = vld [vmem:[%s3306_s6 + $0xcc] sm:$0xf]  ;;  %v2337_v48 = vld [vmem:[%s3306_s6 + $0xd8] sm:$0xf0]  ;;  %v2336_v51 = vor.u32 %v2646_v46, %v2335_v45  ;;  %v2351_v57 = vld [vmem:[%s3306_s6 + $0xe8] sm:$0xf] }
  0xfe   : > { %1567 = vmatpush.bf16.msra.mxu2 %v2700_v27  ;;  %v2304_v27 = vor.u32 %v2638_v22, %v2303_v21  ;;  %v2340_v52 = vor.u32 %v2644_v47, %v2337_v48  ;;  %v2650_v58 = vld [vmem:[%s3306_s6 + $0xf4] sm:$0xf0]  ;;  %v2648_v59 = vld [vmem:[%s3306_s6 + $0xec] sm:$0xf]  ;;  %v2353_v60 = vld [vmem:[%s3306_s6 + $0xf8] sm:$0xf0] }
  0xff   : > { %1656 = vmatpush.bf16.msra.mxu3 %v2708_v28  ;;  %v2308_v28 = vor.u32 %v2636_v23, %v2305_v24  ;;  %v2352_v63 = vor.u32 %v2650_v58, %v2351_v57  ;;  %v2356_v0 = vor.u32 %v2648_v59, %v2353_v60  ;;  %v2367_v5 = vld [vmem:[%s3306_s6 + $0x108] sm:$0xf]  ;;  %v2654_v6 = vld [vmem:[%s3306_s6 + $0x114] sm:$0xf0]  ;;  %v2652_v7 = vld [vmem:[%s3306_s6 + $0x10c] sm:$0xf] }
 0x100   : > { %1390 = vmatpush.bf16.msra.mxu0 %v2683_v29  ;;  %v2311_v29 = vld [vmem:[%s3306_s6 + $0xa0] sm:$0xf]  ;;  %v2369_v8 = vld [vmem:[%s3306_s6 + $0x118] sm:$0xf0]  ;;  %v2657_v24 = vld [vmem:[%s3306_s6 + $0x12c] sm:$0xf0] }
 0x101   : > { %1479 = vmatpush.bf16.msra.mxu1 %v2691_v30  ;;  %v2641_v30 = vld [vmem:[%s3306_s6 + $0xac] sm:$0xf0]  ;;  %v711_v21 = vld [vmem:[%s3310_s25] sm:$0xff]  ;;  %v2393_v57 = vld [vmem:[%s3306_s6 + $0x150] sm:$0xf0] }
 0x102   : > { %1568 = vmatpush.bf16.msra.mxu2 %v2699_v31  ;;  %v2639_v31 = vld [vmem:[%s3306_s6 + $0xa4] sm:$0xf]  ;;  %v2312_v37 = vor.u32 %v2641_v30, %v2311_v29  ;;  %v2375_v23 = vld [vmem:[%s3306_s6 + $0x120] sm:$0xf]  ;;  %v2658_v29 = vld [vmem:[%s3306_s6 + $0x134] sm:$0xf0] }
 0x103   : > { %1657 = vmatpush.bf16.msra.mxu3 %v2707_v32  ;;  %1391 = vmatmul.bf16.vlgmr.msra.gmra.mxu0 %v2232_v41  ;;  %v2313_v32 = vld [vmem:[%s3306_s6 + $0xb0] sm:$0xf0]  ;;  %v2327_v41 = vld [vmem:[%s3306_s6 + $0xc0] sm:$0xf]  ;;  %v2656_v30 = vld [vmem:[%s3306_s6 + $0x12c] sm:$0xf]  ;;  %v2376_v35 = vor.u32 %v2657_v24, %v2375_v23 }
 0x104   : > { %1480 = vmatmul.bf16.vlgmr.msra.gmra.mxu1 %v2236_v42  ;;  %v2316_v38 = vor.u32 %v2639_v31, %v2313_v32  ;;  %v2645_v42 = vld [vmem:[%s3306_s6 + $0xcc] sm:$0xf0]  ;;  %v2385_v31 = vld [vmem:[%s3306_s6 + $0x138] sm:$0xf0]  ;;  %v2399_v58 = vld [vmem:[%s3306_s6 + $0x148] sm:$0xf] }
 0x105   : > { %1569 = vmatmul.bf16.vlgmr.msra.gmra.mxu2 %v2240_v43  ;;  %v2643_v43 = vld [vmem:[%s3306_s6 + $0xc4] sm:$0xf]  ;;  %v2328_v49 = vor.u32 %v2645_v42, %v2327_v41  ;;  %v2388_v41 = vor.u32 %v2656_v30, %v2385_v31  ;;  %v712_v42 = vld [vmem:[%s3310_s25 + $0x8] sm:$0xff]  ;;  %v2662_v59 = vld [vmem:[%s3306_s6 + $0x154] sm:$0xf0] }
 0x106   : > { %1658 = vmatmul.bf16.vlgmr.msra.gmra.mxu3 %v2244_v44  ;;  %v2329_v44 = vld [vmem:[%s3306_s6 + $0xd0] sm:$0xf0]  ;;  %v2660_v60 = vld [vmem:[%s3306_s6 + $0x14c] sm:$0xf]  ;;  %v2415_v24 = vld [vmem:[%s3306_s6 + $0x168] sm:$0xf] }
 0x107   : > { %v2332_v50 = vor.u32 %v2643_v43, %v2329_v44  ;;  %v2409_v23 = vld [vmem:[%s3306_s6 + $0x170] sm:$0xf0] }
 0x113   : > { %1396 = vmatmul.bf16.gmra.mxu0 %v2248_v53  ;;  %v2343_v53 = vld [vmem:[%s3306_s6 + $0xe0] sm:$0xf] }
 0x114   : > { %1485 = vmatmul.bf16.gmra.mxu1 %v2252_v54  ;;  %v2649_v54 = vld [vmem:[%s3306_s6 + $0xec] sm:$0xf0] }
 0x115   : > { %1574 = vmatmul.bf16.gmra.mxu2 %v2256_v55  ;;  %v2647_v55 = vld [vmem:[%s3306_s6 + $0xe4] sm:$0xf]  ;;  %v2344_v61 = vor.u32 %v2649_v54, %v2343_v53  ;;  %v2391_v53 = vld [vmem:[%s3306_s6 + $0x140] sm:$0xf]  ;;  %v2661_v54 = vld [vmem:[%s3306_s6 + $0x14c] sm:$0xf0] }
 0x116   : > { %1663 = vmatmul.bf16.gmra.mxu3 %v2260_v56  ;;  %v2345_v56 = vld [vmem:[%s3306_s6 + $0xf0] sm:$0xf0] }
 0x117   : > { %v2348_v62 = vor.u32 %v2647_v55, %v2345_v56  ;;  %v2659_v56 = vld [vmem:[%s3306_s6 + $0x144] sm:$0xf] }
 0x123   : > { %1401 = vmatmul.bf16.gmra.mxu0 %v2264_v1  ;;  %v2359_v1 = vld [vmem:[%s3306_s6 + $0x100] sm:$0xf] }
 0x124   : > { %1490 = vmatmul.bf16.gmra.mxu1 %v2268_v2  ;;  %v2653_v2 = vld [vmem:[%s3306_s6 + $0x10c] sm:$0xf0] }
 0x125   : > { %1579 = vmatmul.bf16.gmra.mxu2 %v2272_v3  ;;  %v2651_v3 = vld [vmem:[%s3306_s6 + $0x104] sm:$0xf]  ;;  %v2360_v9 = vor.u32 %v2653_v2, %v2359_v1  ;;  %v2392_v1 = vor.u32 %v2661_v54, %v2391_v53  ;;  %v2396_v2 = vor.u32 %v2659_v56, %v2393_v57  ;;  %v2425_v53 = vld [vmem:[%s3306_s6 + $0x190] sm:$0xf0]  ;;  %v2431_v54 = vld [vmem:[%s3306_s6 + $0x188] sm:$0xf] }
 0x126   : > { %1668 = vmatmul.bf16.gmra.mxu3 %v2276_v4  ;;  %v2361_v4 = vld [vmem:[%s3306_s6 + $0x110] sm:$0xf0]  ;;  %v2668_v56 = vld [vmem:[%s3306_s6 + $0x18c] sm:$0xf]  ;;  %v2433_v57 = vld [vmem:[%s3306_s6 + $0x198] sm:$0xf0] }
 0x127   : > { %v2364_v10 = vor.u32 %v2651_v3, %v2361_v4 }
 0x133   : > { %1406 = vmatmul.bf16.gmra.mxu0 %v2280_v13  ;;  %v2368_v13 = vor.u32 %v2654_v6, %v2367_v5  ;;  %v2400_v6 = vor.u32 %v2662_v59, %v2399_v58 }
 0x134   : > { %1495 = vmatmul.bf16.gmra.mxu1 %v2284_v14  ;;  %v2372_v14 = vor.u32 %v2652_v7, %v2369_v8  ;;  %v714_v8 = vld [vmem:[%s3310_s25 + $0x18] sm:$0xff] }
 0x135   : > { %1584 = vmatmul.bf16.gmra.mxu2 %v2288_v15 }
 0x136   : > { %1673 = vmatmul.bf16.gmra.mxu3 %v2292_v16 }
 0x143   : > { %1411 = vmatmul.bf16.gmra.mxu0 %v2296_v25 }
 0x144   : > { %1500 = vmatmul.bf16.gmra.mxu1 %v2300_v26  ;;  %v2655_v26 = vld [vmem:[%s3306_s6 + $0x124] sm:$0xf] }
 0x145   : > { %1589 = vmatmul.bf16.gmra.mxu2 %v2304_v27  ;;  %v2377_v27 = vld [vmem:[%s3306_s6 + $0x130] sm:$0xf0] }
 0x146   : > { %1678 = vmatmul.bf16.gmra.mxu3 %v2308_v28  ;;  %v2383_v28 = vld [vmem:[%s3306_s6 + $0x128] sm:$0xf]  ;;  %v2380_v36 = vor.u32 %v2655_v26, %v2377_v27  ;;  %v2664_v26 = vld [vmem:[%s3306_s6 + $0x16c] sm:$0xf]  ;;  %v2417_v27 = vld [vmem:[%s3306_s6 + $0x178] sm:$0xf0] }
 0x153   : > { %1416 = vmatmul.bf16.gmra.mxu0 %v2312_v37 }
 0x154   : > { %1505 = vmatmul.bf16.gmra.mxu1 %v2316_v38 }
 0x155   : > { %1594 = vmatmul.bf16.gmra.mxu2 %v2320_v39 }
 0x156   : > { %1683 = vmatmul.bf16.gmra.mxu3 %v2324_v40  ;;  %v2384_v40 = vor.u32 %v2658_v29, %v2383_v28 }
 0x163   : > { %1421 = vmatmul.bf16.gmra.mxu0 %v2328_v49 }
 0x164   : > { %1510 = vmatmul.bf16.gmra.mxu1 %v2332_v50 }
 0x165   : > { %1599 = vmatmul.bf16.gmra.mxu2 %v2336_v51  ;;  %v713_v51 = vld [vmem:[%s3310_s25 + $0x10] sm:$0xff] }
 0x166   : > { %1688 = vmatmul.bf16.gmra.mxu3 %v2340_v52 }
 0x173   : > { %1426 = vmatmul.bf16.gmra.mxu0 %v2344_v61  ;;  %v2401_v61 = vld [vmem:[%s3306_s6 + $0x158] sm:$0xf0] }
 0x174   : > { %1515 = vmatmul.bf16.gmra.mxu1 %v2348_v62  ;;  %v2404_v7 = vor.u32 %v2660_v60, %v2401_v61 }
 0x175   : > { %1604 = vmatmul.bf16.gmra.mxu2 %v2352_v63 }
 0x176   : > { %1693 = vmatmul.bf16.gmra.mxu3 %v2356_v0 }
 0x180   : > { %v1392_v11 = vpop.f32.mrf.mxu0 }
 0x181   : > { %v1481_v12 = vpop.f32.mrf.mxu1 }
 0x182   : > { %v1482_v15 = vadd.f32 %v1481_v12, %v1392_v11 }
 0x183   : > { %1431 = vmatmul.bf16.gmra.mxu0 %v2360_v9 }
 0x184   : > { %1520 = vmatmul.bf16.gmra.mxu1 %v2364_v10 }
 0x185   : > { %1609 = vmatmul.bf16.gmra.mxu2 %v2368_v13 }
 0x186   : > { %1698 = vmatmul.bf16.gmra.mxu3 %v2372_v14 }
 0x188   : > { %v1570_v16 = vpop.f32.mrf.mxu2  ;;  %v1394_v19 = vpop.f32.mrf.mxu0 }
 0x189   : > { %v1659_v17 = vpop.f32.mrf.mxu3  ;;  %v1571_v18 = vadd.f32 %v1570_v16, %v1482_v15  ;;  %v1483_v20 = vpop.f32.mrf.mxu1 }
 0x18a   : > { %v1484_v32 = vadd.f32 %v1483_v20, %v1394_v19  ;;  %v2407_v19 = vld [vmem:[%s3306_s6 + $0x160] sm:$0xf]  ;;  %v2665_v20 = vld [vmem:[%s3306_s6 + $0x16c] sm:$0xf0] }
 0x18b   : > { %v1660_v22 = vadd.f32 %v1659_v17, %v1571_v18  ;;  %v715_v17 = vld [vmem:[%s3310_s25 + $0x20] sm:$0xff]  ;;  %v2408_v31 = vor.u32 %v2665_v20, %v2407_v19  ;;  %v2441_v19 = vld [vmem:[%s3306_s6 + $0x1b0] sm:$0xf0]  ;;  %v2447_v20 = vld [vmem:[%s3306_s6 + $0x1a8] sm:$0xf] }
 0x18d   : > { %v1739_v25 = vadd.f32 %v1660_v22, %v711_v21  ;;  %v2663_v22 = vld [vmem:[%s3306_s6 + $0x164] sm:$0xf] }
 0x18f   : > { %1771 = vst [vmem:[%s3310_s25] sm:$0xff] %v1739_v25  ;;  %v2666_v25 = vld [vmem:[%s3306_s6 + $0x174] sm:$0xf0] }
 0x190   : > { %v1572_v33 = vpop.f32.mrf.mxu2  ;;  %v1397_v38 = vpop.f32.mrf.mxu0 }
 0x191   : > { %v1661_v34 = vpop.f32.mrf.mxu3  ;;  %v1573_v37 = vadd.f32 %v1572_v33, %v1484_v32  ;;  %v1486_v39 = vpop.f32.mrf.mxu1  ;;  %v2412_v32 = vor.u32 %v2663_v22, %v2409_v23  ;;  %v2672_v22 = vld [vmem:[%s3306_s6 + $0x1ac] sm:$0xf]  ;;  %v2449_v23 = vld [vmem:[%s3306_s6 + $0x1b8] sm:$0xf0] }
 0x192   : > { %v1487_v45 = vadd.f32 %v1486_v39, %v1397_v38  ;;  %v716_v38 = vld [vmem:[%s3310_s25 + $0x28] sm:$0xff] }
 0x193   : > { %v1662_v43 = vadd.f32 %v1661_v34, %v1573_v37  ;;  %1436 = vmatmul.bf16.gmra.mxu0 %v2376_v35  ;;  %v2420_v37 = vor.u32 %v2664_v26, %v2417_v27 }
 0x194   : > { %1525 = vmatmul.bf16.gmra.mxu1 %v2380_v36  ;;  %v2416_v36 = vor.u32 %v2666_v25, %v2415_v24 }
 0x195   : > { %v1740_v44 = vadd.f32 %v1662_v43, %v712_v42  ;;  %1614 = vmatmul.bf16.gmra.mxu2 %v2384_v40 }
 0x196   : > { %1703 = vmatmul.bf16.gmra.mxu3 %v2388_v41 }
 0x197   : > { %1772 = vst [vmem:[%s3310_s25 + $0x8] sm:$0xff] %v1740_v44 }
 0x198   : > { %v1575_v46 = vpop.f32.mrf.mxu2  ;;  %v1399_v49 = vpop.f32.mrf.mxu0 }
 0x199   : > { %v1664_v47 = vpop.f32.mrf.mxu3  ;;  %v1576_v48 = vadd.f32 %v1575_v46, %v1487_v45  ;;  %v1488_v50 = vpop.f32.mrf.mxu1 }
 0x19a   : > { %v1489_v62 = vadd.f32 %v1488_v50, %v1399_v49  ;;  %v2423_v49 = vld [vmem:[%s3306_s6 + $0x180] sm:$0xf]  ;;  %v2669_v50 = vld [vmem:[%s3306_s6 + $0x18c] sm:$0xf0] }
 0x19b   : > { %v1665_v52 = vadd.f32 %v1664_v47, %v1576_v48  ;;  %v717_v47 = vld [vmem:[%s3310_s25 + $0x30] sm:$0xff]  ;;  %v2424_v61 = vor.u32 %v2669_v50, %v2423_v49  ;;  %v2463_v50 = vld [vmem:[%s3306_s6 + $0x1c8] sm:$0xf] }
 0x19c   : > { %v2457_v49 = vld [vmem:[%s3306_s6 + $0x1d0] sm:$0xf0] }
 0x19d   : > { %v1741_v55 = vadd.f32 %v1665_v52, %v713_v51  ;;  %v2667_v52 = vld [vmem:[%s3306_s6 + $0x184] sm:$0xf] }
 0x19f   : > { %1773 = vst [vmem:[%s3310_s25 + $0x10] sm:$0xff] %v1741_v55  ;;  %v2670_v55 = vld [vmem:[%s3306_s6 + $0x194] sm:$0xf0] }
 0x1a0   : > { %v1577_v63 = vpop.f32.mrf.mxu2  ;;  %v1402_v4 = vpop.f32.mrf.mxu0 }
 0x1a1   : > { %v1666_v0 = vpop.f32.mrf.mxu3  ;;  %v1578_v3 = vadd.f32 %v1577_v63, %v1489_v62  ;;  %v1491_v5 = vpop.f32.mrf.mxu1  ;;  %v2428_v62 = vor.u32 %v2667_v52, %v2425_v53  ;;  %v2676_v52 = vld [vmem:[%s3306_s6 + $0x1cc] sm:$0xf]  ;;  %v2465_v53 = vld [vmem:[%s3306_s6 + $0x1d8] sm:$0xf0] }
 0x1a2   : > { %v1492_v11 = vadd.f32 %v1491_v5, %v1402_v4  ;;  %v718_v4 = vld [vmem:[%s3310_s25 + $0x38] sm:$0xff] }
 0x1a3   : > { %v1667_v9 = vadd.f32 %v1666_v0, %v1578_v3  ;;  %1441 = vmatmul.bf16.gmra.mxu0 %v2392_v1  ;;  %v2436_v3 = vor.u32 %v2668_v56, %v2433_v57 }
 0x1a4   : > { %1530 = vmatmul.bf16.gmra.mxu1 %v2396_v2  ;;  %v2432_v2 = vor.u32 %v2670_v55, %v2431_v54 }
 0x1a5   : > { %v1742_v10 = vadd.f32 %v1667_v9, %v714_v8  ;;  %1619 = vmatmul.bf16.gmra.mxu2 %v2400_v6 }
 0x1a6   : > { %1708 = vmatmul.bf16.gmra.mxu3 %v2404_v7 }
 0x1a7   : > { %1774 = vst [vmem:[%s3310_s25 + $0x18] sm:$0xff] %v1742_v10 }
 0x1a8   : > { %v1580_v12 = vpop.f32.mrf.mxu2  ;;  %v1404_v15 = vpop.f32.mrf.mxu0 }
 0x1a9   : > { %v1669_v13 = vpop.f32.mrf.mxu3  ;;  %v1581_v14 = vadd.f32 %v1580_v12, %v1492_v11  ;;  %v1493_v16 = vpop.f32.mrf.mxu1 }
 0x1aa   : > { %v1494_v28 = vadd.f32 %v1493_v16, %v1404_v15  ;;  %v2439_v15 = vld [vmem:[%s3306_s6 + $0x1a0] sm:$0xf]  ;;  %v2673_v16 = vld [vmem:[%s3306_s6 + $0x1ac] sm:$0xf0] }
 0x1ab   : > { %v1670_v18 = vadd.f32 %v1669_v13, %v1581_v14  ;;  %v719_v13 = vld [vmem:[%s3310_s25 + $0x40] sm:$0xff]  ;;  %v2440_v27 = vor.u32 %v2673_v16, %v2439_v15  ;;  %v2473_v15 = vld [vmem:[%s3306_s6 + $0x1f0] sm:$0xf0]  ;;  %v2479_v16 = vld [vmem:[%s3306_s6 + $0x1e8] sm:$0xf] }
 0x1ad   : > { %v1743_v21 = vadd.f32 %v1670_v18, %v715_v17  ;;  %v2671_v18 = vld [vmem:[%s3306_s6 + $0x1a4] sm:$0xf] }
 0x1af   : > { %1775 = vst [vmem:[%s3310_s25 + $0x20] sm:$0xff] %v1743_v21  ;;  %v2674_v21 = vld [vmem:[%s3306_s6 + $0x1b4] sm:$0xf0] }
 0x1b0   : > { %v1582_v29 = vpop.f32.mrf.mxu2  ;;  %v1407_v34 = vpop.f32.mrf.mxu0 }
 0x1b1   : > { %v1671_v30 = vpop.f32.mrf.mxu3  ;;  %v1583_v33 = vadd.f32 %v1582_v29, %v1494_v28  ;;  %v1496_v35 = vpop.f32.mrf.mxu1  ;;  %v2444_v28 = vor.u32 %v2671_v18, %v2441_v19  ;;  %v2680_v18 = vld [vmem:[%s3306_s6 + $0x1ec] sm:$0xf]  ;;  %v2481_v19 = vld [vmem:[%s3306_s6 + $0x1f8] sm:$0xf0] }
 0x1b2   : > { %v1497_v41 = vadd.f32 %v1496_v35, %v1407_v34  ;;  %v720_v34 = vld [vmem:[%s3310_s25 + $0x48] sm:$0xff] }
 0x1b3   : > { %v1672_v39 = vadd.f32 %v1671_v30, %v1583_v33  ;;  %1446 = vmatmul.bf16.gmra.mxu0 %v2408_v31  ;;  %v2452_v33 = vor.u32 %v2672_v22, %v2449_v23 }
 0x1b4   : > { %1535 = vmatmul.bf16.gmra.mxu1 %v2412_v32  ;;  %v2448_v32 = vor.u32 %v2674_v21, %v2447_v20 }
 0x1b5   : > { %v1744_v40 = vadd.f32 %v1672_v39, %v716_v38  ;;  %1624 = vmatmul.bf16.gmra.mxu2 %v2416_v36 }
 0x1b6   : > { %1713 = vmatmul.bf16.gmra.mxu3 %v2420_v37 }
 0x1b7   : > { %1776 = vst [vmem:[%s3310_s25 + $0x28] sm:$0xff] %v1744_v40 }
 0x1b8   : > { %v1585_v42 = vpop.f32.mrf.mxu2  ;;  %v1409_v45 = vpop.f32.mrf.mxu0 }
 0x1b9   : > { %v1674_v43 = vpop.f32.mrf.mxu3  ;;  %v1586_v44 = vadd.f32 %v1585_v42, %v1497_v41  ;;  %v1498_v46 = vpop.f32.mrf.mxu1 }
 0x1ba   : > { %v1499_v58 = vadd.f32 %v1498_v46, %v1409_v45  ;;  %v2455_v45 = vld [vmem:[%s3306_s6 + $0x1c0] sm:$0xf]  ;;  %v2677_v46 = vld [vmem:[%s3306_s6 + $0x1cc] sm:$0xf0] }
 0x1bb   : > { %v1675_v48 = vadd.f32 %v1674_v43, %v1586_v44  ;;  %v721_v43 = vld [vmem:[%s3310_s25 + $0x50] sm:$0xff]  ;;  %v2456_v57 = vor.u32 %v2677_v46, %v2455_v45 }
 0x1bd   : > { %v1745_v51 = vadd.f32 %v1675_v48, %v717_v47  ;;  %v2675_v48 = vld [vmem:[%s3306_s6 + $0x1c4] sm:$0xf] }
 0x1bf   : > { %1777 = vst [vmem:[%s3310_s25 + $0x30] sm:$0xff] %v1745_v51  ;;  %v2678_v51 = vld [vmem:[%s3306_s6 + $0x1d4] sm:$0xf0] }
 0x1c0   : > { %v1587_v59 = vpop.f32.mrf.mxu2  ;;  %v1412_v0 = vpop.f32.mrf.mxu0 }
 0x1c1   : > { %v1676_v60 = vpop.f32.mrf.mxu3  ;;  %v1588_v63 = vadd.f32 %v1587_v59, %v1499_v58  ;;  %v1501_v1 = vpop.f32.mrf.mxu1  ;;  %v2460_v58 = vor.u32 %v2675_v48, %v2457_v49  ;;  %v726_v48 = vld [vmem:[%s3310_s25 + $0x78] sm:$0xff] }
 0x1c2   : > { %v1502_v7 = vadd.f32 %v1501_v1, %v1412_v0  ;;  %v722_v0 = vld [vmem:[%s3310_s25 + $0x58] sm:$0xff] }
 0x1c3   : > { %v1677_v5 = vadd.f32 %v1676_v60, %v1588_v63  ;;  %1451 = vmatmul.bf16.gmra.mxu0 %v2424_v61  ;;  %v2468_v63 = vor.u32 %v2676_v52, %v2465_v53 }
 0x1c4   : > { %1540 = vmatmul.bf16.gmra.mxu1 %v2428_v62  ;;  %v2464_v62 = vor.u32 %v2678_v51, %v2463_v50 }
 0x1c5   : > { %v1746_v6 = vadd.f32 %v1677_v5, %v718_v4  ;;  %1629 = vmatmul.bf16.gmra.mxu2 %v2432_v2 }
 0x1c6   : > { %1718 = vmatmul.bf16.gmra.mxu3 %v2436_v3 }
 0x1c7   : > { %1778 = vst [vmem:[%s3310_s25 + $0x38] sm:$0xff] %v1746_v6 }
 0x1c8   : > { %v1590_v8 = vpop.f32.mrf.mxu2  ;;  %v1414_v11 = vpop.f32.mrf.mxu0 }
 0x1c9   : > { %v1679_v9 = vpop.f32.mrf.mxu3  ;;  %v1591_v10 = vadd.f32 %v1590_v8, %v1502_v7  ;;  %v1503_v12 = vpop.f32.mrf.mxu1 }
 0x1ca   : > { %v1504_v24 = vadd.f32 %v1503_v12, %v1414_v11  ;;  %v2471_v11 = vld [vmem:[%s3306_s6 + $0x1e0] sm:$0xf]  ;;  %v2681_v12 = vld [vmem:[%s3306_s6 + $0x1ec] sm:$0xf0] }
 0x1cb   : > { %v1680_v14 = vadd.f32 %v1679_v9, %v1591_v10  ;;  %v723_v9 = vld [vmem:[%s3310_s25 + $0x60] sm:$0xff]  ;;  %v2472_v23 = vor.u32 %v2681_v12, %v2471_v11  ;;  %v729_v11 = vld [vmem:[%s3310_s25 + $0x90] sm:$0xff] }
 0x1cd   : > { %v1747_v17 = vadd.f32 %v1680_v14, %v719_v13  ;;  %v2679_v14 = vld [vmem:[%s3306_s6 + $0x1e4] sm:$0xf] }
 0x1cf   : > { %1779 = vst [vmem:[%s3310_s25 + $0x40] sm:$0xff] %v1747_v17  ;;  %v2682_v17 = vld [vmem:[%s3306_s6 + $0x1f4] sm:$0xf0] }
 0x1d0   : > { %v1592_v25 = vpop.f32.mrf.mxu2  ;;  %v1417_v30 = vpop.f32.mrf.mxu0 }
 0x1d1   : > { %v1681_v26 = vpop.f32.mrf.mxu3  ;;  %v1593_v29 = vadd.f32 %v1592_v25, %v1504_v24  ;;  %v1506_v31 = vpop.f32.mrf.mxu1  ;;  %v2476_v24 = vor.u32 %v2679_v14, %v2473_v15 }
 0x1d2   : > { %v1507_v37 = vadd.f32 %v1506_v31, %v1417_v30  ;;  %v724_v30 = vld [vmem:[%s3310_s25 + $0x68] sm:$0xff] }
 0x1d3   : > { %v1682_v35 = vadd.f32 %v1681_v26, %v1593_v29  ;;  %1456 = vmatmul.bf16.gmra.mxu0 %v2440_v27  ;;  %v2484_v29 = vor.u32 %v2680_v18, %v2481_v19 }
 0x1d4   : > { %1545 = vmatmul.bf16.gmra.mxu1 %v2444_v28  ;;  %v2480_v28 = vor.u32 %v2682_v17, %v2479_v16 }
 0x1d5   : > { %v1748_v36 = vadd.f32 %v1682_v35, %v720_v34  ;;  %1634 = vmatmul.bf16.gmra.mxu2 %v2448_v32 }
 0x1d6   : > { %1723 = vmatmul.bf16.gmra.mxu3 %v2452_v33 }
 0x1d7   : > { %1780 = vst [vmem:[%s3310_s25 + $0x48] sm:$0xff] %v1748_v36 }
 0x1d8   : > { %v1595_v38 = vpop.f32.mrf.mxu2  ;;  %v1419_v41 = vpop.f32.mrf.mxu0 }
 0x1d9   : > { %v1684_v39 = vpop.f32.mrf.mxu3  ;;  %v1596_v40 = vadd.f32 %v1595_v38, %v1507_v37  ;;  %v1508_v42 = vpop.f32.mrf.mxu1 }
 0x1da   : > { %v1509_v54 = vadd.f32 %v1508_v42, %v1419_v41 }
 0x1db   : > { %v1685_v44 = vadd.f32 %v1684_v39, %v1596_v40  ;;  %v725_v39 = vld [vmem:[%s3310_s25 + $0x70] sm:$0xff] }
 0x1dd   : > { %v1749_v47 = vadd.f32 %v1685_v44, %v721_v43 }
 0x1df   : > { %1781 = vst [vmem:[%s3310_s25 + $0x50] sm:$0xff] %v1749_v47 }
 0x1e0   : > { %v1597_v55 = vpop.f32.mrf.mxu2  ;;  %v1422_v60 = vpop.f32.mrf.mxu0 }
 0x1e1   : > { %v1686_v56 = vpop.f32.mrf.mxu3  ;;  %v1598_v59 = vadd.f32 %v1597_v55, %v1509_v54  ;;  %v1511_v61 = vpop.f32.mrf.mxu1 }
 0x1e2   : > { %v1512_v3 = vadd.f32 %v1511_v61, %v1422_v60 }
 0x1e3   : > { %v1687_v1 = vadd.f32 %v1686_v56, %v1598_v59  ;;  %1461 = vmatmul.bf16.gmra.mxu0 %v2456_v57  ;;  %v727_v57 = vld [vmem:[%s3310_s25 + $0x80] sm:$0xff] }
 0x1e4   : > { %1550 = vmatmul.bf16.gmra.mxu1 %v2460_v58 }
 0x1e5   : > { %v1750_v2 = vadd.f32 %v1687_v1, %v722_v0  ;;  %1639 = vmatmul.bf16.gmra.mxu2 %v2464_v62 }
 0x1e6   : > { %1728 = vmatmul.bf16.gmra.mxu3 %v2468_v63 }
 0x1e7   : > { %1782 = vst [vmem:[%s3310_s25 + $0x58] sm:$0xff] %v1750_v2  ;;  %v728_v2 = vld [vmem:[%s3310_s25 + $0x88] sm:$0xff] }
 0x1e8   : > { %v1600_v4 = vpop.f32.mrf.mxu2  ;;  %v1424_v7 = vpop.f32.mrf.mxu0 }
 0x1e9   : > { %v1689_v5 = vpop.f32.mrf.mxu3  ;;  %v1601_v6 = vadd.f32 %v1600_v4, %v1512_v3  ;;  %v1513_v8 = vpop.f32.mrf.mxu1 }
 0x1ea   : > { %v1514_v20 = vadd.f32 %v1513_v8, %v1424_v7 }
 0x1eb   : > { %v1690_v10 = vadd.f32 %v1689_v5, %v1601_v6 }
 0x1ed   : > { %v1751_v13 = vadd.f32 %v1690_v10, %v723_v9 }
 0x1ef   : > { %1783 = vst [vmem:[%s3310_s25 + $0x60] sm:$0xff] %v1751_v13 }
 0x1f0   : > { %v1602_v21 = vpop.f32.mrf.mxu2  ;;  %v1427_v26 = vpop.f32.mrf.mxu0 }
 0x1f1   : > { %v1691_v22 = vpop.f32.mrf.mxu3  ;;  %v1603_v25 = vadd.f32 %v1602_v21, %v1514_v20  ;;  %v1516_v27 = vpop.f32.mrf.mxu1  ;;  %v730_v20 = vld [vmem:[%s3310_s25 + $0x98] sm:$0xff] }
 0x1f2   : > { %v1517_v33 = vadd.f32 %v1516_v27, %v1427_v26 }
 0x1f3   : > { %v1692_v31 = vadd.f32 %v1691_v22, %v1603_v25  ;;  %1466 = vmatmul.bf16.gmra.mxu0 %v2472_v23 }
 0x1f4   : > { %1555 = vmatmul.bf16.gmra.mxu1 %v2476_v24 }
 0x1f5   : > { %v1752_v32 = vadd.f32 %v1692_v31, %v724_v30  ;;  %1644 = vmatmul.bf16.gmra.mxu2 %v2480_v28 }
 0x1f6   : > { %1733 = vmatmul.bf16.gmra.mxu3 %v2484_v29  ;;  %v731_v29 = vld [vmem:[%s3310_s25 + $0xa0] sm:$0xff] }
 0x1f7   : > { %1784 = vst [vmem:[%s3310_s25 + $0x68] sm:$0xff] %v1752_v32 }
 0x1f8   : > { %v1605_v34 = vpop.f32.mrf.mxu2  ;;  %v1429_v37 = vpop.f32.mrf.mxu0 }
 0x1f9   : > { %v1694_v35 = vpop.f32.mrf.mxu3  ;;  %v1606_v36 = vadd.f32 %v1605_v34, %v1517_v33  ;;  %v1518_v38 = vpop.f32.mrf.mxu1 }
 0x1fa   : > { %v1519_v42 = vadd.f32 %v1518_v38, %v1429_v37  ;;  %v732_v38 = vld [vmem:[%s3310_s25 + $0xa8] sm:$0xff] }
 0x1fb   : > { %v1695_v40 = vadd.f32 %v1694_v35, %v1606_v36 }
 0x1fd   : > { %v1753_v41 = vadd.f32 %v1695_v40, %v725_v39 }
 0x1ff   : > { %1785 = vst [vmem:[%s3310_s25 + $0x70] sm:$0xff] %v1753_v41 }
 0x200   : > { %v1607_v43 = vpop.f32.mrf.mxu2  ;;  %v1432_v46 = vpop.f32.mrf.mxu0 }
 0x201   : > { %v1696_v44 = vpop.f32.mrf.mxu3  ;;  %v1608_v45 = vadd.f32 %v1607_v43, %v1519_v42  ;;  %v1521_v47 = vpop.f32.mrf.mxu1 }
 0x202   : > { %v1522_v51 = vadd.f32 %v1521_v47, %v1432_v46  ;;  %v733_v47 = vld [vmem:[%s3310_s25 + $0xb0] sm:$0xff] }
 0x203   : > { %v1697_v49 = vadd.f32 %v1696_v44, %v1608_v45 }
 0x205   : > { %v1754_v50 = vadd.f32 %v1697_v49, %v726_v48 }
 0x207   : > { %1786 = vst [vmem:[%s3310_s25 + $0x78] sm:$0xff] %v1754_v50 }
 0x208   : > { %v1610_v52 = vpop.f32.mrf.mxu2  ;;  %v1434_v55 = vpop.f32.mrf.mxu0 }
 0x209   : > { %v1699_v53 = vpop.f32.mrf.mxu3  ;;  %v1611_v54 = vadd.f32 %v1610_v52, %v1522_v51  ;;  %v1523_v56 = vpop.f32.mrf.mxu1 }
 0x20a   : > { %v1524_v60 = vadd.f32 %v1523_v56, %v1434_v55  ;;  %v734_v56 = vld [vmem:[%s3310_s25 + $0xb8] sm:$0xff] }
 0x20b   : > { %v1700_v58 = vadd.f32 %v1699_v53, %v1611_v54 }
 0x20d   : > { %v1755_v59 = vadd.f32 %v1700_v58, %v727_v57 }
 0x20f   : > { %1787 = vst [vmem:[%s3310_s25 + $0x80] sm:$0xff] %v1755_v59 }
 0x210   : > { %v1612_v61 = vpop.f32.mrf.mxu2  ;;  %v1437_v0 = vpop.f32.mrf.mxu0 }
 0x211   : > { %v1701_v62 = vpop.f32.mrf.mxu3  ;;  %v1613_v63 = vadd.f32 %v1612_v61, %v1524_v60  ;;  %v1526_v1 = vpop.f32.mrf.mxu1 }
 0x212   : > { %v1527_v5 = vadd.f32 %v1526_v1, %v1437_v0  ;;  %v735_v1 = vld [vmem:[%s3310_s25 + $0xc0] sm:$0xff] }
 0x213   : > { %v1702_v3 = vadd.f32 %v1701_v62, %v1613_v63 }
 0x215   : > { %v1756_v4 = vadd.f32 %v1702_v3, %v728_v2 }
 0x217   : > { %1788 = vst [vmem:[%s3310_s25 + $0x88] sm:$0xff] %v1756_v4 }
 0x218   : > { %v1615_v6 = vpop.f32.mrf.mxu2  ;;  %v1439_v9 = vpop.f32.mrf.mxu0 }
 0x219   : > { %v1704_v7 = vpop.f32.mrf.mxu3  ;;  %v1616_v8 = vadd.f32 %v1615_v6, %v1527_v5  ;;  %v1528_v10 = vpop.f32.mrf.mxu1 }
 0x21a   : > { %v1529_v14 = vadd.f32 %v1528_v10, %v1439_v9  ;;  %v736_v10 = vld [vmem:[%s3310_s25 + $0xc8] sm:$0xff] }
 0x21b   : > { %v1705_v12 = vadd.f32 %v1704_v7, %v1616_v8 }
 0x21d   : > { %v1757_v13 = vadd.f32 %v1705_v12, %v729_v11 }
 0x21f   : > { %1789 = vst [vmem:[%s3310_s25 + $0x90] sm:$0xff] %v1757_v13 }
 0x220   : > { %v1617_v15 = vpop.f32.mrf.mxu2  ;;  %v1442_v18 = vpop.f32.mrf.mxu0 }
 0x221   : > { %v1706_v16 = vpop.f32.mrf.mxu3  ;;  %v1618_v17 = vadd.f32 %v1617_v15, %v1529_v14  ;;  %v1531_v19 = vpop.f32.mrf.mxu1 }
 0x222   : > { %v1532_v23 = vadd.f32 %v1531_v19, %v1442_v18  ;;  %v737_v19 = vld [vmem:[%s3310_s25 + $0xd0] sm:$0xff] }
 0x223   : > { %v1707_v21 = vadd.f32 %v1706_v16, %v1618_v17 }
 0x225   : > { %v1758_v22 = vadd.f32 %v1707_v21, %v730_v20 }
 0x227   : > { %1790 = vst [vmem:[%s3310_s25 + $0x98] sm:$0xff] %v1758_v22 }
 0x228   : > { %v1620_v24 = vpop.f32.mrf.mxu2  ;;  %v1444_v27 = vpop.f32.mrf.mxu0 }
 0x229   : > { %v1709_v25 = vpop.f32.mrf.mxu3  ;;  %v1621_v26 = vadd.f32 %v1620_v24, %v1532_v23  ;;  %v1533_v28 = vpop.f32.mrf.mxu1 }
 0x22a   : > { %v1534_v32 = vadd.f32 %v1533_v28, %v1444_v27  ;;  %v738_v28 = vld [vmem:[%s3310_s25 + $0xd8] sm:$0xff] }
 0x22b   : > { %v1710_v30 = vadd.f32 %v1709_v25, %v1621_v26 }
 0x22d   : > { %v1759_v31 = vadd.f32 %v1710_v30, %v731_v29 }
 0x22f   : > { %1791 = vst [vmem:[%s3310_s25 + $0xa0] sm:$0xff] %v1759_v31 }
 0x230   : > { %v1622_v33 = vpop.f32.mrf.mxu2  ;;  %v1447_v36 = vpop.f32.mrf.mxu0 }
 0x231   : > { %v1711_v34 = vpop.f32.mrf.mxu3  ;;  %v1623_v35 = vadd.f32 %v1622_v33, %v1534_v32  ;;  %v1536_v37 = vpop.f32.mrf.mxu1 }
 0x232   : > { %v1537_v41 = vadd.f32 %v1536_v37, %v1447_v36  ;;  %v739_v37 = vld [vmem:[%s3310_s25 + $0xe0] sm:$0xff] }
 0x233   : > { %v1712_v39 = vadd.f32 %v1711_v34, %v1623_v35 }
 0x235   : > { %v1760_v40 = vadd.f32 %v1712_v39, %v732_v38 }
 0x237   : > { %1792 = vst [vmem:[%s3310_s25 + $0xa8] sm:$0xff] %v1760_v40 }
 0x238   : > { %v1625_v42 = vpop.f32.mrf.mxu2  ;;  %v1449_v45 = vpop.f32.mrf.mxu0 }
 0x239   : > { %v1714_v43 = vpop.f32.mrf.mxu3  ;;  %v1626_v44 = vadd.f32 %v1625_v42, %v1537_v41  ;;  %v1538_v46 = vpop.f32.mrf.mxu1 }
 0x23a   : > { %v1539_v50 = vadd.f32 %v1538_v46, %v1449_v45 }
 0x23b   : > { %v1715_v48 = vadd.f32 %v1714_v43, %v1626_v44  ;;  %v740_v44 = vld [vmem:[%s3310_s25 + $0xe8] sm:$0xff] }
 0x23d   : > { %v1761_v49 = vadd.f32 %v1715_v48, %v733_v47 }
 0x23f   : > { %1793 = vst [vmem:[%s3310_s25 + $0xb0] sm:$0xff] %v1761_v49 }
 0x240   : > { %v1627_v51 = vpop.f32.mrf.mxu2  ;;  %v1452_v54 = vpop.f32.mrf.mxu0 }
 0x241   : > { %v1716_v52 = vpop.f32.mrf.mxu3  ;;  %v1628_v53 = vadd.f32 %v1627_v51, %v1539_v50  ;;  %v1541_v55 = vpop.f32.mrf.mxu1 }
 0x242   : > { %v1542_v59 = vadd.f32 %v1541_v55, %v1452_v54 }
 0x243   : > { %v1717_v57 = vadd.f32 %v1716_v52, %v1628_v53  ;;  %v741_v53 = vld [vmem:[%s3310_s25 + $0xf0] sm:$0xff] }
 0x245   : > { %v1762_v58 = vadd.f32 %v1717_v57, %v734_v56 }
 0x247   : > { %1794 = vst [vmem:[%s3310_s25 + $0xb8] sm:$0xff] %v1762_v58 }
 0x248   : > { %v1630_v60 = vpop.f32.mrf.mxu2  ;;  %v1454_v63 = vpop.f32.mrf.mxu0 }
 0x249   : > { %v1719_v61 = vpop.f32.mrf.mxu3  ;;  %v1631_v62 = vadd.f32 %v1630_v60, %v1542_v59  ;;  %v1543_v0 = vpop.f32.mrf.mxu1 }
 0x24a   : > { %v1544_v4 = vadd.f32 %v1543_v0, %v1454_v63 }
 0x24b   : > { %v1720_v2 = vadd.f32 %v1719_v61, %v1631_v62  ;;  %v742_v61 = vld [vmem:[%s3310_s25 + $0xf8] sm:$0xff] }
 0x24d   : > { %v1763_v3 = vadd.f32 %v1720_v2, %v735_v1 }
 0x24f   : > { %1795 = vst [vmem:[%s3310_s25 + $0xc0] sm:$0xff] %v1763_v3 }
 0x250   : > { %v1632_v5 = vpop.f32.mrf.mxu2  ;;  %v1457_v8 = vpop.f32.mrf.mxu0 }
 0x251   : > { %v1721_v6 = vpop.f32.mrf.mxu3  ;;  %v1633_v7 = vadd.f32 %v1632_v5, %v1544_v4  ;;  %v1546_v9 = vpop.f32.mrf.mxu1 }
 0x252   : > { %v1547_v13 = vadd.f32 %v1546_v9, %v1457_v8 }
 0x253   : > { %v1722_v11 = vadd.f32 %v1721_v6, %v1633_v7 }
 0x255   : > { %v1764_v12 = vadd.f32 %v1722_v11, %v736_v10 }
 0x257   : > { %1796 = vst [vmem:[%s3310_s25 + $0xc8] sm:$0xff] %v1764_v12 }
 0x258   : > { %v1635_v14 = vpop.f32.mrf.mxu2  ;;  %v1459_v17 = vpop.f32.mrf.mxu0 }
 0x259   : > { %v1724_v15 = vpop.f32.mrf.mxu3  ;;  %v1636_v16 = vadd.f32 %v1635_v14, %v1547_v13  ;;  %v1548_v18 = vpop.f32.mrf.mxu1 }
 0x25a   : > { %v1549_v22 = vadd.f32 %v1548_v18, %v1459_v17 }
 0x25b   : > { %v1725_v20 = vadd.f32 %v1724_v15, %v1636_v16 }
 0x25d   : > { %v1765_v21 = vadd.f32 %v1725_v20, %v737_v19 }
 0x25f   : > { %1797 = vst [vmem:[%s3310_s25 + $0xd0] sm:$0xff] %v1765_v21 }
 0x260   : > { %v1637_v23 = vpop.f32.mrf.mxu2  ;;  %v1462_v26 = vpop.f32.mrf.mxu0 }
 0x261   : > { %v1726_v24 = vpop.f32.mrf.mxu3  ;;  %v1638_v25 = vadd.f32 %v1637_v23, %v1549_v22  ;;  %v1551_v27 = vpop.f32.mrf.mxu1 }
 0x262   : > { %v1552_v31 = vadd.f32 %v1551_v27, %v1462_v26 }
 0x263   : > { %v1727_v29 = vadd.f32 %v1726_v24, %v1638_v25 }
 0x265   : > { %v1766_v30 = vadd.f32 %v1727_v29, %v738_v28 }
 0x267   : > { %1798 = vst [vmem:[%s3310_s25 + $0xd8] sm:$0xff] %v1766_v30 }
 0x268   : > { %v1640_v32 = vpop.f32.mrf.mxu2  ;;  %v1464_v35 = vpop.f32.mrf.mxu0 }
 0x269   : > { %v1729_v33 = vpop.f32.mrf.mxu3  ;;  %v1641_v34 = vadd.f32 %v1640_v32, %v1552_v31  ;;  %v1553_v36 = vpop.f32.mrf.mxu1 }
 0x26a   : > { %v1554_v40 = vadd.f32 %v1553_v36, %v1464_v35 }
 0x26b   : > { %v1730_v38 = vadd.f32 %v1729_v33, %v1641_v34 }
 0x26d   : > { %v1767_v39 = vadd.f32 %v1730_v38, %v739_v37 }
 0x26f   : > { %1799 = vst [vmem:[%s3310_s25 + $0xe0] sm:$0xff] %v1767_v39 }
 0x270   : > { %v1642_v41 = vpop.f32.mrf.mxu2  ;;  %v1467_v45 = vpop.f32.mrf.mxu0 }
 0x271   : > { %v1731_v42 = vpop.f32.mrf.mxu3  ;;  %v1643_v43 = vadd.f32 %v1642_v41, %v1554_v40  ;;  %v1556_v46 = vpop.f32.mrf.mxu1 }
 0x272   : > { %v1557_v49 = vadd.f32 %v1556_v46, %v1467_v45 }
 0x273   : > { %v1732_v47 = vadd.f32 %v1731_v42, %v1643_v43 }
 0x275   : > { %v1768_v48 = vadd.f32 %v1732_v47, %v740_v44 }
 0x277   : > { %1800 = vst [vmem:[%s3310_s25 + $0xe8] sm:$0xff] %v1768_v48 }
 0x278   : > { %v1645_v50 = vpop.f32.mrf.mxu2  ;;  %v1469_v55 = vpop.f32.mrf.mxu0 }
 0x279   : > { %v1734_v51 = vpop.f32.mrf.mxu3  ;;  %v1646_v52 = vadd.f32 %v1645_v50, %v1557_v49  ;;  %v1558_v56 = vpop.f32.mrf.mxu1 }
 0x27a   : > { %v1559_v58 = vadd.f32 %v1558_v56, %v1469_v55 }
 0x27b   : > { %v1735_v54 = vadd.f32 %v1734_v51, %v1646_v52 }
 0x27d   : > { %v1769_v57 = vadd.f32 %v1735_v54, %v741_v53 }
 0x27f   : > { %1801 = vst [vmem:[%s3310_s25 + $0xf0] sm:$0xff] %v1769_v57 }
 0x280   : > { %v1647_v59 = vpop.f32.mrf.mxu2 }
 0x281   : > { %v1648_v60 = vadd.f32 %v1647_v59, %v1559_v58  ;;  %v1736_v62 = vpop.f32.mrf.mxu3 }
 0x283   : > { %v1737_v63 = vadd.f32 %v1736_v62, %v1648_v60  ;;  %1806 = sbr.rel (%p2613_p5) target bundleno = 686 (0x2ae), region = 104 }
 0x285   : > { %v1770_v0 = vadd.f32 %v1737_v63, %v742_v61 }
 0x287   : > { %1802 = vst [vmem:[%s3310_s25 + $0xf8] sm:$0xff] %v1770_v0 }
 0x288   : > { %v1807_v1 = vld [vmem:[%s3310_s25] sm:$0xff]  ;;  %v1808_v3 = vld [vmem:[%s3310_s25 + $0x8] sm:$0xff]  ;;  %v1809_v4 = vld [vmem:[%s3310_s25 + $0x10] sm:$0xff] }
 0x289   : > { %v3576_v2 = vld [vmem:[%s673_s4] ss:$0 sm:$0xff]  ;;  %v1810_v5 = vld [vmem:[%s3310_s25 + $0x18] sm:$0xff]  ;;  %v1812_v11 = vld [vmem:[%s3310_s25 + $0x28] sm:$0xff] }
 0x28a   : > { %v1843_v6 = vadd.f32 %v3576_v2, %v1807_v1  ;;  %v1844_v7 = vadd.f32 %v3576_v2, %v1808_v3  ;;  %v1845_v8 = vadd.f32 %v3576_v2, %v1809_v4  ;;  %v1846_v9 = vadd.f32 %v3576_v2, %v1810_v5  ;;  %v1811_v10 = vld [vmem:[%s3310_s25 + $0x20] sm:$0xff]  ;;  %v1813_v12 = vld [vmem:[%s3310_s25 + $0x30] sm:$0xff]  ;;  %v1814_v15 = vld [vmem:[%s3310_s25 + $0x38] sm:$0xff] }
 0x28b   : > { %v1847_v13 = vadd.f32 %v3576_v2, %v1811_v10  ;;  %v1848_v14 = vadd.f32 %v3576_v2, %v1812_v11  ;;  %v1815_v16 = vld [vmem:[%s3310_s25 + $0x40] sm:$0xff]  ;;  %v1849_v20 = vadd.f32 %v3576_v2, %v1813_v12  ;;  %v1816_v21 = vld [vmem:[%s3310_s25 + $0x48] sm:$0xff]  ;;  %v1850_v23 = vadd.f32 %v3576_v2, %v1814_v15  ;;  %v1817_v24 = vld [vmem:[%s3310_s25 + $0x50] sm:$0xff] }
 0x28c   : > { %v1875_v17 = vmax.f32 %v1843_v6, 0.0  ;;  %v1876_v18 = vmax.f32 %v1844_v7, 0.0  ;;  %v1877_v19 = vmax.f32 %v1845_v8, 0.0  ;;  %v1878_v22 = vmax.f32 %v1846_v9, 0.0  ;;  %v1818_v27 = vld [vmem:[%s3310_s25 + $0x58] sm:$0xff]  ;;  %v1819_v30 = vld [vmem:[%s3310_s25 + $0x60] sm:$0xff] }
 0x28d   : > { %v1879_v25 = vmax.f32 %v1847_v13, 0.0  ;;  %v1851_v26 = vadd.f32 %v3576_v2, %v1815_v16  ;;  %v1880_v28 = vmax.f32 %v1848_v14, 0.0  ;;  %v1852_v29 = vadd.f32 %v3576_v2, %v1816_v21  ;;  %v1820_v33 = vld [vmem:[%s3310_s25 + $0x68] sm:$0xff]  ;;  %v1821_v36 = vld [vmem:[%s3310_s25 + $0x70] sm:$0xff]  ;;  %v1822_v39 = vld [vmem:[%s3310_s25 + $0x78] sm:$0xff] }
 0x28e   : > { %1907 = vst [vmem:[%s3310_s25] sm:$0xff] %v1875_v17  ;;  %v1881_v31 = vmax.f32 %v1849_v20, 0.0  ;;  %v1853_v32 = vadd.f32 %v3576_v2, %v1817_v24  ;;  %v1882_v34 = vmax.f32 %v1850_v23, 0.0  ;;  %v1854_v35 = vadd.f32 %v3576_v2, %v1818_v27  ;;  %v1823_v42 = vld [vmem:[%s3310_s25 + $0x80] sm:$0xff]  ;;  %v1824_v45 = vld [vmem:[%s3310_s25 + $0x88] sm:$0xff]  ;;  %v1825_v48 = vld [vmem:[%s3310_s25 + $0x90] sm:$0xff] }
 0x28f   : > { %1908 = vst [vmem:[%s3310_s25 + $0x8] sm:$0xff] %v1876_v18  ;;  %v1883_v37 = vmax.f32 %v1851_v26, 0.0  ;;  %v1855_v38 = vadd.f32 %v3576_v2, %v1819_v30  ;;  %v1884_v40 = vmax.f32 %v1852_v29, 0.0  ;;  %v1856_v41 = vadd.f32 %v3576_v2, %v1820_v33  ;;  %v1826_v51 = vld [vmem:[%s3310_s25 + $0x98] sm:$0xff]  ;;  %v1827_v54 = vld [vmem:[%s3310_s25 + $0xa0] sm:$0xff]  ;;  %v1828_v57 = vld [vmem:[%s3310_s25 + $0xa8] sm:$0xff] }
 0x290   : > { %1909 = vst [vmem:[%s3310_s25 + $0x10] sm:$0xff] %v1877_v19  ;;  %v1885_v43 = vmax.f32 %v1853_v32, 0.0  ;;  %v1857_v44 = vadd.f32 %v3576_v2, %v1821_v36  ;;  %v1886_v46 = vmax.f32 %v1854_v35, 0.0  ;;  %v1858_v47 = vadd.f32 %v3576_v2, %v1822_v39  ;;  %v1829_v60 = vld [vmem:[%s3310_s25 + $0xb0] sm:$0xff]  ;;  %v1830_v63 = vld [vmem:[%s3310_s25 + $0xb8] sm:$0xff]  ;;  %v1831_v3 = vld [vmem:[%s3310_s25 + $0xc0] sm:$0xff] }
 0x291   : > { %1910 = vst [vmem:[%s3310_s25 + $0x18] sm:$0xff] %v1878_v22  ;;  %v1887_v49 = vmax.f32 %v1855_v38, 0.0  ;;  %v1859_v50 = vadd.f32 %v3576_v2, %v1823_v42  ;;  %v1888_v52 = vmax.f32 %v1856_v41, 0.0  ;;  %v1860_v53 = vadd.f32 %v3576_v2, %v1824_v45  ;;  %v1832_v6 = vld [vmem:[%s3310_s25 + $0xc8] sm:$0xff]  ;;  %v1833_v9 = vld [vmem:[%s3310_s25 + $0xd0] sm:$0xff]  ;;  %v1834_v12 = vld [vmem:[%s3310_s25 + $0xd8] sm:$0xff] }
 0x292   : > { %1911 = vst [vmem:[%s3310_s25 + $0x20] sm:$0xff] %v1879_v25  ;;  %v1889_v55 = vmax.f32 %v1857_v44, 0.0  ;;  %v1861_v56 = vadd.f32 %v3576_v2, %v1825_v48  ;;  %v1890_v58 = vmax.f32 %v1858_v47, 0.0  ;;  %v1862_v59 = vadd.f32 %v3576_v2, %v1826_v51  ;;  %v1835_v15 = vld [vmem:[%s3310_s25 + $0xe0] sm:$0xff]  ;;  %v1836_v18 = vld [vmem:[%s3310_s25 + $0xe8] sm:$0xff]  ;;  %v1837_v21 = vld [vmem:[%s3310_s25 + $0xf0] sm:$0xff] }
 0x293   : > { %1912 = vst [vmem:[%s3310_s25 + $0x28] sm:$0xff] %v1880_v28  ;;  %v1891_v61 = vmax.f32 %v1859_v50, 0.0  ;;  %v1863_v62 = vadd.f32 %v3576_v2, %v1827_v54  ;;  %v1892_v0 = vmax.f32 %v1860_v53, 0.0  ;;  %v1864_v1 = vadd.f32 %v3576_v2, %v1828_v57  ;;  %v1838_v24 = vld [vmem:[%s3310_s25 + $0xf8] sm:$0xff] }
 0x294   : > { %1913 = vst [vmem:[%s3310_s25 + $0x30] sm:$0xff] %v1881_v31  ;;  %v1893_v4 = vmax.f32 %v1861_v56, 0.0  ;;  %v1865_v5 = vadd.f32 %v3576_v2, %v1829_v60  ;;  %v1894_v7 = vmax.f32 %v1862_v59, 0.0  ;;  %v1866_v8 = vadd.f32 %v3576_v2, %v1830_v63 }
 0x295   : > { %1914 = vst [vmem:[%s3310_s25 + $0x38] sm:$0xff] %v1882_v34  ;;  %v1895_v10 = vmax.f32 %v1863_v62, 0.0  ;;  %v1867_v11 = vadd.f32 %v3576_v2, %v1831_v3  ;;  %v1896_v13 = vmax.f32 %v1864_v1, 0.0  ;;  %v1868_v14 = vadd.f32 %v3576_v2, %v1832_v6 }
 0x296   : > { %1915 = vst [vmem:[%s3310_s25 + $0x40] sm:$0xff] %v1883_v37  ;;  %v1897_v16 = vmax.f32 %v1865_v5, 0.0  ;;  %v1869_v17 = vadd.f32 %v3576_v2, %v1833_v9  ;;  %v1898_v19 = vmax.f32 %v1866_v8, 0.0  ;;  %v1870_v20 = vadd.f32 %v3576_v2, %v1834_v12 }
 0x297   : > { %1916 = vst [vmem:[%s3310_s25 + $0x48] sm:$0xff] %v1884_v40  ;;  %v1899_v22 = vmax.f32 %v1867_v11, 0.0  ;;  %v1871_v23 = vadd.f32 %v3576_v2, %v1835_v15  ;;  %v1900_v25 = vmax.f32 %v1868_v14, 0.0  ;;  %v1872_v26 = vadd.f32 %v3576_v2, %v1836_v18 }
 0x298   : > { %1917 = vst [vmem:[%s3310_s25 + $0x50] sm:$0xff] %v1885_v43  ;;  %v1901_v27 = vmax.f32 %v1869_v17, 0.0  ;;  %v1873_v28 = vadd.f32 %v3576_v2, %v1837_v21  ;;  %v1902_v29 = vmax.f32 %v1870_v20, 0.0  ;;  %v1874_v30 = vadd.f32 %v3576_v2, %v1838_v24 }
 0x299   : > { %1918 = vst [vmem:[%s3310_s25 + $0x58] sm:$0xff] %v1886_v46  ;;  %v1903_v31 = vmax.f32 %v1871_v23, 0.0  ;;  %v1904_v32 = vmax.f32 %v1872_v26, 0.0 }
 0x29a   : > { %1919 = vst [vmem:[%s3310_s25 + $0x60] sm:$0xff] %v1887_v49  ;;  %v1905_v33 = vmax.f32 %v1873_v28, 0.0  ;;  %v1906_v34 = vmax.f32 %v1874_v30, 0.0 }
 0x29b   : > { %1920 = vst [vmem:[%s3310_s25 + $0x68] sm:$0xff] %v1888_v52 }
 0x29c   : > { %1921 = vst [vmem:[%s3310_s25 + $0x70] sm:$0xff] %v1889_v55 }
 0x29d   : > { %1922 = vst [vmem:[%s3310_s25 + $0x78] sm:$0xff] %v1890_v58 }
 0x29e   : > { %1923 = vst [vmem:[%s3310_s25 + $0x80] sm:$0xff] %v1891_v61 }
 0x29f   : > { %1924 = vst [vmem:[%s3310_s25 + $0x88] sm:$0xff] %v1892_v0 }
 0x2a0   : > { %1925 = vst [vmem:[%s3310_s25 + $0x90] sm:$0xff] %v1893_v4 }
 0x2a1   : > { %1926 = vst [vmem:[%s3310_s25 + $0x98] sm:$0xff] %v1894_v7 }
 0x2a2   : > { %1927 = vst [vmem:[%s3310_s25 + $0xa0] sm:$0xff] %v1895_v10 }
 0x2a3   : > { %1928 = vst [vmem:[%s3310_s25 + $0xa8] sm:$0xff] %v1896_v13 }
 0x2a4   : > { %1929 = vst [vmem:[%s3310_s25 + $0xb0] sm:$0xff] %v1897_v16 }
 0x2a5   : > { %1930 = vst [vmem:[%s3310_s25 + $0xb8] sm:$0xff] %v1898_v19 }
 0x2a6   : > { %1931 = vst [vmem:[%s3310_s25 + $0xc0] sm:$0xff] %v1899_v22 }
 0x2a7   : > { %1932 = vst [vmem:[%s3310_s25 + $0xc8] sm:$0xff] %v1900_v25 }
 0x2a8   : > { %1933 = vst [vmem:[%s3310_s25 + $0xd0] sm:$0xff] %v1901_v27 }
 0x2a9   : > { %1934 = vst [vmem:[%s3310_s25 + $0xd8] sm:$0xff] %v1902_v29 }
 0x2aa   : > { %1935 = vst [vmem:[%s3310_s25 + $0xe0] sm:$0xff] %v1903_v31 }
 0x2ab   : > { %1936 = vst [vmem:[%s3310_s25 + $0xe8] sm:$0xff] %v1904_v32 }
 0x2ac   : > { %1937 = vst [vmem:[%s3310_s25 + $0xf0] sm:$0xff] %v1905_v33 }
 0x2ad   : > { %1938 = vst [vmem:[%s3310_s25 + $0xf8] sm:$0xff] %v1906_v34 }
 0x2ae PF: > { %1945 = sbr.rel (!%p3009_p12) target bundleno = 720 (0x2d0), region = 108  ;;  %s2615_s14 = sshll.u32 (%p3009_p12), %s2880_s19, 3  ;;  %v2041_v2 = vld [vmem:[%s3310_s25] sm:$0xff] (%p3009_p12)  ;;  %v2043_v35 = vld [vmem:[%s3310_s25 + $0x8] sm:$0xff] (%p3009_p12)  ;;  %v2045_v36 = vld [vmem:[%s3310_s25 + $0x10] sm:$0xff] (%p3009_p12) }
 0x2af   : > { %s3681_s5 = scalar_lea.vmem (%p3009_p12), %s3781_s3, %s2615_s14  ;;  %v2047_v37 = vld [vmem:[%s3310_s25 + $0x18] sm:$0xff] (%p3009_p12)  ;;  %v2049_v38 = vld [vmem:[%s3310_s25 + $0x20] sm:$0xff] (%p3009_p12)  ;;  %v2051_v39 = vld [vmem:[%s3310_s25 + $0x28] sm:$0xff] (%p3009_p12) }
 0x2b0   : > { %2042 = vst [vmem:[%s3681_s5] sm:$0xff] (%p3009_p12), %v2041_v2  ;;  %v2053_v40 = vld [vmem:[%s3310_s25 + $0x30] sm:$0xff] (%p3009_p12)  ;;  %v2055_v41 = vld [vmem:[%s3310_s25 + $0x38] sm:$0xff] (%p3009_p12)  ;;  %v2057_v42 = vld [vmem:[%s3310_s25 + $0x40] sm:$0xff] (%p3009_p12) }
 0x2b1   : > { %2044 = vst [vmem:[%s3681_s5 + $0x18] sm:$0xff] (%p3009_p12), %v2043_v35  ;;  %v2059_v43 = vld [vmem:[%s3310_s25 + $0x48] sm:$0xff] (%p3009_p12)  ;;  %v2061_v44 = vld [vmem:[%s3310_s25 + $0x50] sm:$0xff] (%p3009_p12)  ;;  %v2063_v45 = vld [vmem:[%s3310_s25 + $0x58] sm:$0xff] (%p3009_p12) }
 0x2b2   : > { %2046 = vst [vmem:[%s3681_s5 + $0x30] sm:$0xff] (%p3009_p12), %v2045_v36  ;;  %v2065_v46 = vld [vmem:[%s3310_s25 + $0x60] sm:$0xff] (%p3009_p12)  ;;  %v2067_v47 = vld [vmem:[%s3310_s25 + $0x68] sm:$0xff] (%p3009_p12)  ;;  %v2069_v48 = vld [vmem:[%s3310_s25 + $0x70] sm:$0xff] (%p3009_p12) }
 0x2b3   : > { %2048 = vst [vmem:[%s3681_s5 + $0x48] sm:$0xff] %v2047_v37  ;;  %v2071_v49 = vld [vmem:[%s3310_s25 + $0x78] sm:$0xff]  ;;  %v2073_v50 = vld [vmem:[%s3310_s25 + $0x80] sm:$0xff]  ;;  %v2075_v51 = vld [vmem:[%s3310_s25 + $0x88] sm:$0xff] }
 0x2b4   : > { %2050 = vst [vmem:[%s3681_s5 + $0x60] sm:$0xff] %v2049_v38  ;;  %v2077_v52 = vld [vmem:[%s3310_s25 + $0x90] sm:$0xff]  ;;  %v2079_v53 = vld [vmem:[%s3310_s25 + $0x98] sm:$0xff]  ;;  %v2081_v54 = vld [vmem:[%s3310_s25 + $0xa0] sm:$0xff] }
 0x2b5   : > { %2052 = vst [vmem:[%s3681_s5 + $0x78] sm:$0xff] %v2051_v39  ;;  %v2083_v55 = vld [vmem:[%s3310_s25 + $0xa8] sm:$0xff]  ;;  %v2085_v56 = vld [vmem:[%s3310_s25 + $0xb0] sm:$0xff]  ;;  %v2087_v57 = vld [vmem:[%s3310_s25 + $0xb8] sm:$0xff] }
 0x2b6   : > { %2054 = vst [vmem:[%s3681_s5 + $0x90] sm:$0xff] %v2053_v40  ;;  %v2089_v58 = vld [vmem:[%s3310_s25 + $0xc0] sm:$0xff]  ;;  %v2091_v59 = vld [vmem:[%s3310_s25 + $0xc8] sm:$0xff]  ;;  %v2093_v60 = vld [vmem:[%s3310_s25 + $0xd0] sm:$0xff] }
 0x2b7   : > { %2056 = vst [vmem:[%s3681_s5 + $0xa8] sm:$0xff] %v2055_v41  ;;  %v2095_v61 = vld [vmem:[%s3310_s25 + $0xd8] sm:$0xff]  ;;  %v2097_v62 = vld [vmem:[%s3310_s25 + $0xe0] sm:$0xff]  ;;  %v2099_v63 = vld [vmem:[%s3310_s25 + $0xe8] sm:$0xff] }
 0x2b8   : > { %2058 = vst [vmem:[%s3681_s5 + $0xc0] sm:$0xff] %v2057_v42  ;;  %v2101_v0 = vld [vmem:[%s3310_s25 + $0xf0] sm:$0xff]  ;;  %v2103_v1 = vld [vmem:[%s3310_s25 + $0xf8] sm:$0xff] }
 0x2b9   : > { %2060 = vst [vmem:[%s3681_s5 + $0xd8] sm:$0xff] %v2059_v43 }
 0x2ba   : > { %2062 = vst [vmem:[%s3681_s5 + $0xf0] sm:$0xff] %v2061_v44 }
 0x2bb   : > { %2064 = vst [vmem:[%s3681_s5 + $0x108] sm:$0xff] %v2063_v45 }
 0x2bc   : > { %2066 = vst [vmem:[%s3681_s5 + $0x120] sm:$0xff] %v2065_v46 }
 0x2bd   : > { %2068 = vst [vmem:[%s3681_s5 + $0x138] sm:$0xff] %v2067_v47 }
 0x2be   : > { %2070 = vst [vmem:[%s3681_s5 + $0x150] sm:$0xff] %v2069_v48 }
 0x2bf   : > { %2072 = vst [vmem:[%s3681_s5 + $0x168] sm:$0xff] %v2071_v49 }
 0x2c0   : > { %2074 = vst [vmem:[%s3681_s5 + $0x180] sm:$0xff] %v2073_v50 }
 0x2c1   : > { %2076 = vst [vmem:[%s3681_s5 + $0x198] sm:$0xff] %v2075_v51 }
 0x2c2   : > { %2078 = vst [vmem:[%s3681_s5 + $0x1b0] sm:$0xff] %v2077_v52 }
 0x2c3   : > { %2080 = vst [vmem:[%s3681_s5 + $0x1c8] sm:$0xff] %v2079_v53 }
 0x2c4   : > { %2082 = vst [vmem:[%s3681_s5 + $0x1e0] sm:$0xff] %v2081_v54 }
 0x2c5   : > { %2084 = vst [vmem:[%s3681_s5 + $0x1f8] sm:$0xff] %v2083_v55 }
 0x2c6   : > { %2086 = vst [vmem:[%s3681_s5 + $0x210] sm:$0xff] %v2085_v56 }
 0x2c7   : > { %2088 = vst [vmem:[%s3681_s5 + $0x228] sm:$0xff] %v2087_v57 }
 0x2c8   : > { %2090 = vst [vmem:[%s3681_s5 + $0x240] sm:$0xff] %v2089_v58 }
 0x2c9   : > { %2092 = vst [vmem:[%s3681_s5 + $0x258] sm:$0xff] %v2091_v59 }
 0x2ca   : > { %2094 = vst [vmem:[%s3681_s5 + $0x270] sm:$0xff] %v2093_v60 }
 0x2cb   : > { %2096 = vst [vmem:[%s3681_s5 + $0x288] sm:$0xff] %v2095_v61 }
 0x2cc   : > { %2098 = vst [vmem:[%s3681_s5 + $0x2a0] sm:$0xff] %v2097_v62 }
 0x2cd   : > { %2100 = vst [vmem:[%s3681_s5 + $0x2b8] sm:$0xff] %v2099_v63 }
 0x2ce   : > { %2102 = vst [vmem:[%s3681_s5 + $0x2d0] sm:$0xff] %v2101_v0 }
 0x2cf   : > { %2104 = vst [vmem:[%s3681_s5 + $0x2e8] sm:$0xff] %v2103_v1 }
 0x2d0 PF: > { %s13_s22 = sadd.s32 1, %s2892_s22   ;;  %s3791_s10 = sld [smem:[#allocation5_spill]] }
 0x2d1   : > { %p10_p6 = scmp.ge.s32.totalorder %s13_s22, 17   ;;  %s3792_s12 = smov %s2856_s13 }
 0x2d2   : > { %s3793_s13 = smov %s3007_s9  ;;  %s3794_s14 = smov %s2864_s15 }
 0x2d3   : > { %s3795_s15 = smov %s3004_s8  ;;  %s3796_s16 = smov %s2872_s17 }
 0x2d4   : > { %s3797_s17 = smov %s2990_s30  ;;  %s3798_s18 = smov %s2884_s20 }
 0x2d5   : > { %s3799_s19 = smov %s2888_s21  ;;  %s3800_s20 = smov %s3803_s24 }
 0x2d6   : > { %s3801_s21 = smov %s3791_s10  ;;  %12 = sbr.rel (!%p10_p6) target bundleno = 9 (0x9), region = 188 }

// kernel: _siamese_forward.9
= control target key start
LH: loop header
LB: loop body
LE: loop exit
PB: predicated region body
PF: predicated region fallthrough
CT: control target
= control target key end

     0   :  { %s3778_s0 = inlined_call_operand.vmem [shape: bf16[256,3584], index: 0, kind: input, shape index: {}]   ;;  %s3779_s1 = inlined_call_operand.vmem [shape: bf16[3584,256], index: 1, kind: input, shape index: {}]   ;;  %s3780_s2 = inlined_call_operand.vmem [shape: f32[1,256], index: 2, kind: input, shape index: {}]   ;;  %s3781_s3 = inlined_call_operand.vmem [shape: f32[256,256], index: 3, kind: output, shape index: {}]  }
   0x1   :  { %3783 = sst [smem:[#allocation6_spill]] %s3778_s0 }
   0x2   :  { %3784 = sst [smem:[#allocation7_spill]] %s3779_s1 }
   0x3   :  { %s2915_s12 = smov 0   ;;  %s2917_s13 = smov 0  }
   0x4   :  { %s2919_s14 = smov 0   ;;  %s2921_s15 = smov 0  }
   0x5   :  { %s2923_s16 = smov 0   ;;  %s2925_s17 = smov 0  }
   0x6   :  { %s2927_s18 = smov 0   ;;  %s2929_s19 = smov 0  }
   0x7   :  { %s2931_s20 = smov 0   ;;  %s2933_s21 = smov 0  }
   0x8   :  { %s2935_s22 = smov 0  }
   0x9 LB: > { %s2213_s23 = sadd.s32 4294967295, %s2892_s22   ;;  %s25_s24 = sadd.s32 1, %s2884_s20  ;;  %s2892_s22 = sphi %s2935_s22, %s13_s22   ;;  %s2888_s21 = sphi %s2933_s21, %s3801_s21   ;;  %s2884_s20 = sphi %s2931_s20, %s3800_s20   ;;  %s2880_s19 = sphi %s2929_s19, %s3799_s19   ;;  %s2876_s18 = sphi %s2927_s18, %s3798_s18   ;;  %s2872_s17 = sphi %s2925_s17, %s3797_s17   ;;  %s2868_s16 = sphi %s2923_s16, %s3796_s16   ;;  %s2864_s15 = sphi %s2921_s15, %s3795_s15   ;;  %s2860_s14 = sphi %s2919_s14, %s3794_s14   ;;  %s2856_s13 = sphi %s2917_s13, %s3793_s13   ;;  %s2852_s12 = sphi %s2915_s12, %s3792_s12  }
   0xa   : > { %p26_p0 = scmp.ge.s32.totalorder %s25_s24, 7  ;;  %s28_s25 = sadd.s32 1, %s2888_s21 }
   0xb   : > { %s41_s26 = sadd.s32 1, %s2872_s17  ;;  %p48_p1 = scmp.ne.s32.totalorder %s2872_s17, %s2868_s16 }
   0xc   : > { %s3803_s24 = smov (%p26_p0, %s25_s24), 0  ;;  %s3805_s25 = smov (!%p26_p0, %s28_s25), %s2888_s21 }
   0xd   : > { %s37_s27 = ssub.s32 %s2884_s20, %s3803_s24  ;;  %p49_p2 = scmp.eq.s32.totalorder %s2892_s22, 0 }
   0xe   : > { %p30_p3 = scmp.ge.s32.totalorder %s3805_s25, 2  ;;  %p39_p4 = scmp.eq.s32.totalorder %s37_s27, 0 }
   0xf   : > { %p2982_p5 = por %p49_p2, %p48_p1  ;;  %s69_s29 = sadd.s32 1, %s2864_s15 }
  0x10   : > { %s3807_s25 = smov (%p30_p3, %s3805_s25), 0  ;;  %p76_p6 = scmp.ne.s32.totalorder %s2864_s15, %s2860_s14 }
  0x11   : > { %3786 = sst [smem:[#allocation5_spill]] %s3807_s25  ;;  %s65_s4 = ssub.s32 %s2888_s21, %s3807_s25 }
  0x12   : > { %s2990_s30 = scalar_select %p39_p4, %s2872_s17, %s41_s26  }
  0x13   : > { %s66_s5 = sor.u32 %s65_s4, %s37_s27  ;;  %p121_p7 = scmp.eq.s32.totalorder %s65_s4, 0 }
  0x14   : > { %p67_p8 = scmp.eq.s32.totalorder %s66_s5, 0  ;;  %p2996_p9 = por %p76_p6, %p49_p2 }
  0x15   : > { %s123_s7 = sadd.s32 1, %s2856_s13  ;;  %p133_p10 = scmp.ne.s32.totalorder %s2856_s13, %s2852_s12 }
  0x16   : > { %s3004_s8 = scalar_select %p67_p8, %s2864_s15, %s69_s29  }
  0x17   : > { %s3007_s9 = scalar_select %p121_p7, %s2856_s13, %s123_s7  }
  0x18   : > { %p134_p11 = scmp.eq.s32.totalorder %s2213_s23, 13  ;;  %p2216_p13 = scmp.ge.s32.totalorder %s2892_s22, 14 }
  0x1a   : > { %p3009_p12 = por %p134_p11, %p133_p10  ;;  %156 = sbr.rel (%p2216_p13) target bundleno = 179 (0xb3), region = 16 }
  0x1f   : > { %159 = sbr.rel (!%p2982_p5) target bundleno = 105 (0x69), region = 20  ;;  %s161_s11 = sand.u32 (%p2982_p5), 1, %s2872_s17  }
  0x20   : > { %s2618_s26 = sshll.u32 (%p2982_p5), %s2884_s20, 4  ;;  %s2217_s27 = sshll.u32 (%p2982_p5), %s161_s11, 9 }
  0x21   : > { %s3789_s0 = sld [smem:[#allocation6_spill]] (%p2982_p5)  ;;  %s3026_s23 = scalar_lea.vmem (%p2982_p5), [#allocation2], %s2217_s27 }
  0x27   : > { %s3021_s5 = scalar_lea.vmem %s3789_s0, %s2618_s26 }
  0x28   : > { %v182_v0 = vld [vmem:[%s3021_s5] sm:$0xff]  ;;  %v184_v1 = vld [vmem:[%s3021_s5 + $0x8] sm:$0xff]  ;;  %v186_v2 = vld [vmem:[%s3021_s5 + $0x70] sm:$0xff] }
  0x29   : > { %183 = vst [vmem:[%s3026_s23] sm:$0xff] %v182_v0  ;;  %v188_v3 = vld [vmem:[%s3021_s5 + $0x78] sm:$0xff]  ;;  %v190_v4 = vld [vmem:[%s3021_s5 + $0xe0] sm:$0xff]  ;;  %v192_v5 = vld [vmem:[%s3021_s5 + $0xe8] sm:$0xff] }
  0x2a   : > { %185 = vst [vmem:[%s3026_s23 + $0x8] sm:$0xff] %v184_v1  ;;  %v194_v6 = vld [vmem:[%s3021_s5 + $0x150] sm:$0xff]  ;;  %v196_v7 = vld [vmem:[%s3021_s5 + $0x158] sm:$0xff]  ;;  %v198_v8 = vld [vmem:[%s3021_s5 + $0x1c0] sm:$0xff] }
  0x2b   : > { %187 = vst [vmem:[%s3026_s23 + $0x10] sm:$0xff] %v186_v2  ;;  %v200_v9 = vld [vmem:[%s3021_s5 + $0x1c8] sm:$0xff]  ;;  %v202_v10 = vld [vmem:[%s3021_s5 + $0x230] sm:$0xff]  ;;  %v204_v11 = vld [vmem:[%s3021_s5 + $0x238] sm:$0xff] }
  0x2c   : > { %189 = vst [vmem:[%s3026_s23 + $0x18] sm:$0xff] %v188_v3  ;;  %v206_v12 = vld [vmem:[%s3021_s5 + $0x2a0] sm:$0xff]  ;;  %v208_v13 = vld [vmem:[%s3021_s5 + $0x2a8] sm:$0xff]  ;;  %v210_v14 = vld [vmem:[%s3021_s5 + $0x310] sm:$0xff] }
  0x2d   : > { %191 = vst [vmem:[%s3026_s23 + $0x20] sm:$0xff] %v190_v4  ;;  %v212_v15 = vld [vmem:[%s3021_s5 + $0x318] sm:$0xff]  ;;  %v214_v16 = vld [vmem:[%s3021_s5 + $0x380] sm:$0xff]  ;;  %v216_v17 = vld [vmem:[%s3021_s5 + $0x388] sm:$0xff] }
  0x2e   : > { %193 = vst [vmem:[%s3026_s23 + $0x28] sm:$0xff] %v192_v5  ;;  %v218_v18 = vld [vmem:[%s3021_s5 + $0x3f0] sm:$0xff]  ;;  %v220_v19 = vld [vmem:[%s3021_s5 + $0x3f8] sm:$0xff]  ;;  %v222_v20 = vld [vmem:[%s3021_s5 + $0x460] sm:$0xff] }
  0x2f   : > { %195 = vst [vmem:[%s3026_s23 + $0x30] sm:$0xff] %v194_v6  ;;  %v224_v21 = vld [vmem:[%s3021_s5 + $0x468] sm:$0xff]  ;;  %v226_v22 = vld [vmem:[%s3021_s5 + $0x4d0] sm:$0xff]  ;;  %v228_v23 = vld [vmem:[%s3021_s5 + $0x4d8] sm:$0xff] }
  0x30   : > { %197 = vst [vmem:[%s3026_s23 + $0x38] sm:$0xff] %v196_v7  ;;  %v230_v24 = vld [vmem:[%s3021_s5 + $0x540] sm:$0xff]  ;;  %v232_v25 = vld [vmem:[%s3021_s5 + $0x548] sm:$0xff]  ;;  %v234_v26 = vld [vmem:[%s3021_s5 + $0x5b0] sm:$0xff] }
  0x31   : > { %199 = vst [vmem:[%s3026_s23 + $0x40] sm:$0xff] %v198_v8  ;;  %v236_v27 = vld [vmem:[%s3021_s5 + $0x5b8] sm:$0xff]  ;;  %v238_v28 = vld [vmem:[%s3021_s5 + $0x620] sm:$0xff]  ;;  %v240_v29 = vld [vmem:[%s3021_s5 + $0x628] sm:$0xff] }
  0x32   : > { %201 = vst [vmem:[%s3026_s23 + $0x48] sm:$0xff] %v200_v9  ;;  %v242_v30 = vld [vmem:[%s3021_s5 + $0x690] sm:$0xff]  ;;  %v244_v31 = vld [vmem:[%s3021_s5 + $0x698] sm:$0xff]  ;;  %v246_v32 = vld [vmem:[%s3021_s5 + $0x700] sm:$0xff] }
  0x33   : > { %203 = vst [vmem:[%s3026_s23 + $0x50] sm:$0xff] %v202_v10  ;;  %v248_v33 = vld [vmem:[%s3021_s5 + $0x708] sm:$0xff]  ;;  %v250_v34 = vld [vmem:[%s3021_s5 + $0x770] sm:$0xff]  ;;  %v252_v35 = vld [vmem:[%s3021_s5 + $0x778] sm:$0xff] }
  0x34   : > { %205 = vst [vmem:[%s3026_s23 + $0x58] sm:$0xff] %v204_v11  ;;  %v254_v36 = vld [vmem:[%s3021_s5 + $0x7e0] sm:$0xff]  ;;  %v256_v37 = vld [vmem:[%s3021_s5 + $0x7e8] sm:$0xff]  ;;  %v258_v38 = vld [vmem:[%s3021_s5 + $0x850] sm:$0xff] }
  0x35   : > { %207 = vst [vmem:[%s3026_s23 + $0x60] sm:$0xff] %v206_v12  ;;  %v260_v39 = vld [vmem:[%s3021_s5 + $0x858] sm:$0xff]  ;;  %v262_v40 = vld [vmem:[%s3021_s5 + $0x8c0] sm:$0xff]  ;;  %v264_v41 = vld [vmem:[%s3021_s5 + $0x8c8] sm:$0xff] }
  0x36   : > { %209 = vst [vmem:[%s3026_s23 + $0x68] sm:$0xff] %v208_v13  ;;  %v266_v42 = vld [vmem:[%s3021_s5 + $0x930] sm:$0xff]  ;;  %v268_v43 = vld [vmem:[%s3021_s5 + $0x938] sm:$0xff]  ;;  %v270_v44 = vld [vmem:[%s3021_s5 + $0x9a0] sm:$0xff] }
  0x37   : > { %211 = vst [vmem:[%s3026_s23 + $0x70] sm:$0xff] %v210_v14  ;;  %v272_v45 = vld [vmem:[%s3021_s5 + $0x9a8] sm:$0xff]  ;;  %v274_v46 = vld [vmem:[%s3021_s5 + $0xa10] sm:$0xff]  ;;  %v276_v47 = vld [vmem:[%s3021_s5 + $0xa18] sm:$0xff] }
  0x38   : > { %213 = vst [vmem:[%s3026_s23 + $0x78] sm:$0xff] %v212_v15  ;;  %v278_v48 = vld [vmem:[%s3021_s5 + $0xa80] sm:$0xff]  ;;  %v280_v49 = vld [vmem:[%s3021_s5 + $0xa88] sm:$0xff]  ;;  %v282_v50 = vld [vmem:[%s3021_s5 + $0xaf0] sm:$0xff] }
  0x39   : > { %215 = vst [vmem:[%s3026_s23 + $0x80] sm:$0xff] %v214_v16  ;;  %v284_v51 = vld [vmem:[%s3021_s5 + $0xaf8] sm:$0xff]  ;;  %v286_v52 = vld [vmem:[%s3021_s5 + $0xb60] sm:$0xff]  ;;  %v288_v53 = vld [vmem:[%s3021_s5 + $0xb68] sm:$0xff] }
  0x3a   : > { %217 = vst [vmem:[%s3026_s23 + $0x88] sm:$0xff] %v216_v17  ;;  %v290_v54 = vld [vmem:[%s3021_s5 + $0xbd0] sm:$0xff]  ;;  %v292_v55 = vld [vmem:[%s3021_s5 + $0xbd8] sm:$0xff]  ;;  %v294_v56 = vld [vmem:[%s3021_s5 + $0xc40] sm:$0xff] }
  0x3b   : > { %219 = vst [vmem:[%s3026_s23 + $0x90] sm:$0xff] %v218_v18  ;;  %v296_v57 = vld [vmem:[%s3021_s5 + $0xc48] sm:$0xff]  ;;  %v298_v58 = vld [vmem:[%s3021_s5 + $0xcb0] sm:$0xff]  ;;  %v300_v59 = vld [vmem:[%s3021_s5 + $0xcb8] sm:$0xff] }
  0x3c   : > { %221 = vst [vmem:[%s3026_s23 + $0x98] sm:$0xff] %v220_v19  ;;  %v302_v60 = vld [vmem:[%s3021_s5 + $0xd20] sm:$0xff]  ;;  %v304_v61 = vld [vmem:[%s3021_s5 + $0xd28] sm:$0xff]  ;;  %v306_v62 = vld [vmem:[%s3021_s5 + $0xd90] sm:$0xff] }
  0x3d   : > { %223 = vst [vmem:[%s3026_s23 + $0xa0] sm:$0xff] %v222_v20  ;;  %v308_v63 = vld [vmem:[%s3021_s5 + $0xd98] sm:$0xff] }
  0x3e   : > { %225 = vst [vmem:[%s3026_s23 + $0xa8] sm:$0xff] %v224_v21 }
  0x3f   : > { %227 = vst [vmem:[%s3026_s23 + $0xb0] sm:$0xff] %v226_v22 }
  0x40   : > { %229 = vst [vmem:[%s3026_s23 + $0xb8] sm:$0xff] %v228_v23 }
  0x41   : > { %231 = vst [vmem:[%s3026_s23 + $0xc0] sm:$0xff] %v230_v24 }
  0x42   : > { %233 = vst [vmem:[%s3026_s23 + $0xc8] sm:$0xff] %v232_v25 }
  0x43   : > { %235 = vst [vmem:[%s3026_s23 + $0xd0] sm:$0xff] %v234_v26 }
  0x44   : > { %237 = vst [vmem:[%s3026_s23 + $0xd8] sm:$0xff] %v236_v27 }
  0x45   : > { %239 = vst [vmem:[%s3026_s23 + $0xe0] sm:$0xff] %v238_v28 }
  0x46   : > { %241 = vst [vmem:[%s3026_s23 + $0xe8] sm:$0xff] %v240_v29 }
  0x47   : > { %243 = vst [vmem:[%s3026_s23 + $0xf0] sm:$0xff] %v242_v30 }
  0x48   : > { %245 = vst [vmem:[%s3026_s23 + $0xf8] sm:$0xff] %v244_v31 }
  0x49   : > { %247 = vst [vmem:[%s3026_s23 + $0x100] sm:$0xff] %v246_v32 }
  0x4a   : > { %249 = vst [vmem:[%s3026_s23 + $0x108] sm:$0xff] %v248_v33 }
  0x4b   : > { %251 = vst [vmem:[%s3026_s23 + $0x110] sm:$0xff] %v250_v34 }
  0x4c   : > { %253 = vst [vmem:[%s3026_s23 + $0x118] sm:$0xff] %v252_v35 }
  0x4d   : > { %255 = vst [vmem:[%s3026_s23 + $0x120] sm:$0xff] %v254_v36 }
  0x4e   : > { %257 = vst [vmem:[%s3026_s23 + $0x128] sm:$0xff] %v256_v37 }
  0x4f   : > { %259 = vst [vmem:[%s3026_s23 + $0x130] sm:$0xff] %v258_v38 }
  0x50   : > { %261 = vst [vmem:[%s3026_s23 + $0x138] sm:$0xff] %v260_v39 }
  0x51   : > { %263 = vst [vmem:[%s3026_s23 + $0x140] sm:$0xff] %v262_v40 }
  0x52   : > { %265 = vst [vmem:[%s3026_s23 + $0x148] sm:$0xff] %v264_v41 }
  0x53   : > { %267 = vst [vmem:[%s3026_s23 + $0x150] sm:$0xff] %v266_v42 }
  0x54   : > { %269 = vst [vmem:[%s3026_s23 + $0x158] sm:$0xff] %v268_v43 }
  0x55   : > { %271 = vst [vmem:[%s3026_s23 + $0x160] sm:$0xff] %v270_v44 }
  0x56   : > { %273 = vst [vmem:[%s3026_s23 + $0x168] sm:$0xff] %v272_v45 }
  0x57   : > { %275 = vst [vmem:[%s3026_s23 + $0x170] sm:$0xff] %v274_v46 }
  0x58   : > { %277 = vst [vmem:[%s3026_s23 + $0x178] sm:$0xff] %v276_v47 }
  0x59   : > { %279 = vst [vmem:[%s3026_s23 + $0x180] sm:$0xff] %v278_v48 }
  0x5a   : > { %281 = vst [vmem:[%s3026_s23 + $0x188] sm:$0xff] %v280_v49 }
  0x5b   : > { %283 = vst [vmem:[%s3026_s23 + $0x190] sm:$0xff] %v282_v50 }
  0x5c   : > { %285 = vst [vmem:[%s3026_s23 + $0x198] sm:$0xff] %v284_v51 }
  0x5d   : > { %287 = vst [vmem:[%s3026_s23 + $0x1a0] sm:$0xff] %v286_v52 }
  0x5e   : > { %289 = vst [vmem:[%s3026_s23 + $0x1a8] sm:$0xff] %v288_v53 }
  0x5f   : > { %291 = vst [vmem:[%s3026_s23 + $0x1b0] sm:$0xff] %v290_v54 }
  0x60   : > { %293 = vst [vmem:[%s3026_s23 + $0x1b8] sm:$0xff] %v292_v55 }
  0x61   : > { %295 = vst [vmem:[%s3026_s23 + $0x1c0] sm:$0xff] %v294_v56 }
  0x62   : > { %297 = vst [vmem:[%s3026_s23 + $0x1c8] sm:$0xff] %v296_v57 }
  0x63   : > { %299 = vst [vmem:[%s3026_s23 + $0x1d0] sm:$0xff] %v298_v58 }
  0x64   : > { %301 = vst [vmem:[%s3026_s23 + $0x1d8] sm:$0xff] %v300_v59 }
  0x65   : > { %303 = vst [vmem:[%s3026_s23 + $0x1e0] sm:$0xff] %v302_v60 }
  0x66   : > { %305 = vst [vmem:[%s3026_s23 + $0x1e8] sm:$0xff] %v304_v61 }
  0x67   : > { %307 = vst [vmem:[%s3026_s23 + $0x1f0] sm:$0xff] %v306_v62 }
  0x68   : > { %309 = vst [vmem:[%s3026_s23 + $0x1f8] sm:$0xff] %v308_v63 }
  0x69 PF: > { %315 = sbr.rel (!%p2996_p9) target bundleno = 179 (0xb3), region = 43  ;;  %s317_s28 = sand.u32 (%p2996_p9), 1, %s2864_s15  }
  0x6a   : > { %s2619_s7 = sshll.u32 (%p2996_p9), %s2884_s20, 7  ;;  %s2220_s11 = sshll.u32 (%p2996_p9), %s317_s28, 8 }
  0x6b   : > { %s322_s26 = sadd.s32 (%p2996_p9), %s2888_s21, %s2619_s7  ;;  %s3790_s1 = sld [smem:[#allocation7_spill]] (%p2996_p9) }
  0x6c   : > { %s2223_s27 = sshll.u32 (%p2996_p9), %s322_s26, 2  ;;  %s3166_s6 = scalar_lea.vmem (%p2996_p9), [#allocation3], %s2220_s11 }
  0x71   : > { %s3161_s0 = scalar_lea.vmem %s3790_s1, %s2223_s27 }
  0x72   : > { %v341_v0 = vld [vmem:[%s3161_s0] sm:$0xf]  ;;  %v343_v1 = vld [vmem:[%s3161_s0 + $0x8] sm:$0xf]  ;;  %v345_v2 = vld [vmem:[%s3161_s0 + $0x10] sm:$0xf] }
  0x73   : > { %342 = vst [vmem:[%s3166_s6] sm:$0xf] %v341_v0  ;;  %v347_v3 = vld [vmem:[%s3161_s0 + $0x18] sm:$0xf]  ;;  %v349_v4 = vld [vmem:[%s3161_s0 + $0x20] sm:$0xf] }
  0x74   : > { %344 = vst [vmem:[%s3166_s6 + $0x4] sm:$0xf] %v343_v1  ;;  %v351_v5 = vld [vmem:[%s3161_s0 + $0x28] sm:$0xf]  ;;  %v353_v6 = vld [vmem:[%s3161_s0 + $0x30] sm:$0xf] }
  0x75   : > { %346 = vst [vmem:[%s3166_s6 + $0x8] sm:$0xf] %v345_v2  ;;  %v355_v7 = vld [vmem:[%s3161_s0 + $0x38] sm:$0xf]  ;;  %v357_v8 = vld [vmem:[%s3161_s0 + $0x40] sm:$0xf] }
  0x76   : > { %348 = vst [vmem:[%s3166_s6 + $0xc] sm:$0xf] %v347_v3  ;;  %v359_v9 = vld [vmem:[%s3161_s0 + $0x48] sm:$0xf]  ;;  %v361_v10 = vld [vmem:[%s3161_s0 + $0x50] sm:$0xf] }
  0x77   : > { %350 = vst [vmem:[%s3166_s6 + $0x10] sm:$0xf] %v349_v4  ;;  %v363_v11 = vld [vmem:[%s3161_s0 + $0x58] sm:$0xf]  ;;  %v365_v12 = vld [vmem:[%s3161_s0 + $0x60] sm:$0xf] }
  0x78   : > { %352 = vst [vmem:[%s3166_s6 + $0x14] sm:$0xf] %v351_v5  ;;  %v367_v13 = vld [vmem:[%s3161_s0 + $0x68] sm:$0xf]  ;;  %v369_v14 = vld [vmem:[%s3161_s0 + $0x70] sm:$0xf] }
  0x79   : > { %354 = vst [vmem:[%s3166_s6 + $0x18] sm:$0xf] %v353_v6  ;;  %v371_v15 = vld [vmem:[%s3161_s0 + $0x78] sm:$0xf]  ;;  %v373_v16 = vld [vmem:[%s3161_s0 + $0x80] sm:$0xf] }
  0x7a   : > { %356 = vst [vmem:[%s3166_s6 + $0x1c] sm:$0xf] %v355_v7  ;;  %v375_v17 = vld [vmem:[%s3161_s0 + $0x88] sm:$0xf]  ;;  %v377_v18 = vld [vmem:[%s3161_s0 + $0x90] sm:$0xf] }
  0x7b   : > { %358 = vst [vmem:[%s3166_s6 + $0x20] sm:$0xf] %v357_v8  ;;  %v379_v19 = vld [vmem:[%s3161_s0 + $0x98] sm:$0xf]  ;;  %v381_v20 = vld [vmem:[%s3161_s0 + $0xa0] sm:$0xf] }
  0x7c   : > { %360 = vst [vmem:[%s3166_s6 + $0x24] sm:$0xf] %v359_v9  ;;  %v383_v21 = vld [vmem:[%s3161_s0 + $0xa8] sm:$0xf]  ;;  %v385_v22 = vld [vmem:[%s3161_s0 + $0xb0] sm:$0xf] }
  0x7d   : > { %362 = vst [vmem:[%s3166_s6 + $0x28] sm:$0xf] %v361_v10  ;;  %v387_v23 = vld [vmem:[%s3161_s0 + $0xb8] sm:$0xf]  ;;  %v389_v24 = vld [vmem:[%s3161_s0 + $0xc0] sm:$0xf] }
  0x7e   : > { %364 = vst [vmem:[%s3166_s6 + $0x2c] sm:$0xf] %v363_v11  ;;  %v391_v25 = vld [vmem:[%s3161_s0 + $0xc8] sm:$0xf]  ;;  %v393_v26 = vld [vmem:[%s3161_s0 + $0xd0] sm:$0xf] }
  0x7f   : > { %366 = vst [vmem:[%s3166_s6 + $0x30] sm:$0xf] %v365_v12  ;;  %v395_v27 = vld [vmem:[%s3161_s0 + $0xd8] sm:$0xf]  ;;  %v397_v28 = vld [vmem:[%s3161_s0 + $0xe0] sm:$0xf] }
  0x80   : > { %368 = vst [vmem:[%s3166_s6 + $0x34] sm:$0xf] %v367_v13  ;;  %v399_v29 = vld [vmem:[%s3161_s0 + $0xe8] sm:$0xf]  ;;  %v401_v30 = vld [vmem:[%s3161_s0 + $0xf0] sm:$0xf] }
  0x81   : > { %370 = vst [vmem:[%s3166_s6 + $0x38] sm:$0xf] %v369_v14  ;;  %v403_v31 = vld [vmem:[%s3161_s0 + $0xf8] sm:$0xf]  ;;  %v405_v32 = vld [vmem:[%s3161_s0 + $0x100] sm:$0xf] }
  0x82   : > { %372 = vst [vmem:[%s3166_s6 + $0x3c] sm:$0xf] %v371_v15  ;;  %v407_v33 = vld [vmem:[%s3161_s0 + $0x108] sm:$0xf]  ;;  %v409_v34 = vld [vmem:[%s3161_s0 + $0x110] sm:$0xf] }
  0x83   : > { %374 = vst [vmem:[%s3166_s6 + $0x40] sm:$0xf] %v373_v16  ;;  %v411_v35 = vld [vmem:[%s3161_s0 + $0x118] sm:$0xf]  ;;  %v413_v36 = vld [vmem:[%s3161_s0 + $0x120] sm:$0xf] }
  0x84   : > { %376 = vst [vmem:[%s3166_s6 + $0x44] sm:$0xf] %v375_v17  ;;  %v415_v37 = vld [vmem:[%s3161_s0 + $0x128] sm:$0xf]  ;;  %v417_v38 = vld [vmem:[%s3161_s0 + $0x130] sm:$0xf] }
  0x85   : > { %378 = vst [vmem:[%s3166_s6 + $0x48] sm:$0xf] %v377_v18  ;;  %v419_v39 = vld [vmem:[%s3161_s0 + $0x138] sm:$0xf]  ;;  %v421_v40 = vld [vmem:[%s3161_s0 + $0x140] sm:$0xf] }
  0x86   : > { %380 = vst [vmem:[%s3166_s6 + $0x4c] sm:$0xf] %v379_v19  ;;  %v423_v41 = vld [vmem:[%s3161_s0 + $0x148] sm:$0xf]  ;;  %v425_v42 = vld [vmem:[%s3161_s0 + $0x150] sm:$0xf] }
  0x87   : > { %382 = vst [vmem:[%s3166_s6 + $0x50] sm:$0xf] %v381_v20  ;;  %v427_v43 = vld [vmem:[%s3161_s0 + $0x158] sm:$0xf]  ;;  %v429_v44 = vld [vmem:[%s3161_s0 + $0x160] sm:$0xf] }
  0x88   : > { %384 = vst [vmem:[%s3166_s6 + $0x54] sm:$0xf] %v383_v21  ;;  %v431_v45 = vld [vmem:[%s3161_s0 + $0x168] sm:$0xf]  ;;  %v433_v46 = vld [vmem:[%s3161_s0 + $0x170] sm:$0xf] }
  0x89   : > { %386 = vst [vmem:[%s3166_s6 + $0x58] sm:$0xf] %v385_v22  ;;  %v435_v47 = vld [vmem:[%s3161_s0 + $0x178] sm:$0xf]  ;;  %v437_v48 = vld [vmem:[%s3161_s0 + $0x180] sm:$0xf] }
  0x8a   : > { %388 = vst [vmem:[%s3166_s6 + $0x5c] sm:$0xf] %v387_v23  ;;  %v439_v49 = vld [vmem:[%s3161_s0 + $0x188] sm:$0xf]  ;;  %v441_v50 = vld [vmem:[%s3161_s0 + $0x190] sm:$0xf] }
  0x8b   : > { %390 = vst [vmem:[%s3166_s6 + $0x60] sm:$0xf] %v389_v24  ;;  %v443_v51 = vld [vmem:[%s3161_s0 + $0x198] sm:$0xf]  ;;  %v445_v52 = vld [vmem:[%s3161_s0 + $0x1a0] sm:$0xf] }
  0x8c   : > { %392 = vst [vmem:[%s3166_s6 + $0x64] sm:$0xf] %v391_v25  ;;  %v447_v53 = vld [vmem:[%s3161_s0 + $0x1a8] sm:$0xf]  ;;  %v449_v54 = vld [vmem:[%s3161_s0 + $0x1b0] sm:$0xf] }
  0x8d   : > { %394 = vst [vmem:[%s3166_s6 + $0x68] sm:$0xf] %v393_v26  ;;  %v451_v55 = vld [vmem:[%s3161_s0 + $0x1b8] sm:$0xf]  ;;  %v453_v56 = vld [vmem:[%s3161_s0 + $0x1c0] sm:$0xf] }
  0x8e   : > { %396 = vst [vmem:[%s3166_s6 + $0x6c] sm:$0xf] %v395_v27  ;;  %v455_v57 = vld [vmem:[%s3161_s0 + $0x1c8] sm:$0xf]  ;;  %v457_v58 = vld [vmem:[%s3161_s0 + $0x1d0] sm:$0xf] }
  0x8f   : > { %398 = vst [vmem:[%s3166_s6 + $0x70] sm:$0xf] %v397_v28  ;;  %v459_v59 = vld [vmem:[%s3161_s0 + $0x1d8] sm:$0xf]  ;;  %v461_v60 = vld [vmem:[%s3161_s0 + $0x1e0] sm:$0xf] }
  0x90   : > { %400 = vst [vmem:[%s3166_s6 + $0x74] sm:$0xf] %v399_v29  ;;  %v463_v61 = vld [vmem:[%s3161_s0 + $0x1e8] sm:$0xf]  ;;  %v465_v62 = vld [vmem:[%s3161_s0 + $0x1f0] sm:$0xf] }
  0x91   : > { %402 = vst [vmem:[%s3166_s6 + $0x78] sm:$0xf] %v401_v30  ;;  %v467_v63 = vld [vmem:[%s3161_s0 + $0x1f8] sm:$0xf] }
  0x92   : > { %404 = vst [vmem:[%s3166_s6 + $0x7c] sm:$0xf] %v403_v31 }
  0x93   : > { %406 = vst [vmem:[%s3166_s6 + $0x80] sm:$0xf] %v405_v32 }
  0x94   : > { %408 = vst [vmem:[%s3166_s6 + $0x84] sm:$0xf] %v407_v33 }
  0x95   : > { %410 = vst [vmem:[%s3166_s6 + $0x88] sm:$0xf] %v409_v34 }
  0x96   : > { %412 = vst [vmem:[%s3166_s6 + $0x8c] sm:$0xf] %v411_v35 }
  0x97   : > { %414 = vst [vmem:[%s3166_s6 + $0x90] sm:$0xf] %v413_v36 }
  0x98   : > { %416 = vst [vmem:[%s3166_s6 + $0x94] sm:$0xf] %v415_v37 }
  0x99   : > { %418 = vst [vmem:[%s3166_s6 + $0x98] sm:$0xf] %v417_v38 }
  0x9a   : > { %420 = vst [vmem:[%s3166_s6 + $0x9c] sm:$0xf] %v419_v39 }
  0x9b   : > { %422 = vst [vmem:[%s3166_s6 + $0xa0] sm:$0xf] %v421_v40 }
  0x9c   : > { %424 = vst [vmem:[%s3166_s6 + $0xa4] sm:$0xf] %v423_v41 }
  0x9d   : > { %426 = vst [vmem:[%s3166_s6 + $0xa8] sm:$0xf] %v425_v42 }
  0x9e   : > { %428 = vst [vmem:[%s3166_s6 + $0xac] sm:$0xf] %v427_v43 }
  0x9f   : > { %430 = vst [vmem:[%s3166_s6 + $0xb0] sm:$0xf] %v429_v44 }
  0xa0   : > { %432 = vst [vmem:[%s3166_s6 + $0xb4] sm:$0xf] %v431_v45 }
  0xa1   : > { %434 = vst [vmem:[%s3166_s6 + $0xb8] sm:$0xf] %v433_v46 }
  0xa2   : > { %436 = vst [vmem:[%s3166_s6 + $0xbc] sm:$0xf] %v435_v47 }
  0xa3   : > { %438 = vst [vmem:[%s3166_s6 + $0xc0] sm:$0xf] %v437_v48 }
  0xa4   : > { %440 = vst [vmem:[%s3166_s6 + $0xc4] sm:$0xf] %v439_v49 }
  0xa5   : > { %442 = vst [vmem:[%s3166_s6 + $0xc8] sm:$0xf] %v441_v50 }
  0xa6   : > { %444 = vst [vmem:[%s3166_s6 + $0xcc] sm:$0xf] %v443_v51 }
  0xa7   : > { %446 = vst [vmem:[%s3166_s6 + $0xd0] sm:$0xf] %v445_v52 }
  0xa8   : > { %448 = vst [vmem:[%s3166_s6 + $0xd4] sm:$0xf] %v447_v53 }
  0xa9   : > { %450 = vst [vmem:[%s3166_s6 + $0xd8] sm:$0xf] %v449_v54 }
  0xaa   : > { %452 = vst [vmem:[%s3166_s6 + $0xdc] sm:$0xf] %v451_v55 }
  0xab   : > { %454 = vst [vmem:[%s3166_s6 + $0xe0] sm:$0xf] %v453_v56 }
  0xac   : > { %456 = vst [vmem:[%s3166_s6 + $0xe4] sm:$0xf] %v455_v57 }
  0xad   : > { %458 = vst [vmem:[%s3166_s6 + $0xe8] sm:$0xf] %v457_v58 }
  0xae   : > { %460 = vst [vmem:[%s3166_s6 + $0xec] sm:$0xf] %v459_v59 }
  0xaf   : > { %462 = vst [vmem:[%s3166_s6 + $0xf0] sm:$0xf] %v461_v60 }
  0xb0   : > { %464 = vst [vmem:[%s3166_s6 + $0xf4] sm:$0xf] %v463_v61 }
  0xb1   : > { %466 = vst [vmem:[%s3166_s6 + $0xf8] sm:$0xf] %v465_v62 }
  0xb2   : > { %468 = vst [vmem:[%s3166_s6 + $0xfc] sm:$0xf] %v467_v63 }
  0xb3 PF: > { %p2224_p0 = scmp.ge.s32.totalorder %s2892_s22, 1  ;;  %p625_p1 = scmp.lt.s32.totalorder %s2892_s22, 15 }
  0xb5   : > { %p626_p2 = pnand %p2224_p0, %p625_p1 }
  0xb6   : > { %s632_s5 = sand.u32 (!%p626_p2), 1, %s2868_s16   ;;  %s639_s23 = sand.u32 (!%p626_p2), 1, %s2860_s14  }
  0xb7   : > { %629 = sbr.rel (%p626_p2) target bundleno = 720 (0x2d0), region = 88  ;;  %s2225_s28 = sshll.u32 (!%p626_p2), %s632_s5, 9 }
  0xb8   : > { %s2226_s0 = sshll.u32 (!%p626_p2), %s639_s23, 8  ;;  %s665_s7 = sand.u32 (!%p626_p2), 1, %s2852_s12  }
  0xb9   : > { %p671_p3 = scmp.lt.s32.totalorder (!%p626_p2), %s2880_s19, 1  ;;  %s2227_s11 = sshll.u32 (!%p626_p2), %s665_s7, 8 }
  0xba   : > { %s3306_s6 = scalar_lea.vmem (!%p626_p2), [#allocation2], %s2225_s28  ;;  %s3308_s1 = scalar_lea.vmem (!%p626_p2), [#allocation3], %s2226_s0 }
  0xbb   : > { %s3310_s25 = scalar_lea.vmem (!%p626_p2), [#allocation4], %s2227_s11  ;;  %p2228_p4 = scmp.ne.s32.totalorder (!%p626_p2), %s2876_s18, 0 }
  0xbc   : > { %s3300_s26 = scalar_select %p671_p3, %s2880_s19, 1 }
  0xbd   : > { %678 = sbr.rel (%p2228_p4) target bundleno = 227 (0xe3), region = 100 }
  0xbe   : > { %s673_s4 = scalar_lea.vmem %s3780_s2, %s3300_s26 }
  0xc2   : > { %v2894_v0 = vmov 0.0  }
  0xc3   : > { %679 = vst [vmem:[%s3310_s25] sm:$0xff] %v2894_v0 }
  0xc4   : > { %680 = vst [vmem:[%s3310_s25 + $0x8] sm:$0xff] %v2894_v0 }
  0xc5   : > { %681 = vst [vmem:[%s3310_s25 + $0x10] sm:$0xff] %v2894_v0 }
  0xc6   : > { %682 = vst [vmem:[%s3310_s25 + $0x18] sm:$0xff] %v2894_v0 }
  0xc7   : > { %683 = vst [vmem:[%s3310_s25 + $0x20] sm:$0xff] %v2894_v0 }
  0xc8   : > { %684 = vst [vmem:[%s3310_s25 + $0x28] sm:$0xff] %v2894_v0 }
  0xc9   : > { %685 = vst [vmem:[%s3310_s25 + $0x30] sm:$0xff] %v2894_v0 }
  0xca   : > { %686 = vst [vmem:[%s3310_s25 + $0x38] sm:$0xff] %v2894_v0 }
  0xcb   : > { %687 = vst [vmem:[%s3310_s25 + $0x40] sm:$0xff] %v2894_v0 }
  0xcc   : > { %688 = vst [vmem:[%s3310_s25 + $0x48] sm:$0xff] %v2894_v0 }
  0xcd   : > { %689 = vst [vmem:[%s3310_s25 + $0x50] sm:$0xff] %v2894_v0 }
  0xce   : > { %690 = vst [vmem:[%s3310_s25 + $0x58] sm:$0xff] %v2894_v0 }
  0xcf   : > { %691 = vst [vmem:[%s3310_s25 + $0x60] sm:$0xff] %v2894_v0 }
  0xd0   : > { %692 = vst [vmem:[%s3310_s25 + $0x68] sm:$0xff] %v2894_v0 }
  0xd1   : > { %693 = vst [vmem:[%s3310_s25 + $0x70] sm:$0xff] %v2894_v0 }
  0xd2   : > { %694 = vst [vmem:[%s3310_s25 + $0x78] sm:$0xff] %v2894_v0 }
  0xd3   : > { %695 = vst [vmem:[%s3310_s25 + $0x80] sm:$0xff] %v2894_v0 }
  0xd4   : > { %696 = vst [vmem:[%s3310_s25 + $0x88] sm:$0xff] %v2894_v0 }
  0xd5   : > { %697 = vst [vmem:[%s3310_s25 + $0x90] sm:$0xff] %v2894_v0 }
  0xd6   : > { %698 = vst [vmem:[%s3310_s25 + $0x98] sm:$0xff] %v2894_v0 }
  0xd7   : > { %699 = vst [vmem:[%s3310_s25 + $0xa0] sm:$0xff] %v2894_v0 }
  0xd8   : > { %700 = vst [vmem:[%s3310_s25 + $0xa8] sm:$0xff] %v2894_v0 }
  0xd9   : > { %701 = vst [vmem:[%s3310_s25 + $0xb0] sm:$0xff] %v2894_v0 }
  0xda   : > { %702 = vst [vmem:[%s3310_s25 + $0xb8] sm:$0xff] %v2894_v0 }
  0xdb   : > { %703 = vst [vmem:[%s3310_s25 + $0xc0] sm:$0xff] %v2894_v0 }
  0xdc   : > { %704 = vst [vmem:[%s3310_s25 + $0xc8] sm:$0xff] %v2894_v0 }
  0xdd   : > { %705 = vst [vmem:[%s3310_s25 + $0xd0] sm:$0xff] %v2894_v0 }
  0xde   : > { %706 = vst [vmem:[%s3310_s25 + $0xd8] sm:$0xff] %v2894_v0 }
  0xdf   : > { %707 = vst [vmem:[%s3310_s25 + $0xe0] sm:$0xff] %v2894_v0 }
  0xe0   : > { %708 = vst [vmem:[%s3310_s25 + $0xe8] sm:$0xff] %v2894_v0 }
  0xe1   : > { %709 = vst [vmem:[%s3310_s25 + $0xf0] sm:$0xff] %v2894_v0 }
  0xe2   : > { %710 = vst [vmem:[%s3310_s25 + $0xf8] sm:$0xff] %v2894_v0 }
  0xe3 PF: > { %v2691_v1 = vld [vmem:[%s3308_s1 + $0x38] sm:$0xff]  ;;  %v2690_v5 = vld [vmem:[%s3308_s1 + $0x30] sm:$0xff]  ;;  %v2689_v9 = vld [vmem:[%s3308_s1 + $0x28] sm:$0xff]  ;;  %p2613_p5 = scmp.ne.s32.totalorder %s2876_s18, 6 }
  0xe4   : > { %v2699_v2 = vld [vmem:[%s3308_s1 + $0x78] sm:$0xff]  ;;  %1383 = vmatpush.bf16.msra.mxu0 %v2691_v1  ;;  %v2698_v6 = vld [vmem:[%s3308_s1 + $0x70] sm:$0xff]  ;;  %v2697_v10 = vld [vmem:[%s3308_s1 + $0x68] sm:$0xff] }
  0xe5   : > { %v2707_v3 = vld [vmem:[%s3308_s1 + $0xb8] sm:$0xff]  ;;  %1472 = vmatpush.bf16.msra.mxu1 %v2699_v2  ;;  %v2706_v7 = vld [vmem:[%s3308_s1 + $0xb0] sm:$0xff]  ;;  %v2705_v11 = vld [vmem:[%s3308_s1 + $0xa8] sm:$0xff] }
  0xe6   : > { %v2715_v4 = vld [vmem:[%s3308_s1 + $0xf8] sm:$0xff]  ;;  %1561 = vmatpush.bf16.msra.mxu2 %v2707_v3  ;;  %v2714_v8 = vld [vmem:[%s3308_s1 + $0xf0] sm:$0xff]  ;;  %v2713_v12 = vld [vmem:[%s3308_s1 + $0xe8] sm:$0xff] }
  0xe7   : > { %1650 = vmatpush.bf16.msra.mxu3 %v2715_v4  ;;  %v2688_v13 = vld [vmem:[%s3308_s1 + $0x20] sm:$0xff]  ;;  %v2687_v17 = vld [vmem:[%s3308_s1 + $0x18] sm:$0xff]  ;;  %v2686_v21 = vld [vmem:[%s3308_s1 + $0x10] sm:$0xff] }
  0xe8   : > { %1384 = vmatpush.bf16.msra.mxu0 %v2690_v5  ;;  %v2696_v14 = vld [vmem:[%s3308_s1 + $0x60] sm:$0xff]  ;;  %v2695_v18 = vld [vmem:[%s3308_s1 + $0x58] sm:$0xff]  ;;  %v2694_v22 = vld [vmem:[%s3308_s1 + $0x50] sm:$0xff] }
  0xe9   : > { %1473 = vmatpush.bf16.msra.mxu1 %v2698_v6  ;;  %v2704_v15 = vld [vmem:[%s3308_s1 + $0xa0] sm:$0xff]  ;;  %v2703_v19 = vld [vmem:[%s3308_s1 + $0x98] sm:$0xff]  ;;  %v2702_v23 = vld [vmem:[%s3308_s1 + $0x90] sm:$0xff] }
  0xea   : > { %1562 = vmatpush.bf16.msra.mxu2 %v2706_v7  ;;  %v2712_v16 = vld [vmem:[%s3308_s1 + $0xe0] sm:$0xff]  ;;  %v2711_v20 = vld [vmem:[%s3308_s1 + $0xd8] sm:$0xff]  ;;  %v2710_v24 = vld [vmem:[%s3308_s1 + $0xd0] sm:$0xff] }
  0xeb   : > { %1651 = vmatpush.bf16.msra.mxu3 %v2714_v8  ;;  %v2685_v25 = vld [vmem:[%s3308_s1 + $0x8] sm:$0xff]  ;;  %v2684_v29 = vld [vmem:[%s3308_s1] sm:$0xff]  ;;  %v2622_v34 = vld [vmem:[%s3306_s6 + $0xc] sm:$0xf0] }
  0xec   : > { %1385 = vmatpush.bf16.msra.mxu0 %v2689_v9  ;;  %v2693_v26 = vld [vmem:[%s3308_s1 + $0x48] sm:$0xff]  ;;  %v2692_v30 = vld [vmem:[%s3308_s1 + $0x40] sm:$0xff]  ;;  %v2233_v36 = vld [vmem:[%s3306_s6 + $0x10] sm:$0xf0] }
  0xed   : > { %1474 = vmatpush.bf16.msra.mxu1 %v2697_v10  ;;  %v2701_v27 = vld [vmem:[%s3308_s1 + $0x88] sm:$0xff]  ;;  %v2700_v31 = vld [vmem:[%s3308_s1 + $0x80] sm:$0xff]  ;;  %v2623_v38 = vld [vmem:[%s3306_s6 + $0x14] sm:$0xf0] }
  0xee   : > { %1563 = vmatpush.bf16.msra.mxu2 %v2705_v11  ;;  %v2709_v28 = vld [vmem:[%s3308_s1 + $0xc8] sm:$0xff]  ;;  %v2708_v32 = vld [vmem:[%s3308_s1 + $0xc0] sm:$0xff]  ;;  %v2241_v40 = vld [vmem:[%s3306_s6 + $0x18] sm:$0xf0] }
  0xef   : > { %1652 = vmatpush.bf16.msra.mxu3 %v2713_v12  ;;  %v2231_v33 = vld [vmem:[%s3306_s6] sm:$0xf]  ;;  %v2620_v35 = vld [vmem:[%s3306_s6 + $0x4] sm:$0xf]  ;;  %v2239_v37 = vld [vmem:[%s3306_s6 + $0x8] sm:$0xf] }
  0xf0   : > { %1386 = vmatpush.bf16.msra.mxu0 %v2688_v13  ;;  %v2621_v39 = vld [vmem:[%s3306_s6 + $0xc] sm:$0xf]  ;;  %v2232_v41 = vor.u32 %v2622_v34, %v2231_v33  ;;  %v2236_v42 = vor.u32 %v2620_v35, %v2233_v36  ;;  %v2240_v43 = vor.u32 %v2623_v38, %v2239_v37  ;;  %v2247_v45 = vld [vmem:[%s3306_s6 + $0x20] sm:$0xf]  ;;  %v2626_v46 = vld [vmem:[%s3306_s6 + $0x2c] sm:$0xf0] }
  0xf1   : > { %1475 = vmatpush.bf16.msra.mxu1 %v2696_v14  ;;  %v2244_v44 = vor.u32 %v2621_v39, %v2241_v40  ;;  %v2624_v47 = vld [vmem:[%s3306_s6 + $0x24] sm:$0xf]  ;;  %v2249_v48 = vld [vmem:[%s3306_s6 + $0x30] sm:$0xf0]  ;;  %v2255_v49 = vld [vmem:[%s3306_s6 + $0x28] sm:$0xf]  ;;  %v2248_v53 = vor.u32 %v2626_v46, %v2247_v45 }
  0xf2   : > { %1564 = vmatpush.bf16.msra.mxu2 %v2704_v15  ;;  %v2627_v50 = vld [vmem:[%s3306_s6 + $0x34] sm:$0xf0]  ;;  %v2625_v51 = vld [vmem:[%s3306_s6 + $0x2c] sm:$0xf]  ;;  %v2257_v52 = vld [vmem:[%s3306_s6 + $0x38] sm:$0xf0]  ;;  %v2252_v54 = vor.u32 %v2624_v47, %v2249_v48 }
  0xf3   : > { %1653 = vmatpush.bf16.msra.mxu3 %v2712_v16  ;;  %v2256_v55 = vor.u32 %v2627_v50, %v2255_v49  ;;  %v2260_v56 = vor.u32 %v2625_v51, %v2257_v52  ;;  %v2263_v57 = vld [vmem:[%s3306_s6 + $0x40] sm:$0xf]  ;;  %v2630_v58 = vld [vmem:[%s3306_s6 + $0x4c] sm:$0xf0]  ;;  %v2628_v59 = vld [vmem:[%s3306_s6 + $0x44] sm:$0xf] }
  0xf4   : > { %1387 = vmatpush.bf16.msra.mxu0 %v2687_v17  ;;  %v2265_v60 = vld [vmem:[%s3306_s6 + $0x50] sm:$0xf0]  ;;  %v2271_v61 = vld [vmem:[%s3306_s6 + $0x48] sm:$0xf]  ;;  %v2631_v62 = vld [vmem:[%s3306_s6 + $0x54] sm:$0xf0]  ;;  %v2264_v1 = vor.u32 %v2630_v58, %v2263_v57 }
  0xf5   : > { %1476 = vmatpush.bf16.msra.mxu1 %v2695_v18  ;;  %v2629_v63 = vld [vmem:[%s3306_s6 + $0x4c] sm:$0xf]  ;;  %v2273_v0 = vld [vmem:[%s3306_s6 + $0x58] sm:$0xf0]  ;;  %v2268_v2 = vor.u32 %v2628_v59, %v2265_v60  ;;  %v2272_v3 = vor.u32 %v2631_v62, %v2271_v61  ;;  %v2279_v5 = vld [vmem:[%s3306_s6 + $0x60] sm:$0xf] }
  0xf6   : > { %1565 = vmatpush.bf16.msra.mxu2 %v2703_v19  ;;  %v2276_v4 = vor.u32 %v2629_v63, %v2273_v0  ;;  %v2634_v6 = vld [vmem:[%s3306_s6 + $0x6c] sm:$0xf0]  ;;  %v2632_v7 = vld [vmem:[%s3306_s6 + $0x64] sm:$0xf]  ;;  %v2281_v8 = vld [vmem:[%s3306_s6 + $0x70] sm:$0xf0] }
  0xf7   : > { %1654 = vmatpush.bf16.msra.mxu3 %v2711_v20  ;;  %v2287_v9 = vld [vmem:[%s3306_s6 + $0x68] sm:$0xf]  ;;  %v2635_v10 = vld [vmem:[%s3306_s6 + $0x74] sm:$0xf0]  ;;  %v2633_v11 = vld [vmem:[%s3306_s6 + $0x6c] sm:$0xf]  ;;  %v2280_v13 = vor.u32 %v2634_v6, %v2279_v5  ;;  %v2284_v14 = vor.u32 %v2632_v7, %v2281_v8 }
  0xf8   : > { %1388 = vmatpush.bf16.msra.mxu0 %v2686_v21  ;;  %v2289_v12 = vld [vmem:[%s3306_s6 + $0x78] sm:$0xf0]  ;;  %v2288_v15 = vor.u32 %v2635_v10, %v2287_v9  ;;  %v2295_v17 = vld [vmem:[%s3306_s6 + $0x80] sm:$0xf]  ;;  %v2638_v18 = vld [vmem:[%s3306_s6 + $0x8c] sm:$0xf0] }
  0xf9   : > { %1477 = vmatpush.bf16.msra.mxu1 %v2694_v22  ;;  %v2292_v16 = vor.u32 %v2633_v11, %v2289_v12  ;;  %v2636_v19 = vld [vmem:[%s3306_s6 + $0x84] sm:$0xf]  ;;  %v2297_v20 = vld [vmem:[%s3306_s6 + $0x90] sm:$0xf0]  ;;  %v2303_v21 = vld [vmem:[%s3306_s6 + $0x88] sm:$0xf] }
  0xfa   : > { %1566 = vmatpush.bf16.msra.mxu2 %v2702_v23  ;;  %v2639_v22 = vld [vmem:[%s3306_s6 + $0x94] sm:$0xf0]  ;;  %v2637_v23 = vld [vmem:[%s3306_s6 + $0x8c] sm:$0xf]  ;;  %v2319_v33 = vld [vmem:[%s3306_s6 + $0xa8] sm:$0xf] }
  0xfb   : > { %1655 = vmatpush.bf16.msra.mxu3 %v2710_v24  ;;  %v2305_v24 = vld [vmem:[%s3306_s6 + $0x98] sm:$0xf0]  ;;  %v2643_v34 = vld [vmem:[%s3306_s6 + $0xb4] sm:$0xf0]  ;;  %v2641_v35 = vld [vmem:[%s3306_s6 + $0xac] sm:$0xf] }
  0xfc   : > { %1389 = vmatpush.bf16.msra.mxu0 %v2685_v25  ;;  %v2296_v25 = vor.u32 %v2638_v18, %v2295_v17  ;;  %v2321_v36 = vld [vmem:[%s3306_s6 + $0xb8] sm:$0xf0]  ;;  %v2320_v39 = vor.u32 %v2643_v34, %v2319_v33  ;;  %v2335_v45 = vld [vmem:[%s3306_s6 + $0xc8] sm:$0xf]  ;;  %v2647_v46 = vld [vmem:[%s3306_s6 + $0xd4] sm:$0xf0] }
  0xfd   : > { %1478 = vmatpush.bf16.msra.mxu1 %v2693_v26  ;;  %v2300_v26 = vor.u32 %v2636_v19, %v2297_v20  ;;  %v2324_v40 = vor.u32 %v2641_v35, %v2321_v36  ;;  %v2645_v47 = vld [vmem:[%s3306_s6 + $0xcc] sm:$0xf]  ;;  %v2337_v48 = vld [vmem:[%s3306_s6 + $0xd8] sm:$0xf0]  ;;  %v2336_v51 = vor.u32 %v2647_v46, %v2335_v45  ;;  %v2351_v57 = vld [vmem:[%s3306_s6 + $0xe8] sm:$0xf] }
  0xfe   : > { %1567 = vmatpush.bf16.msra.mxu2 %v2701_v27  ;;  %v2304_v27 = vor.u32 %v2639_v22, %v2303_v21  ;;  %v2340_v52 = vor.u32 %v2645_v47, %v2337_v48  ;;  %v2651_v58 = vld [vmem:[%s3306_s6 + $0xf4] sm:$0xf0]  ;;  %v2649_v59 = vld [vmem:[%s3306_s6 + $0xec] sm:$0xf]  ;;  %v2353_v60 = vld [vmem:[%s3306_s6 + $0xf8] sm:$0xf0] }
  0xff   : > { %1656 = vmatpush.bf16.msra.mxu3 %v2709_v28  ;;  %v2308_v28 = vor.u32 %v2637_v23, %v2305_v24  ;;  %v2352_v63 = vor.u32 %v2651_v58, %v2351_v57  ;;  %v2356_v0 = vor.u32 %v2649_v59, %v2353_v60  ;;  %v2367_v5 = vld [vmem:[%s3306_s6 + $0x108] sm:$0xf]  ;;  %v2655_v6 = vld [vmem:[%s3306_s6 + $0x114] sm:$0xf0]  ;;  %v2653_v7 = vld [vmem:[%s3306_s6 + $0x10c] sm:$0xf] }
 0x100   : > { %1390 = vmatpush.bf16.msra.mxu0 %v2684_v29  ;;  %v2311_v29 = vld [vmem:[%s3306_s6 + $0xa0] sm:$0xf]  ;;  %v2369_v8 = vld [vmem:[%s3306_s6 + $0x118] sm:$0xf0]  ;;  %v2658_v24 = vld [vmem:[%s3306_s6 + $0x12c] sm:$0xf0] }
 0x101   : > { %1479 = vmatpush.bf16.msra.mxu1 %v2692_v30  ;;  %v2642_v30 = vld [vmem:[%s3306_s6 + $0xac] sm:$0xf0]  ;;  %v711_v21 = vld [vmem:[%s3310_s25] sm:$0xff]  ;;  %v2393_v57 = vld [vmem:[%s3306_s6 + $0x150] sm:$0xf0] }
 0x102   : > { %1568 = vmatpush.bf16.msra.mxu2 %v2700_v31  ;;  %v2640_v31 = vld [vmem:[%s3306_s6 + $0xa4] sm:$0xf]  ;;  %v2312_v37 = vor.u32 %v2642_v30, %v2311_v29  ;;  %v2375_v23 = vld [vmem:[%s3306_s6 + $0x120] sm:$0xf]  ;;  %v2659_v29 = vld [vmem:[%s3306_s6 + $0x134] sm:$0xf0] }
 0x103   : > { %1657 = vmatpush.bf16.msra.mxu3 %v2708_v32  ;;  %1391 = vmatmul.bf16.vlgmr.msra.gmra.mxu0 %v2232_v41  ;;  %v2313_v32 = vld [vmem:[%s3306_s6 + $0xb0] sm:$0xf0]  ;;  %v2327_v41 = vld [vmem:[%s3306_s6 + $0xc0] sm:$0xf]  ;;  %v2657_v30 = vld [vmem:[%s3306_s6 + $0x12c] sm:$0xf]  ;;  %v2376_v35 = vor.u32 %v2658_v24, %v2375_v23 }
 0x104   : > { %1480 = vmatmul.bf16.vlgmr.msra.gmra.mxu1 %v2236_v42  ;;  %v2316_v38 = vor.u32 %v2640_v31, %v2313_v32  ;;  %v2646_v42 = vld [vmem:[%s3306_s6 + $0xcc] sm:$0xf0]  ;;  %v2385_v31 = vld [vmem:[%s3306_s6 + $0x138] sm:$0xf0]  ;;  %v2399_v58 = vld [vmem:[%s3306_s6 + $0x148] sm:$0xf] }
 0x105   : > { %1569 = vmatmul.bf16.vlgmr.msra.gmra.mxu2 %v2240_v43  ;;  %v2644_v43 = vld [vmem:[%s3306_s6 + $0xc4] sm:$0xf]  ;;  %v2328_v49 = vor.u32 %v2646_v42, %v2327_v41  ;;  %v2388_v41 = vor.u32 %v2657_v30, %v2385_v31  ;;  %v712_v42 = vld [vmem:[%s3310_s25 + $0x8] sm:$0xff]  ;;  %v2663_v59 = vld [vmem:[%s3306_s6 + $0x154] sm:$0xf0] }
 0x106   : > { %1658 = vmatmul.bf16.vlgmr.msra.gmra.mxu3 %v2244_v44  ;;  %v2329_v44 = vld [vmem:[%s3306_s6 + $0xd0] sm:$0xf0]  ;;  %v2661_v60 = vld [vmem:[%s3306_s6 + $0x14c] sm:$0xf]  ;;  %v2415_v24 = vld [vmem:[%s3306_s6 + $0x168] sm:$0xf] }
 0x107   : > { %v2332_v50 = vor.u32 %v2644_v43, %v2329_v44  ;;  %v2409_v23 = vld [vmem:[%s3306_s6 + $0x170] sm:$0xf0] }
 0x113   : > { %1396 = vmatmul.bf16.gmra.mxu0 %v2248_v53  ;;  %v2343_v53 = vld [vmem:[%s3306_s6 + $0xe0] sm:$0xf] }
 0x114   : > { %1485 = vmatmul.bf16.gmra.mxu1 %v2252_v54  ;;  %v2650_v54 = vld [vmem:[%s3306_s6 + $0xec] sm:$0xf0] }
 0x115   : > { %1574 = vmatmul.bf16.gmra.mxu2 %v2256_v55  ;;  %v2648_v55 = vld [vmem:[%s3306_s6 + $0xe4] sm:$0xf]  ;;  %v2344_v61 = vor.u32 %v2650_v54, %v2343_v53  ;;  %v2391_v53 = vld [vmem:[%s3306_s6 + $0x140] sm:$0xf]  ;;  %v2662_v54 = vld [vmem:[%s3306_s6 + $0x14c] sm:$0xf0] }
 0x116   : > { %1663 = vmatmul.bf16.gmra.mxu3 %v2260_v56  ;;  %v2345_v56 = vld [vmem:[%s3306_s6 + $0xf0] sm:$0xf0] }
 0x117   : > { %v2348_v62 = vor.u32 %v2648_v55, %v2345_v56  ;;  %v2660_v56 = vld [vmem:[%s3306_s6 + $0x144] sm:$0xf] }
 0x123   : > { %1401 = vmatmul.bf16.gmra.mxu0 %v2264_v1  ;;  %v2359_v1 = vld [vmem:[%s3306_s6 + $0x100] sm:$0xf] }
 0x124   : > { %1490 = vmatmul.bf16.gmra.mxu1 %v2268_v2  ;;  %v2654_v2 = vld [vmem:[%s3306_s6 + $0x10c] sm:$0xf0] }
 0x125   : > { %1579 = vmatmul.bf16.gmra.mxu2 %v2272_v3  ;;  %v2652_v3 = vld [vmem:[%s3306_s6 + $0x104] sm:$0xf]  ;;  %v2360_v9 = vor.u32 %v2654_v2, %v2359_v1  ;;  %v2392_v1 = vor.u32 %v2662_v54, %v2391_v53  ;;  %v2396_v2 = vor.u32 %v2660_v56, %v2393_v57  ;;  %v2425_v53 = vld [vmem:[%s3306_s6 + $0x190] sm:$0xf0]  ;;  %v2431_v54 = vld [vmem:[%s3306_s6 + $0x188] sm:$0xf] }
 0x126   : > { %1668 = vmatmul.bf16.gmra.mxu3 %v2276_v4  ;;  %v2361_v4 = vld [vmem:[%s3306_s6 + $0x110] sm:$0xf0]  ;;  %v2669_v56 = vld [vmem:[%s3306_s6 + $0x18c] sm:$0xf]  ;;  %v2433_v57 = vld [vmem:[%s3306_s6 + $0x198] sm:$0xf0] }
 0x127   : > { %v2364_v10 = vor.u32 %v2652_v3, %v2361_v4 }
 0x133   : > { %1406 = vmatmul.bf16.gmra.mxu0 %v2280_v13  ;;  %v2368_v13 = vor.u32 %v2655_v6, %v2367_v5  ;;  %v2400_v6 = vor.u32 %v2663_v59, %v2399_v58 }
 0x134   : > { %1495 = vmatmul.bf16.gmra.mxu1 %v2284_v14  ;;  %v2372_v14 = vor.u32 %v2653_v7, %v2369_v8  ;;  %v714_v8 = vld [vmem:[%s3310_s25 + $0x18] sm:$0xff] }
 0x135   : > { %1584 = vmatmul.bf16.gmra.mxu2 %v2288_v15 }
 0x136   : > { %1673 = vmatmul.bf16.gmra.mxu3 %v2292_v16 }
 0x143   : > { %1411 = vmatmul.bf16.gmra.mxu0 %v2296_v25 }
 0x144   : > { %1500 = vmatmul.bf16.gmra.mxu1 %v2300_v26  ;;  %v2656_v26 = vld [vmem:[%s3306_s6 + $0x124] sm:$0xf] }
 0x145   : > { %1589 = vmatmul.bf16.gmra.mxu2 %v2304_v27  ;;  %v2377_v27 = vld [vmem:[%s3306_s6 + $0x130] sm:$0xf0] }
 0x146   : > { %1678 = vmatmul.bf16.gmra.mxu3 %v2308_v28  ;;  %v2383_v28 = vld [vmem:[%s3306_s6 + $0x128] sm:$0xf]  ;;  %v2380_v36 = vor.u32 %v2656_v26, %v2377_v27  ;;  %v2665_v26 = vld [vmem:[%s3306_s6 + $0x16c] sm:$0xf]  ;;  %v2417_v27 = vld [vmem:[%s3306_s6 + $0x178] sm:$0xf0] }
 0x153   : > { %1416 = vmatmul.bf16.gmra.mxu0 %v2312_v37 }
 0x154   : > { %1505 = vmatmul.bf16.gmra.mxu1 %v2316_v38 }
 0x155   : > { %1594 = vmatmul.bf16.gmra.mxu2 %v2320_v39 }
 0x156   : > { %1683 = vmatmul.bf16.gmra.mxu3 %v2324_v40  ;;  %v2384_v40 = vor.u32 %v2659_v29, %v2383_v28 }
 0x163   : > { %1421 = vmatmul.bf16.gmra.mxu0 %v2328_v49 }
 0x164   : > { %1510 = vmatmul.bf16.gmra.mxu1 %v2332_v50 }
 0x165   : > { %1599 = vmatmul.bf16.gmra.mxu2 %v2336_v51  ;;  %v713_v51 = vld [vmem:[%s3310_s25 + $0x10] sm:$0xff] }
 0x166   : > { %1688 = vmatmul.bf16.gmra.mxu3 %v2340_v52 }
 0x173   : > { %1426 = vmatmul.bf16.gmra.mxu0 %v2344_v61  ;;  %v2401_v61 = vld [vmem:[%s3306_s6 + $0x158] sm:$0xf0] }
 0x174   : > { %1515 = vmatmul.bf16.gmra.mxu1 %v2348_v62  ;;  %v2404_v7 = vor.u32 %v2661_v60, %v2401_v61 }
 0x175   : > { %1604 = vmatmul.bf16.gmra.mxu2 %v2352_v63 }
 0x176   : > { %1693 = vmatmul.bf16.gmra.mxu3 %v2356_v0 }
 0x180   : > { %v1392_v11 = vpop.f32.mrf.mxu0 }
 0x181   : > { %v1481_v12 = vpop.f32.mrf.mxu1 }
 0x182   : > { %v1482_v15 = vadd.f32 %v1481_v12, %v1392_v11 }
 0x183   : > { %1431 = vmatmul.bf16.gmra.mxu0 %v2360_v9 }
 0x184   : > { %1520 = vmatmul.bf16.gmra.mxu1 %v2364_v10 }
 0x185   : > { %1609 = vmatmul.bf16.gmra.mxu2 %v2368_v13 }
 0x186   : > { %1698 = vmatmul.bf16.gmra.mxu3 %v2372_v14 }
 0x188   : > { %v1570_v16 = vpop.f32.mrf.mxu2  ;;  %v1394_v19 = vpop.f32.mrf.mxu0 }
 0x189   : > { %v1659_v17 = vpop.f32.mrf.mxu3  ;;  %v1571_v18 = vadd.f32 %v1570_v16, %v1482_v15  ;;  %v1483_v20 = vpop.f32.mrf.mxu1 }
 0x18a   : > { %v1484_v32 = vadd.f32 %v1483_v20, %v1394_v19  ;;  %v2407_v19 = vld [vmem:[%s3306_s6 + $0x160] sm:$0xf]  ;;  %v2666_v20 = vld [vmem:[%s3306_s6 + $0x16c] sm:$0xf0] }
 0x18b   : > { %v1660_v22 = vadd.f32 %v1659_v17, %v1571_v18  ;;  %v715_v17 = vld [vmem:[%s3310_s25 + $0x20] sm:$0xff]  ;;  %v2408_v31 = vor.u32 %v2666_v20, %v2407_v19  ;;  %v2441_v19 = vld [vmem:[%s3306_s6 + $0x1b0] sm:$0xf0]  ;;  %v2447_v20 = vld [vmem:[%s3306_s6 + $0x1a8] sm:$0xf] }
 0x18d   : > { %v1739_v25 = vadd.f32 %v1660_v22, %v711_v21  ;;  %v2664_v22 = vld [vmem:[%s3306_s6 + $0x164] sm:$0xf] }
 0x18f   : > { %1771 = vst [vmem:[%s3310_s25] sm:$0xff] %v1739_v25  ;;  %v2667_v25 = vld [vmem:[%s3306_s6 + $0x174] sm:$0xf0] }
 0x190   : > { %v1572_v33 = vpop.f32.mrf.mxu2  ;;  %v1397_v38 = vpop.f32.mrf.mxu0 }
 0x191   : > { %v1661_v34 = vpop.f32.mrf.mxu3  ;;  %v1573_v37 = vadd.f32 %v1572_v33, %v1484_v32  ;;  %v1486_v39 = vpop.f32.mrf.mxu1  ;;  %v2412_v32 = vor.u32 %v2664_v22, %v2409_v23  ;;  %v2673_v22 = vld [vmem:[%s3306_s6 + $0x1ac] sm:$0xf]  ;;  %v2449_v23 = vld [vmem:[%s3306_s6 + $0x1b8] sm:$0xf0] }
 0x192   : > { %v1487_v45 = vadd.f32 %v1486_v39, %v1397_v38  ;;  %v716_v38 = vld [vmem:[%s3310_s25 + $0x28] sm:$0xff] }
 0x193   : > { %v1662_v43 = vadd.f32 %v1661_v34, %v1573_v37  ;;  %1436 = vmatmul.bf16.gmra.mxu0 %v2376_v35  ;;  %v2420_v37 = vor.u32 %v2665_v26, %v2417_v27 }
 0x194   : > { %1525 = vmatmul.bf16.gmra.mxu1 %v2380_v36  ;;  %v2416_v36 = vor.u32 %v2667_v25, %v2415_v24 }
 0x195   : > { %v1740_v44 = vadd.f32 %v1662_v43, %v712_v42  ;;  %1614 = vmatmul.bf16.gmra.mxu2 %v2384_v40 }
 0x196   : > { %1703 = vmatmul.bf16.gmra.mxu3 %v2388_v41 }
 0x197   : > { %1772 = vst [vmem:[%s3310_s25 + $0x8] sm:$0xff] %v1740_v44 }
 0x198   : > { %v1575_v46 = vpop.f32.mrf.mxu2  ;;  %v1399_v49 = vpop.f32.mrf.mxu0 }
 0x199   : > { %v1664_v47 = vpop.f32.mrf.mxu3  ;;  %v1576_v48 = vadd.f32 %v1575_v46, %v1487_v45  ;;  %v1488_v50 = vpop.f32.mrf.mxu1 }
 0x19a   : > { %v1489_v62 = vadd.f32 %v1488_v50, %v1399_v49  ;;  %v2423_v49 = vld [vmem:[%s3306_s6 + $0x180] sm:$0xf]  ;;  %v2670_v50 = vld [vmem:[%s3306_s6 + $0x18c] sm:$0xf0] }
 0x19b   : > { %v1665_v52 = vadd.f32 %v1664_v47, %v1576_v48  ;;  %v717_v47 = vld [vmem:[%s3310_s25 + $0x30] sm:$0xff]  ;;  %v2424_v61 = vor.u32 %v2670_v50, %v2423_v49  ;;  %v2463_v50 = vld [vmem:[%s3306_s6 + $0x1c8] sm:$0xf] }
 0x19c   : > { %v2457_v49 = vld [vmem:[%s3306_s6 + $0x1d0] sm:$0xf0] }
 0x19d   : > { %v1741_v55 = vadd.f32 %v1665_v52, %v713_v51  ;;  %v2668_v52 = vld [vmem:[%s3306_s6 + $0x184] sm:$0xf] }
 0x19f   : > { %1773 = vst [vmem:[%s3310_s25 + $0x10] sm:$0xff] %v1741_v55  ;;  %v2671_v55 = vld [vmem:[%s3306_s6 + $0x194] sm:$0xf0] }
 0x1a0   : > { %v1577_v63 = vpop.f32.mrf.mxu2  ;;  %v1402_v4 = vpop.f32.mrf.mxu0 }
 0x1a1   : > { %v1666_v0 = vpop.f32.mrf.mxu3  ;;  %v1578_v3 = vadd.f32 %v1577_v63, %v1489_v62  ;;  %v1491_v5 = vpop.f32.mrf.mxu1  ;;  %v2428_v62 = vor.u32 %v2668_v52, %v2425_v53  ;;  %v2677_v52 = vld [vmem:[%s3306_s6 + $0x1cc] sm:$0xf]  ;;  %v2465_v53 = vld [vmem:[%s3306_s6 + $0x1d8] sm:$0xf0] }
 0x1a2   : > { %v1492_v11 = vadd.f32 %v1491_v5, %v1402_v4  ;;  %v718_v4 = vld [vmem:[%s3310_s25 + $0x38] sm:$0xff] }
 0x1a3   : > { %v1667_v9 = vadd.f32 %v1666_v0, %v1578_v3  ;;  %1441 = vmatmul.bf16.gmra.mxu0 %v2392_v1  ;;  %v2436_v3 = vor.u32 %v2669_v56, %v2433_v57 }
 0x1a4   : > { %1530 = vmatmul.bf16.gmra.mxu1 %v2396_v2  ;;  %v2432_v2 = vor.u32 %v2671_v55, %v2431_v54 }
 0x1a5   : > { %v1742_v10 = vadd.f32 %v1667_v9, %v714_v8  ;;  %1619 = vmatmul.bf16.gmra.mxu2 %v2400_v6 }
 0x1a6   : > { %1708 = vmatmul.bf16.gmra.mxu3 %v2404_v7 }
 0x1a7   : > { %1774 = vst [vmem:[%s3310_s25 + $0x18] sm:$0xff] %v1742_v10 }
 0x1a8   : > { %v1580_v12 = vpop.f32.mrf.mxu2  ;;  %v1404_v15 = vpop.f32.mrf.mxu0 }
 0x1a9   : > { %v1669_v13 = vpop.f32.mrf.mxu3  ;;  %v1581_v14 = vadd.f32 %v1580_v12, %v1492_v11  ;;  %v1493_v16 = vpop.f32.mrf.mxu1 }
 0x1aa   : > { %v1494_v28 = vadd.f32 %v1493_v16, %v1404_v15  ;;  %v2439_v15 = vld [vmem:[%s3306_s6 + $0x1a0] sm:$0xf]  ;;  %v2674_v16 = vld [vmem:[%s3306_s6 + $0x1ac] sm:$0xf0] }
 0x1ab   : > { %v1670_v18 = vadd.f32 %v1669_v13, %v1581_v14  ;;  %v719_v13 = vld [vmem:[%s3310_s25 + $0x40] sm:$0xff]  ;;  %v2440_v27 = vor.u32 %v2674_v16, %v2439_v15  ;;  %v2473_v15 = vld [vmem:[%s3306_s6 + $0x1f0] sm:$0xf0]  ;;  %v2479_v16 = vld [vmem:[%s3306_s6 + $0x1e8] sm:$0xf] }
 0x1ad   : > { %v1743_v21 = vadd.f32 %v1670_v18, %v715_v17  ;;  %v2672_v18 = vld [vmem:[%s3306_s6 + $0x1a4] sm:$0xf] }
 0x1af   : > { %1775 = vst [vmem:[%s3310_s25 + $0x20] sm:$0xff] %v1743_v21  ;;  %v2675_v21 = vld [vmem:[%s3306_s6 + $0x1b4] sm:$0xf0] }
 0x1b0   : > { %v1582_v29 = vpop.f32.mrf.mxu2  ;;  %v1407_v34 = vpop.f32.mrf.mxu0 }
 0x1b1   : > { %v1671_v30 = vpop.f32.mrf.mxu3  ;;  %v1583_v33 = vadd.f32 %v1582_v29, %v1494_v28  ;;  %v1496_v35 = vpop.f32.mrf.mxu1  ;;  %v2444_v28 = vor.u32 %v2672_v18, %v2441_v19  ;;  %v2681_v18 = vld [vmem:[%s3306_s6 + $0x1ec] sm:$0xf]  ;;  %v2481_v19 = vld [vmem:[%s3306_s6 + $0x1f8] sm:$0xf0] }
 0x1b2   : > { %v1497_v41 = vadd.f32 %v1496_v35, %v1407_v34  ;;  %v720_v34 = vld [vmem:[%s3310_s25 + $0x48] sm:$0xff] }
 0x1b3   : > { %v1672_v39 = vadd.f32 %v1671_v30, %v1583_v33  ;;  %1446 = vmatmul.bf16.gmra.mxu0 %v2408_v31  ;;  %v2452_v33 = vor.u32 %v2673_v22, %v2449_v23 }
 0x1b4   : > { %1535 = vmatmul.bf16.gmra.mxu1 %v2412_v32  ;;  %v2448_v32 = vor.u32 %v2675_v21, %v2447_v20 }
 0x1b5   : > { %v1744_v40 = vadd.f32 %v1672_v39, %v716_v38  ;;  %1624 = vmatmul.bf16.gmra.mxu2 %v2416_v36 }
 0x1b6   : > { %1713 = vmatmul.bf16.gmra.mxu3 %v2420_v37 }
 0x1b7   : > { %1776 = vst [vmem:[%s3310_s25 + $0x28] sm:$0xff] %v1744_v40 }
 0x1b8   : > { %v1585_v42 = vpop.f32.mrf.mxu2  ;;  %v1409_v45 = vpop.f32.mrf.mxu0 }
 0x1b9   : > { %v1674_v43 = vpop.f32.mrf.mxu3  ;;  %v1586_v44 = vadd.f32 %v1585_v42, %v1497_v41  ;;  %v1498_v46 = vpop.f32.mrf.mxu1 }
 0x1ba   : > { %v1499_v58 = vadd.f32 %v1498_v46, %v1409_v45  ;;  %v2455_v45 = vld [vmem:[%s3306_s6 + $0x1c0] sm:$0xf]  ;;  %v2678_v46 = vld [vmem:[%s3306_s6 + $0x1cc] sm:$0xf0] }
 0x1bb   : > { %v1675_v48 = vadd.f32 %v1674_v43, %v1586_v44  ;;  %v721_v43 = vld [vmem:[%s3310_s25 + $0x50] sm:$0xff]  ;;  %v2456_v57 = vor.u32 %v2678_v46, %v2455_v45 }
 0x1bd   : > { %v1745_v51 = vadd.f32 %v1675_v48, %v717_v47  ;;  %v2676_v48 = vld [vmem:[%s3306_s6 + $0x1c4] sm:$0xf] }
 0x1bf   : > { %1777 = vst [vmem:[%s3310_s25 + $0x30] sm:$0xff] %v1745_v51  ;;  %v2679_v51 = vld [vmem:[%s3306_s6 + $0x1d4] sm:$0xf0] }
 0x1c0   : > { %v1587_v59 = vpop.f32.mrf.mxu2  ;;  %v1412_v0 = vpop.f32.mrf.mxu0 }
 0x1c1   : > { %v1676_v60 = vpop.f32.mrf.mxu3  ;;  %v1588_v63 = vadd.f32 %v1587_v59, %v1499_v58  ;;  %v1501_v1 = vpop.f32.mrf.mxu1  ;;  %v2460_v58 = vor.u32 %v2676_v48, %v2457_v49  ;;  %v726_v48 = vld [vmem:[%s3310_s25 + $0x78] sm:$0xff] }
 0x1c2   : > { %v1502_v7 = vadd.f32 %v1501_v1, %v1412_v0  ;;  %v722_v0 = vld [vmem:[%s3310_s25 + $0x58] sm:$0xff] }
 0x1c3   : > { %v1677_v5 = vadd.f32 %v1676_v60, %v1588_v63  ;;  %1451 = vmatmul.bf16.gmra.mxu0 %v2424_v61  ;;  %v2468_v63 = vor.u32 %v2677_v52, %v2465_v53 }
 0x1c4   : > { %1540 = vmatmul.bf16.gmra.mxu1 %v2428_v62  ;;  %v2464_v62 = vor.u32 %v2679_v51, %v2463_v50 }
 0x1c5   : > { %v1746_v6 = vadd.f32 %v1677_v5, %v718_v4  ;;  %1629 = vmatmul.bf16.gmra.mxu2 %v2432_v2 }
 0x1c6   : > { %1718 = vmatmul.bf16.gmra.mxu3 %v2436_v3 }
 0x1c7   : > { %1778 = vst [vmem:[%s3310_s25 + $0x38] sm:$0xff] %v1746_v6 }
 0x1c8   : > { %v1590_v8 = vpop.f32.mrf.mxu2  ;;  %v1414_v11 = vpop.f32.mrf.mxu0 }
 0x1c9   : > { %v1679_v9 = vpop.f32.mrf.mxu3  ;;  %v1591_v10 = vadd.f32 %v1590_v8, %v1502_v7  ;;  %v1503_v12 = vpop.f32.mrf.mxu1 }
 0x1ca   : > { %v1504_v24 = vadd.f32 %v1503_v12, %v1414_v11  ;;  %v2471_v11 = vld [vmem:[%s3306_s6 + $0x1e0] sm:$0xf]  ;;  %v2682_v12 = vld [vmem:[%s3306_s6 + $0x1ec] sm:$0xf0] }
 0x1cb   : > { %v1680_v14 = vadd.f32 %v1679_v9, %v1591_v10  ;;  %v723_v9 = vld [vmem:[%s3310_s25 + $0x60] sm:$0xff]  ;;  %v2472_v23 = vor.u32 %v2682_v12, %v2471_v11  ;;  %v729_v11 = vld [vmem:[%s3310_s25 + $0x90] sm:$0xff] }
 0x1cd   : > { %v1747_v17 = vadd.f32 %v1680_v14, %v719_v13  ;;  %v2680_v14 = vld [vmem:[%s3306_s6 + $0x1e4] sm:$0xf] }
 0x1cf   : > { %1779 = vst [vmem:[%s3310_s25 + $0x40] sm:$0xff] %v1747_v17  ;;  %v2683_v17 = vld [vmem:[%s3306_s6 + $0x1f4] sm:$0xf0] }
 0x1d0   : > { %v1592_v25 = vpop.f32.mrf.mxu2  ;;  %v1417_v30 = vpop.f32.mrf.mxu0 }
 0x1d1   : > { %v1681_v26 = vpop.f32.mrf.mxu3  ;;  %v1593_v29 = vadd.f32 %v1592_v25, %v1504_v24  ;;  %v1506_v31 = vpop.f32.mrf.mxu1  ;;  %v2476_v24 = vor.u32 %v2680_v14, %v2473_v15 }
 0x1d2   : > { %v1507_v37 = vadd.f32 %v1506_v31, %v1417_v30  ;;  %v724_v30 = vld [vmem:[%s3310_s25 + $0x68] sm:$0xff] }
 0x1d3   : > { %v1682_v35 = vadd.f32 %v1681_v26, %v1593_v29  ;;  %1456 = vmatmul.bf16.gmra.mxu0 %v2440_v27  ;;  %v2484_v29 = vor.u32 %v2681_v18, %v2481_v19 }
 0x1d4   : > { %1545 = vmatmul.bf16.gmra.mxu1 %v2444_v28  ;;  %v2480_v28 = vor.u32 %v2683_v17, %v2479_v16 }
 0x1d5   : > { %v1748_v36 = vadd.f32 %v1682_v35, %v720_v34  ;;  %1634 = vmatmul.bf16.gmra.mxu2 %v2448_v32 }
 0x1d6   : > { %1723 = vmatmul.bf16.gmra.mxu3 %v2452_v33 }
 0x1d7   : > { %1780 = vst [vmem:[%s3310_s25 + $0x48] sm:$0xff] %v1748_v36 }
 0x1d8   : > { %v1595_v38 = vpop.f32.mrf.mxu2  ;;  %v1419_v41 = vpop.f32.mrf.mxu0 }
 0x1d9   : > { %v1684_v39 = vpop.f32.mrf.mxu3  ;;  %v1596_v40 = vadd.f32 %v1595_v38, %v1507_v37  ;;  %v1508_v42 = vpop.f32.mrf.mxu1 }
 0x1da   : > { %v1509_v54 = vadd.f32 %v1508_v42, %v1419_v41 }
 0x1db   : > { %v1685_v44 = vadd.f32 %v1684_v39, %v1596_v40  ;;  %v725_v39 = vld [vmem:[%s3310_s25 + $0x70] sm:$0xff] }
 0x1dd   : > { %v1749_v47 = vadd.f32 %v1685_v44, %v721_v43 }
 0x1df   : > { %1781 = vst [vmem:[%s3310_s25 + $0x50] sm:$0xff] %v1749_v47 }
 0x1e0   : > { %v1597_v55 = vpop.f32.mrf.mxu2  ;;  %v1422_v60 = vpop.f32.mrf.mxu0 }
 0x1e1   : > { %v1686_v56 = vpop.f32.mrf.mxu3  ;;  %v1598_v59 = vadd.f32 %v1597_v55, %v1509_v54  ;;  %v1511_v61 = vpop.f32.mrf.mxu1 }
 0x1e2   : > { %v1512_v3 = vadd.f32 %v1511_v61, %v1422_v60 }
 0x1e3   : > { %v1687_v1 = vadd.f32 %v1686_v56, %v1598_v59  ;;  %1461 = vmatmul.bf16.gmra.mxu0 %v2456_v57  ;;  %v727_v57 = vld [vmem:[%s3310_s25 + $0x80] sm:$0xff] }
 0x1e4   : > { %1550 = vmatmul.bf16.gmra.mxu1 %v2460_v58 }
 0x1e5   : > { %v1750_v2 = vadd.f32 %v1687_v1, %v722_v0  ;;  %1639 = vmatmul.bf16.gmra.mxu2 %v2464_v62 }
 0x1e6   : > { %1728 = vmatmul.bf16.gmra.mxu3 %v2468_v63 }
 0x1e7   : > { %1782 = vst [vmem:[%s3310_s25 + $0x58] sm:$0xff] %v1750_v2  ;;  %v728_v2 = vld [vmem:[%s3310_s25 + $0x88] sm:$0xff] }
 0x1e8   : > { %v1600_v4 = vpop.f32.mrf.mxu2  ;;  %v1424_v7 = vpop.f32.mrf.mxu0 }
 0x1e9   : > { %v1689_v5 = vpop.f32.mrf.mxu3  ;;  %v1601_v6 = vadd.f32 %v1600_v4, %v1512_v3  ;;  %v1513_v8 = vpop.f32.mrf.mxu1 }
 0x1ea   : > { %v1514_v20 = vadd.f32 %v1513_v8, %v1424_v7 }
 0x1eb   : > { %v1690_v10 = vadd.f32 %v1689_v5, %v1601_v6 }
 0x1ed   : > { %v1751_v13 = vadd.f32 %v1690_v10, %v723_v9 }
 0x1ef   : > { %1783 = vst [vmem:[%s3310_s25 + $0x60] sm:$0xff] %v1751_v13 }
 0x1f0   : > { %v1602_v21 = vpop.f32.mrf.mxu2  ;;  %v1427_v26 = vpop.f32.mrf.mxu0 }
 0x1f1   : > { %v1691_v22 = vpop.f32.mrf.mxu3  ;;  %v1603_v25 = vadd.f32 %v1602_v21, %v1514_v20  ;;  %v1516_v27 = vpop.f32.mrf.mxu1  ;;  %v730_v20 = vld [vmem:[%s3310_s25 + $0x98] sm:$0xff] }
 0x1f2   : > { %v1517_v33 = vadd.f32 %v1516_v27, %v1427_v26 }
 0x1f3   : > { %v1692_v31 = vadd.f32 %v1691_v22, %v1603_v25  ;;  %1466 = vmatmul.bf16.gmra.mxu0 %v2472_v23 }
 0x1f4   : > { %1555 = vmatmul.bf16.gmra.mxu1 %v2476_v24 }
 0x1f5   : > { %v1752_v32 = vadd.f32 %v1692_v31, %v724_v30  ;;  %1644 = vmatmul.bf16.gmra.mxu2 %v2480_v28 }
 0x1f6   : > { %1733 = vmatmul.bf16.gmra.mxu3 %v2484_v29  ;;  %v731_v29 = vld [vmem:[%s3310_s25 + $0xa0] sm:$0xff] }
 0x1f7   : > { %1784 = vst [vmem:[%s3310_s25 + $0x68] sm:$0xff] %v1752_v32 }
 0x1f8   : > { %v1605_v34 = vpop.f32.mrf.mxu2  ;;  %v1429_v37 = vpop.f32.mrf.mxu0 }
 0x1f9   : > { %v1694_v35 = vpop.f32.mrf.mxu3  ;;  %v1606_v36 = vadd.f32 %v1605_v34, %v1517_v33  ;;  %v1518_v38 = vpop.f32.mrf.mxu1 }
 0x1fa   : > { %v1519_v42 = vadd.f32 %v1518_v38, %v1429_v37  ;;  %v732_v38 = vld [vmem:[%s3310_s25 + $0xa8] sm:$0xff] }
 0x1fb   : > { %v1695_v40 = vadd.f32 %v1694_v35, %v1606_v36 }
 0x1fd   : > { %v1753_v41 = vadd.f32 %v1695_v40, %v725_v39 }
 0x1ff   : > { %1785 = vst [vmem:[%s3310_s25 + $0x70] sm:$0xff] %v1753_v41 }
 0x200   : > { %v1607_v43 = vpop.f32.mrf.mxu2  ;;  %v1432_v46 = vpop.f32.mrf.mxu0 }
 0x201   : > { %v1696_v44 = vpop.f32.mrf.mxu3  ;;  %v1608_v45 = vadd.f32 %v1607_v43, %v1519_v42  ;;  %v1521_v47 = vpop.f32.mrf.mxu1 }
 0x202   : > { %v1522_v51 = vadd.f32 %v1521_v47, %v1432_v46  ;;  %v733_v47 = vld [vmem:[%s3310_s25 + $0xb0] sm:$0xff] }
 0x203   : > { %v1697_v49 = vadd.f32 %v1696_v44, %v1608_v45 }
 0x205   : > { %v1754_v50 = vadd.f32 %v1697_v49, %v726_v48 }
 0x207   : > { %1786 = vst [vmem:[%s3310_s25 + $0x78] sm:$0xff] %v1754_v50 }
 0x208   : > { %v1610_v52 = vpop.f32.mrf.mxu2  ;;  %v1434_v55 = vpop.f32.mrf.mxu0 }
 0x209   : > { %v1699_v53 = vpop.f32.mrf.mxu3  ;;  %v1611_v54 = vadd.f32 %v1610_v52, %v1522_v51  ;;  %v1523_v56 = vpop.f32.mrf.mxu1 }
 0x20a   : > { %v1524_v60 = vadd.f32 %v1523_v56, %v1434_v55  ;;  %v734_v56 = vld [vmem:[%s3310_s25 + $0xb8] sm:$0xff] }
 0x20b   : > { %v1700_v58 = vadd.f32 %v1699_v53, %v1611_v54 }
 0x20d   : > { %v1755_v59 = vadd.f32 %v1700_v58, %v727_v57 }
 0x20f   : > { %1787 = vst [vmem:[%s3310_s25 + $0x80] sm:$0xff] %v1755_v59 }
 0x210   : > { %v1612_v61 = vpop.f32.mrf.mxu2  ;;  %v1437_v0 = vpop.f32.mrf.mxu0 }
 0x211   : > { %v1701_v62 = vpop.f32.mrf.mxu3  ;;  %v1613_v63 = vadd.f32 %v1612_v61, %v1524_v60  ;;  %v1526_v1 = vpop.f32.mrf.mxu1 }
 0x212   : > { %v1527_v5 = vadd.f32 %v1526_v1, %v1437_v0  ;;  %v735_v1 = vld [vmem:[%s3310_s25 + $0xc0] sm:$0xff] }
 0x213   : > { %v1702_v3 = vadd.f32 %v1701_v62, %v1613_v63 }
 0x215   : > { %v1756_v4 = vadd.f32 %v1702_v3, %v728_v2 }
 0x217   : > { %1788 = vst [vmem:[%s3310_s25 + $0x88] sm:$0xff] %v1756_v4 }
 0x218   : > { %v1615_v6 = vpop.f32.mrf.mxu2  ;;  %v1439_v9 = vpop.f32.mrf.mxu0 }
 0x219   : > { %v1704_v7 = vpop.f32.mrf.mxu3  ;;  %v1616_v8 = vadd.f32 %v1615_v6, %v1527_v5  ;;  %v1528_v10 = vpop.f32.mrf.mxu1 }
 0x21a   : > { %v1529_v14 = vadd.f32 %v1528_v10, %v1439_v9  ;;  %v736_v10 = vld [vmem:[%s3310_s25 + $0xc8] sm:$0xff] }
 0x21b   : > { %v1705_v12 = vadd.f32 %v1704_v7, %v1616_v8 }
 0x21d   : > { %v1757_v13 = vadd.f32 %v1705_v12, %v729_v11 }
 0x21f   : > { %1789 = vst [vmem:[%s3310_s25 + $0x90] sm:$0xff] %v1757_v13 }
 0x220   : > { %v1617_v15 = vpop.f32.mrf.mxu2  ;;  %v1442_v18 = vpop.f32.mrf.mxu0 }
 0x221   : > { %v1706_v16 = vpop.f32.mrf.mxu3  ;;  %v1618_v17 = vadd.f32 %v1617_v15, %v1529_v14  ;;  %v1531_v19 = vpop.f32.mrf.mxu1 }
 0x222   : > { %v1532_v23 = vadd.f32 %v1531_v19, %v1442_v18  ;;  %v737_v19 = vld [vmem:[%s3310_s25 + $0xd0] sm:$0xff] }
 0x223   : > { %v1707_v21 = vadd.f32 %v1706_v16, %v1618_v17 }
 0x225   : > { %v1758_v22 = vadd.f32 %v1707_v21, %v730_v20 }
 0x227   : > { %1790 = vst [vmem:[%s3310_s25 + $0x98] sm:$0xff] %v1758_v22 }
 0x228   : > { %v1620_v24 = vpop.f32.mrf.mxu2  ;;  %v1444_v27 = vpop.f32.mrf.mxu0 }
 0x229   : > { %v1709_v25 = vpop.f32.mrf.mxu3  ;;  %v1621_v26 = vadd.f32 %v1620_v24, %v1532_v23  ;;  %v1533_v28 = vpop.f32.mrf.mxu1 }
 0x22a   : > { %v1534_v32 = vadd.f32 %v1533_v28, %v1444_v27  ;;  %v738_v28 = vld [vmem:[%s3310_s25 + $0xd8] sm:$0xff] }
 0x22b   : > { %v1710_v30 = vadd.f32 %v1709_v25, %v1621_v26 }
 0x22d   : > { %v1759_v31 = vadd.f32 %v1710_v30, %v731_v29 }
 0x22f   : > { %1791 = vst [vmem:[%s3310_s25 + $0xa0] sm:$0xff] %v1759_v31 }
 0x230   : > { %v1622_v33 = vpop.f32.mrf.mxu2  ;;  %v1447_v36 = vpop.f32.mrf.mxu0 }
 0x231   : > { %v1711_v34 = vpop.f32.mrf.mxu3  ;;  %v1623_v35 = vadd.f32 %v1622_v33, %v1534_v32  ;;  %v1536_v37 = vpop.f32.mrf.mxu1 }
 0x232   : > { %v1537_v41 = vadd.f32 %v1536_v37, %v1447_v36  ;;  %v739_v37 = vld [vmem:[%s3310_s25 + $0xe0] sm:$0xff] }
 0x233   : > { %v1712_v39 = vadd.f32 %v1711_v34, %v1623_v35 }
 0x235   : > { %v1760_v40 = vadd.f32 %v1712_v39, %v732_v38 }
 0x237   : > { %1792 = vst [vmem:[%s3310_s25 + $0xa8] sm:$0xff] %v1760_v40 }
 0x238   : > { %v1625_v42 = vpop.f32.mrf.mxu2  ;;  %v1449_v45 = vpop.f32.mrf.mxu0 }
 0x239   : > { %v1714_v43 = vpop.f32.mrf.mxu3  ;;  %v1626_v44 = vadd.f32 %v1625_v42, %v1537_v41  ;;  %v1538_v46 = vpop.f32.mrf.mxu1 }
 0x23a   : > { %v1539_v50 = vadd.f32 %v1538_v46, %v1449_v45 }
 0x23b   : > { %v1715_v48 = vadd.f32 %v1714_v43, %v1626_v44  ;;  %v740_v44 = vld [vmem:[%s3310_s25 + $0xe8] sm:$0xff] }
 0x23d   : > { %v1761_v49 = vadd.f32 %v1715_v48, %v733_v47 }
 0x23f   : > { %1793 = vst [vmem:[%s3310_s25 + $0xb0] sm:$0xff] %v1761_v49 }
 0x240   : > { %v1627_v51 = vpop.f32.mrf.mxu2  ;;  %v1452_v54 = vpop.f32.mrf.mxu0 }
 0x241   : > { %v1716_v52 = vpop.f32.mrf.mxu3  ;;  %v1628_v53 = vadd.f32 %v1627_v51, %v1539_v50  ;;  %v1541_v55 = vpop.f32.mrf.mxu1 }
 0x242   : > { %v1542_v59 = vadd.f32 %v1541_v55, %v1452_v54 }
 0x243   : > { %v1717_v57 = vadd.f32 %v1716_v52, %v1628_v53  ;;  %v741_v53 = vld [vmem:[%s3310_s25 + $0xf0] sm:$0xff] }
 0x245   : > { %v1762_v58 = vadd.f32 %v1717_v57, %v734_v56 }
 0x247   : > { %1794 = vst [vmem:[%s3310_s25 + $0xb8] sm:$0xff] %v1762_v58 }
 0x248   : > { %v1630_v60 = vpop.f32.mrf.mxu2  ;;  %v1454_v63 = vpop.f32.mrf.mxu0 }
 0x249   : > { %v1719_v61 = vpop.f32.mrf.mxu3  ;;  %v1631_v62 = vadd.f32 %v1630_v60, %v1542_v59  ;;  %v1543_v0 = vpop.f32.mrf.mxu1 }
 0x24a   : > { %v1544_v4 = vadd.f32 %v1543_v0, %v1454_v63 }
 0x24b   : > { %v1720_v2 = vadd.f32 %v1719_v61, %v1631_v62  ;;  %v742_v61 = vld [vmem:[%s3310_s25 + $0xf8] sm:$0xff] }
 0x24d   : > { %v1763_v3 = vadd.f32 %v1720_v2, %v735_v1 }
 0x24f   : > { %1795 = vst [vmem:[%s3310_s25 + $0xc0] sm:$0xff] %v1763_v3 }
 0x250   : > { %v1632_v5 = vpop.f32.mrf.mxu2  ;;  %v1457_v8 = vpop.f32.mrf.mxu0 }
 0x251   : > { %v1721_v6 = vpop.f32.mrf.mxu3  ;;  %v1633_v7 = vadd.f32 %v1632_v5, %v1544_v4  ;;  %v1546_v9 = vpop.f32.mrf.mxu1 }
 0x252   : > { %v1547_v13 = vadd.f32 %v1546_v9, %v1457_v8 }
 0x253   : > { %v1722_v11 = vadd.f32 %v1721_v6, %v1633_v7 }
 0x255   : > { %v1764_v12 = vadd.f32 %v1722_v11, %v736_v10 }
 0x257   : > { %1796 = vst [vmem:[%s3310_s25 + $0xc8] sm:$0xff] %v1764_v12 }
 0x258   : > { %v1635_v14 = vpop.f32.mrf.mxu2  ;;  %v1459_v17 = vpop.f32.mrf.mxu0 }
 0x259   : > { %v1724_v15 = vpop.f32.mrf.mxu3  ;;  %v1636_v16 = vadd.f32 %v1635_v14, %v1547_v13  ;;  %v1548_v18 = vpop.f32.mrf.mxu1 }
 0x25a   : > { %v1549_v22 = vadd.f32 %v1548_v18, %v1459_v17 }
 0x25b   : > { %v1725_v20 = vadd.f32 %v1724_v15, %v1636_v16 }
 0x25d   : > { %v1765_v21 = vadd.f32 %v1725_v20, %v737_v19 }
 0x25f   : > { %1797 = vst [vmem:[%s3310_s25 + $0xd0] sm:$0xff] %v1765_v21 }
 0x260   : > { %v1637_v23 = vpop.f32.mrf.mxu2  ;;  %v1462_v26 = vpop.f32.mrf.mxu0 }
 0x261   : > { %v1726_v24 = vpop.f32.mrf.mxu3  ;;  %v1638_v25 = vadd.f32 %v1637_v23, %v1549_v22  ;;  %v1551_v27 = vpop.f32.mrf.mxu1 }
 0x262   : > { %v1552_v31 = vadd.f32 %v1551_v27, %v1462_v26 }
 0x263   : > { %v1727_v29 = vadd.f32 %v1726_v24, %v1638_v25 }
 0x265   : > { %v1766_v30 = vadd.f32 %v1727_v29, %v738_v28 }
 0x267   : > { %1798 = vst [vmem:[%s3310_s25 + $0xd8] sm:$0xff] %v1766_v30 }
 0x268   : > { %v1640_v32 = vpop.f32.mrf.mxu2  ;;  %v1464_v35 = vpop.f32.mrf.mxu0 }
 0x269   : > { %v1729_v33 = vpop.f32.mrf.mxu3  ;;  %v1641_v34 = vadd.f32 %v1640_v32, %v1552_v31  ;;  %v1553_v36 = vpop.f32.mrf.mxu1 }
 0x26a   : > { %v1554_v40 = vadd.f32 %v1553_v36, %v1464_v35 }
 0x26b   : > { %v1730_v38 = vadd.f32 %v1729_v33, %v1641_v34 }
 0x26d   : > { %v1767_v39 = vadd.f32 %v1730_v38, %v739_v37 }
 0x26f   : > { %1799 = vst [vmem:[%s3310_s25 + $0xe0] sm:$0xff] %v1767_v39 }
 0x270   : > { %v1642_v41 = vpop.f32.mrf.mxu2  ;;  %v1467_v45 = vpop.f32.mrf.mxu0 }
 0x271   : > { %v1731_v42 = vpop.f32.mrf.mxu3  ;;  %v1643_v43 = vadd.f32 %v1642_v41, %v1554_v40  ;;  %v1556_v46 = vpop.f32.mrf.mxu1 }
 0x272   : > { %v1557_v49 = vadd.f32 %v1556_v46, %v1467_v45 }
 0x273   : > { %v1732_v47 = vadd.f32 %v1731_v42, %v1643_v43 }
 0x275   : > { %v1768_v48 = vadd.f32 %v1732_v47, %v740_v44 }
 0x277   : > { %1800 = vst [vmem:[%s3310_s25 + $0xe8] sm:$0xff] %v1768_v48 }
 0x278   : > { %v1645_v50 = vpop.f32.mrf.mxu2  ;;  %v1469_v55 = vpop.f32.mrf.mxu0 }
 0x279   : > { %v1734_v51 = vpop.f32.mrf.mxu3  ;;  %v1646_v52 = vadd.f32 %v1645_v50, %v1557_v49  ;;  %v1558_v56 = vpop.f32.mrf.mxu1 }
 0x27a   : > { %v1559_v58 = vadd.f32 %v1558_v56, %v1469_v55 }
 0x27b   : > { %v1735_v54 = vadd.f32 %v1734_v51, %v1646_v52 }
 0x27d   : > { %v1769_v57 = vadd.f32 %v1735_v54, %v741_v53 }
 0x27f   : > { %1801 = vst [vmem:[%s3310_s25 + $0xf0] sm:$0xff] %v1769_v57 }
 0x280   : > { %v1647_v59 = vpop.f32.mrf.mxu2 }
 0x281   : > { %v1648_v60 = vadd.f32 %v1647_v59, %v1559_v58  ;;  %v1736_v62 = vpop.f32.mrf.mxu3 }
 0x283   : > { %v1737_v63 = vadd.f32 %v1736_v62, %v1648_v60  ;;  %1806 = sbr.rel (%p2613_p5) target bundleno = 686 (0x2ae), region = 104 }
 0x285   : > { %v1770_v0 = vadd.f32 %v1737_v63, %v742_v61 }
 0x287   : > { %1802 = vst [vmem:[%s3310_s25 + $0xf8] sm:$0xff] %v1770_v0 }
 0x288   : > { %v1807_v1 = vld [vmem:[%s3310_s25] sm:$0xff]  ;;  %v1808_v3 = vld [vmem:[%s3310_s25 + $0x8] sm:$0xff]  ;;  %v1809_v4 = vld [vmem:[%s3310_s25 + $0x10] sm:$0xff] }
 0x289   : > { %v3576_v2 = vld [vmem:[%s673_s4] ss:$0 sm:$0xff]  ;;  %v1810_v5 = vld [vmem:[%s3310_s25 + $0x18] sm:$0xff]  ;;  %v1812_v11 = vld [vmem:[%s3310_s25 + $0x28] sm:$0xff] }
 0x28a   : > { %v1843_v6 = vadd.f32 %v3576_v2, %v1807_v1  ;;  %v1844_v7 = vadd.f32 %v3576_v2, %v1808_v3  ;;  %v1845_v8 = vadd.f32 %v3576_v2, %v1809_v4  ;;  %v1846_v9 = vadd.f32 %v3576_v2, %v1810_v5  ;;  %v1811_v10 = vld [vmem:[%s3310_s25 + $0x20] sm:$0xff]  ;;  %v1813_v12 = vld [vmem:[%s3310_s25 + $0x30] sm:$0xff]  ;;  %v1814_v15 = vld [vmem:[%s3310_s25 + $0x38] sm:$0xff] }
 0x28b   : > { %v1847_v13 = vadd.f32 %v3576_v2, %v1811_v10  ;;  %v1848_v14 = vadd.f32 %v3576_v2, %v1812_v11  ;;  %v1815_v16 = vld [vmem:[%s3310_s25 + $0x40] sm:$0xff]  ;;  %v1849_v20 = vadd.f32 %v3576_v2, %v1813_v12  ;;  %v1816_v21 = vld [vmem:[%s3310_s25 + $0x48] sm:$0xff]  ;;  %v1850_v23 = vadd.f32 %v3576_v2, %v1814_v15  ;;  %v1817_v24 = vld [vmem:[%s3310_s25 + $0x50] sm:$0xff] }
 0x28c   : > { %v1875_v17 = vmax.f32 %v1843_v6, 0.0  ;;  %v1876_v18 = vmax.f32 %v1844_v7, 0.0  ;;  %v1877_v19 = vmax.f32 %v1845_v8, 0.0  ;;  %v1878_v22 = vmax.f32 %v1846_v9, 0.0  ;;  %v1818_v27 = vld [vmem:[%s3310_s25 + $0x58] sm:$0xff]  ;;  %v1819_v30 = vld [vmem:[%s3310_s25 + $0x60] sm:$0xff] }
 0x28d   : > { %v1879_v25 = vmax.f32 %v1847_v13, 0.0  ;;  %v1851_v26 = vadd.f32 %v3576_v2, %v1815_v16  ;;  %v1880_v28 = vmax.f32 %v1848_v14, 0.0  ;;  %v1852_v29 = vadd.f32 %v3576_v2, %v1816_v21  ;;  %v1820_v33 = vld [vmem:[%s3310_s25 + $0x68] sm:$0xff]  ;;  %v1821_v36 = vld [vmem:[%s3310_s25 + $0x70] sm:$0xff]  ;;  %v1822_v39 = vld [vmem:[%s3310_s25 + $0x78] sm:$0xff] }
 0x28e   : > { %1907 = vst [vmem:[%s3310_s25] sm:$0xff] %v1875_v17  ;;  %v1881_v31 = vmax.f32 %v1849_v20, 0.0  ;;  %v1853_v32 = vadd.f32 %v3576_v2, %v1817_v24  ;;  %v1882_v34 = vmax.f32 %v1850_v23, 0.0  ;;  %v1854_v35 = vadd.f32 %v3576_v2, %v1818_v27  ;;  %v1823_v42 = vld [vmem:[%s3310_s25 + $0x80] sm:$0xff]  ;;  %v1824_v45 = vld [vmem:[%s3310_s25 + $0x88] sm:$0xff]  ;;  %v1825_v48 = vld [vmem:[%s3310_s25 + $0x90] sm:$0xff] }
 0x28f   : > { %1908 = vst [vmem:[%s3310_s25 + $0x8] sm:$0xff] %v1876_v18  ;;  %v1883_v37 = vmax.f32 %v1851_v26, 0.0  ;;  %v1855_v38 = vadd.f32 %v3576_v2, %v1819_v30  ;;  %v1884_v40 = vmax.f32 %v1852_v29, 0.0  ;;  %v1856_v41 = vadd.f32 %v3576_v2, %v1820_v33  ;;  %v1826_v51 = vld [vmem:[%s3310_s25 + $0x98] sm:$0xff]  ;;  %v1827_v54 = vld [vmem:[%s3310_s25 + $0xa0] sm:$0xff]  ;;  %v1828_v57 = vld [vmem:[%s3310_s25 + $0xa8] sm:$0xff] }
 0x290   : > { %1909 = vst [vmem:[%s3310_s25 + $0x10] sm:$0xff] %v1877_v19  ;;  %v1885_v43 = vmax.f32 %v1853_v32, 0.0  ;;  %v1857_v44 = vadd.f32 %v3576_v2, %v1821_v36  ;;  %v1886_v46 = vmax.f32 %v1854_v35, 0.0  ;;  %v1858_v47 = vadd.f32 %v3576_v2, %v1822_v39  ;;  %v1829_v60 = vld [vmem:[%s3310_s25 + $0xb0] sm:$0xff]  ;;  %v1830_v63 = vld [vmem:[%s3310_s25 + $0xb8] sm:$0xff]  ;;  %v1831_v3 = vld [vmem:[%s3310_s25 + $0xc0] sm:$0xff] }
 0x291   : > { %1910 = vst [vmem:[%s3310_s25 + $0x18] sm:$0xff] %v1878_v22  ;;  %v1887_v49 = vmax.f32 %v1855_v38, 0.0  ;;  %v1859_v50 = vadd.f32 %v3576_v2, %v1823_v42  ;;  %v1888_v52 = vmax.f32 %v1856_v41, 0.0  ;;  %v1860_v53 = vadd.f32 %v3576_v2, %v1824_v45  ;;  %v1832_v6 = vld [vmem:[%s3310_s25 + $0xc8] sm:$0xff]  ;;  %v1833_v9 = vld [vmem:[%s3310_s25 + $0xd0] sm:$0xff]  ;;  %v1834_v12 = vld [vmem:[%s3310_s25 + $0xd8] sm:$0xff] }
 0x292   : > { %1911 = vst [vmem:[%s3310_s25 + $0x20] sm:$0xff] %v1879_v25  ;;  %v1889_v55 = vmax.f32 %v1857_v44, 0.0  ;;  %v1861_v56 = vadd.f32 %v3576_v2, %v1825_v48  ;;  %v1890_v58 = vmax.f32 %v1858_v47, 0.0  ;;  %v1862_v59 = vadd.f32 %v3576_v2, %v1826_v51  ;;  %v1835_v15 = vld [vmem:[%s3310_s25 + $0xe0] sm:$0xff]  ;;  %v1836_v18 = vld [vmem:[%s3310_s25 + $0xe8] sm:$0xff]  ;;  %v1837_v21 = vld [vmem:[%s3310_s25 + $0xf0] sm:$0xff] }
 0x293   : > { %1912 = vst [vmem:[%s3310_s25 + $0x28] sm:$0xff] %v1880_v28  ;;  %v1891_v61 = vmax.f32 %v1859_v50, 0.0  ;;  %v1863_v62 = vadd.f32 %v3576_v2, %v1827_v54  ;;  %v1892_v0 = vmax.f32 %v1860_v53, 0.0  ;;  %v1864_v1 = vadd.f32 %v3576_v2, %v1828_v57  ;;  %v1838_v24 = vld [vmem:[%s3310_s25 + $0xf8] sm:$0xff] }
 0x294   : > { %1913 = vst [vmem:[%s3310_s25 + $0x30] sm:$0xff] %v1881_v31  ;;  %v1893_v4 = vmax.f32 %v1861_v56, 0.0  ;;  %v1865_v5 = vadd.f32 %v3576_v2, %v1829_v60  ;;  %v1894_v7 = vmax.f32 %v1862_v59, 0.0  ;;  %v1866_v8 = vadd.f32 %v3576_v2, %v1830_v63 }
 0x295   : > { %1914 = vst [vmem:[%s3310_s25 + $0x38] sm:$0xff] %v1882_v34  ;;  %v1895_v10 = vmax.f32 %v1863_v62, 0.0  ;;  %v1867_v11 = vadd.f32 %v3576_v2, %v1831_v3  ;;  %v1896_v13 = vmax.f32 %v1864_v1, 0.0  ;;  %v1868_v14 = vadd.f32 %v3576_v2, %v1832_v6 }
 0x296   : > { %1915 = vst [vmem:[%s3310_s25 + $0x40] sm:$0xff] %v1883_v37  ;;  %v1897_v16 = vmax.f32 %v1865_v5, 0.0  ;;  %v1869_v17 = vadd.f32 %v3576_v2, %v1833_v9  ;;  %v1898_v19 = vmax.f32 %v1866_v8, 0.0  ;;  %v1870_v20 = vadd.f32 %v3576_v2, %v1834_v12 }
 0x297   : > { %1916 = vst [vmem:[%s3310_s25 + $0x48] sm:$0xff] %v1884_v40  ;;  %v1899_v22 = vmax.f32 %v1867_v11, 0.0  ;;  %v1871_v23 = vadd.f32 %v3576_v2, %v1835_v15  ;;  %v1900_v25 = vmax.f32 %v1868_v14, 0.0  ;;  %v1872_v26 = vadd.f32 %v3576_v2, %v1836_v18 }
 0x298   : > { %1917 = vst [vmem:[%s3310_s25 + $0x50] sm:$0xff] %v1885_v43  ;;  %v1901_v27 = vmax.f32 %v1869_v17, 0.0  ;;  %v1873_v28 = vadd.f32 %v3576_v2, %v1837_v21  ;;  %v1902_v29 = vmax.f32 %v1870_v20, 0.0  ;;  %v1874_v30 = vadd.f32 %v3576_v2, %v1838_v24 }
 0x299   : > { %1918 = vst [vmem:[%s3310_s25 + $0x58] sm:$0xff] %v1886_v46  ;;  %v1903_v31 = vmax.f32 %v1871_v23, 0.0  ;;  %v1904_v32 = vmax.f32 %v1872_v26, 0.0 }
 0x29a   : > { %1919 = vst [vmem:[%s3310_s25 + $0x60] sm:$0xff] %v1887_v49  ;;  %v1905_v33 = vmax.f32 %v1873_v28, 0.0  ;;  %v1906_v34 = vmax.f32 %v1874_v30, 0.0 }
 0x29b   : > { %1920 = vst [vmem:[%s3310_s25 + $0x68] sm:$0xff] %v1888_v52 }
 0x29c   : > { %1921 = vst [vmem:[%s3310_s25 + $0x70] sm:$0xff] %v1889_v55 }
 0x29d   : > { %1922 = vst [vmem:[%s3310_s25 + $0x78] sm:$0xff] %v1890_v58 }
 0x29e   : > { %1923 = vst [vmem:[%s3310_s25 + $0x80] sm:$0xff] %v1891_v61 }
 0x29f   : > { %1924 = vst [vmem:[%s3310_s25 + $0x88] sm:$0xff] %v1892_v0 }
 0x2a0   : > { %1925 = vst [vmem:[%s3310_s25 + $0x90] sm:$0xff] %v1893_v4 }
 0x2a1   : > { %1926 = vst [vmem:[%s3310_s25 + $0x98] sm:$0xff] %v1894_v7 }
 0x2a2   : > { %1927 = vst [vmem:[%s3310_s25 + $0xa0] sm:$0xff] %v1895_v10 }
 0x2a3   : > { %1928 = vst [vmem:[%s3310_s25 + $0xa8] sm:$0xff] %v1896_v13 }
 0x2a4   : > { %1929 = vst [vmem:[%s3310_s25 + $0xb0] sm:$0xff] %v1897_v16 }
 0x2a5   : > { %1930 = vst [vmem:[%s3310_s25 + $0xb8] sm:$0xff] %v1898_v19 }
 0x2a6   : > { %1931 = vst [vmem:[%s3310_s25 + $0xc0] sm:$0xff] %v1899_v22 }
 0x2a7   : > { %1932 = vst [vmem:[%s3310_s25 + $0xc8] sm:$0xff] %v1900_v25 }
 0x2a8   : > { %1933 = vst [vmem:[%s3310_s25 + $0xd0] sm:$0xff] %v1901_v27 }
 0x2a9   : > { %1934 = vst [vmem:[%s3310_s25 + $0xd8] sm:$0xff] %v1902_v29 }
 0x2aa   : > { %1935 = vst [vmem:[%s3310_s25 + $0xe0] sm:$0xff] %v1903_v31 }
 0x2ab   : > { %1936 = vst [vmem:[%s3310_s25 + $0xe8] sm:$0xff] %v1904_v32 }
 0x2ac   : > { %1937 = vst [vmem:[%s3310_s25 + $0xf0] sm:$0xff] %v1905_v33 }
 0x2ad   : > { %1938 = vst [vmem:[%s3310_s25 + $0xf8] sm:$0xff] %v1906_v34 }
 0x2ae PF: > { %1945 = sbr.rel (!%p3009_p12) target bundleno = 720 (0x2d0), region = 108  ;;  %s2615_s14 = sshll.u32 (%p3009_p12), %s2880_s19, 3  ;;  %v2041_v2 = vld [vmem:[%s3310_s25] sm:$0xff] (%p3009_p12)  ;;  %v2043_v35 = vld [vmem:[%s3310_s25 + $0x8] sm:$0xff] (%p3009_p12)  ;;  %v2045_v36 = vld [vmem:[%s3310_s25 + $0x10] sm:$0xff] (%p3009_p12) }
 0x2af   : > { %s3681_s5 = scalar_lea.vmem (%p3009_p12), %s3781_s3, %s2615_s14  ;;  %v2047_v37 = vld [vmem:[%s3310_s25 + $0x18] sm:$0xff] (%p3009_p12)  ;;  %v2049_v38 = vld [vmem:[%s3310_s25 + $0x20] sm:$0xff] (%p3009_p12)  ;;  %v2051_v39 = vld [vmem:[%s3310_s25 + $0x28] sm:$0xff] (%p3009_p12) }
 0x2b0   : > { %2042 = vst [vmem:[%s3681_s5] sm:$0xff] (%p3009_p12), %v2041_v2  ;;  %v2053_v40 = vld [vmem:[%s3310_s25 + $0x30] sm:$0xff] (%p3009_p12)  ;;  %v2055_v41 = vld [vmem:[%s3310_s25 + $0x38] sm:$0xff] (%p3009_p12)  ;;  %v2057_v42 = vld [vmem:[%s3310_s25 + $0x40] sm:$0xff] (%p3009_p12) }
 0x2b1   : > { %2044 = vst [vmem:[%s3681_s5 + $0x10] sm:$0xff] (%p3009_p12), %v2043_v35  ;;  %v2059_v43 = vld [vmem:[%s3310_s25 + $0x48] sm:$0xff] (%p3009_p12)  ;;  %v2061_v44 = vld [vmem:[%s3310_s25 + $0x50] sm:$0xff] (%p3009_p12)  ;;  %v2063_v45 = vld [vmem:[%s3310_s25 + $0x58] sm:$0xff] (%p3009_p12) }
 0x2b2   : > { %2046 = vst [vmem:[%s3681_s5 + $0x20] sm:$0xff] (%p3009_p12), %v2045_v36  ;;  %v2065_v46 = vld [vmem:[%s3310_s25 + $0x60] sm:$0xff] (%p3009_p12)  ;;  %v2067_v47 = vld [vmem:[%s3310_s25 + $0x68] sm:$0xff] (%p3009_p12)  ;;  %v2069_v48 = vld [vmem:[%s3310_s25 + $0x70] sm:$0xff] (%p3009_p12) }
 0x2b3   : > { %2048 = vst [vmem:[%s3681_s5 + $0x30] sm:$0xff] %v2047_v37  ;;  %v2071_v49 = vld [vmem:[%s3310_s25 + $0x78] sm:$0xff]  ;;  %v2073_v50 = vld [vmem:[%s3310_s25 + $0x80] sm:$0xff]  ;;  %v2075_v51 = vld [vmem:[%s3310_s25 + $0x88] sm:$0xff] }
 0x2b4   : > { %2050 = vst [vmem:[%s3681_s5 + $0x40] sm:$0xff] %v2049_v38  ;;  %v2077_v52 = vld [vmem:[%s3310_s25 + $0x90] sm:$0xff]  ;;  %v2079_v53 = vld [vmem:[%s3310_s25 + $0x98] sm:$0xff]  ;;  %v2081_v54 = vld [vmem:[%s3310_s25 + $0xa0] sm:$0xff] }
 0x2b5   : > { %2052 = vst [vmem:[%s3681_s5 + $0x50] sm:$0xff] %v2051_v39  ;;  %v2083_v55 = vld [vmem:[%s3310_s25 + $0xa8] sm:$0xff]  ;;  %v2085_v56 = vld [vmem:[%s3310_s25 + $0xb0] sm:$0xff]  ;;  %v2087_v57 = vld [vmem:[%s3310_s25 + $0xb8] sm:$0xff] }
 0x2b6   : > { %2054 = vst [vmem:[%s3681_s5 + $0x60] sm:$0xff] %v2053_v40  ;;  %v2089_v58 = vld [vmem:[%s3310_s25 + $0xc0] sm:$0xff]  ;;  %v2091_v59 = vld [vmem:[%s3310_s25 + $0xc8] sm:$0xff]  ;;  %v2093_v60 = vld [vmem:[%s3310_s25 + $0xd0] sm:$0xff] }
 0x2b7   : > { %2056 = vst [vmem:[%s3681_s5 + $0x70] sm:$0xff] %v2055_v41  ;;  %v2095_v61 = vld [vmem:[%s3310_s25 + $0xd8] sm:$0xff]  ;;  %v2097_v62 = vld [vmem:[%s3310_s25 + $0xe0] sm:$0xff]  ;;  %v2099_v63 = vld [vmem:[%s3310_s25 + $0xe8] sm:$0xff] }
 0x2b8   : > { %2058 = vst [vmem:[%s3681_s5 + $0x80] sm:$0xff] %v2057_v42  ;;  %v2101_v0 = vld [vmem:[%s3310_s25 + $0xf0] sm:$0xff]  ;;  %v2103_v1 = vld [vmem:[%s3310_s25 + $0xf8] sm:$0xff] }
 0x2b9   : > { %2060 = vst [vmem:[%s3681_s5 + $0x90] sm:$0xff] %v2059_v43 }
 0x2ba   : > { %2062 = vst [vmem:[%s3681_s5 + $0xa0] sm:$0xff] %v2061_v44 }
 0x2bb   : > { %2064 = vst [vmem:[%s3681_s5 + $0xb0] sm:$0xff] %v2063_v45 }
 0x2bc   : > { %2066 = vst [vmem:[%s3681_s5 + $0xc0] sm:$0xff] %v2065_v46 }
 0x2bd   : > { %2068 = vst [vmem:[%s3681_s5 + $0xd0] sm:$0xff] %v2067_v47 }
 0x2be   : > { %2070 = vst [vmem:[%s3681_s5 + $0xe0] sm:$0xff] %v2069_v48 }
 0x2bf   : > { %2072 = vst [vmem:[%s3681_s5 + $0xf0] sm:$0xff] %v2071_v49 }
 0x2c0   : > { %2074 = vst [vmem:[%s3681_s5 + $0x100] sm:$0xff] %v2073_v50 }
 0x2c1   : > { %2076 = vst [vmem:[%s3681_s5 + $0x110] sm:$0xff] %v2075_v51 }
 0x2c2   : > { %2078 = vst [vmem:[%s3681_s5 + $0x120] sm:$0xff] %v2077_v52 }
 0x2c3   : > { %2080 = vst [vmem:[%s3681_s5 + $0x130] sm:$0xff] %v2079_v53 }
 0x2c4   : > { %2082 = vst [vmem:[%s3681_s5 + $0x140] sm:$0xff] %v2081_v54 }
 0x2c5   : > { %2084 = vst [vmem:[%s3681_s5 + $0x150] sm:$0xff] %v2083_v55 }
 0x2c6   : > { %2086 = vst [vmem:[%s3681_s5 + $0x160] sm:$0xff] %v2085_v56 }
 0x2c7   : > { %2088 = vst [vmem:[%s3681_s5 + $0x170] sm:$0xff] %v2087_v57 }
 0x2c8   : > { %2090 = vst [vmem:[%s3681_s5 + $0x180] sm:$0xff] %v2089_v58 }
 0x2c9   : > { %2092 = vst [vmem:[%s3681_s5 + $0x190] sm:$0xff] %v2091_v59 }
 0x2ca   : > { %2094 = vst [vmem:[%s3681_s5 + $0x1a0] sm:$0xff] %v2093_v60 }
 0x2cb   : > { %2096 = vst [vmem:[%s3681_s5 + $0x1b0] sm:$0xff] %v2095_v61 }
 0x2cc   : > { %2098 = vst [vmem:[%s3681_s5 + $0x1c0] sm:$0xff] %v2097_v62 }
 0x2cd   : > { %2100 = vst [vmem:[%s3681_s5 + $0x1d0] sm:$0xff] %v2099_v63 }
 0x2ce   : > { %2102 = vst [vmem:[%s3681_s5 + $0x1e0] sm:$0xff] %v2101_v0 }
 0x2cf   : > { %2104 = vst [vmem:[%s3681_s5 + $0x1f0] sm:$0xff] %v2103_v1 }
 0x2d0 PF: > { %s13_s22 = sadd.s32 1, %s2892_s22   ;;  %s3791_s10 = sld [smem:[#allocation5_spill]] }
 0x2d1   : > { %p10_p6 = scmp.ge.s32.totalorder %s13_s22, 16   ;;  %s3792_s12 = smov %s2856_s13 }
 0x2d2   : > { %s3793_s13 = smov %s3007_s9  ;;  %s3794_s14 = smov %s2864_s15 }
 0x2d3   : > { %s3795_s15 = smov %s3004_s8  ;;  %s3796_s16 = smov %s2872_s17 }
 0x2d4   : > { %s3797_s17 = smov %s2990_s30  ;;  %s3798_s18 = smov %s2884_s20 }
 0x2d5   : > { %s3799_s19 = smov %s2888_s21  ;;  %s3800_s20 = smov %s3803_s24 }
 0x2d6   : > { %s3801_s21 = smov %s3791_s10  ;;  %12 = sbr.rel (!%p10_p6) target bundleno = 9 (0x9), region = 188 }

// kernel: _siamese_forward.10
= control target key start
LH: loop header
LB: loop body
LE: loop exit
PB: predicated region body
PF: predicated region fallthrough
CT: control target
= control target key end

     0   :  { %s2315_s0 = inlined_call_operand.vmem [shape: bf16[16,2560], index: 0, kind: input, shape index: {}]   ;;  %s2316_s1 = inlined_call_operand.vmem [shape: bf16[2560,1024], index: 1, kind: input, shape index: {}]   ;;  %s2317_s2 = inlined_call_operand.vmem [shape: f32[1,1024], index: 2, kind: input, shape index: {}]   ;;  %s2318_s3 = inlined_call_operand.vmem [shape: f32[16,1024], index: 3, kind: output, shape index: {}]  }
   0x1   :  { %2320 = sst [smem:[#allocation6_spill]] %s2315_s0 }
   0x2   :  { %2321 = sst [smem:[#allocation7_spill]] %s2316_s1 }
   0x3   :  { %s1829_s12 = smov 0   ;;  %s1831_s13 = smov 0  }
   0x4   :  { %s1833_s14 = smov 0   ;;  %s1835_s15 = smov 0  }
   0x5   :  { %s1837_s16 = smov 0   ;;  %s1839_s17 = smov 0  }
   0x6   :  { %s1841_s18 = smov 0   ;;  %s1843_s19 = smov 0  }
   0x7   :  { %s1845_s20 = smov 0   ;;  %s1847_s21 = smov 0  }
   0x8   :  { %s1849_s22 = smov 0  }
   0x9 LB: > { %s1264_s23 = sadd.s32 4294967295, %s1806_s22   ;;  %s25_s24 = sadd.s32 1, %s1798_s20  ;;  %s1806_s22 = sphi %s1849_s22, %s13_s22   ;;  %s1802_s21 = sphi %s1847_s21, %s2338_s21   ;;  %s1798_s20 = sphi %s1845_s20, %s2337_s20   ;;  %s1794_s19 = sphi %s1843_s19, %s2336_s19   ;;  %s1790_s18 = sphi %s1841_s18, %s2335_s18   ;;  %s1786_s17 = sphi %s1839_s17, %s2334_s17   ;;  %s1782_s16 = sphi %s1837_s16, %s2333_s16   ;;  %s1778_s15 = sphi %s1835_s15, %s2332_s15   ;;  %s1774_s14 = sphi %s1833_s14, %s2331_s14   ;;  %s1770_s13 = sphi %s1831_s13, %s2330_s13   ;;  %s1766_s12 = sphi %s1829_s12, %s2329_s12  }
   0xa   : > { %p26_p0 = scmp.ge.s32.totalorder %s25_s24, 5  ;;  %s28_s25 = sadd.s32 1, %s1802_s21 }
   0xb   : > { %s41_s26 = sadd.s32 1, %s1786_s17  ;;  %p48_p1 = scmp.ne.s32.totalorder %s1786_s17, %s1782_s16 }
   0xc   : > { %s2340_s24 = smov (%p26_p0, %s25_s24), 0  ;;  %s2342_s25 = smov (!%p26_p0, %s28_s25), %s1802_s21 }
   0xd   : > { %s37_s27 = ssub.s32 %s1798_s20, %s2340_s24  ;;  %p49_p2 = scmp.eq.s32.totalorder %s1806_s22, 0 }
   0xe   : > { %p30_p3 = scmp.ge.s32.totalorder %s2342_s25, 4  ;;  %p39_p4 = scmp.eq.s32.totalorder %s37_s27, 0 }
   0xf   : > { %p1896_p5 = por %p49_p2, %p48_p1  ;;  %s69_s29 = sadd.s32 1, %s1778_s15 }
  0x10   : > { %s2344_s25 = smov (%p30_p3, %s2342_s25), 0  ;;  %p76_p6 = scmp.ne.s32.totalorder %s1778_s15, %s1774_s14 }
  0x11   : > { %2323 = sst [smem:[#allocation5_spill]] %s2344_s25  ;;  %s65_s4 = ssub.s32 %s1802_s21, %s2344_s25 }
  0x12   : > { %s1904_s30 = scalar_select %p39_p4, %s1786_s17, %s41_s26  }
  0x13   : > { %s66_s5 = sor.u32 %s65_s4, %s37_s27  ;;  %p121_p7 = scmp.eq.s32.totalorder %s65_s4, 0 }
  0x14   : > { %p67_p8 = scmp.eq.s32.totalorder %s66_s5, 0  ;;  %p1910_p9 = por %p76_p6, %p49_p2 }
  0x15   : > { %s123_s7 = sadd.s32 1, %s1770_s13  ;;  %p133_p10 = scmp.ne.s32.totalorder %s1770_s13, %s1766_s12 }
  0x16   : > { %s1918_s8 = scalar_select %p67_p8, %s1778_s15, %s69_s29  }
  0x17   : > { %s1921_s9 = scalar_select %p121_p7, %s1770_s13, %s123_s7  }
  0x18   : > { %p134_p11 = scmp.eq.s32.totalorder %s1264_s23, 19  ;;  %p1267_p13 = scmp.ge.s32.totalorder %s1806_s22, 20 }
  0x1a   : > { %p1923_p12 = por %p134_p11, %p133_p10  ;;  %156 = sbr.rel (%p1267_p13) target bundleno = 119 (0x77), region = 16 }
  0x1f   : > { %159 = sbr.rel (!%p1896_p5) target bundleno = 45 (0x2d), region = 20  ;;  %s161_s11 = sand.u32 (%p1896_p5), 1, %s1786_s17  }
  0x20   : > { %s1560_s26 = sshll.u32 (%p1896_p5), %s1798_s20, 4  ;;  %s1268_s27 = sshll.u32 (%p1896_p5), %s161_s11, 5 }
  0x21   : > { %s2326_s0 = sld [smem:[#allocation6_spill]] (%p1896_p5)  ;;  %s163_s23 = scalar_lea.vmem (%p1896_p5), [#allocation2], %s1268_s27 }
  0x27   : > { %s169_s5 = scalar_lea.vmem %s2326_s0, %s1560_s26 }
  0x28   : > { %v182_v0 = vld [vmem:[%s169_s5] sm:$0xff]  ;;  %v184_v1 = vld [vmem:[%s169_s5 + $0x8] sm:$0xff]  ;;  %v186_v2 = vld [vmem:[%s169_s5 + $0x50] sm:$0xff] }
  0x29   : > { %183 = vst [vmem:[%s163_s23] sm:$0xff] %v182_v0  ;;  %v188_v3 = vld [vmem:[%s169_s5 + $0x58] sm:$0xff] }
  0x2a   : > { %185 = vst [vmem:[%s163_s23 + $0x8] sm:$0xff] %v184_v1 }
  0x2b   : > { %187 = vst [vmem:[%s163_s23 + $0x10] sm:$0xff] %v186_v2 }
  0x2c   : > { %189 = vst [vmem:[%s163_s23 + $0x18] sm:$0xff] %v188_v3 }
  0x2d PF: > { %195 = sbr.rel (!%p1910_p9) target bundleno = 119 (0x77), region = 43  ;;  %s197_s28 = sand.u32 (%p1910_p9), 1, %s1778_s15  }
  0x2e   : > { %s1273_s7 = sshll.u32 (%p1910_p9), %s1802_s21, 1  ;;  %s1271_s11 = sshll.u32 (%p1910_p9), %s197_s28, 9 }
  0x2f   : > { %s1561_s26 = sshll.u32 (%p1910_p9), %s1798_s20, 9  ;;  %s2327_s1 = sld [smem:[#allocation7_spill]] (%p1910_p9) }
  0x30   : > { %s203_s29 = sadd.s32 (%p1910_p9), %s1561_s26, %s1273_s7  ;;  %s1948_s6 = scalar_lea.vmem (%p1910_p9), [#allocation3], %s1271_s11 }
  0x31   : > { %s1275_s4 = sshll.u32 (%p1910_p9), %s203_s29, 2 }
  0x35   : > { %s1943_s5 = scalar_lea.vmem %s2327_s1, %s1275_s4 }
  0x36   : > { %v360_v4 = vld [vmem:[%s1943_s5] sm:$0xff] }
  0x37   : > { %v362_v5 = vld [vmem:[%s1943_s5 + $0x20] sm:$0xff]  ;;  %361 = vst [vmem:[%s1948_s6] sm:$0xff] %v360_v4 }
  0x38   : > { %v364_v6 = vld [vmem:[%s1943_s5 + $0x40] sm:$0xff]  ;;  %363 = vst [vmem:[%s1948_s6 + $0x8] sm:$0xff] %v362_v5 }
  0x39   : > { %v366_v7 = vld [vmem:[%s1943_s5 + $0x60] sm:$0xff]  ;;  %365 = vst [vmem:[%s1948_s6 + $0x10] sm:$0xff] %v364_v6 }
  0x3a   : > { %v368_v8 = vld [vmem:[%s1943_s5 + $0x80] sm:$0xff]  ;;  %367 = vst [vmem:[%s1948_s6 + $0x18] sm:$0xff] %v366_v7 }
  0x3b   : > { %v370_v9 = vld [vmem:[%s1943_s5 + $0xa0] sm:$0xff]  ;;  %369 = vst [vmem:[%s1948_s6 + $0x20] sm:$0xff] %v368_v8 }
  0x3c   : > { %v372_v10 = vld [vmem:[%s1943_s5 + $0xc0] sm:$0xff]  ;;  %371 = vst [vmem:[%s1948_s6 + $0x28] sm:$0xff] %v370_v9 }
  0x3d   : > { %v374_v11 = vld [vmem:[%s1943_s5 + $0xe0] sm:$0xff]  ;;  %373 = vst [vmem:[%s1948_s6 + $0x30] sm:$0xff] %v372_v10 }
  0x3e   : > { %v376_v12 = vld [vmem:[%s1943_s5 + $0x100] sm:$0xff]  ;;  %375 = vst [vmem:[%s1948_s6 + $0x38] sm:$0xff] %v374_v11 }
  0x3f   : > { %v378_v13 = vld [vmem:[%s1943_s5 + $0x120] sm:$0xff]  ;;  %377 = vst [vmem:[%s1948_s6 + $0x40] sm:$0xff] %v376_v12 }
  0x40   : > { %v380_v14 = vld [vmem:[%s1943_s5 + $0x140] sm:$0xff]  ;;  %379 = vst [vmem:[%s1948_s6 + $0x48] sm:$0xff] %v378_v13 }
  0x41   : > { %v382_v15 = vld [vmem:[%s1943_s5 + $0x160] sm:$0xff]  ;;  %381 = vst [vmem:[%s1948_s6 + $0x50] sm:$0xff] %v380_v14 }
  0x42   : > { %v384_v16 = vld [vmem:[%s1943_s5 + $0x180] sm:$0xff]  ;;  %383 = vst [vmem:[%s1948_s6 + $0x58] sm:$0xff] %v382_v15 }
  0x43   : > { %v386_v17 = vld [vmem:[%s1943_s5 + $0x1a0] sm:$0xff]  ;;  %385 = vst [vmem:[%s1948_s6 + $0x60] sm:$0xff] %v384_v16 }
  0x44   : > { %v388_v18 = vld [vmem:[%s1943_s5 + $0x1c0] sm:$0xff]  ;;  %387 = vst [vmem:[%s1948_s6 + $0x68] sm:$0xff] %v386_v17 }
  0x45   : > { %v390_v19 = vld [vmem:[%s1943_s5 + $0x1e0] sm:$0xff]  ;;  %389 = vst [vmem:[%s1948_s6 + $0x70] sm:$0xff] %v388_v18 }
  0x46   : > { %v392_v20 = vld [vmem:[%s1943_s5 + $0x200] sm:$0xff]  ;;  %391 = vst [vmem:[%s1948_s6 + $0x78] sm:$0xff] %v390_v19 }
  0x47   : > { %v394_v21 = vld [vmem:[%s1943_s5 + $0x220] sm:$0xff]  ;;  %393 = vst [vmem:[%s1948_s6 + $0x80] sm:$0xff] %v392_v20 }
  0x48   : > { %v396_v22 = vld [vmem:[%s1943_s5 + $0x240] sm:$0xff]  ;;  %395 = vst [vmem:[%s1948_s6 + $0x88] sm:$0xff] %v394_v21 }
  0x49   : > { %v398_v23 = vld [vmem:[%s1943_s5 + $0x260] sm:$0xff]  ;;  %397 = vst [vmem:[%s1948_s6 + $0x90] sm:$0xff] %v396_v22 }
  0x4a   : > { %v400_v24 = vld [vmem:[%s1943_s5 + $0x280] sm:$0xff]  ;;  %399 = vst [vmem:[%s1948_s6 + $0x98] sm:$0xff] %v398_v23 }
  0x4b   : > { %v402_v25 = vld [vmem:[%s1943_s5 + $0x2a0] sm:$0xff]  ;;  %401 = vst [vmem:[%s1948_s6 + $0xa0] sm:$0xff] %v400_v24 }
  0x4c   : > { %v404_v26 = vld [vmem:[%s1943_s5 + $0x2c0] sm:$0xff]  ;;  %403 = vst [vmem:[%s1948_s6 + $0xa8] sm:$0xff] %v402_v25 }
  0x4d   : > { %v406_v27 = vld [vmem:[%s1943_s5 + $0x2e0] sm:$0xff]  ;;  %405 = vst [vmem:[%s1948_s6 + $0xb0] sm:$0xff] %v404_v26 }
  0x4e   : > { %v408_v28 = vld [vmem:[%s1943_s5 + $0x300] sm:$0xff]  ;;  %407 = vst [vmem:[%s1948_s6 + $0xb8] sm:$0xff] %v406_v27 }
  0x4f   : > { %v410_v29 = vld [vmem:[%s1943_s5 + $0x320] sm:$0xff]  ;;  %409 = vst [vmem:[%s1948_s6 + $0xc0] sm:$0xff] %v408_v28 }
  0x50   : > { %v412_v30 = vld [vmem:[%s1943_s5 + $0x340] sm:$0xff]  ;;  %411 = vst [vmem:[%s1948_s6 + $0xc8] sm:$0xff] %v410_v29 }
  0x51   : > { %v414_v31 = vld [vmem:[%s1943_s5 + $0x360] sm:$0xff]  ;;  %413 = vst [vmem:[%s1948_s6 + $0xd0] sm:$0xff] %v412_v30 }
  0x52   : > { %v416_v32 = vld [vmem:[%s1943_s5 + $0x380] sm:$0xff]  ;;  %415 = vst [vmem:[%s1948_s6 + $0xd8] sm:$0xff] %v414_v31 }
  0x53   : > { %v418_v33 = vld [vmem:[%s1943_s5 + $0x3a0] sm:$0xff]  ;;  %417 = vst [vmem:[%s1948_s6 + $0xe0] sm:$0xff] %v416_v32 }
  0x54   : > { %v420_v34 = vld [vmem:[%s1943_s5 + $0x3c0] sm:$0xff]  ;;  %419 = vst [vmem:[%s1948_s6 + $0xe8] sm:$0xff] %v418_v33 }
  0x55   : > { %v422_v35 = vld [vmem:[%s1943_s5 + $0x3e0] sm:$0xff]  ;;  %421 = vst [vmem:[%s1948_s6 + $0xf0] sm:$0xff] %v420_v34 }
  0x56   : > { %v424_v36 = vld [vmem:[%s1943_s5 + $0x400] sm:$0xff]  ;;  %423 = vst [vmem:[%s1948_s6 + $0xf8] sm:$0xff] %v422_v35 }
  0x57   : > { %v426_v37 = vld [vmem:[%s1943_s5 + $0x420] sm:$0xff]  ;;  %425 = vst [vmem:[%s1948_s6 + $0x100] sm:$0xff] %v424_v36 }
  0x58   : > { %v428_v38 = vld [vmem:[%s1943_s5 + $0x440] sm:$0xff]  ;;  %427 = vst [vmem:[%s1948_s6 + $0x108] sm:$0xff] %v426_v37 }
  0x59   : > { %v430_v39 = vld [vmem:[%s1943_s5 + $0x460] sm:$0xff]  ;;  %429 = vst [vmem:[%s1948_s6 + $0x110] sm:$0xff] %v428_v38 }
  0x5a   : > { %v432_v40 = vld [vmem:[%s1943_s5 + $0x480] sm:$0xff]  ;;  %431 = vst [vmem:[%s1948_s6 + $0x118] sm:$0xff] %v430_v39 }
  0x5b   : > { %v434_v41 = vld [vmem:[%s1943_s5 + $0x4a0] sm:$0xff]  ;;  %433 = vst [vmem:[%s1948_s6 + $0x120] sm:$0xff] %v432_v40 }
  0x5c   : > { %v436_v42 = vld [vmem:[%s1943_s5 + $0x4c0] sm:$0xff]  ;;  %435 = vst [vmem:[%s1948_s6 + $0x128] sm:$0xff] %v434_v41 }
  0x5d   : > { %v438_v43 = vld [vmem:[%s1943_s5 + $0x4e0] sm:$0xff]  ;;  %437 = vst [vmem:[%s1948_s6 + $0x130] sm:$0xff] %v436_v42 }
  0x5e   : > { %v440_v44 = vld [vmem:[%s1943_s5 + $0x500] sm:$0xff]  ;;  %439 = vst [vmem:[%s1948_s6 + $0x138] sm:$0xff] %v438_v43 }
  0x5f   : > { %v442_v45 = vld [vmem:[%s1943_s5 + $0x520] sm:$0xff]  ;;  %441 = vst [vmem:[%s1948_s6 + $0x140] sm:$0xff] %v440_v44 }
  0x60   : > { %v444_v46 = vld [vmem:[%s1943_s5 + $0x540] sm:$0xff]  ;;  %443 = vst [vmem:[%s1948_s6 + $0x148] sm:$0xff] %v442_v45 }
  0x61   : > { %v446_v47 = vld [vmem:[%s1943_s5 + $0x560] sm:$0xff]  ;;  %445 = vst [vmem:[%s1948_s6 + $0x150] sm:$0xff] %v444_v46 }
  0x62   : > { %v448_v48 = vld [vmem:[%s1943_s5 + $0x580] sm:$0xff]  ;;  %447 = vst [vmem:[%s1948_s6 + $0x158] sm:$0xff] %v446_v47 }
  0x63   : > { %v450_v49 = vld [vmem:[%s1943_s5 + $0x5a0] sm:$0xff]  ;;  %449 = vst [vmem:[%s1948_s6 + $0x160] sm:$0xff] %v448_v48 }
  0x64   : > { %v452_v50 = vld [vmem:[%s1943_s5 + $0x5c0] sm:$0xff]  ;;  %451 = vst [vmem:[%s1948_s6 + $0x168] sm:$0xff] %v450_v49 }
  0x65   : > { %v454_v51 = vld [vmem:[%s1943_s5 + $0x5e0] sm:$0xff]  ;;  %453 = vst [vmem:[%s1948_s6 + $0x170] sm:$0xff] %v452_v50 }
  0x66   : > { %v456_v52 = vld [vmem:[%s1943_s5 + $0x600] sm:$0xff]  ;;  %455 = vst [vmem:[%s1948_s6 + $0x178] sm:$0xff] %v454_v51 }
  0x67   : > { %v458_v53 = vld [vmem:[%s1943_s5 + $0x620] sm:$0xff]  ;;  %457 = vst [vmem:[%s1948_s6 + $0x180] sm:$0xff] %v456_v52 }
  0x68   : > { %v460_v54 = vld [vmem:[%s1943_s5 + $0x640] sm:$0xff]  ;;  %459 = vst [vmem:[%s1948_s6 + $0x188] sm:$0xff] %v458_v53 }
  0x69   : > { %v462_v55 = vld [vmem:[%s1943_s5 + $0x660] sm:$0xff]  ;;  %461 = vst [vmem:[%s1948_s6 + $0x190] sm:$0xff] %v460_v54 }
  0x6a   : > { %v464_v56 = vld [vmem:[%s1943_s5 + $0x680] sm:$0xff]  ;;  %463 = vst [vmem:[%s1948_s6 + $0x198] sm:$0xff] %v462_v55 }
  0x6b   : > { %v466_v57 = vld [vmem:[%s1943_s5 + $0x6a0] sm:$0xff]  ;;  %465 = vst [vmem:[%s1948_s6 + $0x1a0] sm:$0xff] %v464_v56 }
  0x6c   : > { %v468_v58 = vld [vmem:[%s1943_s5 + $0x6c0] sm:$0xff]  ;;  %467 = vst [vmem:[%s1948_s6 + $0x1a8] sm:$0xff] %v466_v57 }
  0x6d   : > { %v470_v59 = vld [vmem:[%s1943_s5 + $0x6e0] sm:$0xff]  ;;  %469 = vst [vmem:[%s1948_s6 + $0x1b0] sm:$0xff] %v468_v58 }
  0x6e   : > { %v472_v60 = vld [vmem:[%s1943_s5 + $0x700] sm:$0xff]  ;;  %471 = vst [vmem:[%s1948_s6 + $0x1b8] sm:$0xff] %v470_v59 }
  0x6f   : > { %v474_v61 = vld [vmem:[%s1943_s5 + $0x720] sm:$0xff]  ;;  %473 = vst [vmem:[%s1948_s6 + $0x1c0] sm:$0xff] %v472_v60 }
  0x70   : > { %v476_v62 = vld [vmem:[%s1943_s5 + $0x740] sm:$0xff]  ;;  %475 = vst [vmem:[%s1948_s6 + $0x1c8] sm:$0xff] %v474_v61 }
  0x71   : > { %v478_v63 = vld [vmem:[%s1943_s5 + $0x760] sm:$0xff]  ;;  %477 = vst [vmem:[%s1948_s6 + $0x1d0] sm:$0xff] %v476_v62 }
  0x72   : > { %v480_v0 = vld [vmem:[%s1943_s5 + $0x780] sm:$0xff]  ;;  %479 = vst [vmem:[%s1948_s6 + $0x1d8] sm:$0xff] %v478_v63 }
  0x73   : > { %v482_v1 = vld [vmem:[%s1943_s5 + $0x7a0] sm:$0xff]  ;;  %481 = vst [vmem:[%s1948_s6 + $0x1e0] sm:$0xff] %v480_v0 }
  0x74   : > { %v484_v2 = vld [vmem:[%s1943_s5 + $0x7c0] sm:$0xff]  ;;  %483 = vst [vmem:[%s1948_s6 + $0x1e8] sm:$0xff] %v482_v1 }
  0x75   : > { %v486_v3 = vld [vmem:[%s1943_s5 + $0x7e0] sm:$0xff]  ;;  %485 = vst [vmem:[%s1948_s6 + $0x1f0] sm:$0xff] %v484_v2 }
  0x76   : > { %487 = vst [vmem:[%s1948_s6 + $0x1f8] sm:$0xff] %v486_v3 }
  0x77 PF: > { %p1276_p0 = scmp.ge.s32.totalorder %s1806_s22, 1  ;;  %p500_p1 = scmp.lt.s32.totalorder %s1806_s22, 21 }
  0x79   : > { %p501_p2 = pnand %p1276_p0, %p500_p1 }
  0x7a   : > { %s507_s0 = sand.u32 (!%p501_p2), 1, %s1782_s16   ;;  %s514_s23 = sand.u32 (!%p501_p2), 1, %s1774_s14  }
  0x7b   : > { %504 = sbr.rel (%p501_p2) target bundleno = 375 (0x177), region = 85  ;;  %s1277_s28 = sshll.u32 (!%p501_p2), %s507_s0, 5 }
  0x7c   : > { %s1278_s7 = sshll.u32 (!%p501_p2), %s514_s23, 9  ;;  %s541_s11 = sand.u32 (!%p501_p2), 1, %s1766_s12  }
  0x7d   : > { %s1280_s26 = sshll.u32 (!%p501_p2), %s1794_s19, 1  ;;  %s1279_s29 = sshll.u32 (!%p501_p2), %s541_s11, 5 }
  0x7e   : > { %p549_p3 = scmp.lt.s32.totalorder (!%p501_p2), %s1280_s26, 7  ;;  %s2087_s6 = scalar_lea.vmem (!%p501_p2), [#allocation2], %s1277_s28 }
  0x7f   : > { %s2089_s1 = scalar_lea.vmem (!%p501_p2), [#allocation3], %s1278_s7  ;;  %s2091_s25 = scalar_lea.vmem (!%p501_p2), [#allocation4], %s1279_s29 }
  0x80   : > { %s2346_s26 = smov (!%p549_p3, %s1280_s26), 7  ;;  %p1281_p4 = scmp.ne.s32.totalorder %s1790_s18, 0 }
  0x81   : > { %s551_s5 = scalar_lea.vmem %s2317_s2, %s2346_s26 }
  0x82   : > { %558 = sbr.rel (%p1281_p4) target bundleno = 140 (0x8c), region = 97 }
  0x87   : > { %v1808_v4 = vmov 0.0  }
  0x88   : > { %559 = vst [vmem:[%s2091_s25] sm:$0xff] %v1808_v4 }
  0x89   : > { %560 = vst [vmem:[%s2091_s25 + $0x8] sm:$0xff] %v1808_v4 }
  0x8a   : > { %561 = vst [vmem:[%s2091_s25 + $0x10] sm:$0xff] %v1808_v4 }
  0x8b   : > { %562 = vst [vmem:[%s2091_s25 + $0x18] sm:$0xff] %v1808_v4 }
  0x8c PF: > { %v1356_v5 = vld [vmem:[%s2089_s1 + $0x70] sm:$0xf]  ;;  %v1581_v6 = vld [vmem:[%s2089_s1 + $0x74] sm:$0xf0]  ;;  %v1348_v16 = vld [vmem:[%s2089_s1 + $0x60] sm:$0xf] }
  0x8d   : > { %v1420_v7 = vld [vmem:[%s2089_s1 + $0xf0] sm:$0xf]  ;;  %v1357_v8 = vor.u32 %v1581_v6, %v1356_v5  ;;  %v1597_v9 = vld [vmem:[%s2089_s1 + $0xf4] sm:$0xf0]  ;;  %v1579_v18 = vld [vmem:[%s2089_s1 + $0x64] sm:$0xf0] }
  0x8e   : > { %v1484_v10 = vld [vmem:[%s2089_s1 + $0x170] sm:$0xf]  ;;  %v1613_v11 = vld [vmem:[%s2089_s1 + $0x174] sm:$0xf0]  ;;  %v1421_v12 = vor.u32 %v1597_v9, %v1420_v7  ;;  %v1412_v19 = vld [vmem:[%s2089_s1 + $0xe0] sm:$0xf]  ;;  %v1349_v21 = vor.u32 %v1579_v18, %v1348_v16 }
  0x8f   : > { %v1485_v13 = vor.u32 %v1613_v11, %v1484_v10  ;;  %v1548_v14 = vld [vmem:[%s2089_s1 + $0x1f0] sm:$0xf]  ;;  %v1629_v15 = vld [vmem:[%s2089_s1 + $0x1f4] sm:$0xf0]  ;;  %975 = vmatpush.bf16.msra.mxu0 %v1357_v8  ;;  %v1595_v20 = vld [vmem:[%s2089_s1 + $0xe4] sm:$0xf0] }
  0x90   : > { %v1549_v17 = vor.u32 %v1629_v15, %v1548_v14  ;;  %989 = vmatpush.bf16.msra.mxu1 %v1421_v12  ;;  %v1413_v22 = vor.u32 %v1595_v20, %v1412_v19  ;;  %v1476_v23 = vld [vmem:[%s2089_s1 + $0x160] sm:$0xf]  ;;  %v1611_v24 = vld [vmem:[%s2089_s1 + $0x164] sm:$0xf0]  ;;  %v1340_v28 = vld [vmem:[%s2089_s1 + $0x50] sm:$0xf] }
  0x91   : > { %1003 = vmatpush.bf16.msra.mxu2 %v1485_v13  ;;  %v1540_v25 = vld [vmem:[%s2089_s1 + $0x1e0] sm:$0xf]  ;;  %v1477_v26 = vor.u32 %v1611_v24, %v1476_v23  ;;  %v1627_v27 = vld [vmem:[%s2089_s1 + $0x1e4] sm:$0xf0]  ;;  %v1577_v29 = vld [vmem:[%s2089_s1 + $0x54] sm:$0xf0] }
  0x92   : > { %1017 = vmatpush.bf16.msra.mxu3 %v1549_v17  ;;  %v1541_v30 = vor.u32 %v1627_v27, %v1540_v25  ;;  %v1404_v31 = vld [vmem:[%s2089_s1 + $0xd0] sm:$0xf]  ;;  %v1593_v32 = vld [vmem:[%s2089_s1 + $0xd4] sm:$0xf0]  ;;  %v1341_v34 = vor.u32 %v1577_v29, %v1340_v28  ;;  %v1332_v40 = vld [vmem:[%s2089_s1 + $0x40] sm:$0xf] }
  0x93   : > { %v1468_v33 = vld [vmem:[%s2089_s1 + $0x150] sm:$0xf]  ;;  %976 = vmatpush.bf16.msra.mxu0 %v1349_v21  ;;  %v1609_v35 = vld [vmem:[%s2089_s1 + $0x154] sm:$0xf0]  ;;  %v1405_v38 = vor.u32 %v1593_v32, %v1404_v31  ;;  %v1575_v41 = vld [vmem:[%s2089_s1 + $0x44] sm:$0xf0] }
  0x94   : > { %v1532_v36 = vld [vmem:[%s2089_s1 + $0x1d0] sm:$0xf]  ;;  %v1625_v37 = vld [vmem:[%s2089_s1 + $0x1d4] sm:$0xf0]  ;;  %990 = vmatpush.bf16.msra.mxu1 %v1413_v22  ;;  %v1469_v39 = vor.u32 %v1609_v35, %v1468_v33  ;;  %v1396_v42 = vld [vmem:[%s2089_s1 + $0xc0] sm:$0xf]  ;;  %v1333_v49 = vor.u32 %v1575_v41, %v1332_v40 }
  0x95   : > { %1004 = vmatpush.bf16.msra.mxu2 %v1477_v26  ;;  %v1533_v43 = vor.u32 %v1625_v37, %v1532_v36  ;;  %v1591_v44 = vld [vmem:[%s2089_s1 + $0xc4] sm:$0xf0]  ;;  %v1460_v45 = vld [vmem:[%s2089_s1 + $0x140] sm:$0xf]  ;;  %v1324_v52 = vld [vmem:[%s2089_s1 + $0x30] sm:$0xf] }
  0x96   : > { %1018 = vmatpush.bf16.msra.mxu3 %v1541_v30  ;;  %v1607_v46 = vld [vmem:[%s2089_s1 + $0x144] sm:$0xf0]  ;;  %v1524_v47 = vld [vmem:[%s2089_s1 + $0x1c0] sm:$0xf]  ;;  %v1397_v50 = vor.u32 %v1591_v44, %v1396_v42  ;;  %v1573_v53 = vld [vmem:[%s2089_s1 + $0x34] sm:$0xf0] }
  0x97   : > { %v1623_v48 = vld [vmem:[%s2089_s1 + $0x1c4] sm:$0xf0]  ;;  %977 = vmatpush.bf16.msra.mxu0 %v1341_v34  ;;  %v1461_v51 = vor.u32 %v1607_v46, %v1460_v45  ;;  %v1388_v54 = vld [vmem:[%s2089_s1 + $0xb0] sm:$0xf]  ;;  %v1589_v56 = vld [vmem:[%s2089_s1 + $0xb4] sm:$0xf0]  ;;  %v1325_v61 = vor.u32 %v1573_v53, %v1324_v52 }
  0x98   : > { %991 = vmatpush.bf16.msra.mxu1 %v1405_v38  ;;  %v1525_v55 = vor.u32 %v1623_v48, %v1524_v47  ;;  %v1452_v57 = vld [vmem:[%s2089_s1 + $0x130] sm:$0xf]  ;;  %v1605_v58 = vld [vmem:[%s2089_s1 + $0x134] sm:$0xf0]  ;;  %v1389_v62 = vor.u32 %v1589_v56, %v1388_v54  ;;  %v1316_v0 = vld [vmem:[%s2089_s1 + $0x20] sm:$0xf] }
  0x99   : > { %1005 = vmatpush.bf16.msra.mxu2 %v1469_v39  ;;  %v1516_v59 = vld [vmem:[%s2089_s1 + $0x1b0] sm:$0xf]  ;;  %v1621_v60 = vld [vmem:[%s2089_s1 + $0x1b4] sm:$0xf0]  ;;  %v1453_v63 = vor.u32 %v1605_v58, %v1452_v57  ;;  %v1571_v1 = vld [vmem:[%s2089_s1 + $0x24] sm:$0xf0] }
  0x9a   : > { %1019 = vmatpush.bf16.msra.mxu3 %v1533_v43  ;;  %v1380_v2 = vld [vmem:[%s2089_s1 + $0xa0] sm:$0xf]  ;;  %v1517_v3 = vor.u32 %v1621_v60, %v1516_v59  ;;  %v1587_v4 = vld [vmem:[%s2089_s1 + $0xa4] sm:$0xf0]  ;;  %v1317_v9 = vor.u32 %v1571_v1, %v1316_v0  ;;  %v1308_v12 = vld [vmem:[%s2089_s1 + $0x10] sm:$0xf] }
  0x9b   : > { %978 = vmatpush.bf16.msra.mxu0 %v1333_v49  ;;  %v1444_v5 = vld [vmem:[%s2089_s1 + $0x120] sm:$0xf]  ;;  %v1603_v6 = vld [vmem:[%s2089_s1 + $0x124] sm:$0xf0]  ;;  %v1381_v10 = vor.u32 %v1587_v4, %v1380_v2  ;;  %v1569_v13 = vld [vmem:[%s2089_s1 + $0x14] sm:$0xf0] }
  0x9c   : > { %992 = vmatpush.bf16.msra.mxu1 %v1397_v50  ;;  %v1508_v7 = vld [vmem:[%s2089_s1 + $0x1a0] sm:$0xf]  ;;  %v1619_v8 = vld [vmem:[%s2089_s1 + $0x1a4] sm:$0xf0]  ;;  %v1445_v11 = vor.u32 %v1603_v6, %v1444_v5  ;;  %v1372_v14 = vld [vmem:[%s2089_s1 + $0x90] sm:$0xf]  ;;  %v1309_v22 = vor.u32 %v1569_v13, %v1308_v12 }
  0x9d   : > { %1006 = vmatpush.bf16.msra.mxu2 %v1461_v51  ;;  %v1509_v15 = vor.u32 %v1619_v8, %v1508_v7  ;;  %v1585_v16 = vld [vmem:[%s2089_s1 + $0x94] sm:$0xf0]  ;;  %v1436_v17 = vld [vmem:[%s2089_s1 + $0x110] sm:$0xf]  ;;  %v1300_v21 = vld [vmem:[%s2089_s1] sm:$0xf] }
  0x9e   : > { %1020 = vmatpush.bf16.msra.mxu3 %v1525_v55  ;;  %v1601_v18 = vld [vmem:[%s2089_s1 + $0x114] sm:$0xf0]  ;;  %v1500_v19 = vld [vmem:[%s2089_s1 + $0x190] sm:$0xf]  ;;  %v1567_v23 = vld [vmem:[%s2089_s1 + $0x4] sm:$0xf0]  ;;  %v1373_v26 = vor.u32 %v1585_v16, %v1372_v14 }
  0x9f   : > { %979 = vmatpush.bf16.msra.mxu0 %v1325_v61  ;;  %v1617_v20 = vld [vmem:[%s2089_s1 + $0x194] sm:$0xf0]  ;;  %v1364_v24 = vld [vmem:[%s2089_s1 + $0x80] sm:$0xf]  ;;  %v1583_v25 = vld [vmem:[%s2089_s1 + $0x84] sm:$0xf0]  ;;  %v1437_v27 = vor.u32 %v1601_v18, %v1436_v17  ;;  %v1301_v38 = vor.u32 %v1567_v23, %v1300_v21 }
  0xa0   : > { %993 = vmatpush.bf16.msra.mxu1 %v1389_v62  ;;  %v1428_v28 = vld [vmem:[%s2089_s1 + $0x100] sm:$0xf]  ;;  %v1599_v29 = vld [vmem:[%s2089_s1 + $0x104] sm:$0xf0]  ;;  %v1501_v31 = vor.u32 %v1617_v20, %v1500_v19  ;;  %v1580_v33 = vld [vmem:[%s2089_s1 + $0x74] sm:$0xf]  ;;  %v1365_v42 = vor.u32 %v1583_v25, %v1364_v24 }
  0xa1   : > { %1007 = vmatpush.bf16.msra.mxu2 %v1453_v63  ;;  %v1492_v30 = vld [vmem:[%s2089_s1 + $0x180] sm:$0xf]  ;;  %v1615_v32 = vld [vmem:[%s2089_s1 + $0x184] sm:$0xf0]  ;;  %v1358_v34 = vld [vmem:[%s2089_s1 + $0x78] sm:$0xf0]  ;;  %v1429_v43 = vor.u32 %v1599_v29, %v1428_v28 }
  0xa2   : > { %1021 = vmatpush.bf16.msra.mxu3 %v1517_v3  ;;  %v1596_v35 = vld [vmem:[%s2089_s1 + $0xf4] sm:$0xf]  ;;  %v1422_v36 = vld [vmem:[%s2089_s1 + $0xf8] sm:$0xf0]  ;;  %v1578_v44 = vld [vmem:[%s2089_s1 + $0x64] sm:$0xf]  ;;  %v1493_v48 = vor.u32 %v1615_v32, %v1492_v30  ;;  %v1361_v49 = vor.u32 %v1580_v33, %v1358_v34 }
  0xa3   : > { %980 = vmatpush.bf16.msra.mxu0 %v1317_v9  ;;  %v1612_v37 = vld [vmem:[%s2089_s1 + $0x174] sm:$0xf]  ;;  %v1486_v39 = vld [vmem:[%s2089_s1 + $0x178] sm:$0xf0]  ;;  %v1350_v45 = vld [vmem:[%s2089_s1 + $0x68] sm:$0xf0]  ;;  %v1425_v54 = vor.u32 %v1596_v35, %v1422_v36 }
  0xa4   : > { %994 = vmatpush.bf16.msra.mxu1 %v1381_v10  ;;  %v1628_v40 = vld [vmem:[%s2089_s1 + $0x1f4] sm:$0xf]  ;;  %v1550_v41 = vld [vmem:[%s2089_s1 + $0x1f8] sm:$0xf0]  ;;  %v1292_v46 = vld [vmem:[%s2087_s6 + $0x8] sm:$0xf]  ;;  %v1489_v55 = vor.u32 %v1612_v37, %v1486_v39  ;;  %v1353_v4 = vor.u32 %v1578_v44, %v1350_v45 }
  0xa5   : > { %1008 = vmatpush.bf16.msra.mxu2 %v1445_v11  ;;  %v1565_v47 = vld [vmem:[%s2087_s6 + $0x14] sm:$0xf0]  ;;  %v1594_v50 = vld [vmem:[%s2089_s1 + $0xe4] sm:$0xf]  ;;  %v1414_v51 = vld [vmem:[%s2089_s1 + $0xe8] sm:$0xf0]  ;;  %v1553_v59 = vor.u32 %v1628_v40, %v1550_v41 }
  0xa6   : > { %1022 = vmatpush.bf16.msra.mxu3 %v1509_v15  ;;  %v1610_v52 = vld [vmem:[%s2089_s1 + $0x164] sm:$0xf]  ;;  %v1478_v53 = vld [vmem:[%s2089_s1 + $0x168] sm:$0xf0]  ;;  %v1294_v57 = vld [vmem:[%s2087_s6 + $0x18] sm:$0xf0]  ;;  %v2181_v60 = vor.u32 %v1565_v47, %v1292_v46  ;;  %v1417_v6 = vor.u32 %v1594_v50, %v1414_v51 }
  0xa7   : > { %981 = vmatpush.bf16.msra.mxu0 %v1309_v22  ;;  %v1563_v56 = vld [vmem:[%s2087_s6 + $0xc] sm:$0xf]  ;;  %v1284_v58 = vld [vmem:[%s2087_s6] sm:$0xf]  ;;  %v1564_v61 = vld [vmem:[%s2087_s6 + $0xc] sm:$0xf0]  ;;  %v1481_v7 = vor.u32 %v1610_v52, %v1478_v53 }
  0xa8   : > { %995 = vmatpush.bf16.msra.mxu1 %v1373_v26  ;;  %v1562_v62 = vld [vmem:[%s2087_s6 + $0x4] sm:$0xf]  ;;  %v1286_v63 = vld [vmem:[%s2087_s6 + $0x10] sm:$0xf0]  ;;  %v1542_v1 = vld [vmem:[%s2089_s1 + $0x1e8] sm:$0xf0]  ;;  %v2188_v2 = vor.u32 %v1563_v56, %v1294_v57  ;;  %v2190_v3 = vor.u32 %v1564_v61, %v1284_v58 }
  0xa9   : > { %1009 = vmatpush.bf16.msra.mxu2 %v1437_v27  ;;  %v1626_v0 = vld [vmem:[%s2089_s1 + $0x1e4] sm:$0xf]  ;;  %v2192_v5 = vor.u32 %v1562_v62, %v1286_v63  ;;  %v1576_v8 = vld [vmem:[%s2089_s1 + $0x54] sm:$0xf]  ;;  %v1342_v9 = vld [vmem:[%s2089_s1 + $0x58] sm:$0xf0] }
  0xaa   : > { %1023 = vmatpush.bf16.msra.mxu3 %v1501_v31  ;;  %v1592_v10 = vld [vmem:[%s2089_s1 + $0xd4] sm:$0xf]  ;;  %v1545_v11 = vor.u32 %v1626_v0, %v1542_v1  ;;  %v1406_v12 = vld [vmem:[%s2089_s1 + $0xd8] sm:$0xf0]  ;;  %v1345_v17 = vor.u32 %v1576_v8, %v1342_v9  ;;  %v1574_v20 = vld [vmem:[%s2089_s1 + $0x44] sm:$0xf] }
  0xab   : > { %982 = vmatpush.bf16.msra.mxu0 %v1301_v38  ;;  %v1608_v13 = vld [vmem:[%s2089_s1 + $0x154] sm:$0xf]  ;;  %v1470_v14 = vld [vmem:[%s2089_s1 + $0x158] sm:$0xf0]  ;;  %v1409_v18 = vor.u32 %v1592_v10, %v1406_v12  ;;  %v1334_v21 = vld [vmem:[%s2089_s1 + $0x48] sm:$0xf0] }
  0xac   : > { %996 = vmatpush.bf16.msra.mxu1 %v1365_v42  ;;  %v1624_v15 = vld [vmem:[%s2089_s1 + $0x1d4] sm:$0xf]  ;;  %v1534_v16 = vld [vmem:[%s2089_s1 + $0x1d8] sm:$0xf0]  ;;  %v1473_v19 = vor.u32 %v1608_v13, %v1470_v14  ;;  %v1590_v22 = vld [vmem:[%s2089_s1 + $0xc4] sm:$0xf]  ;;  %v1337_v29 = vor.u32 %v1574_v20, %v1334_v21 }
  0xad   : > { %1010 = vmatpush.bf16.msra.mxu2 %v1429_v43  ;;  %v1537_v23 = vor.u32 %v1624_v15, %v1534_v16  ;;  %v1398_v24 = vld [vmem:[%s2089_s1 + $0xc8] sm:$0xf0]  ;;  %v1606_v25 = vld [vmem:[%s2089_s1 + $0x144] sm:$0xf]  ;;  %v1572_v32 = vld [vmem:[%s2089_s1 + $0x34] sm:$0xf] }
  0xae   : > { %1024 = vmatpush.bf16.msra.mxu3 %v1493_v48  ;;  %983 = vmatmul.bf16.vlgmr.msra.gmra.mxu0 %v2190_v3  ;;  %v1462_v26 = vld [vmem:[%s2089_s1 + $0x148] sm:$0xf0]  ;;  %v1622_v27 = vld [vmem:[%s2089_s1 + $0x1c4] sm:$0xf]  ;;  %v1401_v30 = vor.u32 %v1590_v22, %v1398_v24  ;;  %v1326_v33 = vld [vmem:[%s2089_s1 + $0x38] sm:$0xf0] }
  0xaf   : > { %1031 = vmatpush.bf16.msrb.mxu0 %v1361_v49  ;;  %997 = vmatmul.bf16.vlgmr.msra.gmra.mxu1 %v2192_v5  ;;  %v1526_v28 = vld [vmem:[%s2089_s1 + $0x1c8] sm:$0xf0]  ;;  %v1465_v31 = vor.u32 %v1606_v25, %v1462_v26  ;;  %v1588_v34 = vld [vmem:[%s2089_s1 + $0xb4] sm:$0xf]  ;;  %v1390_v36 = vld [vmem:[%s2089_s1 + $0xb8] sm:$0xf0]  ;;  %v1329_v41 = vor.u32 %v1572_v32, %v1326_v33 }
  0xb0   : > { %1045 = vmatpush.bf16.msrb.mxu1 %v1425_v54  ;;  %1011 = vmatmul.bf16.vlgmr.msra.gmra.mxu2 %v2181_v60  ;;  %v1529_v35 = vor.u32 %v1622_v27, %v1526_v28  ;;  %v1604_v37 = vld [vmem:[%s2089_s1 + $0x134] sm:$0xf]  ;;  %v1454_v38 = vld [vmem:[%s2089_s1 + $0x138] sm:$0xf0]  ;;  %v1393_v42 = vor.u32 %v1588_v34, %v1390_v36  ;;  %v1570_v44 = vld [vmem:[%s2089_s1 + $0x24] sm:$0xf] }
  0xb1   : > { %1059 = vmatpush.bf16.msrb.mxu2 %v1489_v55  ;;  %1025 = vmatmul.bf16.vlgmr.msra.gmra.mxu3 %v2188_v2  ;;  %v1620_v39 = vld [vmem:[%s2089_s1 + $0x1b4] sm:$0xf]  ;;  %v1518_v40 = vld [vmem:[%s2089_s1 + $0x1b8] sm:$0xf0]  ;;  %v1457_v43 = vor.u32 %v1604_v37, %v1454_v38  ;;  %v1318_v45 = vld [vmem:[%s2089_s1 + $0x28] sm:$0xf0] }
  0xb2   : > { %1073 = vmatpush.bf16.msrb.mxu3 %v1553_v59  ;;  %v1586_v46 = vld [vmem:[%s2089_s1 + $0xa4] sm:$0xf]  ;;  %v1521_v47 = vor.u32 %v1620_v39, %v1518_v40  ;;  %v1382_v48 = vld [vmem:[%s2089_s1 + $0xa8] sm:$0xf0]  ;;  %v1321_v53 = vor.u32 %v1570_v44, %v1318_v45  ;;  %v1568_v56 = vld [vmem:[%s2089_s1 + $0x14] sm:$0xf] }
  0xb3   : > { %1032 = vmatpush.bf16.msrb.mxu0 %v1353_v4  ;;  %v1602_v49 = vld [vmem:[%s2089_s1 + $0x124] sm:$0xf]  ;;  %v1446_v50 = vld [vmem:[%s2089_s1 + $0x128] sm:$0xf0]  ;;  %v1385_v54 = vor.u32 %v1586_v46, %v1382_v48  ;;  %v1310_v57 = vld [vmem:[%s2089_s1 + $0x18] sm:$0xf0] }
  0xb4   : > { %1046 = vmatpush.bf16.msrb.mxu1 %v1417_v6  ;;  %v1618_v51 = vld [vmem:[%s2089_s1 + $0x1a4] sm:$0xf]  ;;  %v1510_v52 = vld [vmem:[%s2089_s1 + $0x1a8] sm:$0xf0]  ;;  %v1449_v55 = vor.u32 %v1602_v49, %v1446_v50  ;;  %v1584_v58 = vld [vmem:[%s2089_s1 + $0x94] sm:$0xf]  ;;  %v1313_v4 = vor.u32 %v1568_v56, %v1310_v57 }
  0xb5   : > { %1060 = vmatpush.bf16.msrb.mxu2 %v1481_v7  ;;  %v1513_v59 = vor.u32 %v1618_v51, %v1510_v52  ;;  %v1374_v61 = vld [vmem:[%s2089_s1 + $0x98] sm:$0xf0]  ;;  %v1600_v62 = vld [vmem:[%s2089_s1 + $0x114] sm:$0xf]  ;;  %v1566_v8 = vld [vmem:[%s2089_s1 + $0x4] sm:$0xf] }
  0xb6   : > { %1074 = vmatpush.bf16.msrb.mxu3 %v1545_v11  ;;  %v1438_v63 = vld [vmem:[%s2089_s1 + $0x118] sm:$0xf0]  ;;  %v1616_v0 = vld [vmem:[%s2089_s1 + $0x194] sm:$0xf]  ;;  %v1377_v6 = vor.u32 %v1584_v58, %v1374_v61  ;;  %v1302_v9 = vld [vmem:[%s2089_s1 + $0x8] sm:$0xf0] }
  0xb7   : > { %1033 = vmatpush.bf16.msrb.mxu0 %v1345_v17  ;;  %v1502_v1 = vld [vmem:[%s2089_s1 + $0x198] sm:$0xf0]  ;;  %v1441_v7 = vor.u32 %v1600_v62, %v1438_v63  ;;  %v1582_v10 = vld [vmem:[%s2089_s1 + $0x84] sm:$0xf]  ;;  %v1366_v12 = vld [vmem:[%s2089_s1 + $0x88] sm:$0xf0]  ;;  %v1305_v17 = vor.u32 %v1566_v8, %v1302_v9 }
  0xb8   : > { %1047 = vmatpush.bf16.msrb.mxu1 %v1409_v18  ;;  %v1505_v11 = vor.u32 %v1616_v0, %v1502_v1  ;;  %v1598_v13 = vld [vmem:[%s2089_s1 + $0x104] sm:$0xf]  ;;  %v1430_v14 = vld [vmem:[%s2089_s1 + $0x108] sm:$0xf0]  ;;  %v1369_v18 = vor.u32 %v1582_v10, %v1366_v12  ;;  %v566_v49 = vld [vmem:[%s2091_s25 + $0x18] sm:$0xff]  ;;  %p1554_p5 = scmp.ne.s32.totalorder %s1790_s18, 4 }
  0xb9   : > { %1061 = vmatpush.bf16.msrb.mxu2 %v1473_v19  ;;  %v1614_v15 = vld [vmem:[%s2089_s1 + $0x184] sm:$0xf]  ;;  %v1494_v16 = vld [vmem:[%s2089_s1 + $0x188] sm:$0xf0]  ;;  %v1433_v19 = vor.u32 %v1598_v13, %v1430_v14 }
  0xba   : > { %1075 = vmatpush.bf16.msrb.mxu3 %v1537_v23  ;;  %v1497_v20 = vor.u32 %v1614_v15, %v1494_v16  ;;  %v563_v27 = vld [vmem:[%s2091_s25] sm:$0xff] }
  0xbb   : > { %1034 = vmatpush.bf16.msrb.mxu0 %v1337_v29 }
  0xbc   : > { %1048 = vmatpush.bf16.msrb.mxu1 %v1401_v30 }
  0xbd   : > { %1062 = vmatpush.bf16.msrb.mxu2 %v1465_v31 }
  0xbe   : > { %1076 = vmatpush.bf16.msrb.mxu3 %v1529_v35 }
  0xbf   : > { %1035 = vmatpush.bf16.msrb.mxu0 %v1329_v41  ;;  %v564_v41 = vld [vmem:[%s2091_s25 + $0x8] sm:$0xff] }
  0xc0   : > { %1049 = vmatpush.bf16.msrb.mxu1 %v1393_v42 }
  0xc1   : > { %1063 = vmatpush.bf16.msrb.mxu2 %v1457_v43 }
  0xc2   : > { %1077 = vmatpush.bf16.msrb.mxu3 %v1521_v47 }
  0xc3   : > { %1036 = vmatpush.bf16.msrb.mxu0 %v1321_v53 }
  0xc4   : > { %1050 = vmatpush.bf16.msrb.mxu1 %v1385_v54 }
  0xc5   : > { %1064 = vmatpush.bf16.msrb.mxu2 %v1449_v55 }
  0xc6   : > { %1078 = vmatpush.bf16.msrb.mxu3 %v1513_v59 }
  0xc7   : > { %1037 = vmatpush.bf16.msrb.mxu0 %v1313_v4 }
  0xc8   : > { %1051 = vmatpush.bf16.msrb.mxu1 %v1377_v6 }
  0xc9   : > { %1065 = vmatpush.bf16.msrb.mxu2 %v1441_v7 }
  0xca   : > { %1079 = vmatpush.bf16.msrb.mxu3 %v1505_v11 }
  0xcb   : > { %1038 = vmatpush.bf16.msrb.mxu0 %v1305_v17 }
  0xcc   : > { %1052 = vmatpush.bf16.msrb.mxu1 %v1369_v18 }
  0xcd   : > { %1066 = vmatpush.bf16.msrb.mxu2 %v1433_v19 }
  0xce   : > { %1080 = vmatpush.bf16.msrb.mxu3 %v1497_v20  ;;  %1039 = vmatmul.bf16.vlgmr.msrb.gmra.mxu0 %v2190_v3 }
  0xcf   : > { %1053 = vmatmul.bf16.vlgmr.msrb.gmra.mxu1 %v2192_v5 }
  0xd0   : > { %1067 = vmatmul.bf16.vlgmr.msrb.gmra.mxu2 %v2181_v60 }
  0xd1   : > { %1081 = vmatmul.bf16.vlgmr.msrb.gmra.mxu3 %v2188_v2  ;;  %v565_v2 = vld [vmem:[%s2091_s25 + $0x10] sm:$0xff] }
 0x12b   : > { %v984_v21 = vpop.f32.mrf.mxu0 }
 0x12c   : > { %v998_v22 = vpop.f32.mrf.mxu1 }
 0x12d   : > { %v999_v23 = vadd.f32 %v998_v22, %v984_v21 }
 0x133   : > { %v1012_v24 = vpop.f32.mrf.mxu2  ;;  %v986_v29 = vpop.f32.mrf.mxu0 }
 0x134   : > { %v1013_v25 = vadd.f32 %v1012_v24, %v999_v23  ;;  %v1026_v26 = vpop.f32.mrf.mxu3  ;;  %v1000_v30 = vpop.f32.mrf.mxu1 }
 0x135   : > { %v1001_v31 = vadd.f32 %v1000_v30, %v986_v29 }
 0x136   : > { %v1027_v28 = vadd.f32 %v1026_v26, %v1013_v25 }
 0x138   : > { %v1087_v3 = vadd.f32 %v1027_v28, %v563_v27 }
 0x13a   : > { %1091 = vst [vmem:[%s2091_s25] sm:$0xff] %v1087_v3 }
 0x13b   : > { %v1014_v5 = vpop.f32.mrf.mxu2 }
 0x13c   : > { %v1015_v60 = vadd.f32 %v1014_v5, %v1001_v31  ;;  %v1028_v32 = vpop.f32.mrf.mxu3 }
 0x13e   : > { %v1029_v33 = vadd.f32 %v1028_v32, %v1015_v60 }
 0x140   : > { %v1089_v34 = vadd.f32 %v1029_v33, %v565_v2 }
 0x142   : > { %1093 = vst [vmem:[%s2091_s25 + $0x10] sm:$0xff] %v1089_v34 }
 0x14b   : > { %v1040_v35 = vpop.f32.mrf.mxu0 }
 0x14c   : > { %v1054_v36 = vpop.f32.mrf.mxu1 }
 0x14d   : > { %v1055_v37 = vadd.f32 %v1054_v36, %v1040_v35 }
 0x153   : > { %v1068_v38 = vpop.f32.mrf.mxu2  ;;  %v1042_v43 = vpop.f32.mrf.mxu0 }
 0x154   : > { %v1069_v39 = vadd.f32 %v1068_v38, %v1055_v37  ;;  %v1082_v40 = vpop.f32.mrf.mxu3  ;;  %v1056_v44 = vpop.f32.mrf.mxu1 }
 0x155   : > { %v1057_v46 = vadd.f32 %v1056_v44, %v1042_v43 }
 0x156   : > { %v1083_v42 = vadd.f32 %v1082_v40, %v1069_v39 }
 0x158   : > { %v1088_v45 = vadd.f32 %v1083_v42, %v564_v41 }
 0x15a   : > { %1092 = vst [vmem:[%s2091_s25 + $0x8] sm:$0xff] %v1088_v45 }
 0x15b   : > { %v1070_v47 = vpop.f32.mrf.mxu2 }
 0x15c   : > { %v1071_v48 = vadd.f32 %v1070_v47, %v1057_v46  ;;  %v1084_v50 = vpop.f32.mrf.mxu3 }
 0x15e   : > { %v1085_v51 = vadd.f32 %v1084_v50, %v1071_v48  ;;  %1098 = sbr.rel (%p1554_p5) target bundleno = 367 (0x16f), region = 101 }
 0x160   : > { %v1090_v52 = vadd.f32 %v1085_v51, %v566_v49 }
 0x162   : > { %1094 = vst [vmem:[%s2091_s25 + $0x18] sm:$0xff] %v1090_v52 }
 0x163   : > { %v1099_v53 = vld [vmem:[%s2091_s25] sm:$0xff]  ;;  %v1100_v55 = vld [vmem:[%s2091_s25 + $0x8] sm:$0xff]  ;;  %v1101_v58 = vld [vmem:[%s2091_s25 + $0x10] sm:$0xff] }
 0x164   : > { %v1103_v54 = vld [vmem:[%s551_s5] sm:$0x3] }
 0x165   : > { %v1105_v56 = vperm.slane %v1103_v54, 0  ;;  %v1106_v57 = vperm.slane %v1103_v54, 1 }
 0x167   : > { %v1109_v61 = vadd.f32 %v1105_v56, %v1099_v53  ;;  %v1110_v62 = vadd.f32 %v1106_v57, %v1100_v55  ;;  %v1111_v63 = vadd.f32 %v1105_v56, %v1101_v58 }
 0x169   : > { %v1102_v59 = vld [vmem:[%s2091_s25 + $0x18] sm:$0xff]  ;;  %v1113_v1 = vmax.f32 %v1109_v61, 0.0  ;;  %v1114_v4 = vmax.f32 %v1110_v62, 0.0  ;;  %v1115_v6 = vmax.f32 %v1111_v63, 0.0 }
 0x16a   : > { %v1112_v0 = vadd.f32 %v1106_v57, %v1102_v59 }
 0x16b   : > { %1117 = vst [vmem:[%s2091_s25] sm:$0xff] %v1113_v1 }
 0x16c   : > { %v1116_v7 = vmax.f32 %v1112_v0, 0.0  ;;  %1118 = vst [vmem:[%s2091_s25 + $0x8] sm:$0xff] %v1114_v4 }
 0x16d   : > { %1119 = vst [vmem:[%s2091_s25 + $0x10] sm:$0xff] %v1115_v6 }
 0x16e   : > { %1120 = vst [vmem:[%s2091_s25 + $0x18] sm:$0xff] %v1116_v7 }
 0x16f PF: > { %1127 = sbr.rel (!%p1923_p12) target bundleno = 375 (0x177), region = 105  ;;  %s1630_s14 = sshll.u32 (%p1923_p12), %s1794_s19, 4 }
 0x170   : > { %s1133_s0 = scalar_lea.vmem (%p1923_p12), %s2318_s3, %s1630_s14 }
 0x172   : > { %v1146_v8 = vld [vmem:[%s2091_s25] sm:$0xff] (%p1923_p12) }
 0x173   : > { %v1148_v9 = vld [vmem:[%s2091_s25 + $0x8] sm:$0xff] (%p1923_p12)  ;;  %1147 = vst [vmem:[%s1133_s0] sm:$0xff] (%p1923_p12), %v1146_v8 }
 0x174   : > { %v1150_v10 = vld [vmem:[%s2091_s25 + $0x10] sm:$0xff]  ;;  %1149 = vst [vmem:[%s1133_s0 + $0x8] sm:$0xff] %v1148_v9 }
 0x175   : > { %v1152_v11 = vld [vmem:[%s2091_s25 + $0x18] sm:$0xff]  ;;  %1151 = vst [vmem:[%s1133_s0 + $0x40] sm:$0xff] %v1150_v10 }
 0x176   : > { %1153 = vst [vmem:[%s1133_s0 + $0x48] sm:$0xff] %v1152_v11 }
 0x177 PF: > { %s13_s22 = sadd.s32 1, %s1806_s22   ;;  %s2328_s10 = sld [smem:[#allocation5_spill]] }
 0x178   : > { %p10_p6 = scmp.ge.s32.totalorder %s13_s22, 22   ;;  %s2329_s12 = smov %s1770_s13 }
 0x179   : > { %s2330_s13 = smov %s1921_s9  ;;  %s2331_s14 = smov %s1778_s15 }
 0x17a   : > { %s2332_s15 = smov %s1918_s8  ;;  %s2333_s16 = smov %s1786_s17 }
 0x17b   : > { %s2334_s17 = smov %s1904_s30  ;;  %s2335_s18 = smov %s1798_s20 }
 0x17c   : > { %s2336_s19 = smov %s1802_s21  ;;  %s2337_s20 = smov %s2340_s24 }
 0x17d   : > { %s2338_s21 = smov %s2328_s10  ;;  %12 = sbr.rel (!%p10_p6) target bundleno = 9 (0x9), region = 170 }

// kernel: _siamese_forward.11
= control target key start
LH: loop header
LB: loop body
LE: loop exit
PB: predicated region body
PF: predicated region fallthrough
CT: control target
= control target key end

     0   :  { %s1495_s1 = inlined_call_operand.vmem [shape: bf16[1024,128], index: 1, kind: input, shape index: {}]   ;;  %s1496_s2 = inlined_call_operand.vmem [shape: f32[1,128], index: 2, kind: input, shape index: {}]   ;;  %s1497_s0 = inlined_call_operand.vmem [shape: bf16[16,1024], index: 0, kind: input, shape index: {}]   ;;  %s1498_s4 = inlined_call_operand.vmem [shape: f32[1,128], index: 4, kind: input, shape index: {}]   ;;  %s1499_s3 = inlined_call_operand.vmem [shape: bf16[128,128], index: 3, kind: input, shape index: {}]   ;;  %s1500_s5 = inlined_call_operand.vmem [shape: f32[16,128], index: 5, kind: output, shape index: {}]  }
   0x1   :  { %v1122_v0 = vld [vmem:[%s1495_s1 + $0x38] sm:$0xff]  ;;  %v1121_v4 = vld [vmem:[%s1495_s1 + $0x30] sm:$0xff]  ;;  %v1120_v8 = vld [vmem:[%s1495_s1 + $0x28] sm:$0xff] }
   0x2   :  { %v1130_v1 = vld [vmem:[%s1495_s1 + $0x78] sm:$0xff]  ;;  %584 = vmatpush.bf16.msra.mxu0 %v1122_v0  ;;  %v1129_v5 = vld [vmem:[%s1495_s1 + $0x70] sm:$0xff]  ;;  %v1128_v9 = vld [vmem:[%s1495_s1 + $0x68] sm:$0xff] }
   0x3   :  { %v1138_v2 = vld [vmem:[%s1495_s1 + $0xb8] sm:$0xff]  ;;  %598 = vmatpush.bf16.msra.mxu1 %v1130_v1  ;;  %v1137_v6 = vld [vmem:[%s1495_s1 + $0xb0] sm:$0xff]  ;;  %v1136_v10 = vld [vmem:[%s1495_s1 + $0xa8] sm:$0xff] }
   0x4   :  { %v1146_v3 = vld [vmem:[%s1495_s1 + $0xf8] sm:$0xff]  ;;  %612 = vmatpush.bf16.msra.mxu2 %v1138_v2  ;;  %v1145_v7 = vld [vmem:[%s1495_s1 + $0xf0] sm:$0xff]  ;;  %v1144_v11 = vld [vmem:[%s1495_s1 + $0xe8] sm:$0xff] }
   0x5   :  { %626 = vmatpush.bf16.msra.mxu3 %v1146_v3  ;;  %v1119_v12 = vld [vmem:[%s1495_s1 + $0x20] sm:$0xff]  ;;  %v1118_v16 = vld [vmem:[%s1495_s1 + $0x18] sm:$0xff]  ;;  %v1117_v20 = vld [vmem:[%s1495_s1 + $0x10] sm:$0xff] }
   0x6   :  { %585 = vmatpush.bf16.msra.mxu0 %v1121_v4  ;;  %v1127_v13 = vld [vmem:[%s1495_s1 + $0x60] sm:$0xff]  ;;  %v1126_v17 = vld [vmem:[%s1495_s1 + $0x58] sm:$0xff]  ;;  %v1125_v21 = vld [vmem:[%s1495_s1 + $0x50] sm:$0xff] }
   0x7   :  { %599 = vmatpush.bf16.msra.mxu1 %v1129_v5  ;;  %v1135_v14 = vld [vmem:[%s1495_s1 + $0xa0] sm:$0xff]  ;;  %v1134_v18 = vld [vmem:[%s1495_s1 + $0x98] sm:$0xff]  ;;  %v1133_v22 = vld [vmem:[%s1495_s1 + $0x90] sm:$0xff] }
   0x8   :  { %613 = vmatpush.bf16.msra.mxu2 %v1137_v6  ;;  %v1143_v15 = vld [vmem:[%s1495_s1 + $0xe0] sm:$0xff]  ;;  %v1142_v19 = vld [vmem:[%s1495_s1 + $0xd8] sm:$0xff]  ;;  %v1141_v23 = vld [vmem:[%s1495_s1 + $0xd0] sm:$0xff] }
   0x9   :  { %627 = vmatpush.bf16.msra.mxu3 %v1145_v7  ;;  %v1116_v24 = vld [vmem:[%s1495_s1 + $0x8] sm:$0xff]  ;;  %v1115_v28 = vld [vmem:[%s1495_s1] sm:$0xff]  ;;  %v1154_v32 = vld [vmem:[%s1495_s1 + $0x138] sm:$0xff] }
   0xa   :  { %586 = vmatpush.bf16.msra.mxu0 %v1120_v8  ;;  %v1124_v25 = vld [vmem:[%s1495_s1 + $0x48] sm:$0xff]  ;;  %v1123_v29 = vld [vmem:[%s1495_s1 + $0x40] sm:$0xff]  ;;  %v1162_v33 = vld [vmem:[%s1495_s1 + $0x178] sm:$0xff] }
   0xb   :  { %600 = vmatpush.bf16.msra.mxu1 %v1128_v9  ;;  %v1132_v26 = vld [vmem:[%s1495_s1 + $0x88] sm:$0xff]  ;;  %v1131_v30 = vld [vmem:[%s1495_s1 + $0x80] sm:$0xff]  ;;  %v1170_v42 = vld [vmem:[%s1495_s1 + $0x1b8] sm:$0xff] }
   0xc   :  { %614 = vmatpush.bf16.msra.mxu2 %v1136_v10  ;;  %v1140_v27 = vld [vmem:[%s1495_s1 + $0xc8] sm:$0xff]  ;;  %v1139_v31 = vld [vmem:[%s1495_s1 + $0xc0] sm:$0xff]  ;;  %v1178_v43 = vld [vmem:[%s1495_s1 + $0x1f8] sm:$0xff] }
   0xd   :  { %628 = vmatpush.bf16.msra.mxu3 %v1144_v11  ;;  %v797_v34 = vld [vmem:[%s1497_s0 + $0x8] sm:$0xf]  ;;  %v789_v36 = vld [vmem:[%s1497_s0] sm:$0xf]  ;;  %v1108_v38 = vld [vmem:[%s1497_s0 + $0xc] sm:$0xf] }
   0xe   :  { %587 = vmatpush.bf16.msra.mxu0 %v1119_v12  ;;  %v1112_v35 = vld [vmem:[%s1497_s0 + $0x24] sm:$0xf0]  ;;  %v1111_v37 = vld [vmem:[%s1497_s0 + $0x1c] sm:$0xf0]  ;;  %v799_v39 = vld [vmem:[%s1497_s0 + $0x28] sm:$0xf0] }
   0xf   :  { %601 = vmatpush.bf16.msra.mxu1 %v1127_v13  ;;  %v1107_v40 = vld [vmem:[%s1497_s0 + $0x4] sm:$0xf]  ;;  %v798_v44 = vor.u32 %v1112_v35, %v797_v34  ;;  %v790_v45 = vor.u32 %v1111_v37, %v789_v36  ;;  %v802_v46 = vor.u32 %v1108_v38, %v799_v39  ;;  %v1153_v48 = vld [vmem:[%s1495_s1 + $0x130] sm:$0xff]  ;;  %v1152_v52 = vld [vmem:[%s1495_s1 + $0x128] sm:$0xff] }
  0x10   :  { %615 = vmatpush.bf16.msra.mxu2 %v1135_v14  ;;  %v791_v41 = vld [vmem:[%s1497_s0 + $0x20] sm:$0xf0]  ;;  %v1161_v49 = vld [vmem:[%s1495_s1 + $0x170] sm:$0xff]  ;;  %v1160_v53 = vld [vmem:[%s1495_s1 + $0x168] sm:$0xff] }
  0x11   :  { %629 = vmatpush.bf16.msra.mxu3 %v1143_v15  ;;  %v794_v47 = vor.u32 %v1107_v40, %v791_v41  ;;  %v1169_v50 = vld [vmem:[%s1495_s1 + $0x1b0] sm:$0xff]  ;;  %v1168_v54 = vld [vmem:[%s1495_s1 + $0x1a8] sm:$0xff]  ;;  %v1151_v56 = vld [vmem:[%s1495_s1 + $0x120] sm:$0xff] }
  0x12   :  { %588 = vmatpush.bf16.msra.mxu0 %v1118_v16  ;;  %v1177_v51 = vld [vmem:[%s1495_s1 + $0x1f0] sm:$0xff]  ;;  %v1176_v55 = vld [vmem:[%s1495_s1 + $0x1e8] sm:$0xff]  ;;  %v1159_v57 = vld [vmem:[%s1495_s1 + $0x160] sm:$0xff] }
  0x13   :  { %602 = vmatpush.bf16.msra.mxu1 %v1126_v17  ;;  %v1167_v58 = vld [vmem:[%s1495_s1 + $0x1a0] sm:$0xff]  ;;  %v1150_v60 = vld [vmem:[%s1495_s1 + $0x118] sm:$0xff]  ;;  %v1149_v0 = vld [vmem:[%s1495_s1 + $0x110] sm:$0xff] }
  0x14   :  { %616 = vmatpush.bf16.msra.mxu2 %v1134_v18  ;;  %v1175_v59 = vld [vmem:[%s1495_s1 + $0x1e0] sm:$0xff]  ;;  %v1158_v61 = vld [vmem:[%s1495_s1 + $0x158] sm:$0xff]  ;;  %v1157_v1 = vld [vmem:[%s1495_s1 + $0x150] sm:$0xff] }
  0x15   :  { %630 = vmatpush.bf16.msra.mxu3 %v1142_v19  ;;  %v1166_v62 = vld [vmem:[%s1495_s1 + $0x198] sm:$0xff]  ;;  %v1165_v2 = vld [vmem:[%s1495_s1 + $0x190] sm:$0xff]  ;;  %v1148_v4 = vld [vmem:[%s1495_s1 + $0x108] sm:$0xff] }
  0x16   :  { %589 = vmatpush.bf16.msra.mxu0 %v1117_v20  ;;  %v1174_v63 = vld [vmem:[%s1495_s1 + $0x1d8] sm:$0xff]  ;;  %v1173_v3 = vld [vmem:[%s1495_s1 + $0x1d0] sm:$0xff]  ;;  %v1156_v5 = vld [vmem:[%s1495_s1 + $0x148] sm:$0xff] }
  0x17   :  { %603 = vmatpush.bf16.msra.mxu1 %v1125_v21  ;;  %v1164_v6 = vld [vmem:[%s1495_s1 + $0x188] sm:$0xff]  ;;  %v1147_v8 = vld [vmem:[%s1495_s1 + $0x100] sm:$0xff]  ;;  %v805_v12 = vld [vmem:[%s1497_s0 + $0x10] sm:$0xf] }
  0x18   :  { %617 = vmatpush.bf16.msra.mxu2 %v1133_v22  ;;  %v1172_v7 = vld [vmem:[%s1495_s1 + $0x1c8] sm:$0xff]  ;;  %v1155_v9 = vld [vmem:[%s1495_s1 + $0x140] sm:$0xff]  ;;  %v1113_v13 = vld [vmem:[%s1497_s0 + $0x2c] sm:$0xf0] }
  0x19   :  { %631 = vmatpush.bf16.msra.mxu3 %v1141_v23  ;;  %v1163_v10 = vld [vmem:[%s1495_s1 + $0x180] sm:$0xff]  ;;  %v1109_v14 = vld [vmem:[%s1497_s0 + $0x14] sm:$0xf]  ;;  %v813_v16 = vld [vmem:[%s1497_s0 + $0x18] sm:$0xf]  ;;  %v806_v20 = vor.u32 %v1113_v13, %v805_v12 }
  0x1a   :  { %590 = vmatpush.bf16.msra.mxu0 %v1116_v24  ;;  %v1171_v11 = vld [vmem:[%s1495_s1 + $0x1c0] sm:$0xff]  ;;  %v807_v15 = vld [vmem:[%s1497_s0 + $0x30] sm:$0xf0]  ;;  %v1114_v17 = vld [vmem:[%s1497_s0 + $0x34] sm:$0xf0] }
  0x1b   :  { %604 = vmatpush.bf16.msra.mxu1 %v1124_v25  ;;  %v1110_v18 = vld [vmem:[%s1497_s0 + $0x1c] sm:$0xf]  ;;  %v810_v21 = vor.u32 %v1109_v14, %v807_v15  ;;  %v814_v22 = vor.u32 %v1114_v17, %v813_v16  ;;  %v1185_v25 = vld [vmem:[%s1499_s3 + $0x30] sm:$0xff]  ;;  %v1187_v34 = vld [vmem:[%s1496_s2] ss:$0 sm:$0xff] }
  0x1c   :  { %618 = vmatpush.bf16.msra.mxu2 %v1132_v26  ;;  %v815_v19 = vld [vmem:[%s1497_s0 + $0x38] sm:$0xf0]  ;;  %v1184_v26 = vld [vmem:[%s1499_s3 + $0x28] sm:$0xff] }
  0x1d   :  { %632 = vmatpush.bf16.msra.mxu3 %v1140_v27  ;;  %v818_v23 = vor.u32 %v1110_v18, %v815_v19  ;;  %v1186_v24 = vld [vmem:[%s1499_s3 + $0x38] sm:$0xff]  ;;  %v1183_v27 = vld [vmem:[%s1499_s3 + $0x20] sm:$0xff] }
  0x1e   :  { %591 = vmatpush.bf16.msra.mxu0 %v1115_v28  ;;  %v1182_v28 = vld [vmem:[%s1499_s3 + $0x18] sm:$0xff] }
  0x1f   :  { %605 = vmatpush.bf16.msra.mxu1 %v1123_v29  ;;  %v1181_v29 = vld [vmem:[%s1499_s3 + $0x10] sm:$0xff] }
  0x20   :  { %619 = vmatpush.bf16.msra.mxu2 %v1131_v30 }
  0x21   :  { %633 = vmatpush.bf16.msra.mxu3 %v1139_v31  ;;  %592 = vmatmul.bf16.vlgmr.msra.gmra.mxu0 %v790_v45  ;;  %v1180_v31 = vld [vmem:[%s1499_s3 + $0x8] sm:$0xff] }
  0x22   :  { %640 = vmatpush.bf16.msrb.mxu0 %v1154_v32  ;;  %606 = vmatmul.bf16.vlgmr.msra.gmra.mxu1 %v794_v47 }
  0x23   :  { %654 = vmatpush.bf16.msrb.mxu1 %v1162_v33  ;;  %620 = vmatmul.bf16.vlgmr.msra.gmra.mxu2 %v798_v44  ;;  %v1179_v33 = vld [vmem:[%s1499_s3] sm:$0xff] }
  0x24   :  { %668 = vmatpush.bf16.msrb.mxu2 %v1170_v42  ;;  %634 = vmatmul.bf16.vlgmr.msra.gmra.mxu3 %v802_v46 }
  0x25   :  { %682 = vmatpush.bf16.msrb.mxu3 %v1178_v43 }
  0x26   :  { %641 = vmatpush.bf16.msrb.mxu0 %v1153_v48 }
  0x27   :  { %655 = vmatpush.bf16.msrb.mxu1 %v1161_v49 }
  0x28   :  { %669 = vmatpush.bf16.msrb.mxu2 %v1169_v50 }
  0x29   :  { %683 = vmatpush.bf16.msrb.mxu3 %v1177_v51 }
  0x2a   :  { %642 = vmatpush.bf16.msrb.mxu0 %v1152_v52 }
  0x2b   :  { %656 = vmatpush.bf16.msrb.mxu1 %v1160_v53 }
  0x2c   :  { %670 = vmatpush.bf16.msrb.mxu2 %v1168_v54 }
  0x2d   :  { %684 = vmatpush.bf16.msrb.mxu3 %v1176_v55 }
  0x2e   :  { %643 = vmatpush.bf16.msrb.mxu0 %v1151_v56 }
  0x2f   :  { %657 = vmatpush.bf16.msrb.mxu1 %v1159_v57 }
  0x30   :  { %671 = vmatpush.bf16.msrb.mxu2 %v1167_v58 }
  0x31   :  { %685 = vmatpush.bf16.msrb.mxu3 %v1175_v59 }
  0x32   :  { %644 = vmatpush.bf16.msrb.mxu0 %v1150_v60 }
  0x33   :  { %658 = vmatpush.bf16.msrb.mxu1 %v1158_v61 }
  0x34   :  { %672 = vmatpush.bf16.msrb.mxu2 %v1166_v62 }
  0x35   :  { %686 = vmatpush.bf16.msrb.mxu3 %v1174_v63 }
  0x36   :  { %645 = vmatpush.bf16.msrb.mxu0 %v1149_v0 }
  0x37   :  { %659 = vmatpush.bf16.msrb.mxu1 %v1157_v1 }
  0x38   :  { %673 = vmatpush.bf16.msrb.mxu2 %v1165_v2 }
  0x39   :  { %687 = vmatpush.bf16.msrb.mxu3 %v1173_v3 }
  0x3a   :  { %646 = vmatpush.bf16.msrb.mxu0 %v1148_v4  ;;  %v1188_v4 = vld [vmem:[%s1498_s4] ss:$0 sm:$0xff] }
  0x3b   :  { %660 = vmatpush.bf16.msrb.mxu1 %v1156_v5 }
  0x3c   :  { %674 = vmatpush.bf16.msrb.mxu2 %v1164_v6 }
  0x3d   :  { %688 = vmatpush.bf16.msrb.mxu3 %v1172_v7 }
  0x3e   :  { %647 = vmatpush.bf16.msrb.mxu0 %v1147_v8 }
  0x3f   :  { %661 = vmatpush.bf16.msrb.mxu1 %v1155_v9 }
  0x40   :  { %675 = vmatpush.bf16.msrb.mxu2 %v1163_v10 }
  0x41   :  { %689 = vmatpush.bf16.msrb.mxu3 %v1171_v11  ;;  %648 = vmatmul.bf16.vlgmr.msrb.gmra.mxu0 %v806_v20 }
  0x42   :  { %662 = vmatmul.bf16.vlgmr.msrb.gmra.mxu1 %v810_v21  ;;  %767 = vmatpush.bf16.msra.mxu0 %v1186_v24 }
  0x43   :  { %676 = vmatmul.bf16.vlgmr.msrb.gmra.mxu2 %v814_v22 }
  0x44   :  { %690 = vmatmul.bf16.vlgmr.msrb.gmra.mxu3 %v818_v23 }
  0x46   :  { %768 = vmatpush.bf16.msra.mxu0 %v1185_v25 }
  0x4a   :  { %769 = vmatpush.bf16.msra.mxu0 %v1184_v26 }
  0x4e   :  { %770 = vmatpush.bf16.msra.mxu0 %v1183_v27 }
  0x52   :  { %771 = vmatpush.bf16.msra.mxu0 %v1182_v28 }
  0x56   :  { %772 = vmatpush.bf16.msra.mxu0 %v1181_v29 }
  0x5a   :  { %773 = vmatpush.bf16.msra.mxu0 %v1180_v31 }
  0x5e   :  { %774 = vmatpush.bf16.msra.mxu0 %v1179_v33 }
  0x9e   :  { %v593_v30 = vpop.f32.mrf.mxu0 }
  0x9f   :  { %v607_v32 = vpop.f32.mrf.mxu1  ;;  %v594_v37 = vadd.f32 %v1187_v34, %v593_v30 }
  0xa1   :  { %v608_v40 = vadd.f32 %v607_v32, %v594_v37 }
  0xa6   :  { %v621_v35 = vpop.f32.mrf.mxu2  ;;  %v595_v38 = vpop.f32.mrf.mxu0 }
  0xa7   :  { %v635_v36 = vpop.f32.mrf.mxu3  ;;  %v609_v39 = vpop.f32.mrf.mxu1  ;;  %v596_v41 = vadd.f32 %v1187_v34, %v595_v38  ;;  %v622_v44 = vadd.f32 %v621_v35, %v608_v40 }
  0xa9   :  { %v610_v45 = vadd.f32 %v609_v39, %v596_v41  ;;  %v636_v48 = vadd.f32 %v635_v36, %v622_v44 }
  0xae   :  { %v623_v42 = vpop.f32.mrf.mxu2 }
  0xaf   :  { %v637_v43 = vpop.f32.mrf.mxu3  ;;  %v624_v49 = vadd.f32 %v623_v42, %v610_v45 }
  0xb1   :  { %v638_v53 = vadd.f32 %v637_v43, %v624_v49 }
  0xbe   :  { %v649_v46 = vpop.f32.mrf.mxu0 }
  0xbf   :  { %v663_v47 = vpop.f32.mrf.mxu1  ;;  %v650_v50 = vadd.f32 %v649_v46, %v636_v48 }
  0xc1   :  { %v664_v55 = vadd.f32 %v663_v47, %v650_v50 }
  0xc6   :  { %v677_v51 = vpop.f32.mrf.mxu2  ;;  %v651_v54 = vpop.f32.mrf.mxu0 }
  0xc7   :  { %v691_v52 = vpop.f32.mrf.mxu3  ;;  %v652_v56 = vadd.f32 %v651_v54, %v638_v53  ;;  %v678_v57 = vadd.f32 %v677_v51, %v664_v55  ;;  %v665_v58 = vpop.f32.mrf.mxu1 }
  0xc9   :  { %v666_v59 = vadd.f32 %v665_v58, %v652_v56  ;;  %v692_v61 = vadd.f32 %v691_v52, %v678_v57 }
  0xcb   :  { %v696_v1 = vmax.f32 %v692_v61, 0.0 }
  0xce   :  { %v679_v60 = vpop.f32.mrf.mxu2 }
  0xcf   :  { %v680_v62 = vadd.f32 %v679_v60, %v666_v59  ;;  %v693_v63 = vpop.f32.mrf.mxu3 }
  0xd1   :  { %v694_v0 = vadd.f32 %v693_v63, %v680_v62 }
  0xd3   :  { %v697_v2 = vmax.f32 %v694_v0, 0.0 }
  0xd5   :  { %v698_v3 = vpack.c.bf16 %v697_v2, %v696_v1 }
  0xd7   :  { %775 = vmatmul.bf16.vlgmr.msra.gmra.mxu0 %v698_v3 }
 0x154   :  { %v776_v5 = vpop.f32.mrf.mxu0 }
 0x155   :  { %v777_v6 = vadd.f32 %v1188_v4, %v776_v5 }
 0x157   :  { %781 = vst [vmem:[%s1500_s5] sm:$0xff] %v777_v6 }
 0x15c   :  { %v778_v7 = vpop.f32.mrf.mxu0 }
 0x15d   :  { %v779_v8 = vadd.f32 %v1188_v4, %v778_v7 }
 0x15f   :  { %782 = vst [vmem:[%s1500_s5 + $0x8] sm:$0xff] %v779_v8 }

</bundles_post_ra>
